<compile_context>
chip_gen: v6e
topology: v6e:2x2x1
jax: 0.10.0
libtpu: 0.0.40
codegen_flags: <defaults>
</compile_context>

<pallas_src>
import jax
import jax.numpy as jnp
from jax.experimental import pallas as pl
from jax.experimental.pallas import tpu as pltpu

SPECTRUM_CHANNEL = 15
INPUT_DIM = SPECTRUM_CHANNEL * 128      # 1920
HIDDEN1 = 1024
HIDDEN2 = 512
OUT_DIM = 5
OUT_PAD = 128                           # lane-dense padded head width
FUSE_MAX_B = 512                        # <= this -> single fused kernel
BATCH_TILE = 512                        # FC batch tile for the large-B path
STATS_TILE = 1024                       # stats pass gets its own, larger tile
VMEM_LIMIT = 32 * 1024 * 1024


def _round_up(a, m):
    return (a + m - 1) // m * m


# ---------------------------------------------------------------------------
# Fused path (B <= FUSE_MAX_B): stats + normalize + FC + sigmoid in one body.
# ---------------------------------------------------------------------------
def _fused_kernel(x_ref, w1_ref, b1_ref, w2_ref, b2_ref, w3_ref, b3_ref, o_ref):
    x = x_ref[...]                                      # (B, 1920) f32, VMEM resident
    n = float(x.shape[0] * x.shape[1])

    # two-stage reductions (lanes then sublanes) -> (1,1) scalars
    s = jnp.sum(jnp.sum(x, axis=1, keepdims=True), axis=0, keepdims=True)
    mean = s * (1.0 / n)
    xc = x - mean                                       # reused for the normalize
    var = jnp.sum(jnp.sum(xc * xc, axis=1, keepdims=True),
                  axis=0, keepdims=True) / (n - 1.0)    # torch .std(): unbiased (ddof=1)
    inv_std = jax.lax.rsqrt(var)

    xn = (xc * inv_std).astype(jnp.bfloat16)            # cast only at the MXU boundary
    h1 = jnp.dot(xn, w1_ref[...], preferred_element_type=jnp.float32) + b1_ref[...]
    h1 = jnp.maximum(h1, 0.0).astype(jnp.bfloat16)
    h2 = jnp.dot(h1, w2_ref[...], preferred_element_type=jnp.float32) + b2_ref[...]
    h2 = jnp.maximum(h2, 0.0).astype(jnp.bfloat16)
    logits = jnp.dot(h2, w3_ref[...], preferred_element_type=jnp.float32) + b3_ref[...]
    o_ref[...] = jax.nn.sigmoid(logits).astype(o_ref.dtype)


# ---------------------------------------------------------------------------
# Large-B pass 1: masked global sum / sum-of-squares with per-lane partials.
# ---------------------------------------------------------------------------
def _stats_kernel(x_ref, nvalid_ref, mean_ref, invstd_ref, sum_acc, sq_acc):
    i = pl.program_id(0)
    nb = pl.num_programs(0)
    tb = x_ref.shape[0]

    @pl.when(i == 0)
    def _():
        sum_acc[...] = jnp.zeros_like(sum_acc)
        sq_acc[...] = jnp.zeros_like(sq_acc)

    x = x_ref[...]                                               # (tb, 1920) f32
    row = jax.lax.broadcasted_iota(jnp.int32, x.shape, 0) + i * tb
    xm = jnp.where(row < nvalid_ref[0], x, 0.0)                  # mask OOB rows of the
                                                                 # partial final block

    # per-lane partial accumulation; cross-lane reduce deferred to the final step
    sum_acc[...] += jnp.sum(xm, axis=0, keepdims=True)           # (1, 1920)
    sq_acc[...] += jnp.sum(xm * xm, axis=0, keepdims=True)

    @pl.when(i == nb - 1)
    def _():
        n = nvalid_ref[0].astype(jnp.float32) * float(INPUT_DIM)
        s = jnp.sum(sum_acc[...], axis=1, keepdims=True)         # (1,1)
        ss = jnp.sum(sq_acc[...], axis=1, keepdims=True)
        mean = s / n
        var = (ss - n * mean * mean) / (n - 1.0)                 # unbiased (ddof=1)
        mean_ref[...] = mean
        invstd_ref[...] = jax.lax.rsqrt(var)


# ---------------------------------------------------------------------------
# Large-B pass 2: normalize + fc stack + sigmoid, weights VMEM-resident.
# ---------------------------------------------------------------------------
def _fc_kernel(x_ref, mean_ref, invstd_ref,
               w1_ref, b1_ref, w2_ref, b2_ref, w3_ref, b3_ref, o_ref):
    mean = mean_ref[0, 0]                          # SMEM scalars (no VMEM broadcast tile)
    inv_std = invstd_ref[0, 0]
    x = x_ref[...]                                 # (tb, 1920) f32

    xn = ((x - mean) * inv_std).astype(jnp.bfloat16)
    h1 = jnp.dot(xn, w1_ref[...], preferred_element_type=jnp.float32) + b1_ref[...]
    h1 = jnp.maximum(h1, 0.0).astype(jnp.bfloat16)
    h2 = jnp.dot(h1, w2_ref[...], preferred_element_type=jnp.float32) + b2_ref[...]
    h2 = jnp.maximum(h2, 0.0).astype(jnp.bfloat16)
    logits = jnp.dot(h2, w3_ref[...], preferred_element_type=jnp.float32) + b3_ref[...]
    o_ref[...] = jax.nn.sigmoid(logits).astype(o_ref.dtype)


def _fc_pass(xf, mean, inv_std, w1b, b1, w2b, b2, w3p, b3p, *, single_buffer_weights):
    """FC pass over batch tiles; weights have constant index maps (VMEM resident)."""
    B = xf.shape[0]
    tb = BATCH_TILE
    grid = (pl.cdiv(B, tb),)

    def wspec(shape):
        # Constant index map -> block never changes; the second pipeline buffer is
        # never needed for overlap, so request single buffering to free ~5 MiB VMEM.
        if single_buffer_weights:
            return pl.BlockSpec(shape, lambda i: (0, 0), pipeline_mode=pl.Buffered(1))
        return pl.BlockSpec(shape, lambda i: (0, 0))

    return pl.pallas_call(
        _fc_kernel,
        grid=grid,
        in_specs=[
            pl.BlockSpec((tb, INPUT_DIM), lambda i: (i, 0)),         # x tile
            pl.BlockSpec(memory_space=pltpu.MemorySpace.SMEM),       # mean   (1,1)
            pl.BlockSpec(memory_space=pltpu.MemorySpace.SMEM),       # invstd (1,1)
            wspec((INPUT_DIM, HIDDEN1)),                             # W1 (bf16)
            wspec((1, HIDDEN1)),                                     # b1 (f32)
            wspec((HIDDEN1, HIDDEN2)),                               # W2 (bf16)
            wspec((1, HIDDEN2)),                                     # b2 (f32)
            wspec((HIDDEN2, OUT_PAD)),                               # W3 (bf16, padded)
            wspec((1, OUT_PAD)),                                     # b3 (f32, padded)
        ],
        out_specs=pl.BlockSpec((tb, OUT_PAD), lambda i: (i, 0)),
        out_shape=jax.ShapeDtypeStruct((B, OUT_PAD), jnp.float32),
        compiler_params=pltpu.CompilerParams(
            dimension_semantics=("parallel",),   # B > FUSE_MAX_B => >= 2 steps (v7x 2 TCs)
            vmem_limit_bytes=VMEM_LIMIT),
    )(xf, mean, inv_std, w1b, b1, w2b, b2, w3p, b3p)


# ---------------------------------------------------------------------------
# Wrapper
# ---------------------------------------------------------------------------
def prepare_params(params):
    """Cast matmul weights to bf16 and lane-pad the 5-wide head to 128 lanes."""
    w1, b1, w2, b2, w3, b3 = params
    w3p = jnp.pad(w3, ((0, 0), (0, OUT_PAD - OUT_DIM)))
    b3p = jnp.pad(b3, ((0, 0), (0, OUT_PAD - OUT_DIM)))
    return (w1.astype(jnp.bfloat16), b1,
            w2.astype(jnp.bfloat16), b2,
            w3p.astype(jnp.bfloat16), b3p)


def audio_fc_net(x, params):
    """x: (B, spectrum_channel, 128) or (B, INPUT_DIM); params: f32 (in,out) weights
    and (1,out) biases.  Returns (B, OUT_DIM) f32."""
    w1b, b1, w2b, b2, w3p, b3p = prepare_params(params)

    xf = x.reshape(-1, INPUT_DIM).astype(jnp.float32)   # glue: view(-1, 15*128)
    B = xf.shape[0]

    # ---- small / moderate batch: single fused kernel (one x read, one launch) ----
    if B <= FUSE_MAX_B:
        out_pad = pl.pallas_call(
            _fused_kernel,
            out_shape=jax.ShapeDtypeStruct((B, OUT_PAD), jnp.float32),
            compiler_params=pltpu.CompilerParams(vmem_limit_bytes=VMEM_LIMIT),
        )(xf, w1b, b1, w2b, b2, w3p, b3p)
        return out_pad[:, :OUT_DIM]

    # ---- large batch: two-pass, no padding copy of x ---------------------------
    nvalid = jnp.array([B], dtype=jnp.int32)

    stats_tb = min(STATS_TILE, _round_up(B, 8))
    mean, inv_std = pl.pallas_call(
        _stats_kernel,
        grid=(pl.cdiv(B, stats_tb),),
        in_specs=[
            pl.BlockSpec((stats_tb, INPUT_DIM), lambda i: (i, 0)),
            pl.BlockSpec(memory_space=pltpu.MemorySpace.SMEM),
        ],
        out_specs=[
            pl.BlockSpec((1, 1), lambda i: (0, 0)),
            pl.BlockSpec((1, 1), lambda i: (0, 0)),
        ],
        out_shape=[
            jax.ShapeDtypeStruct((1, 1), jnp.float32),
            jax.ShapeDtypeStruct((1, 1), jnp.float32),
        ],
        scratch_shapes=[pltpu.VMEM((1, INPUT_DIM), jnp.float32),
                        pltpu.VMEM((1, INPUT_DIM), jnp.float32)],
        compiler_params=pltpu.CompilerParams(
            dimension_semantics=("arbitrary",),
            vmem_limit_bytes=VMEM_LIMIT),
    )(xf, nvalid)

    try:
        out_pad = _fc_pass(xf, mean, inv_std, w1b, b1, w2b, b2, w3p, b3p,
                           single_buffer_weights=True)
    except Exception:
        # pl.Buffered(1) not supported on this jax version -> default double buffering
        out_pad = _fc_pass(xf, mean, inv_std, w1b, b1, w2b, b2, w3p, b3p,
                           single_buffer_weights=False)
    return out_pad[:, :OUT_DIM]


# ---------------------------------------------------------------------------
# Params / references
# ---------------------------------------------------------------------------
def init_params(key):
    """nn.Linear default U(-1/sqrt(fan_in), 1/sqrt(fan_in)); weights stored (in,out)."""
    ks = jax.random.split(key, 6)

    def linear(kw, kb, fan_in, fan_out):
        bound = 1.0 / jnp.sqrt(fan_in)
        w = jax.random.uniform(kw, (fan_in, fan_out), jnp.float32, -bound, bound)
        b = jax.random.uniform(kb, (1, fan_out), jnp.float32, -bound, bound)
        return w, b

    w1, b1 = linear(ks[0], ks[1], INPUT_DIM, HIDDEN1)
    w2, b2 = linear(ks[2], ks[3], HIDDEN1, HIDDEN2)
    w3, b3 = linear(ks[4], ks[5], HIDDEN2, OUT_DIM)
    return (w1, b1, w2, b2, w3, b3)


def _bf16_dot(a, w):
    return jnp.dot(a.astype(jnp.bfloat16), w.astype(jnp.bfloat16),
                   preferred_element_type=jnp.float32)


def reference(x, params):
    """Pure-JAX reference mirroring the kernel math (bf16 matmuls, f32 accumulation)."""
    w1, b1, w2, b2, w3, b3 = params
    xf = x.reshape(-1, INPUT_DIM).astype(jnp.float32)
    xf = (xf - xf.mean()) / xf.std(ddof=1)
    h1 = jnp.maximum(_bf16_dot(xf, w1) + b1, 0.0)
    h2 = jnp.maximum(_bf16_dot(h1, w2) + b2, 0.0)
    return jax.nn.sigmoid(_bf16_dot(h2, w3) + b3)


def reference_f32(x, params):
    """Full-f32 reference of the original PyTorch module (loose semantic check)."""
    w1, b1, w2, b2, w3, b3 = params
    xf = x.reshape(-1, INPUT_DIM).astype(jnp.float32)
    xf = (xf - xf.mean()) / xf.std(ddof=1)
    h1 = jnp.maximum(xf @ w1 + b1, 0.0)
    h2 = jnp.maximum(h1 @ w2 + b2, 0.0)
    return jax.nn.sigmoid(h2 @ w3 + b3)


if __name__ == "__main__":
    key = jax.random.PRNGKey(0)
    k_x, k_x2, k_p = jax.random.split(key, 3)
    params = init_params(k_p)

    # small batch -> fused single-kernel path
    B = 4
    x = jax.random.normal(k_x, (B, SPECTRUM_CHANNEL, 128), dtype=jnp.float32)
    out = jax.block_until_ready(audio_fc_net(x, params))
    assert out.shape == (B, OUT_DIM)
    ref = reference(x, params)
    assert jnp.allclose(out, ref, atol=3e-3, rtol=0.0), float(jnp.max(jnp.abs(out - ref)))
    ref32 = reference_f32(x, params)   # bf16 weights -> loose tolerance vs f32 semantics
    assert jnp.allclose(out, ref32, atol=5e-2, rtol=0.0), float(jnp.max(jnp.abs(out - ref32)))

    # larger batch -> tiled two-pass path (partial final blocks, no padding copy)
    B2 = 640
    x2 = jax.random.normal(k_x2, (B2, SPECTRUM_CHANNEL, 128), dtype=jnp.float32)
    out2 = jax.block_until_ready(audio_fc_net(x2, params))
    assert out2.shape == (B2, OUT_DIM)
    ref2 = reference(x2, params)
    assert jnp.allclose(out2, ref2, atol=3e-3, rtol=0.0), float(jnp.max(jnp.abs(out2 - ref2)))

    print("KERNEL_OK")
</pallas_src>

<mosaic_0001>
module attributes {stable_mosaic.version = 11 : i64} {
  func.func @_fused_kernel(%arg0: memref<4x1920xf32, #tpu.memory_space<vmem>>, %arg1: memref<1920x1024xbf16, #tpu.memory_space<vmem>>, %arg2: memref<1x1024xf32, #tpu.memory_space<vmem>>, %arg3: memref<1024x512xbf16, #tpu.memory_space<vmem>>, %arg4: memref<1x512xf32, #tpu.memory_space<vmem>>, %arg5: memref<512x128xbf16, #tpu.memory_space<vmem>>, %arg6: memref<1x128xf32, #tpu.memory_space<vmem>>, %arg7: memref<4x128xf32, #tpu.memory_space<vmem>>) attributes {dimension_semantics = [], scalar_prefetch = 0 : i64, scratch_operands = 0 : i64, tpu.core_type = #tpu.core_type<tc>} {
    %c0 = arith.constant 0 : index
    %c0_0 = arith.constant 0 : index
    %0 = vector.load %arg0[%c0, %c0_0] : memref<4x1920xf32, #tpu.memory_space<vmem>>, vector<4x1920xf32>
    %cst = arith.constant dense<0.000000e+00> : vector<4xf32>
    %1 = vector.multi_reduction <add>, %0, %cst [1] : vector<4x1920xf32> to vector<4xf32>
    %2 = vector.shape_cast %1 : vector<4xf32> to vector<4x1xf32>
    %cst_1 = arith.constant dense<0.000000e+00> : vector<1xf32>
    %3 = vector.multi_reduction <add>, %2, %cst_1 [0] : vector<4x1xf32> to vector<1xf32>
    %4 = vector.shape_cast %3 : vector<1xf32> to vector<1x1xf32>
    %cst_2 = arith.constant 1.3020834E-4 : f32
    %5 = vector.broadcast %cst_2 : f32 to vector<1x1xf32>
    %6 = arith.mulf %4, %5 : vector<1x1xf32>
    %7 = vector.broadcast %6 : vector<1x1xf32> to vector<4x1920xf32>
    %8 = arith.subf %0, %7 : vector<4x1920xf32>
    %9 = arith.mulf %8, %8 : vector<4x1920xf32>
    %cst_3 = arith.constant dense<0.000000e+00> : vector<4xf32>
    %10 = vector.multi_reduction <add>, %9, %cst_3 [1] : vector<4x1920xf32> to vector<4xf32>
    %11 = vector.shape_cast %10 : vector<4xf32> to vector<4x1xf32>
    %cst_4 = arith.constant dense<0.000000e+00> : vector<1xf32>
    %12 = vector.multi_reduction <add>, %11, %cst_4 [0] : vector<4x1xf32> to vector<1xf32>
    %13 = vector.shape_cast %12 : vector<1xf32> to vector<1x1xf32>
    %cst_5 = arith.constant 7.679000e+03 : f32
    %14 = vector.broadcast %cst_5 : f32 to vector<1x1xf32>
    %15 = arith.divf %13, %14 : vector<1x1xf32>
    %16 = math.rsqrt %15 : vector<1x1xf32>
    %17 = vector.broadcast %16 : vector<1x1xf32> to vector<4x1920xf32>
    %18 = arith.mulf %8, %17 : vector<4x1920xf32>
    %19 = arith.truncf %18 : vector<4x1920xf32> to vector<4x1920xbf16>
    %c0_6 = arith.constant 0 : index
    %c0_7 = arith.constant 0 : index
    %20 = vector.load %arg1[%c0_6, %c0_7] : memref<1920x1024xbf16, #tpu.memory_space<vmem>>, vector<1920x1024xbf16>
    %cst_8 = arith.constant dense<0.000000e+00> : vector<4x1024xf32>
    %21 = tpu.matmul %19, %20, %cst_8 {dimension_numbers = #tpu.dot_dimension_numbers<[1], [0], [0], [1], [0, 0, 1, 1], [], []>} : vector<4x1920xbf16>, vector<1920x1024xbf16>, vector<4x1024xf32> -> vector<4x1024xf32>
    %c0_9 = arith.constant 0 : index
    %c0_10 = arith.constant 0 : index
    %22 = vector.load %arg2[%c0_9, %c0_10] : memref<1x1024xf32, #tpu.memory_space<vmem>>, vector<1x1024xf32>
    %23 = vector.broadcast %22 : vector<1x1024xf32> to vector<4x1024xf32>
    %24 = arith.addf %21, %23 : vector<4x1024xf32>
    %cst_11 = arith.constant 0.000000e+00 : f32
    %25 = vector.broadcast %cst_11 : f32 to vector<4x1024xf32>
    %26 = arith.maximumf %24, %25 : vector<4x1024xf32>
    %27 = arith.truncf %26 : vector<4x1024xf32> to vector<4x1024xbf16>
    %c0_12 = arith.constant 0 : index
    %c0_13 = arith.constant 0 : index
    %28 = vector.load %arg3[%c0_12, %c0_13] : memref<1024x512xbf16, #tpu.memory_space<vmem>>, vector<1024x512xbf16>
    %cst_14 = arith.constant dense<0.000000e+00> : vector<4x512xf32>
    %29 = tpu.matmul %27, %28, %cst_14 {dimension_numbers = #tpu.dot_dimension_numbers<[1], [0], [0], [1], [0, 0, 1, 1], [], []>} : vector<4x1024xbf16>, vector<1024x512xbf16>, vector<4x512xf32> -> vector<4x512xf32>
    %c0_15 = arith.constant 0 : index
    %c0_16 = arith.constant 0 : index
    %30 = vector.load %arg4[%c0_15, %c0_16] : memref<1x512xf32, #tpu.memory_space<vmem>>, vector<1x512xf32>
    %31 = vector.broadcast %30 : vector<1x512xf32> to vector<4x512xf32>
    %32 = arith.addf %29, %31 : vector<4x512xf32>
    %cst_17 = arith.constant 0.000000e+00 : f32
    %33 = vector.broadcast %cst_17 : f32 to vector<4x512xf32>
    %34 = arith.maximumf %32, %33 : vector<4x512xf32>
    %35 = arith.truncf %34 : vector<4x512xf32> to vector<4x512xbf16>
    %c0_18 = arith.constant 0 : index
    %c0_19 = arith.constant 0 : index
    %36 = vector.load %arg5[%c0_18, %c0_19] : memref<512x128xbf16, #tpu.memory_space<vmem>>, vector<512x128xbf16>
    %cst_20 = arith.constant dense<0.000000e+00> : vector<4x128xf32>
    %37 = tpu.matmul %35, %36, %cst_20 {dimension_numbers = #tpu.dot_dimension_numbers<[1], [0], [0], [1], [0, 0, 1, 1], [], []>} : vector<4x512xbf16>, vector<512x128xbf16>, vector<4x128xf32> -> vector<4x128xf32>
    %c0_21 = arith.constant 0 : index
    %c0_22 = arith.constant 0 : index
    %38 = vector.load %arg6[%c0_21, %c0_22] : memref<1x128xf32, #tpu.memory_space<vmem>>, vector<1x128xf32>
    %39 = vector.broadcast %38 : vector<1x128xf32> to vector<4x128xf32>
    %40 = arith.addf %37, %39 : vector<4x128xf32>
    %41 = arith.negf %40 : vector<4x128xf32>
    %42 = math.exp %41 : vector<4x128xf32>
    %cst_23 = arith.constant 1.000000e+00 : f32
    %43 = vector.broadcast %cst_23 : f32 to vector<4x128xf32>
    %44 = arith.addf %43, %42 : vector<4x128xf32>
    %45 = arith.divf %43, %44 : vector<4x128xf32>
    %c0_24 = arith.constant 0 : index
    %c0_25 = arith.constant 0 : index
    %46 = vector.load %arg7[%c0_24, %c0_25] : memref<4x128xf32, #tpu.memory_space<vmem>>, vector<4x128xf32>
    tpu.vector_store %arg7[%c0_24, %c0_25], %45 {strides = array<i32>} : memref<4x128xf32, #tpu.memory_space<vmem>>, vector<4x128xf32>,
    return
  }
}

</mosaic_0001>

<bundles_post_ra>
// kernel: tpu_custom_call.1
= control target key start
LH: loop header
LB: loop body
LE: loop exit
PB: predicated region body
PF: predicated region fallthrough
CT: control target
= control target key end

     0   :  { %12 = vsyncpa [#allocation3], 0  ;;  %s12158_s0 = inlined_call_operand.hbm [shape: f32[4,1920], index: 0, kind: input, shape index: {}]   ;;  %s12159_s1 = inlined_call_operand.hbm [shape: bf16[1920,1024], index: 1, kind: input, shape index: {}]   ;;  %s12160_s2 = inlined_call_operand.hbm [shape: f32[1,1024], index: 2, kind: input, shape index: {}]   ;;  %s12161_s3 = inlined_call_operand.hbm [shape: bf16[1024,512], index: 3, kind: input, shape index: {}]   ;;  %s12162_s4 = inlined_call_operand.hbm [shape: f32[1,512], index: 4, kind: input, shape index: {}]   ;;  %s12163_s5 = inlined_call_operand.hbm [shape: bf16[512,128], index: 5, kind: input, shape index: {}]   ;;  %s12164_s6 = inlined_call_operand.hbm [shape: f32[1,128], index: 6, kind: input, shape index: {}]   ;;  %s12165_s7 = inlined_call_operand.hbm [shape: f32[4,128], index: 7, kind: output, shape index: {}]  }
   0x1   :  { %13 = vsyncpa [#allocation6], 0 }
   0x2   :  { %14 = vsyncpa [#allocation9], 0 }
   0x3   :  { %15 = vsyncpa [#allocation12], 0 }
   0x4   :  { %16 = vsyncpa [#allocation4], 0  ;;  %s11609_s24 = smov [#allocation5]  }
   0x5   :  { %s32_s25 = sshll.u32 %s11609_s24, 4  ;;  %s33_s25 = int_to_ptr.vmem [resolvable:$true] %s32_s25 }
   0x6   :  { %s11447_s26 = scalar_lea.vmem %s33_s25, 122880  ;;  %p11452_p1 = scmp.lt.s32.totalorder %s33_s25, %s33_s25 }
   0x7   :  { %p11448_p0 = scmp.ne.s32.totalorder %s33_s25, %s11447_s26  ;;  %p11453_p2 = scmp.lt.s32.totalorder %s11447_s26, %s11447_s26 }
   0x9   :  { %p11454_p3 = por %p11453_p2, %p11452_p1 }
   0xb   :  { %p11455_p4 = pnand %p11454_p3, %p11448_p0 }
   0xd   :  { %11458 = shalt.err (!%p11455_p4)
}
   0xe   :  { %s11610_s27 = smov 512   ;;  %s11611_s28 = smov 32  }
   0xf   :  { %38 = dma.hbm_to_vmem [thread:$0]  %s12159_s1, 122880, %s33_s25, [#allocation6], %s11610_s27, %s11610_s27, %s11611_s28  }
  0x10   :  { %s11612_s8 = smov [#allocation8]  }
  0x11   :  { %s54_s9 = sshll.u32 %s11612_s8, 4  ;;  %s55_s9 = int_to_ptr.vmem [resolvable:$true] %s54_s9 }
  0x12   :  { %s11467_s10 = scalar_lea.vmem %s55_s9, 32768  ;;  %p11472_p6 = scmp.lt.s32.totalorder %s55_s9, %s55_s9 }
  0x13   :  { %p11468_p5 = scmp.ne.s32.totalorder %s55_s9, %s11467_s10  ;;  %p11473_p7 = scmp.lt.s32.totalorder %s11467_s10, %s11467_s10 }
  0x15   :  { %p11474_p8 = por %p11473_p7, %p11472_p6 }
  0x17   :  { %p11475_p9 = pnand %p11474_p8, %p11468_p5 }
  0x19   :  { %11478 = shalt.err (!%p11475_p9)
}
  0x1a   :  { %s11613_s11 = smov 256   ;;  %s11614_s12 = smov 16  }
  0x1b   :  { %60 = dma.hbm_to_vmem [thread:$0]  %s12161_s3, 32768, %s55_s9, [#allocation9], %s11613_s11, %s11613_s11, %s11614_s12  }
  0x1c   :  { %s11615_s15 = smov [#allocation11]  }
  0x1d   :  { %s76_s16 = sshll.u32 %s11615_s15, 4  ;;  %s77_s16 = int_to_ptr.vmem [resolvable:$true] %s76_s16 }
  0x1e   :  { %s11487_s1 = scalar_lea.vmem %s77_s16, 4096  ;;  %p11492_p11 = scmp.lt.s32.totalorder %s77_s16, %s77_s16 }
  0x1f   :  { %p11488_p10 = scmp.ne.s32.totalorder %s77_s16, %s11487_s1  ;;  %p11493_p12 = scmp.lt.s32.totalorder %s11487_s1, %s11487_s1 }
  0x21   :  { %p11494_p13 = por %p11493_p12, %p11492_p11 }
  0x23   :  { %p11495_p0 = pnand %p11494_p13, %p11488_p10 }
  0x25   :  { %11498 = shalt.err (!%p11495_p0)
}
  0x26   :  { %s11616_s17 = smov 64   ;;  %s11617_s18 = smov 4  }
  0x27   :  { %82 = dma.hbm_to_vmem [thread:$0]  %s12163_s5, 4096, %s77_s16, [#allocation12], %s11616_s17, %s11616_s17, %s11617_s18  }
  0x28   :  { %s11618_s21 = smov [#allocation2]   ;;  %s11619_s3 = smov [#allocation7]  }
  0x29   :  { %s23_s22 = sshll.u32 %s11618_s21, 4  ;;  %s45_s23 = sshll.u32 %s11619_s3, 4  ;;  %s24_s22 = int_to_ptr.vmem [resolvable:$true] %s23_s22  ;;  %s46_s23 = int_to_ptr.vmem [resolvable:$true] %s45_s23 }
  0x2a   :  { %s11507_s24 = scalar_lea.vmem %s24_s22, 960  ;;  %p11512_p2 = scmp.lt.s32.totalorder %s24_s22, %s24_s22 }
  0x2b   :  { %p11508_p1 = scmp.ne.s32.totalorder %s24_s22, %s11507_s24  ;;  %p11513_p3 = scmp.lt.s32.totalorder %s11507_s24, %s11507_s24 }
  0x2d   :  { %p11514_p4 = por %p11513_p3, %p11512_p2 }
  0x2f   :  { %p11515_p5 = pnand %p11514_p4, %p11508_p1 }
  0x31   :  { %11518 = shalt.err (!%p11515_p5)
}
  0x32   :  { %26 = dma.hbm_to_vmem [thread:$0]  %s12158_s0, 960, %s24_s22, [#allocation3]  }
  0x33   :  { %s11527_s27 = scalar_lea.vmem %s46_s23, 128  ;;  %p11532_p7 = scmp.lt.s32.totalorder %s46_s23, %s46_s23 }
  0x34   :  { %p11528_p6 = scmp.ne.s32.totalorder %s46_s23, %s11527_s27  ;;  %p11533_p8 = scmp.lt.s32.totalorder %s11527_s27, %s11527_s27 }
  0x36   :  { %p11534_p9 = por %p11533_p8, %p11532_p7 }
  0x38   :  { %p11535_p10 = pnand %p11534_p9, %p11528_p6 }
  0x3a   :  { %11538 = shalt.err (!%p11535_p10)
}
  0x3b   :  { %48 = dma.hbm_to_vmem [thread:$0]  %s12160_s2, 128, %s46_s23, [#allocation6]  }
  0x3c   :  { %s11620_s29 = smov [#allocation10]   ;;  %s11621_s8 = smov [#allocation13]  }
  0x3d   :  { %s67_s30 = sshll.u32 %s11620_s29, 4  ;;  %s89_s9 = sshll.u32 %s11621_s8, 4  ;;  %s68_s30 = int_to_ptr.vmem [resolvable:$true] %s67_s30  ;;  %s90_s9 = int_to_ptr.vmem [resolvable:$true] %s89_s9 }
  0x3e   :  { %s11547_s10 = scalar_lea.vmem %s68_s30, 64  ;;  %p11552_p12 = scmp.lt.s32.totalorder %s68_s30, %s68_s30 }
  0x3f   :  { %p11548_p11 = scmp.ne.s32.totalorder %s68_s30, %s11547_s10  ;;  %p11553_p13 = scmp.lt.s32.totalorder %s11547_s10, %s11547_s10 }
  0x41   :  { %p11554_p0 = por %p11553_p13, %p11552_p12 }
  0x43   :  { %p11555_p1 = pnand %p11554_p0, %p11548_p11 }
  0x45   :  { %11558 = shalt.err (!%p11555_p1)
}
  0x46   :  { %70 = dma.hbm_to_vmem [thread:$0]  %s12162_s4, 64, %s68_s30, [#allocation9]  }
  0x47   :  { %s11567_s12 = scalar_lea.vmem %s90_s9, 16  ;;  %s11571_s2 = scalar_lea.vmem %s90_s9, 32 }
  0x48   :  { %p11568_p2 = scmp.ne.s32.totalorder %s90_s9, %s11567_s12  ;;  %p11572_p3 = scmp.lt.s32.totalorder %s90_s9, %s90_s9 }
  0x49   :  { %p11573_p4 = scmp.lt.s32.totalorder %s11571_s2, %s11567_s12 }
  0x4b   :  { %p11574_p5 = por %p11573_p4, %p11572_p3 }
  0x4d   :  { %p11575_p6 = pnand %p11574_p5, %p11568_p2 }
  0x4f   :  { %11578 = shalt.err (!%p11575_p6)
}
  0x50   :  { %92 = dma.hbm_to_vmem [thread:$0]  %s12164_s6, 16, %s90_s9, [#allocation12]  }
  0x51   :  { %11599 = dma.done.wait [#allocation3], 960  }
  0x52   :  { %11600 = vsyncadd [#allocation3], 4294966336 }
  0x53   :  { %11601 = dma.done.wait [#allocation6], 123008  }
  0x54   :  { %11602 = vsyncadd [#allocation6], 4294844288 }
  0x55   :  { %11603 = dma.done.wait [#allocation9], 32832  }
  0x56   :  { %11604 = vsyncadd [#allocation9], 4294934464 }
  0x57   :  { %11605 = dma.done.wait [#allocation12], 4112  }
  0x58   :  { %11606 = vsyncadd [#allocation12], 4294963184  ;;  %vm144_vm0 = vcmask 1043456   ;;  %v11685_v0 = vld [vmem:[#allocation2] sm:$0xff]  ;;  %v11687_v1 = vld [vmem:[#allocation2 + $0x8] sm:$0xff]  ;;  %s11623_s4 = smov [#allocation14]  }
  0x59   :  { %v130_v2 = vcombine.high %v11685_v0, %v11685_v0  ;;  %v131_v3 = vcombine.high %v11687_v1, %v11687_v1  ;;  %v145_v4 = vsel %vm144_vm0, %v11685_v0, 0.0  ;;  %v11695_v5 = vld [vmem:[#allocation2 + $0x10] sm:$0xff]  ;;  %v148_v7 = vsel %vm144_vm0, %v11687_v1, 0.0  ;;  %v11700_v9 = vld [vmem:[#allocation2 + $0x18] sm:$0xff]  ;;  %v11707_v14 = vld [vmem:[#allocation2 + $0x20] sm:$0xff]  ;;  %s9686_s6 = sshll.u32 %s11623_s4, 4  ;;  %s9687_s6 = int_to_ptr.vmem [resolvable:$true] %s9686_s6 }
  0x5a   :  { %v132_v10 = vcombine.high %v11695_v5, %v11695_v5  ;;  %v152_v13 = vsel %vm144_vm0, %v11695_v5, 0.0  ;;  %v133_v16 = vcombine.high %v11700_v9, %v11700_v9  ;;  %v156_v19 = vsel %vm144_vm0, %v11700_v9, 0.0  ;;  %v11714_v20 = vld [vmem:[#allocation2 + $0x28] sm:$0xff]  ;;  %v11721_v26 = vld [vmem:[#allocation2 + $0x30] sm:$0xff]  ;;  %v11731_v35 = vld [vmem:[#allocation2 + $0x38] sm:$0xf]  ;;  %p11584_p8 = scmp.lt.s32.totalorder %s9687_s6, %s9687_s6 }
  0x5b   :  { %v146_v6 = vsel %vm144_vm0, %v130_v2, 0.0  ;;  %v150_v11 = vsel %vm144_vm0, %v131_v3, 0.0  ;;  %v134_v22 = vcombine.high %v11707_v14, %v11707_v14  ;;  %v160_v25 = vsel %vm144_vm0, %v11707_v14, 0.0  ;;  %v362_v44 = vld [vmem:[#allocation5 + $0x1c0] sm:$0xff]  ;;  %s11579_s15 = scalar_lea.vmem %s9687_s6, 64 }
  0x5c   :  { %v147_v8 = vadd.f32 %v146_v6, %v145_v4  ;;  %v154_v17 = vsel %vm144_vm0, %v132_v10, 0.0  ;;  %v158_v23 = vsel %vm144_vm0, %v133_v16, 0.0  ;;  %v135_v28 = vcombine.high %v11714_v20, %v11714_v20  ;;  %v366_v45 = vld [vmem:[#allocation5 + $0x1e0] sm:$0xff]  ;;  %p11580_p7 = scmp.ne.s32.totalorder %s9687_s6, %s11579_s15  ;;  %p11585_p9 = scmp.lt.s32.totalorder %s11579_s15, %s11579_s15 }
  0x5d   :  { %v162_v29 = vsel %vm144_vm0, %v134_v22, 0.0  ;;  %v164_v31 = vsel %vm144_vm0, %v11714_v20, 0.0  ;;  %v136_v33 = vcombine.high %v11721_v26, %v11721_v26  ;;  %v168_v37 = vsel %vm144_vm0, %v11721_v26, 0.0  ;;  %v490_v46 = vld [vmem:[#allocation5 + $0x5c0] sm:$0xff] }
  0x5e   :  { %v149_v12 = vadd.f32 %v148_v7, %v147_v8  ;;  %v166_v34 = vsel %vm144_vm0, %v135_v28, 0.0  ;;  %v172_v41 = vsel %vm144_vm0, %v11731_v35, 0.0  ;;  %v9755_v47 = vcombine.high %v362_v44, %v366_v45  ;;  %v494_v48 = vld [vmem:[#allocation5 + $0x5e0] sm:$0xff]  ;;  %p11586_p10 = por %p11585_p9, %p11584_p8 }
  0x5f   :  { %v170_v39 = vsel %vm144_vm0, %v136_v33, 0.0  ;;  %v9754_v49 = vcombine.low %v362_v44, %v366_v45  ;;  %v354_v50 = vld [vmem:[#allocation5 + $0x180] sm:$0xff]  ;;  %v9883_v52 = vcombine.high %v490_v46, %v494_v48  ;;  %v9882_v53 = vcombine.low %v490_v46, %v494_v48 }
  0x60   :  { %v151_v15 = vadd.f32 %v150_v11, %v149_v12  ;;  %v358_v51 = vld [vmem:[#allocation5 + $0x1a0] sm:$0xff]  ;;  %6108 = vmatprep.subr.bf16.mxu0 %v9755_v47  ;;  %p11587_p11 = pnand %p11586_p10, %p11580_p7 }
  0x61   :  { %v9747_v54 = vcombine.high %v354_v50, %v358_v51  ;;  %v482_v55 = vld [vmem:[#allocation5 + $0x580] sm:$0xff]  ;;  %6149 = vmatprep.subr.bf16.mxu1 %v9883_v52  ;;  %6109 = vmatpush1.bf16.msra.mxu0 %v9754_v49  ;;  %v9746_v62 = vcombine.low %v354_v50, %v358_v51 }
  0x62   :  { %v153_v18 = vadd.f32 %v152_v13, %v151_v15  ;;  %v486_v56 = vld [vmem:[#allocation5 + $0x5a0] sm:$0xff]  ;;  %6150 = vmatpush1.bf16.msra.mxu1 %v9882_v53 }
  0x63   :  { %v346_v57 = vld [vmem:[#allocation5 + $0x140] sm:$0xff]  ;;  %v9875_v58 = vcombine.high %v482_v55, %v486_v56  ;;  %6110 = vmatprep.subr.bf16.mxu0 %v9747_v54  ;;  %v9874_v63 = vcombine.low %v482_v55, %v486_v56 }
  0x64   :  { %v155_v21 = vadd.f32 %v154_v17, %v153_v18  ;;  %v350_v59 = vld [vmem:[#allocation5 + $0x160] sm:$0xff] }
  0x65   :  { %v474_v60 = vld [vmem:[#allocation5 + $0x540] sm:$0xff]  ;;  %v9739_v2 = vcombine.high %v346_v57, %v350_v59  ;;  %6151 = vmatprep.subr.bf16.mxu1 %v9875_v58  ;;  %6111 = vmatpush1.bf16.msra.mxu0 %v9746_v62  ;;  %v9738_v10 = vcombine.low %v346_v57, %v350_v59 }
  0x66   :  { %v157_v24 = vadd.f32 %v156_v19, %v155_v21  ;;  %v478_v61 = vld [vmem:[#allocation5 + $0x560] sm:$0xff]  ;;  %6152 = vmatpush1.bf16.msra.mxu1 %v9874_v63 }
  0x67   :  { %v9867_v3 = vcombine.high %v474_v60, %v478_v61  ;;  %v338_v4 = vld [vmem:[#allocation5 + $0x100] sm:$0xff]  ;;  %6112 = vmatprep.subr.bf16.mxu0 %v9739_v2  ;;  %v9866_v11 = vcombine.low %v474_v60, %v478_v61 }
  0x68   :  { %v159_v27 = vadd.f32 %v158_v23, %v157_v24  ;;  %v342_v6 = vld [vmem:[#allocation5 + $0x120] sm:$0xff] }
  0x69   :  { %v466_v7 = vld [vmem:[#allocation5 + $0x500] sm:$0xff]  ;;  %v9731_v12 = vcombine.high %v338_v4, %v342_v6  ;;  %6153 = vmatprep.subr.bf16.mxu1 %v9867_v3  ;;  %6113 = vmatpush1.bf16.msra.mxu0 %v9738_v10  ;;  %v9730_v19 = vcombine.low %v338_v4, %v342_v6 }
  0x6a   :  { %v161_v30 = vadd.f32 %v160_v25, %v159_v27  ;;  %v470_v8 = vld [vmem:[#allocation5 + $0x520] sm:$0xff]  ;;  %6154 = vmatpush1.bf16.msra.mxu1 %v9866_v11 }
  0x6b   :  { %v330_v13 = vld [vmem:[#allocation5 + $0xc0] sm:$0xff]  ;;  %v9859_v16 = vcombine.high %v466_v7, %v470_v8  ;;  %6114 = vmatprep.subr.bf16.mxu0 %v9731_v12  ;;  %v9858_v23 = vcombine.low %v466_v7, %v470_v8 }
  0x6c   :  { %v163_v32 = vadd.f32 %v162_v29, %v161_v30  ;;  %v334_v15 = vld [vmem:[#allocation5 + $0xe0] sm:$0xff] }
  0x6d   :  { %v458_v17 = vld [vmem:[#allocation5 + $0x4c0] sm:$0xff]  ;;  %v9723_v24 = vcombine.high %v330_v13, %v334_v15  ;;  %6155 = vmatprep.subr.bf16.mxu1 %v9859_v16  ;;  %6115 = vmatpush1.bf16.msra.mxu0 %v9730_v19  ;;  %v9722_v29 = vcombine.low %v330_v13, %v334_v15 }
  0x6e   :  { %v165_v36 = vadd.f32 %v164_v31, %v163_v32  ;;  %v462_v18 = vld [vmem:[#allocation5 + $0x4e0] sm:$0xff]  ;;  %6156 = vmatpush1.bf16.msra.mxu1 %v9858_v23 }
  0x6f   :  { %v322_v21 = vld [vmem:[#allocation5 + $0x80] sm:$0xff]  ;;  %v9851_v28 = vcombine.high %v458_v17, %v462_v18  ;;  %6116 = vmatprep.subr.bf16.mxu0 %v9723_v24  ;;  %v9850_v32 = vcombine.low %v458_v17, %v462_v18 }
  0x70   :  { %v167_v38 = vadd.f32 %v166_v34, %v165_v36  ;;  %v326_v22 = vld [vmem:[#allocation5 + $0xa0] sm:$0xff] }
  0x71   :  { %v450_v25 = vld [vmem:[#allocation5 + $0x480] sm:$0xff]  ;;  %v9715_v33 = vcombine.high %v322_v21, %v326_v22  ;;  %6157 = vmatprep.subr.bf16.mxu1 %v9851_v28  ;;  %6117 = vmatpush1.bf16.msra.mxu0 %v9722_v29 }
  0x72   :  { %v169_v40 = vadd.f32 %v168_v37, %v167_v38  ;;  %v454_v27 = vld [vmem:[#allocation5 + $0x4a0] sm:$0xff]  ;;  %v9714_v38 = vcombine.low %v322_v21, %v326_v22  ;;  %6158 = vmatpush1.bf16.msra.mxu1 %v9850_v32 }
  0x73   :  { %v314_v30 = vld [vmem:[#allocation5 + $0x40] sm:$0xff]  ;;  %v9843_v37 = vcombine.high %v450_v25, %v454_v27  ;;  %6118 = vmatprep.subr.bf16.mxu0 %v9715_v33 }
  0x74   :  { %v171_v42 = vadd.f32 %v170_v39, %v169_v40  ;;  %v318_v31 = vld [vmem:[#allocation5 + $0x60] sm:$0xff] }
  0x75   :  { %v442_v34 = vld [vmem:[#allocation5 + $0x440] sm:$0xff]  ;;  %6159 = vmatprep.subr.bf16.mxu1 %v9843_v37  ;;  %6119 = vmatpush1.bf16.msra.mxu0 %v9714_v38  ;;  %v9706_v46 = vcombine.low %v314_v30, %v318_v31 }
  0x76   :  { %v173_v43 = vadd.f32 %v172_v41, %v171_v42  ;;  %v446_v36 = vld [vmem:[#allocation5 + $0x460] sm:$0xff]  ;;  %v9842_v41 = vcombine.low %v450_v25, %v454_v27  ;;  %v9707_v42 = vcombine.high %v314_v30, %v318_v31 }
  0x77   :  { %v11738_v39 = vld [vmem:[#allocation5] sm:$0xff]  ;;  %v9835_v45 = vcombine.high %v442_v34, %v446_v36  ;;  %v9834_v47 = vcombine.low %v442_v34, %v446_v36 }
  0x78   :  { %174 = vadd.xlane.f32.xlu0 %v173_v43  ;;  %v11740_v40 = vld [vmem:[#allocation5 + $0x20] sm:$0xff]  ;;  %6160 = vmatpush1.bf16.msra.mxu1 %v9842_v41 }
  0x79   :  { %v11742_v43 = vld [vmem:[#allocation5 + $0x400] sm:$0xff]  ;;  %6120 = vmatprep.subr.bf16.mxu0 %v9707_v42  ;;  %v9699_v48 = vcombine.high %v11738_v39, %v11740_v40  ;;  %6161 = vmatprep.subr.bf16.mxu1 %v9835_v45 }
  0x7a   :  { %v11744_v44 = vld [vmem:[#allocation5 + $0x420] sm:$0xff]  ;;  %6121 = vmatpush1.bf16.msra.mxu0 %v9706_v46 }
  0x7b   :  { %v9827_v49 = vcombine.high %v11742_v43, %v11744_v44  ;;  %6122 = vmatprep.subr.bf16.mxu0 %v9699_v48 }
  0x7c   :  { %6162 = vmatpush1.bf16.msra.mxu1 %v9834_v47 }
  0x7d   :  { %6163 = vmatprep.subr.bf16.mxu1 %v9827_v49 }
 0x101   :  { %v175_v50 = vpop.xlane.xlu0 %174 }
 0x102   :  { %v176_v51 = vsel %vm144_vm0, %v175_v50, 0.0 }
 0x103   :  { %v177_v52 = vrot.slane %v176_v51, 4 }
 0x105   :  { %v178_v53 = vadd.f32 %v177_v52, %v176_v51  ;;  %v9698_v51 = vcombine.low %v11738_v39, %v11740_v40  ;;  %v9826_v52 = vcombine.low %v11742_v43, %v11744_v44  ;;  %v550_v40 = vld [vmem:[#allocation5 + $0x7a0] sm:$0xff] }
 0x107   :  { %v179_v54 = vrot.slane %v178_v53, 2  ;;  %6123 = vmatpush1.bf16.msra.mxu0 %v9698_v51  ;;  %6164 = vmatpush1.bf16.msra.mxu1 %v9826_v52  ;;  %v370_v51 = vld [vmem:[#allocation5 + $0x200] sm:$0xff] }
 0x108   :  { %v374_v52 = vld [vmem:[#allocation5 + $0x220] sm:$0xff] }
 0x109   :  { %v180_v55 = vadd.f32 %v179_v54, %v178_v53  ;;  %v426_v53 = vld [vmem:[#allocation5 + $0x3c0] sm:$0xff] }
 0x10a   :  { %v430_v54 = vld [vmem:[#allocation5 + $0x3e0] sm:$0xff] }
 0x10b   :  { %v181_v56 = vrot.slane %v180_v55, 1 }
 0x10d   :  { %v182_v57 = vadd.f32 %v181_v56, %v180_v55  ;;  %v554_v55 = vld [vmem:[#allocation5 + $0x7c0] sm:$0xff]  ;;  %v9819_v56 = vcombine.high %v426_v53, %v430_v54 }
 0x10f   :  { %v183_v58 = vmul.f32 0.00013020834, %v182_v57  ;;  %v558_v57 = vld [vmem:[#allocation5 + $0x7e0] sm:$0xff]  ;;  %6124 = vmatprep.subr.bf16.mxu0 %v9819_v56 }
 0x111   :  { %v11752_v59 = vsub.f32 %v11685_v0, %v183_v58  ;;  %v11755_v60 = vsub.f32 %v11687_v1, %v183_v58  ;;  %v11758_v61 = vsub.f32 %v11695_v5, %v183_v58  ;;  %v11765_v3 = vsub.f32 %v11700_v9, %v183_v58 }
 0x112   :  { %v11773_v10 = vsub.f32 %v11707_v14, %v183_v58  ;;  %v11780_v17 = vsub.f32 %v11714_v20, %v183_v58  ;;  %v11787_v24 = vsub.f32 %v11721_v26, %v183_v58  ;;  %v11797_v26 = vsub.f32 %v11731_v35, %v183_v58 }
 0x113   :  { %v192_v62 = vmul.f32 %v11752_v59, %v11752_v59  ;;  %v193_v63 = vmul.f32 %v11755_v60, %v11755_v60  ;;  %v194_v0 = vmul.f32 %v11758_v61, %v11758_v61  ;;  %v195_v11 = vmul.f32 %v11765_v3, %v11765_v3 }
 0x114   :  { %v196_v18 = vmul.f32 %v11773_v10, %v11773_v10  ;;  %v197_v25 = vmul.f32 %v11780_v17, %v11780_v17  ;;  %v198_v31 = vmul.f32 %v11787_v24, %v11787_v24  ;;  %v199_v45 = vmul.f32 %v11797_v26, %v11797_v26 }
 0x115   :  { %v207_v2 = vcombine.high %v192_v62, %v192_v62  ;;  %v208_v4 = vcombine.high %v193_v63, %v193_v63  ;;  %v221_v1 = vsel %vm144_vm0, %v192_v62, 0.0  ;;  %v224_v7 = vsel %vm144_vm0, %v193_v63, 0.0 }
 0x116   :  { %v209_v9 = vcombine.high %v194_v0, %v194_v0  ;;  %v228_v15 = vsel %vm144_vm0, %v194_v0, 0.0  ;;  %v210_v19 = vcombine.high %v195_v11, %v195_v11  ;;  %v232_v22 = vsel %vm144_vm0, %v195_v11, 0.0  ;;  %v422_v0 = vld [vmem:[#allocation5 + $0x3a0] sm:$0xff] }
 0x117   :  { %v222_v6 = vsel %vm144_vm0, %v207_v2, 0.0  ;;  %v226_v12 = vsel %vm144_vm0, %v208_v4, 0.0  ;;  %v211_v27 = vcombine.high %v196_v18, %v196_v18  ;;  %v236_v29 = vsel %vm144_vm0, %v196_v18, 0.0  ;;  %v418_v2 = vld [vmem:[#allocation5 + $0x380] sm:$0xff] }
 0x118   :  { %v223_v5 = vadd.f32 %v222_v6, %v221_v1  ;;  %v230_v14 = vsel %vm144_vm0, %v209_v9, 0.0  ;;  %v234_v20 = vsel %vm144_vm0, %v210_v19, 0.0  ;;  %v212_v32 = vcombine.high %v197_v25, %v197_v25  ;;  %v546_v4 = vld [vmem:[#allocation5 + $0x780] sm:$0xff] }
 0x119   :  { %v238_v33 = vsel %vm144_vm0, %v211_v27, 0.0  ;;  %v240_v36 = vsel %vm144_vm0, %v197_v25, 0.0  ;;  %v213_v38 = vcombine.high %v198_v31, %v198_v31  ;;  %v244_v46 = vsel %vm144_vm0, %v198_v31, 0.0  ;;  %v410_v6 = vld [vmem:[#allocation5 + $0x340] sm:$0xff] }
 0x11a   :  { %v225_v8 = vadd.f32 %v224_v7, %v223_v5  ;;  %v242_v41 = vsel %vm144_vm0, %v212_v32, 0.0  ;;  %v248_v50 = vsel %vm144_vm0, %v199_v45, 0.0  ;;  %v9947_v58 = vcombine.high %v554_v55, %v558_v57  ;;  %v414_v5 = vld [vmem:[#allocation5 + $0x360] sm:$0xff] }
 0x11b   :  { %v246_v48 = vsel %vm144_vm0, %v213_v38, 0.0  ;;  %v9818_v62 = vcombine.low %v426_v53, %v430_v54  ;;  %v9946_v63 = vcombine.low %v554_v55, %v558_v57  ;;  %v9811_v39 = vcombine.high %v418_v2, %v422_v0  ;;  %v538_v7 = vld [vmem:[#allocation5 + $0x740] sm:$0xff] }
 0x11c   :  { %v227_v13 = vadd.f32 %v226_v12, %v225_v8  ;;  %6165 = vmatprep.subr.bf16.mxu1 %v9947_v58  ;;  %v9939_v43 = vcombine.high %v546_v4, %v550_v40  ;;  %v9810_v44 = vcombine.low %v418_v2, %v422_v0  ;;  %v9938_v1 = vcombine.low %v546_v4, %v550_v40  ;;  %v542_v11 = vld [vmem:[#allocation5 + $0x760] sm:$0xff] }
 0x11d   :  { %6125 = vmatpush2.bf16.msra.mxu0 %v9818_v62  ;;  %6166 = vmatpush2.bf16.msra.mxu1 %v9946_v63  ;;  %v9803_v8 = vcombine.high %v410_v6, %v414_v5  ;;  %v9931_v9 = vcombine.high %v538_v7, %v542_v11  ;;  %v9802_v12 = vcombine.low %v410_v6, %v414_v5  ;;  %v530_v18 = vld [vmem:[#allocation5 + $0x700] sm:$0xff] }
 0x11e   :  { %v229_v16 = vadd.f32 %v228_v15, %v227_v13  ;;  %6126 = vmatprep.subr.bf16.mxu0 %v9811_v39  ;;  %6167 = vmatprep.subr.bf16.mxu1 %v9939_v43  ;;  %v9930_v13 = vcombine.low %v538_v7, %v542_v11  ;;  %v402_v15 = vld [vmem:[#allocation5 + $0x300] sm:$0xff]  ;;  %v9763_v57 = vcombine.high %v370_v51, %v374_v52 }
 0x11f   :  { %v522_v27 = vld [vmem:[#allocation5 + $0x6c0] sm:$0xff]  ;;  %v9762_v62 = vcombine.low %v370_v51, %v374_v52 }
 0x120   :  { %v231_v21 = vadd.f32 %v230_v14, %v229_v16  ;;  %v406_v16 = vld [vmem:[#allocation5 + $0x320] sm:$0xff] }
 0x121   :  { %6127 = vmatpush2.bf16.msra.mxu0 %v9810_v44  ;;  %6168 = vmatpush2.bf16.msra.mxu1 %v9938_v1  ;;  %v9795_v19 = vcombine.high %v402_v15, %v406_v16  ;;  %v534_v14 = vld [vmem:[#allocation5 + $0x720] sm:$0xff]  ;;  %v9794_v25 = vcombine.low %v402_v15, %v406_v16 }
 0x122   :  { %v233_v23 = vadd.f32 %v232_v22, %v231_v21  ;;  %6128 = vmatprep.subr.bf16.mxu0 %v9803_v8  ;;  %v394_v21 = vld [vmem:[#allocation5 + $0x2c0] sm:$0xff]  ;;  %6169 = vmatprep.subr.bf16.mxu1 %v9931_v9 }
 0x123   :  { %v398_v22 = vld [vmem:[#allocation5 + $0x2e0] sm:$0xff] }
 0x124   :  { %v235_v28 = vadd.f32 %v234_v20, %v233_v23  ;;  %v9923_v23 = vcombine.high %v530_v18, %v534_v14  ;;  %v526_v20 = vld [vmem:[#allocation5 + $0x6e0] sm:$0xff] }
 0x125   :  { %6129 = vmatpush2.bf16.msra.mxu0 %v9802_v12  ;;  %6170 = vmatpush2.bf16.msra.mxu1 %v9930_v13  ;;  %v386_v31 = vld [vmem:[#allocation5 + $0x280] sm:$0xff] }
 0x126   :  { %v237_v30 = vadd.f32 %v236_v29, %v235_v28  ;;  %6130 = vmatprep.subr.bf16.mxu0 %v9795_v19  ;;  %v9922_v28 = vcombine.low %v530_v18, %v534_v14  ;;  %v9787_v29 = vcombine.high %v394_v21, %v398_v22  ;;  %6171 = vmatprep.subr.bf16.mxu1 %v9923_v23  ;;  %v390_v32 = vld [vmem:[#allocation5 + $0x2a0] sm:$0xff] }
 0x127   :  { %v9779_v38 = vcombine.high %v386_v31, %v390_v32  ;;  %v382_v45 = vld [vmem:[#allocation5 + $0x260] sm:$0xff] }
 0x128   :  { %v239_v34 = vadd.f32 %v238_v33, %v237_v30  ;;  %v9915_v30 = vcombine.high %v522_v27, %v526_v20  ;;  %v514_v33 = vld [vmem:[#allocation5 + $0x680] sm:$0xff] }
 0x129   :  { %6131 = vmatpush2.bf16.msra.mxu0 %v9794_v25  ;;  %6172 = vmatpush2.bf16.msra.mxu1 %v9922_v28  ;;  %v498_v53 = vld [vmem:[#allocation5 + $0x600] sm:$0xff] }
 0x12a   :  { %v241_v37 = vadd.f32 %v240_v36, %v239_v34  ;;  %v518_v34 = vld [vmem:[#allocation5 + $0x6a0] sm:$0xff]  ;;  %v9786_v36 = vcombine.low %v394_v21, %v398_v22  ;;  %6132 = vmatprep.subr.bf16.mxu0 %v9787_v29  ;;  %6173 = vmatprep.subr.bf16.mxu1 %v9915_v30 }
 0x12b   :  { %v502_v54 = vld [vmem:[#allocation5 + $0x620] sm:$0xff] }
 0x12c   :  { %v243_v42 = vadd.f32 %v242_v41, %v241_v37  ;;  %v9914_v37 = vcombine.low %v522_v27, %v526_v20  ;;  %v9907_v41 = vcombine.high %v514_v33, %v518_v34  ;;  %v9891_v58 = vcombine.high %v498_v53, %v502_v54  ;;  %v618_v2 = vld [vmem:[#allocation5 + $0x9c0] sm:$0xff] }
 0x12d   :  { %6133 = vmatpush2.bf16.msra.mxu0 %v9786_v36  ;;  %v9890_v63 = vcombine.low %v498_v53, %v502_v54  ;;  %v622_v0 = vld [vmem:[#allocation5 + $0x9e0] sm:$0xff] }
 0x12e   :  { %v245_v47 = vadd.f32 %v244_v46, %v243_v42  ;;  %v378_v42 = vld [vmem:[#allocation5 + $0x240] sm:$0xff]  ;;  %6174 = vmatpush2.bf16.msra.mxu1 %v9914_v37  ;;  %6134 = vmatprep.subr.bf16.mxu0 %v9779_v38  ;;  %v10010_v39 = vcombine.low %v618_v2, %v622_v0  ;;  %v10011_v40 = vcombine.high %v618_v2, %v622_v0 }
 0x12f   :  { %v506_v46 = vld [vmem:[#allocation5 + $0x640] sm:$0xff]  ;;  %6175 = vmatprep.subr.bf16.mxu1 %v9907_v41  ;;  %v9770_v55 = vcombine.low %v378_v42, %v382_v45 }
 0x130   :  { %v247_v49 = vadd.f32 %v246_v48, %v245_v47  ;;  %v510_v47 = vld [vmem:[#allocation5 + $0x660] sm:$0xff]  ;;  %v9778_v48 = vcombine.low %v386_v31, %v390_v32 }
 0x131   :  { %v9898_v56 = vcombine.low %v506_v46, %v510_v47  ;;  %v746_v4 = vld [vmem:[#allocation5 + $0xdc0] sm:$0xff] }
 0x132   :  { %v249_v35 = vadd.f32 %v248_v50, %v247_v49  ;;  %v9906_v49 = vcombine.low %v514_v33, %v518_v34  ;;  %v9771_v50 = vcombine.high %v378_v42, %v382_v45  ;;  %6135 = vmatpush2.bf16.msra.mxu0 %v9778_v48  ;;  %v750_v43 = vld [vmem:[#allocation5 + $0xde0] sm:$0xff] }
 0x133   :  { %v10138_v44 = vcombine.low %v746_v4, %v750_v43  ;;  %v10139_v1 = vcombine.high %v746_v4, %v750_v43  ;;  %v610_v25 = vld [vmem:[#allocation5 + $0x980] sm:$0xff] }
 0x134   :  { %250 = vadd.xlane.f32.xlu0 %v249_v35  ;;  %v9899_v35 = vcombine.high %v506_v46, %v510_v47  ;;  %6176 = vmatpush2.bf16.msra.mxu1 %v9906_v49  ;;  %v614_v20 = vld [vmem:[#allocation5 + $0x9a0] sm:$0xff] }
 0x135   :  { %6136 = vmatprep.subr.bf16.mxu0 %v9771_v50  ;;  %v738_v28 = vld [vmem:[#allocation5 + $0xd80] sm:$0xff]  ;;  %v10003_v32 = vcombine.high %v610_v25, %v614_v20  ;;  %v10002_v42 = vcombine.low %v610_v25, %v614_v20 }
 0x136   :  { %6177 = vmatprep.subr.bf16.mxu1 %v9899_v35  ;;  %6137 = vmatpush2.bf16.msra.mxu0 %v9770_v55  ;;  %v602_v31 = vld [vmem:[#allocation5 + $0x940] sm:$0xff] }
 0x137   :  { %6138 = vmatprep.subr.bf16.mxu0 %v9763_v57  ;;  %v606_v34 = vld [vmem:[#allocation5 + $0x960] sm:$0xff] }
 0x138   :  { %6178 = vmatpush2.bf16.msra.mxu1 %v9898_v56  ;;  %v730_v36 = vld [vmem:[#allocation5 + $0xd40] sm:$0xff]  ;;  %v9995_v46 = vcombine.high %v602_v31, %v606_v34  ;;  %v9994_v51 = vcombine.low %v602_v31, %v606_v34 }
 0x139   :  { %6179 = vmatprep.subr.bf16.mxu1 %v9891_v58  ;;  %v734_v37 = vld [vmem:[#allocation5 + $0xd60] sm:$0xff] }
 0x13a   :  { %6139 = vmatpush2.bf16.msra.mxu0 %v9762_v62  ;;  %v10123_v47 = vcombine.high %v730_v36, %v734_v37  ;;  %v594_v48 = vld [vmem:[#allocation5 + $0x900] sm:$0xff]  ;;  %v10122_v52 = vcombine.low %v730_v36, %v734_v37 }
 0x13b   :  { %6190 = vmatprep.subr.bf16.mxu0 %v10011_v40  ;;  %v598_v49 = vld [vmem:[#allocation5 + $0x920] sm:$0xff] }
 0x13c   :  { %6180 = vmatpush2.bf16.msra.mxu1 %v9890_v63  ;;  %v722_v50 = vld [vmem:[#allocation5 + $0xd00] sm:$0xff]  ;;  %v9987_v53 = vcombine.high %v594_v48, %v598_v49  ;;  %v9986_v62 = vcombine.low %v594_v48, %v598_v49 }
 0x13d   :  { %6231 = vmatprep.subr.bf16.mxu1 %v10139_v1  ;;  %v726_v35 = vld [vmem:[#allocation5 + $0xd20] sm:$0xff] }
 0x13e   :  { %v10115_v54 = vcombine.high %v722_v50, %v726_v35  ;;  %v586_v55 = vld [vmem:[#allocation5 + $0x8c0] sm:$0xff]  ;;  %v10114_v63 = vcombine.low %v722_v50, %v726_v35 }
 0x13f   :  { %v590_v56 = vld [vmem:[#allocation5 + $0x8e0] sm:$0xff] }
 0x140   :  { %v714_v57 = vld [vmem:[#allocation5 + $0xcc0] sm:$0xff]  ;;  %v9979_v2 = vcombine.high %v586_v55, %v590_v56 }
 0x141   :  { %v718_v58 = vld [vmem:[#allocation5 + $0xce0] sm:$0xff] }
 0x142   :  { %v10107_v0 = vcombine.high %v714_v57, %v718_v58  ;;  %v578_v4 = vld [vmem:[#allocation5 + $0x880] sm:$0xff]  ;;  %v10106_v1 = vcombine.low %v714_v57, %v718_v58 }
 0x143   :  { %v706_v40 = vld [vmem:[#allocation5 + $0xc80] sm:$0xff] }
 0x144   :  { %v710_v43 = vld [vmem:[#allocation5 + $0xca0] sm:$0xff] }
 0x145   :  { %v694_v25 = vld [vmem:[#allocation5 + $0xc20] sm:$0xff] }
 0x146   :  { %v686_v31 = vld [vmem:[#allocation5 + $0xbe0] sm:$0xff] }
 0x147   :  { %v806_v48 = vld [vmem:[#allocation5 + $0xfa0] sm:$0xff] }
 0x1bd   :  { %v251_v6 = vpop.xlane.xlu0 %250 }
 0x1be   :  { %v252_v5 = vsel %vm144_vm0, %v251_v6, 0.0 }
 0x1bf   :  { %v253_v7 = vrot.slane %v252_v5, 4 }
 0x1c1   :  { %v254_v8 = vadd.f32 %v253_v7, %v252_v5  ;;  %v10099_v5 = vcombine.high %v706_v40, %v710_v43  ;;  %v570_v7 = vld [vmem:[#allocation5 + $0x840] sm:$0xff] }
 0x1c3   :  { %v255_v11 = vrot.slane %v254_v8, 2 }
 0x1c5   :  { %v256_v9 = vadd.f32 %v255_v11, %v254_v8  ;;  %v574_v8 = vld [vmem:[#allocation5 + $0x860] sm:$0xff] }
 0x1c6   :  { %v698_v11 = vld [vmem:[#allocation5 + $0xc40] sm:$0xff] }
 0x1c7   :  { %v257_v12 = vrot.slane %v256_v9, 1 }
 0x1c9   :  { %v258_v13 = vadd.f32 %v257_v12, %v256_v9  ;;  %v702_v9 = vld [vmem:[#allocation5 + $0xc60] sm:$0xff] }
 0x1cb   :  { %v260_v15 = vmul.f32 0.0001302253, %v258_v13  ;;  %v10098_v13 = vcombine.low %v706_v40, %v710_v43 }
 0x1cd   :  { %11430 = vrsqrt.f32 %v260_v15  ;;  %v9963_v15 = vcombine.high %v570_v7, %v574_v8 }
 0x1da   :  { %v11811_v16 = vpop.eup %11430 }
 0x1db   :  { %v262_v18 = vmul.f32 %v11811_v16, %v11752_v59  ;;  %v263_v19 = vmul.f32 %v11811_v16, %v11755_v60  ;;  %v11819_v14 = vmul.f32 %v11811_v16, %v11758_v61  ;;  %v11823_v21 = vmul.f32 %v11811_v16, %v11765_v3  ;;  %v742_v60 = vld [vmem:[#allocation5 + $0xda0] sm:$0xff] }
 0x1dc   :  { %v10131_v33 = vcombine.high %v738_v28, %v742_v60  ;;  %v10130_v45 = vcombine.low %v738_v28, %v742_v60  ;;  %v682_v60 = vld [vmem:[#allocation5 + $0xbc0] sm:$0xff] }
 0x1dd   :  { %v277_v22 = vcombine.high %v262_v18, %v262_v18  ;;  %v278_v23 = vcombine.high %v263_v19, %v263_v19  ;;  %v279_v27 = vcombine.high %v11819_v14, %v11819_v14  ;;  %v280_v59 = vcombine.high %v11823_v21, %v11823_v21 }
 0x1de   :  { %v11833_v30 = vpack.c.bf16 %v262_v18, %v262_v18  ;;  %v11835_v3 = vpack.c.bf16 %v263_v19, %v263_v19  ;;  %v10091_v18 = vcombine.high %v698_v11, %v702_v9  ;;  %v562_v19 = vld [vmem:[#allocation5 + $0x800] sm:$0xff]  ;;  %v10075_v37 = vcombine.high %v682_v60, %v686_v31 }
 0x1df   :  { %v11829_v29 = vpack.c.bf16 %v277_v22, %v277_v22  ;;  %v11831_v61 = vpack.c.bf16 %v278_v23, %v278_v23  ;;  %v11841_v38 = vpack.c.bf16 %v279_v27, %v279_v27  ;;  %v11843_v41 = vpack.c.bf16 %v280_v59, %v280_v59  ;;  %v566_v22 = vld [vmem:[#allocation5 + $0x820] sm:$0xff] }
 0x1e0   :  { %v690_v23 = vld [vmem:[#allocation5 + $0xc00] sm:$0xff]  ;;  %v9962_v27 = vcombine.low %v570_v7, %v574_v8  ;;  %v10090_v59 = vcombine.low %v698_v11, %v702_v9  ;;  %v9955_v20 = vcombine.high %v562_v19, %v566_v22  ;;  %v9954_v34 = vcombine.low %v562_v19, %v566_v22 }
 0x1e1   :  { %6140 = vmatprep.mubr.bf16.mxu0 %v11829_v29  ;;  %6181 = vmatprep.mubr.bf16.mxu1 %v11831_v61  ;;  %v10083_v28 = vcombine.high %v690_v23, %v694_v25  ;;  %v10082_v36 = vcombine.low %v690_v23, %v694_v25  ;;  %v10074_v49 = vcombine.low %v682_v60, %v686_v31  ;;  %v782_v7 = vld [vmem:[#allocation5 + $0xee0] sm:$0xff] }
 0x1e2   :  { %6141 = vmatmul.mubr.bf16.vlgmr.msra.gmra.mxu0 %v11833_v30  ;;  %6182 = vmatmul.mubr.bf16.vlgmr.msra.gmra.mxu1 %v11835_v3  ;;  %v774_v19 = vld [vmem:[#allocation5 + $0xea0] sm:$0xff] }
 0x1e3   :  { %6191 = vmatpush1.bf16.msra.mxu0 %v10010_v39  ;;  %6232 = vmatpush1.bf16.msra.mxu1 %v10138_v44  ;;  %v582_v39 = vld [vmem:[#allocation5 + $0x8a0] sm:$0xff]  ;;  %v9978_v44 = vcombine.low %v586_v55, %v590_v56 }
 0x1e4   :  { %6222 = vmatprep.mubr.bf16.mxu0 %v11841_v38  ;;  %6263 = vmatprep.mubr.bf16.mxu1 %v11843_v41  ;;  %v9971_v6 = vcombine.high %v578_v4, %v582_v39  ;;  %v9970_v12 = vcombine.low %v578_v4, %v582_v39  ;;  %v798_v55 = vld [vmem:[#allocation5 + $0xf60] sm:$0xff] }
 0x1e5   :  { %6192 = vmatprep.subr.bf16.mxu0 %v10003_v32  ;;  %6233 = vmatprep.subr.bf16.mxu1 %v10131_v33  ;;  %v810_v32 = vld [vmem:[#allocation5 + $0xfc0] sm:$0xff] }
 0x1e6   :  { %v814_v33 = vld [vmem:[#allocation5 + $0xfe0] sm:$0xff] }
 0x1e7   :  { %6193 = vmatpush1.bf16.msra.mxu0 %v10002_v42  ;;  %6234 = vmatpush1.bf16.msra.mxu1 %v10130_v45  ;;  %v10203_v42 = vcombine.high %v810_v32, %v814_v33  ;;  %v674_v45 = vld [vmem:[#allocation5 + $0xb80] sm:$0xff]  ;;  %v10202_v50 = vcombine.low %v810_v32, %v814_v33 }
 0x1e8   :  { %6194 = vmatprep.subr.bf16.mxu0 %v9995_v46  ;;  %6235 = vmatprep.subr.bf16.mxu1 %v10123_v47  ;;  %v678_v46 = vld [vmem:[#allocation5 + $0xba0] sm:$0xff] }
 0x1e9   :  { %v802_v47 = vld [vmem:[#allocation5 + $0xf80] sm:$0xff]  ;;  %v10067_v35 = vcombine.high %v674_v45, %v678_v46  ;;  %v10066_v56 = vcombine.low %v674_v45, %v678_v46 }
 0x1ea   :  { %v10194_v57 = vcombine.low %v802_v47, %v806_v48  ;;  %v790_v4 = vld [vmem:[#allocation5 + $0xf20] sm:$0xff] }
 0x1eb   :  { %6195 = vmatpush1.bf16.msra.mxu0 %v9994_v51  ;;  %6236 = vmatpush1.bf16.msra.mxu1 %v10122_v52  ;;  %v10195_v51 = vcombine.high %v802_v47, %v806_v48  ;;  %v666_v52 = vld [vmem:[#allocation5 + $0xb40] sm:$0xff] }
 0x1ec   :  { %6196 = vmatprep.subr.bf16.mxu0 %v9987_v53  ;;  %6237 = vmatprep.subr.bf16.mxu1 %v10115_v54  ;;  %v670_v53 = vld [vmem:[#allocation5 + $0xb60] sm:$0xff] }
 0x1ed   :  { %v794_v54 = vld [vmem:[#allocation5 + $0xf40] sm:$0xff]  ;;  %v10059_v58 = vcombine.high %v666_v52, %v670_v53  ;;  %v10058_v39 = vcombine.low %v666_v52, %v670_v53  ;;  %v11849_v53 = vmul.f32 %v11811_v16, %v11773_v10 }
 0x1ee   :  { %v10186_v40 = vcombine.low %v794_v54, %v798_v55  ;;  %v766_v60 = vld [vmem:[#allocation5 + $0xe60] sm:$0xff] }
 0x1ef   :  { %6197 = vmatpush1.bf16.msra.mxu0 %v9986_v62  ;;  %6238 = vmatpush1.bf16.msra.mxu1 %v10114_v63  ;;  %v10187_v62 = vcombine.high %v794_v54, %v798_v55  ;;  %v658_v63 = vld [vmem:[#allocation5 + $0xb00] sm:$0xff]  ;;  %v11853_v54 = vmul.f32 %v11811_v16, %v11780_v17 }
 0x1f0   :  { %6198 = vmatprep.subr.bf16.mxu0 %v9979_v2  ;;  %6239 = vmatprep.subr.bf16.mxu1 %v10107_v0  ;;  %v662_v2 = vld [vmem:[#allocation5 + $0xb20] sm:$0xff] }
 0x1f1   :  { %v786_v0 = vld [vmem:[#allocation5 + $0xf00] sm:$0xff]  ;;  %v10051_v43 = vcombine.high %v658_v63, %v662_v2  ;;  %v10050_v8 = vcombine.low %v658_v63, %v662_v2  ;;  %v282_v10 = vcombine.high %v11853_v54, %v11853_v54 }
 0x1f2   :  { %v10178_v11 = vcombine.low %v786_v0, %v790_v4  ;;  %v758_v45 = vld [vmem:[#allocation5 + $0xe20] sm:$0xff] }
 0x1f3   :  { %6199 = vmatpush1.bf16.msra.mxu0 %v9978_v44  ;;  %6240 = vmatpush1.bf16.msra.mxu1 %v10106_v1  ;;  %v10179_v44 = vcombine.high %v786_v0, %v790_v4  ;;  %v650_v1 = vld [vmem:[#allocation5 + $0xac0] sm:$0xff] }
 0x1f4   :  { %6200 = vmatprep.subr.bf16.mxu0 %v9971_v6  ;;  %6241 = vmatprep.subr.bf16.mxu1 %v10099_v5  ;;  %v654_v6 = vld [vmem:[#allocation5 + $0xae0] sm:$0xff] }
 0x1f5   :  { %v778_v5 = vld [vmem:[#allocation5 + $0xec0] sm:$0xff]  ;;  %v10043_v9 = vcombine.high %v650_v1, %v654_v6  ;;  %v10042_v22 = vcombine.low %v650_v1, %v654_v6 }
 0x1f6   :  { %v10170_v23 = vcombine.low %v778_v5, %v782_v7  ;;  %v1006_v52 = vld [vmem:[#allocation5 + $0x15e0] sm:$0xff] }
 0x1f7   :  { %6201 = vmatpush1.bf16.msra.mxu0 %v9970_v12  ;;  %6242 = vmatpush1.bf16.msra.mxu1 %v10098_v13  ;;  %v10171_v12 = vcombine.high %v778_v5, %v782_v7  ;;  %v642_v13 = vld [vmem:[#allocation5 + $0xa80] sm:$0xff] }
 0x1f8   :  { %6202 = vmatprep.subr.bf16.mxu0 %v9963_v15  ;;  %6243 = vmatprep.subr.bf16.mxu1 %v10091_v18  ;;  %v646_v15 = vld [vmem:[#allocation5 + $0xaa0] sm:$0xff] }
 0x1f9   :  { %v770_v18 = vld [vmem:[#allocation5 + $0xe80] sm:$0xff]  ;;  %v10035_v25 = vcombine.high %v642_v13, %v646_v15  ;;  %v10034_v31 = vcombine.low %v642_v13, %v646_v15 }
 0x1fa   :  { %v10162_v32 = vcombine.low %v770_v18, %v774_v19  ;;  %v866_v63 = vld [vmem:[#allocation5 + $0x1180] sm:$0xff] }
 0x1fb   :  { %6203 = vmatpush1.bf16.msra.mxu0 %v9962_v27  ;;  %6244 = vmatpush1.bf16.msra.mxu1 %v10090_v59  ;;  %v10163_v27 = vcombine.high %v770_v18, %v774_v19  ;;  %v634_v59 = vld [vmem:[#allocation5 + $0xa40] sm:$0xff] }
 0x1fc   :  { %6204 = vmatprep.subr.bf16.mxu0 %v9955_v20  ;;  %6245 = vmatprep.subr.bf16.mxu1 %v10083_v28  ;;  %v638_v20 = vld [vmem:[#allocation5 + $0xa60] sm:$0xff] }
 0x1fd   :  { %v762_v28 = vld [vmem:[#allocation5 + $0xe40] sm:$0xff]  ;;  %v10027_v33 = vcombine.high %v634_v59, %v638_v20  ;;  %v10026_v46 = vcombine.low %v634_v59, %v638_v20 }
 0x1fe   :  { %v10154_v47 = vcombine.low %v762_v28, %v766_v60  ;;  %v870_v2 = vld [vmem:[#allocation5 + $0x11a0] sm:$0xff] }
 0x1ff   :  { %6205 = vmatpush1.bf16.msra.mxu0 %v9954_v34  ;;  %6246 = vmatpush1.bf16.msra.mxu1 %v10082_v36  ;;  %v10155_v34 = vcombine.high %v762_v28, %v766_v60  ;;  %v626_v36 = vld [vmem:[#allocation5 + $0xa00] sm:$0xff]  ;;  %v10259_v1 = vcombine.high %v866_v63, %v870_v2 }
 0x200   :  { %6206 = vmatprep.subr.bf16.mxu0 %v10075_v37  ;;  %6247 = vmatprep.subr.bf16.mxu1 %v10203_v42  ;;  %v630_v37 = vld [vmem:[#allocation5 + $0xa20] sm:$0xff] }
 0x201   :  { %v754_v42 = vld [vmem:[#allocation5 + $0xe00] sm:$0xff]  ;;  %v10019_v48 = vcombine.high %v626_v36, %v630_v37  ;;  %v10018_v55 = vcombine.low %v626_v36, %v630_v37 }
 0x202   :  { %v994_v0 = vld [vmem:[#allocation5 + $0x1580] sm:$0xff] }
 0x203   :  { %6207 = vmatpush2.bf16.msra.mxu0 %v10074_v49  ;;  %6248 = vmatpush2.bf16.msra.mxu1 %v10202_v50  ;;  %v10147_v49 = vcombine.high %v754_v42, %v758_v45  ;;  %v874_v50 = vld [vmem:[#allocation5 + $0x11c0] sm:$0xff] }
 0x204   :  { %6208 = vmatprep.subr.bf16.mxu0 %v10067_v35  ;;  %6249 = vmatprep.subr.bf16.mxu1 %v10195_v51  ;;  %v878_v35 = vld [vmem:[#allocation5 + $0x11e0] sm:$0xff] }
 0x205   :  { %v1002_v51 = vld [vmem:[#allocation5 + $0x15c0] sm:$0xff]  ;;  %v10266_v17 = vcombine.low %v874_v50, %v878_v35 }
 0x206   :  { %v998_v4 = vld [vmem:[#allocation5 + $0x15a0] sm:$0xff] }
 0x207   :  { %6209 = vmatpush2.bf16.msra.mxu0 %v10066_v56  ;;  %6250 = vmatpush2.bf16.msra.mxu1 %v10194_v57  ;;  %v10146_v56 = vcombine.low %v754_v42, %v758_v45  ;;  %v10267_v57 = vcombine.high %v874_v50, %v878_v35  ;;  %v10387_v6 = vcombine.high %v994_v0, %v998_v4  ;;  %v858_v5 = vld [vmem:[#allocation5 + $0x1140] sm:$0xff] }
 0x208   :  { %6210 = vmatprep.subr.bf16.mxu0 %v10059_v58  ;;  %6251 = vmatprep.subr.bf16.mxu1 %v10187_v62  ;;  %v10395_v58 = vcombine.high %v1002_v51, %v1006_v52  ;;  %v281_v62 = vcombine.high %v11849_v53, %v11849_v53  ;;  %v862_v7 = vld [vmem:[#allocation5 + $0x1160] sm:$0xff] }
 0x209   :  { %v850_v15 = vld [vmem:[#allocation5 + $0x1100] sm:$0xff] }
 0x20a   :  { %v854_v18 = vld [vmem:[#allocation5 + $0x1120] sm:$0xff] }
 0x20b   :  { %6211 = vmatpush2.bf16.msra.mxu0 %v10058_v39  ;;  %6252 = vmatpush2.bf16.msra.mxu1 %v10186_v40  ;;  %v11861_v39 = vpack.c.bf16 %v11819_v14, %v11819_v14  ;;  %v11865_v40 = vpack.c.bf16 %v11823_v21, %v11823_v21  ;;  %v986_v14 = vld [vmem:[#allocation5 + $0x1540] sm:$0xff]  ;;  %v10258_v21 = vcombine.low %v866_v63, %v870_v2 }
 0x20c   :  { %6212 = vmatprep.subr.bf16.mxu0 %v10051_v43  ;;  %6253 = vmatprep.subr.bf16.mxu1 %v10179_v44  ;;  %v10394_v43 = vcombine.low %v1002_v51, %v1006_v52  ;;  %v11867_v44 = vpack.c.bf16 %v281_v62, %v281_v62  ;;  %v978_v19 = vld [vmem:[#allocation5 + $0x1500] sm:$0xff] }
 0x20d   :  { %v842_v20 = vld [vmem:[#allocation5 + $0x10c0] sm:$0xff] }
 0x20e   :  { %v846_v28 = vld [vmem:[#allocation5 + $0x10e0] sm:$0xff] }
 0x20f   :  { %6213 = vmatpush2.bf16.msra.mxu0 %v10050_v8  ;;  %6254 = vmatpush2.bf16.msra.mxu1 %v10178_v11  ;;  %v11871_v8 = vpack.c.bf16 %v282_v10, %v282_v10  ;;  %v990_v11 = vld [vmem:[#allocation5 + $0x1560] sm:$0xff] }
 0x210   :  { %6214 = vmatprep.subr.bf16.mxu0 %v10043_v9  ;;  %6255 = vmatprep.subr.bf16.mxu1 %v10171_v12  ;;  %v10386_v9 = vcombine.low %v994_v0, %v998_v4  ;;  %v10251_v12 = vcombine.high %v858_v5, %v862_v7  ;;  %v10379_v13 = vcombine.high %v986_v14, %v990_v11  ;;  %v970_v60 = vld [vmem:[#allocation5 + $0x14c0] sm:$0xff] }
 0x211   :  { %v834_v37 = vld [vmem:[#allocation5 + $0x1080] sm:$0xff] }
 0x212   :  { %v838_v42 = vld [vmem:[#allocation5 + $0x10a0] sm:$0xff] }
 0x213   :  { %6215 = vmatpush2.bf16.msra.mxu0 %v10042_v22  ;;  %6256 = vmatpush2.bf16.msra.mxu1 %v10170_v23  ;;  %v982_v22 = vld [vmem:[#allocation5 + $0x1520] sm:$0xff]  ;;  %v10250_v23 = vcombine.low %v858_v5, %v862_v7 }
 0x214   :  { %6216 = vmatprep.subr.bf16.mxu0 %v10035_v25  ;;  %6257 = vmatprep.subr.bf16.mxu1 %v10163_v27  ;;  %v10378_v25 = vcombine.low %v986_v14, %v990_v11  ;;  %v10243_v27 = vcombine.high %v850_v15, %v854_v18  ;;  %v10371_v59 = vcombine.high %v978_v19, %v982_v22  ;;  %v962_v45 = vld [vmem:[#allocation5 + $0x1480] sm:$0xff] }
 0x215   :  { %v826_v35 = vld [vmem:[#allocation5 + $0x1040] sm:$0xff] }
 0x216   :  { %v830_v51 = vld [vmem:[#allocation5 + $0x1060] sm:$0xff] }
 0x217   :  { %6217 = vmatpush2.bf16.msra.mxu0 %v10034_v31  ;;  %6258 = vmatpush2.bf16.msra.mxu1 %v10162_v32  ;;  %v974_v31 = vld [vmem:[#allocation5 + $0x14e0] sm:$0xff]  ;;  %v10242_v32 = vcombine.low %v850_v15, %v854_v18  ;;  %v10218_v4 = vcombine.low %v826_v35, %v830_v51 }
 0x218   :  { %6218 = vmatprep.subr.bf16.mxu0 %v10027_v33  ;;  %6259 = vmatprep.subr.bf16.mxu1 %v10155_v34  ;;  %v10370_v33 = vcombine.low %v978_v19, %v982_v22  ;;  %v10235_v34 = vcombine.high %v842_v20, %v846_v28  ;;  %v10363_v36 = vcombine.high %v970_v60, %v974_v31  ;;  %v954_v52 = vld [vmem:[#allocation5 + $0x1440] sm:$0xff] }
 0x219   :  { %v818_v63 = vld [vmem:[#allocation5 + $0x1000] sm:$0xff] }
 0x21a   :  { %v822_v10 = vld [vmem:[#allocation5 + $0x1020] sm:$0xff] }
 0x21b   :  { %6219 = vmatpush2.bf16.msra.mxu0 %v10026_v46  ;;  %6260 = vmatpush2.bf16.msra.mxu1 %v10154_v47  ;;  %v966_v46 = vld [vmem:[#allocation5 + $0x14a0] sm:$0xff]  ;;  %v10234_v47 = vcombine.low %v842_v20, %v846_v28  ;;  %v10210_v11 = vcombine.low %v818_v63, %v822_v10 }
 0x21c   :  { %6220 = vmatprep.subr.bf16.mxu0 %v10019_v48  ;;  %6261 = vmatprep.subr.bf16.mxu1 %v10147_v49  ;;  %v10362_v48 = vcombine.low %v970_v60, %v974_v31  ;;  %v10227_v49 = vcombine.high %v834_v37, %v838_v42  ;;  %v10355_v50 = vcombine.high %v962_v45, %v966_v46  ;;  %v946_v2 = vld [vmem:[#allocation5 + $0x1400] sm:$0xff] }
 0x21d   :  { %v950_v0 = vld [vmem:[#allocation5 + $0x1420] sm:$0xff] }
 0x21e   :  { %v942_v5 = vld [vmem:[#allocation5 + $0x13e0] sm:$0xff] }
 0x21f   :  { %6221 = vmatpush2.bf16.msra.mxu0 %v10018_v55  ;;  %6262 = vmatpush2.bf16.msra.mxu1 %v10146_v56  ;;  %v958_v55 = vld [vmem:[#allocation5 + $0x1460] sm:$0xff]  ;;  %v10226_v56 = vcombine.low %v834_v37, %v838_v42 }
 0x220   :  { %6272 = vmatprep.subr.bf16.mxu0 %v10267_v57  ;;  %6313 = vmatprep.subr.bf16.mxu1 %v10395_v58  ;;  %v10354_v57 = vcombine.low %v962_v45, %v966_v46  ;;  %v10219_v58 = vcombine.high %v826_v35, %v830_v51  ;;  %v10347_v62 = vcombine.high %v954_v52, %v958_v55  ;;  %v1066_v7 = vld [vmem:[#allocation5 + $0x17c0] sm:$0xff] }
 0x221   :  { %v1070_v14 = vld [vmem:[#allocation5 + $0x17e0] sm:$0xff] }
 0x222   :  { %6223 = vmatmul.mubr.bf16.vlgmr.msra.gmra.mxu0 %v11861_v39  ;;  %6264 = vmatmul.mubr.bf16.vlgmr.msra.gmra.mxu1 %v11865_v40  ;;  %v934_v15 = vld [vmem:[#allocation5 + $0x13a0] sm:$0xff] }
 0x223   :  { %6273 = vmatpush1.bf16.msra.mxu0 %v10266_v17  ;;  %6304 = vmatprep.mubr.bf16.mxu0 %v11867_v44  ;;  %v10346_v17 = vcombine.low %v954_v52, %v958_v55  ;;  %v1058_v18 = vld [vmem:[#allocation5 + $0x1780] sm:$0xff] }
 0x224   :  { %6314 = vmatpush1.bf16.msra.mxu1 %v10394_v43  ;;  %6345 = vmatprep.mubr.bf16.mxu1 %v11871_v8  ;;  %v10211_v43 = vcombine.high %v818_v63, %v822_v10  ;;  %v1062_v19 = vld [vmem:[#allocation5 + $0x17a0] sm:$0xff] }
 0x225   :  { %6274 = vmatprep.subr.bf16.mxu0 %v10259_v1  ;;  %6315 = vmatprep.subr.bf16.mxu1 %v10387_v6  ;;  %v10339_v1 = vcombine.high %v946_v2, %v950_v0  ;;  %v938_v6 = vld [vmem:[#allocation5 + $0x13c0] sm:$0xff] }
 0x226   :  { %v10330_v22 = vcombine.low %v938_v6, %v942_v5  ;;  %v926_v20 = vld [vmem:[#allocation5 + $0x1360] sm:$0xff] }
 0x227   :  { %6275 = vmatpush1.bf16.msra.mxu0 %v10258_v21  ;;  %v10338_v21 = vcombine.low %v946_v2, %v950_v0  ;;  %v1050_v28 = vld [vmem:[#allocation5 + $0x1740] sm:$0xff] }
 0x228   :  { %6316 = vmatpush1.bf16.msra.mxu1 %v10386_v9  ;;  %6276 = vmatprep.subr.bf16.mxu0 %v10251_v12  ;;  %v10331_v9 = vcombine.high %v938_v6, %v942_v5  ;;  %v10459_v12 = vcombine.high %v1066_v7, %v1070_v14  ;;  %v1054_v60 = vld [vmem:[#allocation5 + $0x1760] sm:$0xff] }
 0x229   :  { %6317 = vmatprep.subr.bf16.mxu1 %v10379_v13  ;;  %v930_v13 = vld [vmem:[#allocation5 + $0x1380] sm:$0xff] }
 0x22a   :  { %v10322_v31 = vcombine.low %v930_v13, %v934_v15  ;;  %v918_v37 = vld [vmem:[#allocation5 + $0x1320] sm:$0xff] }
 0x22b   :  { %6277 = vmatpush1.bf16.msra.mxu0 %v10250_v23  ;;  %v10458_v23 = vcombine.low %v1066_v7, %v1070_v14  ;;  %v1042_v42 = vld [vmem:[#allocation5 + $0x1700] sm:$0xff] }
 0x22c   :  { %6318 = vmatpush1.bf16.msra.mxu1 %v10378_v25  ;;  %6278 = vmatprep.subr.bf16.mxu0 %v10243_v27  ;;  %v10323_v25 = vcombine.high %v930_v13, %v934_v15  ;;  %v10451_v27 = vcombine.high %v1058_v18, %v1062_v19  ;;  %v1046_v45 = vld [vmem:[#allocation5 + $0x1720] sm:$0xff] }
 0x22d   :  { %6319 = vmatprep.subr.bf16.mxu1 %v10371_v59  ;;  %v922_v59 = vld [vmem:[#allocation5 + $0x1340] sm:$0xff] }
 0x22e   :  { %v10314_v46 = vcombine.low %v922_v59, %v926_v20  ;;  %v910_v35 = vld [vmem:[#allocation5 + $0x12e0] sm:$0xff] }
 0x22f   :  { %6279 = vmatpush1.bf16.msra.mxu0 %v10242_v32  ;;  %v10450_v32 = vcombine.low %v1058_v18, %v1062_v19  ;;  %v1034_v51 = vld [vmem:[#allocation5 + $0x16c0] sm:$0xff] }
 0x230   :  { %6320 = vmatpush1.bf16.msra.mxu1 %v10370_v33  ;;  %6280 = vmatprep.subr.bf16.mxu0 %v10235_v34  ;;  %v10315_v33 = vcombine.high %v922_v59, %v926_v20  ;;  %v10443_v34 = vcombine.high %v1050_v28, %v1054_v60  ;;  %v1038_v52 = vld [vmem:[#allocation5 + $0x16e0] sm:$0xff] }
 0x231   :  { %6321 = vmatprep.subr.bf16.mxu1 %v10363_v36  ;;  %v914_v36 = vld [vmem:[#allocation5 + $0x1300] sm:$0xff] }
 0x232   :  { %v10306_v55 = vcombine.low %v914_v36, %v918_v37  ;;  %v902_v63 = vld [vmem:[#allocation5 + $0x12a0] sm:$0xff] }
 0x233   :  { %6281 = vmatpush1.bf16.msra.mxu0 %v10234_v47  ;;  %v10442_v47 = vcombine.low %v1050_v28, %v1054_v60  ;;  %v1026_v10 = vld [vmem:[#allocation5 + $0x1680] sm:$0xff]  ;;  %v11877_v60 = vmul.f32 %v11811_v16, %v11787_v24  ;;  %v11883_v24 = vpack.c.bf16 %v11849_v53, %v11849_v53 }
 0x234   :  { %6322 = vmatpush1.bf16.msra.mxu1 %v10362_v48  ;;  %6282 = vmatprep.subr.bf16.mxu0 %v10227_v49  ;;  %v10307_v48 = vcombine.high %v914_v36, %v918_v37  ;;  %v10435_v49 = vcombine.high %v1042_v42, %v1046_v45  ;;  %v1030_v2 = vld [vmem:[#allocation5 + $0x16a0] sm:$0xff] }
 0x235   :  { %6323 = vmatprep.subr.bf16.mxu1 %v10355_v50  ;;  %v906_v50 = vld [vmem:[#allocation5 + $0x12c0] sm:$0xff]  ;;  %v283_v37 = vcombine.high %v11877_v60, %v11877_v60 }
 0x236   :  { %v10298_v0 = vcombine.low %v906_v50, %v910_v35  ;;  %v894_v6 = vld [vmem:[#allocation5 + $0x1260] sm:$0xff] }
 0x237   :  { %6283 = vmatpush1.bf16.msra.mxu0 %v10226_v56  ;;  %v10434_v56 = vcombine.low %v1042_v42, %v1046_v45  ;;  %v1018_v5 = vld [vmem:[#allocation5 + $0x1640] sm:$0xff] }
 0x238   :  { %6324 = vmatpush1.bf16.msra.mxu1 %v10354_v57  ;;  %6284 = vmatprep.subr.bf16.mxu0 %v10219_v58  ;;  %v10299_v57 = vcombine.high %v906_v50, %v910_v35  ;;  %v10427_v58 = vcombine.high %v1034_v51, %v1038_v52  ;;  %v1022_v7 = vld [vmem:[#allocation5 + $0x1660] sm:$0xff] }
 0x239   :  { %6325 = vmatprep.subr.bf16.mxu1 %v10347_v62  ;;  %v898_v62 = vld [vmem:[#allocation5 + $0x1280] sm:$0xff] }
 0x23a   :  { %v10290_v14 = vcombine.low %v898_v62, %v902_v63  ;;  %v886_v13 = vld [vmem:[#allocation5 + $0x1220] sm:$0xff] }
 0x23b   :  { %6285 = vmatpush1.bf16.msra.mxu0 %v10218_v4  ;;  %v10426_v4 = vcombine.low %v1034_v51, %v1038_v52  ;;  %v1010_v15 = vld [vmem:[#allocation5 + $0x1600] sm:$0xff] }
 0x23c   :  { %6326 = vmatpush1.bf16.msra.mxu1 %v10346_v17  ;;  %6286 = vmatprep.subr.bf16.mxu0 %v10211_v43  ;;  %v10291_v17 = vcombine.high %v898_v62, %v902_v63  ;;  %v10419_v43 = vcombine.high %v1026_v10, %v1030_v2  ;;  %v1014_v18 = vld [vmem:[#allocation5 + $0x1620] sm:$0xff] }
 0x23d   :  { %6327 = vmatprep.subr.bf16.mxu1 %v10339_v1  ;;  %v890_v1 = vld [vmem:[#allocation5 + $0x1240] sm:$0xff] }
 0x23e   :  { %v10282_v19 = vcombine.low %v890_v1, %v894_v6  ;;  %v1134_v59 = vld [vmem:[#allocation5 + $0x19e0] sm:$0xff] }
 0x23f   :  { %6287 = vmatpush1.bf16.msra.mxu0 %v10210_v11  ;;  %v10418_v11 = vcombine.low %v1026_v10, %v1030_v2  ;;  %v1258_v20 = vld [vmem:[#allocation5 + $0x1dc0] sm:$0xff] }
 0x240   :  { %6328 = vmatpush1.bf16.msra.mxu1 %v10338_v21  ;;  %6288 = vmatprep.subr.bf16.mxu0 %v10331_v9  ;;  %v10283_v21 = vcombine.high %v890_v1, %v894_v6  ;;  %v10411_v9 = vcombine.high %v1018_v5, %v1022_v7  ;;  %v1262_v28 = vld [vmem:[#allocation5 + $0x1de0] sm:$0xff] }
 0x241   :  { %6329 = vmatprep.subr.bf16.mxu1 %v10459_v12  ;;  %v882_v12 = vld [vmem:[#allocation5 + $0x1200] sm:$0xff] }
 0x242   :  { %v1122_v36 = vld [vmem:[#allocation5 + $0x1980] sm:$0xff] }
 0x243   :  { %6289 = vmatpush2.bf16.msra.mxu0 %v10330_v22  ;;  %v10410_v22 = vcombine.low %v1018_v5, %v1022_v7  ;;  %v1126_v42 = vld [vmem:[#allocation5 + $0x19a0] sm:$0xff] }
 0x244   :  { %6330 = vmatpush2.bf16.msra.mxu1 %v10458_v23  ;;  %6290 = vmatprep.subr.bf16.mxu0 %v10323_v25  ;;  %v10275_v23 = vcombine.high %v882_v12, %v886_v13  ;;  %v10403_v25 = vcombine.high %v1010_v15, %v1014_v18  ;;  %v1250_v45 = vld [vmem:[#allocation5 + $0x1d80] sm:$0xff]  ;;  %v10515_v50 = vcombine.high %v1122_v36, %v1126_v42 }
 0x245   :  { %6331 = vmatprep.subr.bf16.mxu1 %v10451_v27  ;;  %v1130_v27 = vld [vmem:[#allocation5 + $0x19c0] sm:$0xff]  ;;  %v10514_v53 = vcombine.low %v1122_v36, %v1126_v42 }
 0x246   :  { %v1114_v51 = vld [vmem:[#allocation5 + $0x1940] sm:$0xff] }
 0x247   :  { %6291 = vmatpush2.bf16.msra.mxu0 %v10322_v31  ;;  %v10274_v31 = vcombine.low %v882_v12, %v886_v13  ;;  %v1118_v52 = vld [vmem:[#allocation5 + $0x1960] sm:$0xff] }
 0x248   :  { %6332 = vmatpush2.bf16.msra.mxu1 %v10450_v32  ;;  %6292 = vmatprep.subr.bf16.mxu0 %v10315_v33  ;;  %v10402_v32 = vcombine.low %v1010_v15, %v1014_v18  ;;  %v10523_v33 = vcombine.high %v1130_v27, %v1134_v59  ;;  %v1106_v63 = vld [vmem:[#allocation5 + $0x1900] sm:$0xff] }
 0x249   :  { %6333 = vmatprep.subr.bf16.mxu1 %v10443_v34  ;;  %v10651_v34 = vcombine.high %v1258_v20, %v1262_v28  ;;  %v1110_v10 = vld [vmem:[#allocation5 + $0x1920] sm:$0xff] }
 0x24a   :  { %v1234_v2 = vld [vmem:[#allocation5 + $0x1d00] sm:$0xff]  ;;  %v10499_v1 = vcombine.high %v1106_v63, %v1110_v10 }
 0x24b   :  { %6293 = vmatpush2.bf16.msra.mxu0 %v10314_v46  ;;  %v1254_v46 = vld [vmem:[#allocation5 + $0x1da0] sm:$0xff] }
 0x24c   :  { %6334 = vmatpush2.bf16.msra.mxu1 %v10442_v47  ;;  %6294 = vmatprep.subr.bf16.mxu0 %v10307_v48  ;;  %v10522_v47 = vcombine.low %v1130_v27, %v1134_v59  ;;  %v10650_v48 = vcombine.low %v1258_v20, %v1262_v28  ;;  %v10643_v35 = vcombine.high %v1250_v45, %v1254_v46  ;;  %v1098_v5 = vld [vmem:[#allocation5 + $0x18c0] sm:$0xff] }
 0x24d   :  { %6335 = vmatprep.subr.bf16.mxu1 %v10435_v49  ;;  %v11887_v49 = vpack.c.bf16 %v11853_v54, %v11853_v54  ;;  %v10642_v54 = vcombine.low %v1250_v45, %v1254_v46  ;;  %v1102_v7 = vld [vmem:[#allocation5 + $0x18e0] sm:$0xff] }
 0x24e   :  { %v10491_v12 = vcombine.high %v1098_v5, %v1102_v7  ;;  %v1090_v15 = vld [vmem:[#allocation5 + $0x1880] sm:$0xff] }
 0x24f   :  { %6295 = vmatpush2.bf16.msra.mxu0 %v10306_v55  ;;  %v11890_v55 = vpack.c.bf16 %v283_v37, %v283_v37  ;;  %v1094_v18 = vld [vmem:[#allocation5 + $0x18a0] sm:$0xff] }
 0x250   :  { %6336 = vmatpush2.bf16.msra.mxu1 %v10434_v56  ;;  %6296 = vmatprep.subr.bf16.mxu0 %v10299_v57  ;;  %v1242_v56 = vld [vmem:[#allocation5 + $0x1d40] sm:$0xff]  ;;  %v10483_v27 = vcombine.high %v1090_v15, %v1094_v18 }
 0x251   :  { %6337 = vmatprep.subr.bf16.mxu1 %v10427_v58  ;;  %v1246_v57 = vld [vmem:[#allocation5 + $0x1d60] sm:$0xff]  ;;  %v10507_v58 = vcombine.high %v1114_v51, %v1118_v52 }
 0x252   :  { %v10635_v62 = vcombine.high %v1242_v56, %v1246_v57  ;;  %v1082_v20 = vld [vmem:[#allocation5 + $0x1840] sm:$0xff] }
 0x253   :  { %6297 = vmatpush2.bf16.msra.mxu0 %v10298_v0  ;;  %v1238_v0 = vld [vmem:[#allocation5 + $0x1d20] sm:$0xff] }
 0x254   :  { %6338 = vmatpush2.bf16.msra.mxu1 %v10426_v4  ;;  %6298 = vmatprep.subr.bf16.mxu0 %v10291_v17  ;;  %v11622_v4 = vmov 0   ;;  %v10506_v17 = vcombine.low %v1114_v51, %v1118_v52  ;;  %v10627_v6 = vcombine.high %v1234_v2, %v1238_v0  ;;  %v1086_v28 = vld [vmem:[#allocation5 + $0x1860] sm:$0xff] }
 0x255   :  { %6339 = vmatprep.subr.bf16.mxu1 %v10419_v43  ;;  %v10634_v43 = vcombine.low %v1242_v56, %v1246_v57  ;;  %v10475_v36 = vcombine.high %v1082_v20, %v1086_v28  ;;  %v1074_v42 = vld [vmem:[#allocation5 + $0x1800] sm:$0xff]  ;;  %v363_v57 = vld [vmem:[#allocation5 + $0x1c8] sm:$0xff] }
 0x256   :  { %v1078_v45 = vld [vmem:[#allocation5 + $0x1820] sm:$0xff] }
 0x257   :  { %6299 = vmatpush2.bf16.msra.mxu0 %v10290_v14  ;;  %v1226_v14 = vld [vmem:[#allocation5 + $0x1cc0] sm:$0xff] }
 0x258   :  { %6340 = vmatpush2.bf16.msra.mxu1 %v10418_v11  ;;  %6300 = vmatprep.subr.bf16.mxu0 %v10283_v21  ;;  %v1230_v11 = vld [vmem:[#allocation5 + $0x1ce0] sm:$0xff]  ;;  %v10498_v21 = vcombine.low %v1106_v63, %v1110_v10  ;;  %v269_v63 = vmul.f32 %v11811_v16, %v11797_v26 }
 0x259   :  { %6341 = vmatprep.subr.bf16.mxu1 %v10411_v9  ;;  %v10626_v9 = vcombine.low %v1234_v2, %v1238_v0  ;;  %v10619_v13 = vcombine.high %v1226_v14, %v1230_v11  ;;  %v1202_v46 = vld [vmem:[#allocation5 + $0x1c00] sm:$0xff] }
 0x25a   :  { %v1194_v52 = vld [vmem:[#allocation5 + $0x1bc0] sm:$0xff] }
 0x25b   :  { %6301 = vmatpush2.bf16.msra.mxu0 %v10282_v19  ;;  %v1218_v19 = vld [vmem:[#allocation5 + $0x1c80] sm:$0xff] }
 0x25c   :  { %6342 = vmatpush2.bf16.msra.mxu1 %v10410_v22  ;;  %6302 = vmatprep.subr.bf16.mxu0 %v10275_v23  ;;  %v1222_v22 = vld [vmem:[#allocation5 + $0x1ca0] sm:$0xff]  ;;  %v10490_v23 = vcombine.low %v1098_v5, %v1102_v7  ;;  %v11897_v5 = vpack.c.bf16 %v269_v63, %v269_v63 }
 0x25d   :  { %6343 = vmatprep.subr.bf16.mxu1 %v10403_v25  ;;  %v10618_v25 = vcombine.low %v1226_v14, %v1230_v11  ;;  %v10611_v59 = vcombine.high %v1218_v19, %v1222_v22  ;;  %v1198_v56 = vld [vmem:[#allocation5 + $0x1be0] sm:$0xff] }
 0x25e   :  { %v1186_v2 = vld [vmem:[#allocation5 + $0x1b80] sm:$0xff] }
 0x25f   :  { %6303 = vmatpush2.bf16.msra.mxu0 %v10274_v31  ;;  %v1210_v31 = vld [vmem:[#allocation5 + $0x1c40] sm:$0xff] }
 0x260   :  { %6344 = vmatpush2.bf16.msra.mxu1 %v10402_v32  ;;  %6354 = vmatprep.subr.bf16.mxu0 %v10523_v33  ;;  %v1214_v32 = vld [vmem:[#allocation5 + $0x1c60] sm:$0xff]  ;;  %v10482_v33 = vcombine.low %v1090_v15, %v1094_v18 }
 0x261   :  { %6395 = vmatprep.subr.bf16.mxu1 %v10651_v34  ;;  %v10610_v34 = vcombine.low %v1218_v19, %v1222_v22  ;;  %v10603_v37 = vcombine.high %v1210_v31, %v1214_v32  ;;  %v1190_v0 = vld [vmem:[#allocation5 + $0x1ba0] sm:$0xff]  ;;  %v339_v22 = vld [vmem:[#allocation5 + $0x108] sm:$0xff] }
 0x262   :  { %6305 = vmatmul.mubr.bf16.vlgmr.msra.gmra.mxu0 %v11883_v24  ;;  %v10579_v7 = vcombine.high %v1186_v2, %v1190_v0  ;;  %v1178_v11 = vld [vmem:[#allocation5 + $0x1b40] sm:$0xff]  ;;  %v10578_v26 = vcombine.low %v1186_v2, %v1190_v0 }
 0x263   :  { %6346 = vmatmul.mubr.bf16.vlgmr.msra.gmra.mxu1 %v11887_v49  ;;  %6355 = vmatpush1.bf16.msra.mxu0 %v10522_v47  ;;  %v1206_v47 = vld [vmem:[#allocation5 + $0x1c20] sm:$0xff] }
 0x264   :  { %6386 = vmatprep.mubr.bf16.mxu0 %v11890_v55  ;;  %6396 = vmatpush1.bf16.msra.mxu1 %v10650_v48  ;;  %v10474_v48 = vcombine.low %v1082_v20, %v1086_v28  ;;  %v10595_v51 = vcombine.high %v1202_v46, %v1206_v47  ;;  %v1170_v18 = vld [vmem:[#allocation5 + $0x1b00] sm:$0xff] }
 0x265   :  { %6356 = vmatprep.subr.bf16.mxu0 %v10515_v50  ;;  %6397 = vmatprep.subr.bf16.mxu1 %v10643_v35  ;;  %v10602_v50 = vcombine.low %v1210_v31, %v1214_v32  ;;  %v10467_v35 = vcombine.high %v1074_v42, %v1078_v45  ;;  %v1174_v19 = vld [vmem:[#allocation5 + $0x1b20] sm:$0xff]  ;;  %v331_v32 = vld [vmem:[#allocation5 + $0xc8] sm:$0xff] }
 0x266   :  { %6427 = vmatprep.mubr.bf16.mxu1 %v11622_v4  ;;  %v1162_v28 = vld [vmem:[#allocation5 + $0x1ac0] sm:$0xff] }
 0x267   :  { %6357 = vmatpush1.bf16.msra.mxu0 %v10514_v53  ;;  %v367_v53 = vld [vmem:[#allocation5 + $0x1e8] sm:$0xff]  ;;  %v1166_v31 = vld [vmem:[#allocation5 + $0x1ae0] sm:$0xff] }
 0x268   :  { %6398 = vmatpush1.bf16.msra.mxu1 %v10642_v54  ;;  %6358 = vmatprep.subr.bf16.mxu0 %v10507_v58  ;;  %v10466_v54 = vcombine.low %v1074_v42, %v1078_v45  ;;  %v10594_v58 = vcombine.low %v1202_v46, %v1206_v47  ;;  %v9757_v10 = vcombine.high %v363_v57, %v367_v53  ;;  %v1154_v45 = vld [vmem:[#allocation5 + $0x1a80] sm:$0xff]  ;;  %v323_v47 = vld [vmem:[#allocation5 + $0x88] sm:$0xff] }
 0x269   :  { %6399 = vmatprep.subr.bf16.mxu1 %v10635_v62  ;;  %v10587_v62 = vcombine.high %v1194_v52, %v1198_v56  ;;  %v1158_v46 = vld [vmem:[#allocation5 + $0x1aa0] sm:$0xff] }
 0x26a   :  { %v1138_v0 = vld [vmem:[#allocation5 + $0x1a00] sm:$0xff] }
 0x26b   :  { %6359 = vmatpush1.bf16.msra.mxu0 %v10506_v17  ;;  %v355_v17 = vld [vmem:[#allocation5 + $0x188] sm:$0xff] }
 0x26c   :  { %6400 = vmatpush1.bf16.msra.mxu1 %v10634_v43  ;;  %6360 = vmatprep.subr.bf16.mxu0 %v10499_v1  ;;  %v359_v43 = vld [vmem:[#allocation5 + $0x1a8] sm:$0xff]  ;;  %v10586_v1 = vcombine.low %v1194_v52, %v1198_v56  ;;  %v1146_v56 = vld [vmem:[#allocation5 + $0x1a40] sm:$0xff] }
 0x26d   :  { %6401 = vmatprep.subr.bf16.mxu1 %v10627_v6  ;;  %v9756_v6 = vcombine.low %v363_v57, %v367_v53  ;;  %v9749_v14 = vcombine.high %v355_v17, %v359_v43  ;;  %v9748_v16 = vcombine.low %v355_v17, %v359_v43  ;;  %v1150_v57 = vld [vmem:[#allocation5 + $0x1a60] sm:$0xff]  ;;  %v315_v53 = vld [vmem:[#allocation5 + $0x48] sm:$0xff] }
 0x26e   :  { %v1142_v17 = vld [vmem:[#allocation5 + $0x1a20] sm:$0xff]  ;;  %v307_v43 = vld [vmem:[#allocation5 + $0x8] sm:$0xff] }
 0x26f   :  { %6361 = vmatpush1.bf16.msra.mxu0 %v10498_v21  ;;  %v1182_v21 = vld [vmem:[#allocation5 + $0x1b60] sm:$0xff] }
 0x270   :  { %6402 = vmatpush1.bf16.msra.mxu1 %v10626_v9  ;;  %6362 = vmatprep.subr.bf16.mxu0 %v10491_v12  ;;  %v347_v9 = vld [vmem:[#allocation5 + $0x148] sm:$0xff] }
 0x271   :  { %6403 = vmatprep.subr.bf16.mxu1 %v10619_v13  ;;  %v351_v12 = vld [vmem:[#allocation5 + $0x168] sm:$0xff]  ;;  %v10571_v13 = vcombine.high %v1178_v11, %v1182_v21 }
 0x272   :  { %v9741_v15 = vcombine.high %v347_v9, %v351_v12 }
 0x273   :  { %6363 = vmatpush1.bf16.msra.mxu0 %v10490_v23  ;;  %v343_v23 = vld [vmem:[#allocation5 + $0x128] sm:$0xff] }
 0x274   :  { %6404 = vmatpush1.bf16.msra.mxu1 %v10618_v25  ;;  %6364 = vmatprep.subr.bf16.mxu0 %v10483_v27  ;;  %v10570_v25 = vcombine.low %v1178_v11, %v1182_v21  ;;  %v9740_v27 = vcombine.low %v347_v9, %v351_v12  ;;  %v9733_v20 = vcombine.high %v339_v22, %v343_v23  ;;  %v491_v9 = vld [vmem:[#allocation5 + $0x5c8] sm:$0xff] }
 0x275   :  { %6405 = vmatprep.subr.bf16.mxu1 %v10611_v59  ;;  %v10563_v59 = vcombine.high %v1170_v18, %v1174_v19  ;;  %v10531_v11 = vcombine.high %v1138_v0, %v1142_v17  ;;  %v495_v12 = vld [vmem:[#allocation5 + $0x5e8] sm:$0xff] }
 0x277   :  { %6365 = vmatpush1.bf16.msra.mxu0 %v10482_v33  ;;  %v335_v33 = vld [vmem:[#allocation5 + $0xe8] sm:$0xff] }
 0x278   :  { %6406 = vmatpush1.bf16.msra.mxu1 %v10610_v34  ;;  %6366 = vmatprep.subr.bf16.mxu0 %v10475_v36  ;;  %v10562_v34 = vcombine.low %v1170_v18, %v1174_v19  ;;  %v9732_v36 = vcombine.low %v339_v22, %v343_v23  ;;  %v9725_v42 = vcombine.high %v331_v32, %v335_v33  ;;  %v1266_v22 = vld [vmem:[#allocation7] sm:$0xff] }
 0x279   :  { %6407 = vmatprep.subr.bf16.mxu1 %v10603_v37  ;;  %v10555_v37 = vcombine.high %v1162_v28, %v1166_v31  ;;  %v9885_v19 = vcombine.high %v491_v9, %v495_v12 }
 0x27b   :  { %6367 = vmatpush1.bf16.msra.mxu0 %v10474_v48  ;;  %v327_v48 = vld [vmem:[#allocation5 + $0xa8] sm:$0xff] }
 0x27c   :  { %6408 = vmatpush1.bf16.msra.mxu1 %v10602_v50  ;;  %6368 = vmatprep.subr.bf16.mxu0 %v10467_v35  ;;  %v10554_v50 = vcombine.low %v1162_v28, %v1166_v31  ;;  %v9724_v35 = vcombine.low %v331_v32, %v335_v33  ;;  %v9717_v52 = vcombine.high %v323_v47, %v327_v48  ;;  %v423_v28 = vld [vmem:[#allocation5 + $0x3a8] sm:$0xff] }
 0x27d   :  { %6409 = vmatprep.subr.bf16.mxu1 %v10595_v51  ;;  %v10547_v51 = vcombine.high %v1154_v45, %v1158_v46  ;;  %v9716_v63 = vcombine.low %v323_v47, %v327_v48  ;;  %v9884_v31 = vcombine.low %v491_v9, %v495_v12  ;;  %v11909_v33 = vpack.c.bf16 %v11877_v60, %v11877_v60 }
 0x27f   :  { %6369 = vmatpush1.bf16.msra.mxu0 %v10466_v54  ;;  %v319_v54 = vld [vmem:[#allocation5 + $0x68] sm:$0xff] }
 0x280   :  { %6410 = vmatpush1.bf16.msra.mxu1 %v10594_v58  ;;  %6370 = vmatprep.subr.bf16.mxu0 %v10587_v62  ;;  %v10546_v58 = vcombine.low %v1154_v45, %v1158_v46  ;;  %v1268_v62 = vlaneseq  ;;  %v9709_v2 = vcombine.high %v315_v53, %v319_v54  ;;  %v475_v45 = vld [vmem:[#allocation5 + $0x548] sm:$0xff] }
 0x281   :  { %6436 = vmatprep.subr.bf16.mxu1 %v9757_v10  ;;  %v10539_v10 = vcombine.high %v1146_v56, %v1150_v57  ;;  %v479_v46 = vld [vmem:[#allocation5 + $0x568] sm:$0xff] }
 0x283   :  { %6428 = vmatmul.mubr.bf16.vlgmr.msra.gmra.mxu1 %v11897_v5  ;;  %6371 = vmatpush2.bf16.msra.mxu0 %v10586_v1  ;;  %v311_v1 = vld [vmem:[#allocation5 + $0x28] sm:$0xff] }
 0x284   :  { %6437 = vmatpush1.bf16.msra.mxu1 %v9756_v6  ;;  %6468 = vmatprep.mubr.bf16.mxu1 %v11829_v29  ;;  %v10538_v6 = vcombine.low %v1146_v56, %v1150_v57  ;;  %v9701_v21 = vcombine.high %v307_v43, %v311_v1  ;;  %v9700_v18 = vcombine.low %v307_v43, %v311_v1  ;;  %v407_v43 = vld [vmem:[#allocation5 + $0x328] sm:$0xff] }
 0x285   :  { %6372 = vmatprep.subr.bf16.mxu0 %v10579_v7  ;;  %6438 = vmatprep.subr.bf16.mxu1 %v9749_v14  ;;  %v11901_v7 = vshrl.u32 %v1268_v62, 7  ;;  %v9708_v14 = vcombine.low %v315_v53, %v319_v54  ;;  %v9869_v53 = vcombine.high %v475_v45, %v479_v46 }
 0x287   :  { %6373 = vmatpush2.bf16.msra.mxu0 %v10578_v26  ;;  %v427_v26 = vld [vmem:[#allocation5 + $0x3c8] sm:$0xff] }
 0x288   :  { %6439 = vmatpush1.bf16.msra.mxu1 %v9748_v16  ;;  %6374 = vmatprep.subr.bf16.mxu0 %v10571_v13  ;;  %v431_v16 = vld [vmem:[#allocation5 + $0x3e8] sm:$0xff]  ;;  %v10530_v13 = vcombine.low %v1138_v0, %v1142_v17 }
 0x289   :  { %6440 = vmatprep.subr.bf16.mxu1 %v9741_v15  ;;  %v1270_v15 = vsub.s32 0, %v11901_v7  ;;  %v9821_v23 = vcombine.high %v427_v26, %v431_v16  ;;  %v403_v17 = vld [vmem:[#allocation5 + $0x308] sm:$0xff] }
 0x28a   :  { %v9797_v12 = vcombine.high %v403_v17, %v407_v43 }
 0x28b   :  { %6375 = vmatpush2.bf16.msra.mxu0 %v10570_v25  ;;  %v1274_v25 = vsub.s32 1, %v11901_v7  ;;  %v1271_v32 = vrot.slane %v1266_v22, %v1270_v15 }
 0x28c   :  { %6441 = vmatpush1.bf16.msra.mxu1 %v9740_v27  ;;  %6376 = vmatprep.subr.bf16.mxu0 %v10563_v59  ;;  %v483_v27 = vld [vmem:[#allocation5 + $0x588] sm:$0xff] }
 0x28d   :  { %6442 = vmatprep.subr.bf16.mxu1 %v9733_v20  ;;  %v487_v59 = vld [vmem:[#allocation5 + $0x5a8] sm:$0xff] }
 0x28e   :  { %v419_v20 = vld [vmem:[#allocation5 + $0x388] sm:$0xff]  ;;  %v9876_v60 = vcombine.low %v483_v27, %v487_v59 }
 0x28f   :  { %6377 = vmatpush2.bf16.msra.mxu0 %v10562_v34  ;;  %v9820_v34 = vcombine.low %v427_v26, %v431_v16  ;;  %v9812_v57 = vcombine.low %v419_v20, %v423_v28  ;;  %v459_v26 = vld [vmem:[#allocation5 + $0x4c8] sm:$0xff] }
 0x290   :  { %6443 = vmatpush1.bf16.msra.mxu1 %v9732_v36  ;;  %6378 = vmatprep.subr.bf16.mxu0 %v10555_v37  ;;  %v9877_v36 = vcombine.high %v483_v27, %v487_v59  ;;  %v1275_v37 = vrot.slane %v1266_v22, %v1274_v25  ;;  %v463_v16 = vld [vmem:[#allocation5 + $0x4e8] sm:$0xff]  ;;  %v9796_v22 = vcombine.low %v403_v17, %v407_v43 }
 0x291   :  { %6444 = vmatprep.subr.bf16.mxu1 %v9725_v42  ;;  %v9813_v42 = vcombine.high %v419_v20, %v423_v28  ;;  %v451_v59 = vld [vmem:[#allocation5 + $0x488] sm:$0xff] }
 0x292   :  { %v455_v20 = vld [vmem:[#allocation5 + $0x4a8] sm:$0xff] }
 0x293   :  { %6379 = vmatpush2.bf16.msra.mxu0 %v10554_v50  ;;  %v411_v50 = vld [vmem:[#allocation5 + $0x348] sm:$0xff] }
 0x294   :  { %6445 = vmatpush1.bf16.msra.mxu1 %v9724_v35  ;;  %6380 = vmatprep.subr.bf16.mxu0 %v10547_v51  ;;  %v415_v35 = vld [vmem:[#allocation5 + $0x368] sm:$0xff] }
 0x295   :  { %6446 = vmatprep.subr.bf16.mxu1 %v9717_v52  ;;  %v9805_v62 = vcombine.high %v411_v50, %v415_v35  ;;  %v387_v28 = vld [vmem:[#allocation5 + $0x288] sm:$0xff] }
 0x296   :  { %v623_v17 = vld [vmem:[#allocation5 + $0x9e8] sm:$0xff] }
 0x297   :  { %6381 = vmatpush2.bf16.msra.mxu0 %v10546_v58 }
 0x298   :  { %6447 = vmatpush1.bf16.msra.mxu1 %v9716_v63  ;;  %6382 = vmatprep.subr.bf16.mxu0 %v10539_v10  ;;  %v467_v63 = vld [vmem:[#allocation5 + $0x508] sm:$0xff] }
 0x299   :  { %6448 = vmatprep.subr.bf16.mxu1 %v9709_v2  ;;  %v471_v10 = vld [vmem:[#allocation5 + $0x528] sm:$0xff] }
 0x29a   :  { %v9861_v9 = vcombine.high %v467_v63, %v471_v10 }
 0x29b   :  { %6383 = vmatpush2.bf16.msra.mxu0 %v10538_v6  ;;  %v9868_v6 = vcombine.low %v475_v45, %v479_v46  ;;  %v447_v45 = vld [vmem:[#allocation5 + $0x468] sm:$0xff] }
 0x29c   :  { %6449 = vmatpush1.bf16.msra.mxu1 %v9708_v14  ;;  %6384 = vmatprep.subr.bf16.mxu0 %v10531_v11  ;;  %v379_v46 = vld [vmem:[#allocation5 + $0x248] sm:$0xff] }
 0x29d   :  { %6450 = vmatprep.subr.bf16.mxu1 %v9701_v21  ;;  %v9804_v21 = vcombine.low %v411_v50, %v415_v35 }
 0x29f   :  { %6385 = vmatpush2.bf16.msra.mxu0 %v10530_v13  ;;  %v395_v13 = vld [vmem:[#allocation5 + $0x2c8] sm:$0xff] }
 0x2a0   :  { %6451 = vmatpush1.bf16.msra.mxu1 %v9700_v18  ;;  %6477 = vmatprep.subr.bf16.mxu0 %v9885_v19  ;;  %v399_v18 = vld [vmem:[#allocation5 + $0x2e8] sm:$0xff]  ;;  %v9860_v19 = vcombine.low %v467_v63, %v471_v10 }
 0x2a1   :  { %6452 = vmatprep.subr.bf16.mxu1 %v9821_v23  ;;  %v9853_v23 = vcombine.high %v459_v26, %v463_v16  ;;  %v9789_v27 = vcombine.high %v395_v13, %v399_v18  ;;  %v555_v10 = vld [vmem:[#allocation5 + $0x7c8] sm:$0xff] }
 0x2a2   :  { %6387 = vmatmul.mubr.bf16.vlgmr.msra.gmra.mxu0 %v11909_v33  ;;  %v6142_v47 = vpop.f32.mrf.mxu0  ;;  %v6183_v48 = vpop.f32.mrf.mxu1 }
 0x2a3   :  { %v6143_v51 = vadd.f32 %v6142_v47, %v1271_v32  ;;  %6478 = vmatpush1.bf16.msra.mxu0 %v9884_v31  ;;  %6509 = vmatprep.mubr.bf16.mxu0 %v11831_v61  ;;  %v391_v31 = vld [vmem:[#allocation5 + $0x2a8] sm:$0xff]  ;;  %v9852_v32 = vcombine.low %v459_v26, %v463_v16 }
 0x2a4   :  { %6453 = vmatpush2.bf16.msra.mxu1 %v9820_v34  ;;  %v6144_v52 = vpop.f32.mrf.mxu0  ;;  %v6185_v56 = vpop.f32.mrf.mxu1  ;;  %6479 = vmatprep.subr.bf16.mxu0 %v9877_v36  ;;  %v9788_v34 = vcombine.low %v395_v13, %v399_v18  ;;  %v9845_v36 = vcombine.high %v451_v59, %v455_v20  ;;  %v383_v47 = vld [vmem:[#allocation5 + $0x268] sm:$0xff]  ;;  %v9780_v50 = vcombine.low %v387_v28, %v391_v31 }
 0x2a5   :  { %v11915_v54 = vadd.f32 %v6183_v48, %v6143_v51  ;;  %v6145_v58 = vadd.f32 %v6144_v52, %v1275_v37  ;;  %6454 = vmatprep.subr.bf16.mxu1 %v9813_v42  ;;  %v9781_v37 = vcombine.high %v387_v28, %v391_v31  ;;  %v443_v42 = vld [vmem:[#allocation5 + $0x448] sm:$0xff]  ;;  %v9844_v48 = vcombine.low %v451_v59, %v455_v20 }
 0x2a6   :  { %v6146_v2 = vpop.f32.mrf.mxu0  ;;  %v6187_v0 = vpop.f32.mrf.mxu1  ;;  %v9837_v35 = vcombine.high %v443_v42, %v447_v45  ;;  %v9773_v51 = vcombine.high %v379_v46, %v383_v47  ;;  %v439_v52 = vld [vmem:[#allocation5 + $0x428] sm:$0xff] }
 0x2a7   :  { %v11917_v1 = vadd.f32 %v6185_v56, %v6145_v58  ;;  %6480 = vmatpush1.bf16.msra.mxu0 %v9876_v60  ;;  %v435_v60 = vld [vmem:[#allocation5 + $0x408] sm:$0xff]  ;;  %v9772_v58 = vcombine.low %v379_v46, %v383_v47 }
 0x2a8   :  { %6455 = vmatpush2.bf16.msra.mxu1 %v9812_v57  ;;  %v6147_v14 = vpop.f32.mrf.mxu0  ;;  %v6188_v11 = vpop.f32.mrf.mxu1  ;;  %6481 = vmatprep.subr.bf16.mxu0 %v9869_v53  ;;  %v371_v56 = vld [vmem:[#allocation5 + $0x208] sm:$0xff]  ;;  %v9836_v53 = vcombine.low %v443_v42, %v447_v45  ;;  %v9828_v43 = vcombine.low %v435_v60, %v439_v52 }
 0x2a9   :  { %6456 = vmatprep.subr.bf16.mxu1 %v9805_v62  ;;  %v375_v57 = vld [vmem:[#allocation5 + $0x228] sm:$0xff]  ;;  %v9829_v62 = vcombine.high %v435_v60, %v439_v52 }
 0x2aa   :  { %v9765_v63 = vcombine.high %v371_v56, %v375_v57  ;;  %v559_v2 = vld [vmem:[#allocation5 + $0x7e8] sm:$0xff] }
 0x2ab   :  { %6482 = vmatpush1.bf16.msra.mxu0 %v9868_v6  ;;  %v619_v0 = vld [vmem:[#allocation5 + $0x9c8] sm:$0xff]  ;;  %v9764_v6 = vcombine.low %v371_v56, %v375_v57  ;;  %v9949_v14 = vcombine.high %v555_v10, %v559_v2  ;;  %v9948_v16 = vcombine.low %v555_v10, %v559_v2 }
 0x2ac   :  { %6457 = vmatpush2.bf16.msra.mxu1 %v9804_v21  ;;  %6483 = vmatprep.subr.bf16.mxu0 %v9861_v9  ;;  %v10013_v11 = vcombine.high %v619_v0, %v623_v17  ;;  %v547_v21 = vld [vmem:[#allocation5 + $0x788] sm:$0xff]  ;;  %v10012_v13 = vcombine.low %v619_v0, %v623_v17 }
 0x2ad   :  { %6458 = vmatprep.subr.bf16.mxu1 %v9797_v12  ;;  %v551_v9 = vld [vmem:[#allocation5 + $0x7a8] sm:$0xff] }
 0x2ae   :  { %v611_v12 = vld [vmem:[#allocation5 + $0x988] sm:$0xff]  ;;  %v9941_v18 = vcombine.high %v547_v21, %v551_v9  ;;  %v9940_v20 = vcombine.low %v547_v21, %v551_v9 }
 0x2af   :  { %6484 = vmatpush1.bf16.msra.mxu0 %v9860_v19  ;;  %v615_v26 = vld [vmem:[#allocation5 + $0x9a8] sm:$0xff] }
 0x2b0   :  { %6459 = vmatpush2.bf16.msra.mxu1 %v9796_v22  ;;  %6485 = vmatprep.subr.bf16.mxu0 %v9853_v23  ;;  %v10005_v19 = vcombine.high %v611_v12, %v615_v26  ;;  %v539_v22 = vld [vmem:[#allocation5 + $0x748] sm:$0xff]  ;;  %v10004_v28 = vcombine.low %v611_v12, %v615_v26 }
 0x2b1   :  { %6460 = vmatprep.subr.bf16.mxu1 %v9789_v27  ;;  %v543_v23 = vld [vmem:[#allocation5 + $0x768] sm:$0xff] }
 0x2b2   :  { %v603_v27 = vld [vmem:[#allocation5 + $0x948] sm:$0xff]  ;;  %v9933_v31 = vcombine.high %v539_v22, %v543_v23  ;;  %v9932_v45 = vcombine.low %v539_v22, %v543_v23 }
 0x2b3   :  { %6486 = vmatpush1.bf16.msra.mxu0 %v9852_v32  ;;  %v607_v59 = vld [vmem:[#allocation5 + $0x968] sm:$0xff] }
 0x2b4   :  { %6461 = vmatpush2.bf16.msra.mxu1 %v9788_v34  ;;  %6487 = vmatprep.subr.bf16.mxu0 %v9845_v36  ;;  %v9997_v32 = vcombine.high %v603_v27, %v607_v59  ;;  %v531_v34 = vld [vmem:[#allocation5 + $0x708] sm:$0xff]  ;;  %v9996_v46 = vcombine.low %v603_v27, %v607_v59 }
 0x2b5   :  { %6462 = vmatprep.subr.bf16.mxu1 %v9781_v37  ;;  %v535_v36 = vld [vmem:[#allocation5 + $0x728] sm:$0xff] }
 0x2b6   :  { %v595_v37 = vld [vmem:[#allocation5 + $0x908] sm:$0xff]  ;;  %v9925_v47 = vcombine.high %v531_v34, %v535_v36  ;;  %v9924_v52 = vcombine.low %v531_v34, %v535_v36 }
 0x2b7   :  { %6488 = vmatpush1.bf16.msra.mxu0 %v9844_v48  ;;  %v599_v42 = vld [vmem:[#allocation5 + $0x928] sm:$0xff] }
 0x2b8   :  { %6463 = vmatpush2.bf16.msra.mxu1 %v9780_v50  ;;  %6489 = vmatprep.subr.bf16.mxu0 %v9837_v35  ;;  %v9989_v48 = vcombine.high %v595_v37, %v599_v42  ;;  %v523_v50 = vld [vmem:[#allocation5 + $0x6c8] sm:$0xff]  ;;  %v9988_v56 = vcombine.low %v595_v37, %v599_v42 }
 0x2b9   :  { %6464 = vmatprep.subr.bf16.mxu1 %v9773_v51  ;;  %v527_v35 = vld [vmem:[#allocation5 + $0x6e8] sm:$0xff] }
 0x2ba   :  { %v587_v51 = vld [vmem:[#allocation5 + $0x8c8] sm:$0xff]  ;;  %v9917_v57 = vcombine.high %v523_v50, %v527_v35  ;;  %v9916_v2 = vcombine.low %v523_v50, %v527_v35 }
 0x2bb   :  { %6490 = vmatpush1.bf16.msra.mxu0 %v9836_v53  ;;  %v591_v60 = vld [vmem:[#allocation5 + $0x8e8] sm:$0xff] }
 0x2bc   :  { %6465 = vmatpush2.bf16.msra.mxu1 %v9772_v58  ;;  %6491 = vmatprep.subr.bf16.mxu0 %v9829_v62  ;;  %v9981_v53 = vcombine.high %v587_v51, %v591_v60  ;;  %v515_v58 = vld [vmem:[#allocation5 + $0x688] sm:$0xff]  ;;  %v9980_v0 = vcombine.low %v587_v51, %v591_v60 }
 0x2bd   :  { %6466 = vmatprep.subr.bf16.mxu1 %v9765_v63  ;;  %v519_v62 = vld [vmem:[#allocation5 + $0x6a8] sm:$0xff] }
 0x2be   :  { %v579_v63 = vld [vmem:[#allocation5 + $0x888] sm:$0xff]  ;;  %v9909_v17 = vcombine.high %v515_v58, %v519_v62  ;;  %v9908_v9 = vcombine.low %v515_v58, %v519_v62 }
 0x2bf   :  { %6492 = vmatpush1.bf16.msra.mxu0 %v9828_v43  ;;  %v583_v10 = vld [vmem:[#allocation5 + $0x8a8] sm:$0xff] }
 0x2c0   :  { %6467 = vmatpush2.bf16.msra.mxu1 %v9764_v6  ;;  %6493 = vmatprep.subr.bf16.mxu0 %v9949_v14  ;;  %v9973_v43 = vcombine.high %v579_v63, %v583_v10  ;;  %v507_v6 = vld [vmem:[#allocation5 + $0x648] sm:$0xff]  ;;  %v9972_v12 = vcombine.low %v579_v63, %v583_v10 }
 0x2c1   :  { %6518 = vmatprep.subr.bf16.mxu1 %v10013_v11  ;;  %v511_v14 = vld [vmem:[#allocation5 + $0x668] sm:$0xff] }
 0x2c2   :  { %v571_v11 = vld [vmem:[#allocation5 + $0x848] sm:$0xff]  ;;  %v9901_v26 = vcombine.high %v507_v6, %v511_v14  ;;  %v9900_v23 = vcombine.low %v507_v6, %v511_v14 }
 0x2c3   :  { %6469 = vmatmul.mubr.bf16.vlgmr.msra.gmra.mxu1 %v11833_v30  ;;  %6494 = vmatpush2.bf16.msra.mxu0 %v9948_v16  ;;  %v575_v21 = vld [vmem:[#allocation5 + $0x868] sm:$0xff] }
 0x2c4   :  { %6519 = vmatpush1.bf16.msra.mxu1 %v10012_v13  ;;  %6550 = vmatprep.mubr.bf16.mxu1 %v11841_v38  ;;  %v9965_v16 = vcombine.high %v571_v11, %v575_v21  ;;  %v499_v13 = vld [vmem:[#allocation5 + $0x608] sm:$0xff]  ;;  %v9964_v27 = vcombine.low %v571_v11, %v575_v21 }
 0x2c5   :  { %6495 = vmatprep.subr.bf16.mxu0 %v9941_v18  ;;  %6520 = vmatprep.subr.bf16.mxu1 %v10005_v19  ;;  %v503_v18 = vld [vmem:[#allocation5 + $0x628] sm:$0xff] }
 0x2c6   :  { %v563_v19 = vld [vmem:[#allocation5 + $0x808] sm:$0xff]  ;;  %v9893_v59 = vcombine.high %v499_v13, %v503_v18  ;;  %v9892_v36 = vcombine.low %v499_v13, %v503_v18 }
 0x2c7   :  { %6496 = vmatpush2.bf16.msra.mxu0 %v9940_v20  ;;  %v567_v22 = vld [vmem:[#allocation5 + $0x828] sm:$0xff] }
 0x2c8   :  { %6521 = vmatpush1.bf16.msra.mxu1 %v10004_v28  ;;  %6497 = vmatprep.subr.bf16.mxu0 %v9933_v31  ;;  %v9957_v20 = vcombine.high %v563_v19, %v567_v22  ;;  %v747_v28 = vld [vmem:[#allocation5 + $0xdc8] sm:$0xff]  ;;  %v9956_v37 = vcombine.low %v563_v19, %v567_v22 }
 0x2c9   :  { %6522 = vmatprep.subr.bf16.mxu1 %v9997_v32  ;;  %v751_v31 = vld [vmem:[#allocation5 + $0xde8] sm:$0xff] }
 0x2ca   :  { %v683_v32 = vld [vmem:[#allocation5 + $0xbc8] sm:$0xff]  ;;  %v10141_v42 = vcombine.high %v747_v28, %v751_v31  ;;  %v10140_v35 = vcombine.low %v747_v28, %v751_v31 }
 0x2cb   :  { %6498 = vmatpush2.bf16.msra.mxu0 %v9932_v45  ;;  %v687_v34 = vld [vmem:[#allocation5 + $0xbe8] sm:$0xff] }
 0x2cc   :  { %6523 = vmatpush1.bf16.msra.mxu1 %v9996_v46  ;;  %6499 = vmatprep.subr.bf16.mxu0 %v9925_v47  ;;  %v10077_v45 = vcombine.high %v683_v32, %v687_v34  ;;  %v739_v46 = vld [vmem:[#allocation5 + $0xd88] sm:$0xff]  ;;  %v10076_v51 = vcombine.low %v683_v32, %v687_v34 }
 0x2cd   :  { %6524 = vmatprep.subr.bf16.mxu1 %v9989_v48  ;;  %v743_v47 = vld [vmem:[#allocation5 + $0xda8] sm:$0xff] }
 0x2ce   :  { %v675_v48 = vld [vmem:[#allocation5 + $0xb88] sm:$0xff]  ;;  %v10133_v60 = vcombine.high %v739_v46, %v743_v47 }
 0x2cf   :  { %6500 = vmatpush2.bf16.msra.mxu0 %v9924_v52  ;;  %v679_v50 = vld [vmem:[#allocation5 + $0xba8] sm:$0xff] }
 0x2d0   :  { %6525 = vmatpush1.bf16.msra.mxu1 %v9988_v56  ;;  %6501 = vmatprep.subr.bf16.mxu0 %v9917_v57  ;;  %v10069_v52 = vcombine.high %v675_v48, %v679_v50  ;;  %v731_v56 = vld [vmem:[#allocation5 + $0xd48] sm:$0xff] }
 0x2d1   :  { %6526 = vmatprep.subr.bf16.mxu1 %v9981_v53  ;;  %v735_v57 = vld [vmem:[#allocation5 + $0xd68] sm:$0xff] }
 0x2d2   :  { %v667_v62 = vld [vmem:[#allocation5 + $0xb48] sm:$0xff]  ;;  %v10125_v6 = vcombine.high %v731_v56, %v735_v57  ;;  %v10124_v19 = vcombine.low %v731_v56, %v735_v57 }
 0x2d3   :  { %6502 = vmatpush2.bf16.msra.mxu0 %v9916_v2  ;;  %v671_v63 = vld [vmem:[#allocation5 + $0xb68] sm:$0xff]  ;;  %v10132_v2 = vcombine.low %v739_v46, %v743_v47 }
 0x2d4   :  { %6527 = vmatpush1.bf16.msra.mxu1 %v9980_v0  ;;  %6503 = vmatprep.subr.bf16.mxu0 %v9909_v17  ;;  %v10061_v21 = vcombine.high %v667_v62, %v671_v63  ;;  %v663_v13 = vld [vmem:[#allocation5 + $0xb28] sm:$0xff] }
 0x2d5   :  { %6528 = vmatprep.subr.bf16.mxu1 %v9973_v43  ;;  %v10068_v43 = vcombine.low %v675_v48, %v679_v50  ;;  %v719_v28 = vld [vmem:[#allocation5 + $0xce8] sm:$0xff] }
 0x2d6   :  { %v651_v31 = vld [vmem:[#allocation5 + $0xac8] sm:$0xff] }
 0x2d7   :  { %6504 = vmatpush2.bf16.msra.mxu0 %v9908_v9  ;;  %v723_v9 = vld [vmem:[#allocation5 + $0xd08] sm:$0xff] }
 0x2d8   :  { %6529 = vmatpush1.bf16.msra.mxu1 %v9972_v12  ;;  %6505 = vmatprep.subr.bf16.mxu0 %v9901_v26  ;;  %v727_v12 = vld [vmem:[#allocation5 + $0xd28] sm:$0xff] }
 0x2d9   :  { %6530 = vmatprep.subr.bf16.mxu1 %v9965_v16  ;;  %v659_v16 = vld [vmem:[#allocation5 + $0xb08] sm:$0xff]  ;;  %v10116_v34 = vcombine.low %v723_v9, %v727_v12 }
 0x2da   :  { %v655_v32 = vld [vmem:[#allocation5 + $0xae8] sm:$0xff] }
 0x2db   :  { %6506 = vmatpush2.bf16.msra.mxu0 %v9900_v23  ;;  %v711_v46 = vld [vmem:[#allocation5 + $0xca8] sm:$0xff] }
 0x2dc   :  { %6531 = vmatpush1.bf16.msra.mxu1 %v9964_v27  ;;  %6507 = vmatprep.subr.bf16.mxu0 %v9893_v59  ;;  %v10060_v27 = vcombine.low %v667_v62, %v671_v63  ;;  %v10117_v59 = vcombine.high %v723_v9, %v727_v12  ;;  %v643_v47 = vld [vmem:[#allocation5 + $0xa88] sm:$0xff] }
 0x2dd   :  { %6532 = vmatprep.subr.bf16.mxu1 %v9957_v20  ;;  %v715_v20 = vld [vmem:[#allocation5 + $0xcc8] sm:$0xff] }
 0x2de   :  { %v647_v48 = vld [vmem:[#allocation5 + $0xaa8] sm:$0xff]  ;;  %v10108_v50 = vcombine.low %v715_v20, %v719_v28 }
 0x2df   :  { %6508 = vmatpush2.bf16.msra.mxu0 %v9892_v36  ;;  %v10052_v36 = vcombine.low %v659_v16, %v663_v13  ;;  %v703_v56 = vld [vmem:[#allocation5 + $0xc68] sm:$0xff]  ;;  %v10036_v62 = vcombine.low %v643_v47, %v647_v48 }
 0x2e0   :  { %6533 = vmatpush1.bf16.msra.mxu1 %v9956_v37  ;;  %6559 = vmatprep.subr.bf16.mxu0 %v10141_v42  ;;  %v10109_v37 = vcombine.high %v715_v20, %v719_v28  ;;  %v10045_v42 = vcombine.high %v651_v31, %v655_v32  ;;  %v635_v57 = vld [vmem:[#allocation5 + $0xa48] sm:$0xff] }
 0x2e1   :  { %6534 = vmatprep.subr.bf16.mxu1 %v10077_v45  ;;  %v707_v45 = vld [vmem:[#allocation5 + $0xc88] sm:$0xff] }
 0x2e2   :  { %v6224_v53 = vpop.f32.mrf.mxu0  ;;  %v6265_v58 = vpop.f32.mrf.mxu1  ;;  %6510 = vmatmul.mubr.bf16.vlgmr.msra.gmra.mxu0 %v11835_v3  ;;  %v811_v12 = vld [vmem:[#allocation5 + $0xfc8] sm:$0xff] }
 0x2e3   :  { %v6225_v10 = vadd.f32 %v6224_v53, %v11915_v54  ;;  %6560 = vmatpush1.bf16.msra.mxu0 %v10140_v35  ;;  %6591 = vmatprep.mubr.bf16.mxu0 %v11843_v41  ;;  %v10044_v35 = vcombine.low %v651_v31, %v655_v32  ;;  %v639_v53 = vld [vmem:[#allocation5 + $0xa68] sm:$0xff] }
 0x2e4   :  { %6535 = vmatpush2.bf16.msra.mxu1 %v10076_v51  ;;  %v6226_v0 = vpop.f32.mrf.mxu0  ;;  %v6267_v17 = vpop.f32.mrf.mxu1  ;;  %6561 = vmatprep.subr.bf16.mxu0 %v10133_v60  ;;  %v10101_v51 = vcombine.high %v707_v45, %v711_v46  ;;  %v10037_v60 = vcombine.high %v643_v47, %v647_v48  ;;  %v871_v20 = vld [vmem:[#allocation5 + $0x11a8] sm:$0xff] }
 0x2e5   :  { %v11924_v14 = vadd.f32 %v6265_v58, %v6225_v10  ;;  %v6227_v11 = vadd.f32 %v6226_v0, %v11917_v1  ;;  %6536 = vmatprep.subr.bf16.mxu1 %v10069_v52  ;;  %v10053_v1 = vcombine.high %v659_v16, %v663_v13  ;;  %v699_v52 = vld [vmem:[#allocation5 + $0xc48] sm:$0xff]  ;;  %v10100_v58 = vcombine.low %v707_v45, %v711_v46 }
 0x2e6   :  { %v6228_v26 = vpop.f32.mrf.mxu0  ;;  %v6269_v54 = vpop.f32.mrf.mxu1  ;;  %v10093_v63 = vcombine.high %v699_v52, %v703_v56  ;;  %v10029_v10 = vcombine.high %v635_v57, %v639_v53  ;;  %v695_v0 = vld [vmem:[#allocation5 + $0xc28] sm:$0xff] }
 0x2e7   :  { %v11927_v18 = vadd.f32 %v6267_v17, %v6227_v11  ;;  %6562 = vmatpush1.bf16.msra.mxu0 %v10132_v2  ;;  %v691_v2 = vld [vmem:[#allocation5 + $0xc08] sm:$0xff]  ;;  %v10028_v11 = vcombine.low %v635_v57, %v639_v53 }
 0x2e8   :  { %6537 = vmatpush2.bf16.msra.mxu1 %v10068_v43  ;;  %v6229_v22 = vpop.f32.mrf.mxu0  ;;  %v6270_v23 = vpop.f32.mrf.mxu1  ;;  %6563 = vmatprep.subr.bf16.mxu0 %v10125_v6  ;;  %v627_v17 = vld [vmem:[#allocation5 + $0xa08] sm:$0xff]  ;;  %v10092_v6 = vcombine.low %v699_v52, %v703_v56  ;;  %v10084_v13 = vcombine.low %v691_v2, %v695_v0 }
 0x2e9   :  { %6538 = vmatprep.subr.bf16.mxu1 %v10061_v21  ;;  %v631_v43 = vld [vmem:[#allocation5 + $0xa28] sm:$0xff]  ;;  %v10085_v21 = vcombine.high %v691_v2, %v695_v0 }
 0x2ea   :  { %v10021_v9 = vcombine.high %v627_v17, %v631_v43  ;;  %v815_v26 = vld [vmem:[#allocation5 + $0xfe8] sm:$0xff] }
 0x2eb   :  { %6564 = vmatpush1.bf16.msra.mxu0 %v10124_v19  ;;  %v875_v54 = vld [vmem:[#allocation5 + $0x11c8] sm:$0xff]  ;;  %v10020_v19 = vcombine.low %v627_v17, %v631_v43  ;;  %v10205_v22 = vcombine.high %v811_v12, %v815_v26  ;;  %v10204_v28 = vcombine.low %v811_v12, %v815_v26 }
 0x2ec   :  { %6539 = vmatpush2.bf16.msra.mxu1 %v10060_v27  ;;  %6565 = vmatprep.subr.bf16.mxu0 %v10117_v59  ;;  %v879_v16 = vld [vmem:[#allocation5 + $0x11e8] sm:$0xff] }
 0x2ed   :  { %6540 = vmatprep.subr.bf16.mxu1 %v10053_v1  ;;  %v10269_v23 = vcombine.high %v875_v54, %v879_v16  ;;  %v803_v27 = vld [vmem:[#allocation5 + $0xf88] sm:$0xff]  ;;  %v10268_v31 = vcombine.low %v875_v54, %v879_v16 }
 0x2ee   :  { %v807_v59 = vld [vmem:[#allocation5 + $0xfa8] sm:$0xff] }
 0x2ef   :  { %6566 = vmatpush1.bf16.msra.mxu0 %v10116_v34  ;;  %v867_v1 = vld [vmem:[#allocation5 + $0x1188] sm:$0xff]  ;;  %v10197_v32 = vcombine.high %v803_v27, %v807_v59  ;;  %v10196_v46 = vcombine.low %v803_v27, %v807_v59 }
 0x2f0   :  { %6541 = vmatpush2.bf16.msra.mxu1 %v10052_v36  ;;  %6567 = vmatprep.subr.bf16.mxu0 %v10109_v37  ;;  %v10261_v34 = vcombine.high %v867_v1, %v871_v20  ;;  %v795_v36 = vld [vmem:[#allocation5 + $0xf48] sm:$0xff]  ;;  %v10260_v47 = vcombine.low %v867_v1, %v871_v20 }
 0x2f1   :  { %6542 = vmatprep.subr.bf16.mxu1 %v10045_v42  ;;  %v799_v37 = vld [vmem:[#allocation5 + $0xf68] sm:$0xff] }
 0x2f2   :  { %v859_v42 = vld [vmem:[#allocation5 + $0x1148] sm:$0xff]  ;;  %v10189_v48 = vcombine.high %v795_v36, %v799_v37  ;;  %v10188_v56 = vcombine.low %v795_v36, %v799_v37 }
 0x2f3   :  { %6568 = vmatpush1.bf16.msra.mxu0 %v10108_v50  ;;  %v863_v45 = vld [vmem:[#allocation5 + $0x1168] sm:$0xff] }
 0x2f4   :  { %6543 = vmatpush2.bf16.msra.mxu1 %v10044_v35  ;;  %6569 = vmatprep.subr.bf16.mxu0 %v10101_v51  ;;  %v10253_v50 = vcombine.high %v859_v42, %v863_v45  ;;  %v787_v35 = vld [vmem:[#allocation5 + $0xf08] sm:$0xff]  ;;  %v10252_v57 = vcombine.low %v859_v42, %v863_v45 }
 0x2f5   :  { %6544 = vmatprep.subr.bf16.mxu1 %v10037_v60  ;;  %v791_v51 = vld [vmem:[#allocation5 + $0xf28] sm:$0xff] }
 0x2f6   :  { %v851_v60 = vld [vmem:[#allocation5 + $0x1108] sm:$0xff]  ;;  %v10181_v53 = vcombine.high %v787_v35, %v791_v51  ;;  %v10180_v0 = vcombine.low %v787_v35, %v791_v51 }
 0x2f7   :  { %6570 = vmatpush1.bf16.msra.mxu0 %v10100_v58  ;;  %v855_v52 = vld [vmem:[#allocation5 + $0x1128] sm:$0xff] }
 0x2f8   :  { %6545 = vmatpush2.bf16.msra.mxu1 %v10036_v62  ;;  %6571 = vmatprep.subr.bf16.mxu0 %v10093_v63  ;;  %v10245_v58 = vcombine.high %v851_v60, %v855_v52  ;;  %v779_v62 = vld [vmem:[#allocation5 + $0xec8] sm:$0xff]  ;;  %v10244_v17 = vcombine.low %v851_v60, %v855_v52 }
 0x2f9   :  { %6546 = vmatprep.subr.bf16.mxu1 %v10029_v10  ;;  %v783_v63 = vld [vmem:[#allocation5 + $0xee8] sm:$0xff] }
 0x2fa   :  { %v843_v10 = vld [vmem:[#allocation5 + $0x10c8] sm:$0xff]  ;;  %v10173_v43 = vcombine.high %v779_v62, %v783_v63  ;;  %v10172_v26 = vcombine.low %v779_v62, %v783_v63 }
 0x2fb   :  { %6572 = vmatpush1.bf16.msra.mxu0 %v10092_v6  ;;  %v847_v2 = vld [vmem:[#allocation5 + $0x10e8] sm:$0xff] }
 0x2fc   :  { %6547 = vmatpush2.bf16.msra.mxu1 %v10028_v11  ;;  %6573 = vmatprep.subr.bf16.mxu0 %v10085_v21  ;;  %v10237_v6 = vcombine.high %v843_v10, %v847_v2  ;;  %v771_v11 = vld [vmem:[#allocation5 + $0xe88] sm:$0xff]  ;;  %v10236_v54 = vcombine.low %v843_v10, %v847_v2 }
 0x2fd   :  { %6548 = vmatprep.subr.bf16.mxu1 %v10021_v9  ;;  %v775_v21 = vld [vmem:[#allocation5 + $0xea8] sm:$0xff] }
 0x2fe   :  { %v835_v9 = vld [vmem:[#allocation5 + $0x1088] sm:$0xff]  ;;  %v10165_v16 = vcombine.high %v771_v11, %v775_v21  ;;  %v10164_v59 = vcombine.low %v771_v11, %v775_v21 }
 0x2ff   :  { %6574 = vmatpush1.bf16.msra.mxu0 %v10084_v13  ;;  %v839_v12 = vld [vmem:[#allocation5 + $0x10a8] sm:$0xff] }
 0x300   :  { %6549 = vmatpush2.bf16.msra.mxu1 %v10020_v19  ;;  %6575 = vmatprep.subr.bf16.mxu0 %v10205_v22  ;;  %v10229_v13 = vcombine.high %v835_v9, %v839_v12  ;;  %v763_v19 = vld [vmem:[#allocation5 + $0xe48] sm:$0xff]  ;;  %v10228_v1 = vcombine.low %v835_v9, %v839_v12 }
 0x301   :  { %6600 = vmatprep.subr.bf16.mxu1 %v10269_v23  ;;  %v767_v22 = vld [vmem:[#allocation5 + $0xe68] sm:$0xff] }
 0x302   :  { %v827_v23 = vld [vmem:[#allocation5 + $0x1048] sm:$0xff]  ;;  %v10157_v20 = vcombine.high %v763_v19, %v767_v22  ;;  %v10156_v37 = vcombine.low %v763_v19, %v767_v22 }
 0x303   :  { %6551 = vmatmul.mubr.bf16.vlgmr.msra.gmra.mxu1 %v11861_v39  ;;  %6576 = vmatpush2.bf16.msra.mxu0 %v10204_v28  ;;  %v831_v27 = vld [vmem:[#allocation5 + $0x1068] sm:$0xff] }
 0x304   :  { %6601 = vmatpush1.bf16.msra.mxu1 %v10268_v31  ;;  %6632 = vmatprep.mubr.bf16.mxu1 %v11867_v44  ;;  %v10221_v28 = vcombine.high %v827_v23, %v831_v27  ;;  %v755_v31 = vld [vmem:[#allocation5 + $0xe08] sm:$0xff]  ;;  %v10220_v42 = vcombine.low %v827_v23, %v831_v27 }
 0x305   :  { %6577 = vmatprep.subr.bf16.mxu0 %v10197_v32  ;;  %6602 = vmatprep.subr.bf16.mxu1 %v10261_v34  ;;  %v759_v32 = vld [vmem:[#allocation5 + $0xe28] sm:$0xff] }
 0x306   :  { %v819_v34 = vld [vmem:[#allocation5 + $0x1008] sm:$0xff]  ;;  %v10149_v45 = vcombine.high %v755_v31, %v759_v32  ;;  %v10148_v51 = vcombine.low %v755_v31, %v759_v32 }
 0x307   :  { %6578 = vmatpush2.bf16.msra.mxu0 %v10196_v46  ;;  %v823_v36 = vld [vmem:[#allocation5 + $0x1028] sm:$0xff] }
 0x308   :  { %6603 = vmatpush1.bf16.msra.mxu1 %v10260_v47  ;;  %6579 = vmatprep.subr.bf16.mxu0 %v10189_v48  ;;  %v10213_v46 = vcombine.high %v819_v34, %v823_v36  ;;  %v1003_v47 = vld [vmem:[#allocation5 + $0x15c8] sm:$0xff]  ;;  %v10212_v60 = vcombine.low %v819_v34, %v823_v36 }
 0x309   :  { %6604 = vmatprep.subr.bf16.mxu1 %v10253_v50  ;;  %v1007_v48 = vld [vmem:[#allocation5 + $0x15e8] sm:$0xff] }
 0x30a   :  { %v939_v50 = vld [vmem:[#allocation5 + $0x13c8] sm:$0xff]  ;;  %v10397_v52 = vcombine.high %v1003_v47, %v1007_v48  ;;  %v10396_v63 = vcombine.low %v1003_v47, %v1007_v48 }
 0x30b   :  { %6580 = vmatpush2.bf16.msra.mxu0 %v10188_v56  ;;  %v943_v35 = vld [vmem:[#allocation5 + $0x13e8] sm:$0xff] }
 0x30c   :  { %6605 = vmatpush1.bf16.msra.mxu1 %v10252_v57  ;;  %6581 = vmatprep.subr.bf16.mxu0 %v10181_v53  ;;  %v10333_v56 = vcombine.high %v939_v50, %v943_v35  ;;  %v995_v57 = vld [vmem:[#allocation5 + $0x1588] sm:$0xff]  ;;  %v10332_v10 = vcombine.low %v939_v50, %v943_v35 }
 0x30d   :  { %6606 = vmatprep.subr.bf16.mxu1 %v10245_v58  ;;  %v999_v53 = vld [vmem:[#allocation5 + $0x15a8] sm:$0xff] }
 0x30e   :  { %v931_v58 = vld [vmem:[#allocation5 + $0x1388] sm:$0xff]  ;;  %v10389_v2 = vcombine.high %v995_v57, %v999_v53 }
 0x30f   :  { %6582 = vmatpush2.bf16.msra.mxu0 %v10180_v0  ;;  %v935_v62 = vld [vmem:[#allocation5 + $0x13a8] sm:$0xff] }
 0x310   :  { %6607 = vmatpush1.bf16.msra.mxu1 %v10244_v17  ;;  %6583 = vmatprep.subr.bf16.mxu0 %v10173_v43  ;;  %v10325_v0 = vcombine.high %v931_v58, %v935_v62  ;;  %v987_v17 = vld [vmem:[#allocation5 + $0x1548] sm:$0xff] }
 0x311   :  { %6608 = vmatprep.subr.bf16.mxu1 %v10237_v6  ;;  %v991_v43 = vld [vmem:[#allocation5 + $0x1568] sm:$0xff] }
 0x312   :  { %v923_v11 = vld [vmem:[#allocation5 + $0x1348] sm:$0xff]  ;;  %v10380_v34 = vcombine.low %v987_v17, %v991_v43 }
 0x313   :  { %6584 = vmatpush2.bf16.msra.mxu0 %v10172_v26  ;;  %v927_v21 = vld [vmem:[#allocation5 + $0x1368] sm:$0xff]  ;;  %v10388_v26 = vcombine.low %v995_v57, %v999_v53 }
 0x314   :  { %6609 = vmatpush1.bf16.msra.mxu1 %v10236_v54  ;;  %6585 = vmatprep.subr.bf16.mxu0 %v10165_v16  ;;  %v10324_v16 = vcombine.low %v931_v58, %v935_v62  ;;  %v10317_v27 = vcombine.high %v923_v11, %v927_v21  ;;  %v975_v47 = vld [vmem:[#allocation5 + $0x14e8] sm:$0xff] }
 0x315   :  { %6610 = vmatprep.subr.bf16.mxu1 %v10229_v13  ;;  %v10381_v13 = vcombine.high %v987_v17, %v991_v43  ;;  %v907_v48 = vld [vmem:[#allocation5 + $0x12c8] sm:$0xff] }
 0x316   :  { %v911_v50 = vld [vmem:[#allocation5 + $0x12e8] sm:$0xff] }
 0x317   :  { %6586 = vmatpush2.bf16.msra.mxu0 %v10164_v59  ;;  %v979_v59 = vld [vmem:[#allocation5 + $0x1508] sm:$0xff] }
 0x318   :  { %6611 = vmatpush1.bf16.msra.mxu1 %v10228_v1  ;;  %6587 = vmatprep.subr.bf16.mxu0 %v10157_v20  ;;  %v983_v1 = vld [vmem:[#allocation5 + $0x1528] sm:$0xff] }
 0x319   :  { %6612 = vmatprep.subr.bf16.mxu1 %v10221_v28  ;;  %v915_v20 = vld [vmem:[#allocation5 + $0x1308] sm:$0xff]  ;;  %v10372_v35 = vcombine.low %v979_v59, %v983_v1 }
 0x31a   :  { %v919_v28 = vld [vmem:[#allocation5 + $0x1328] sm:$0xff] }
 0x31b   :  { %6588 = vmatpush2.bf16.msra.mxu0 %v10156_v37  ;;  %v10316_v37 = vcombine.low %v923_v11, %v927_v21  ;;  %v967_v57 = vld [vmem:[#allocation5 + $0x14a8] sm:$0xff] }
 0x31c   :  { %6613 = vmatpush1.bf16.msra.mxu1 %v10220_v42  ;;  %6589 = vmatprep.subr.bf16.mxu0 %v10149_v45  ;;  %v10373_v42 = vcombine.high %v979_v59, %v983_v1  ;;  %v899_v53 = vld [vmem:[#allocation5 + $0x1288] sm:$0xff] }
 0x31d   :  { %6614 = vmatprep.subr.bf16.mxu1 %v10213_v46  ;;  %v971_v46 = vld [vmem:[#allocation5 + $0x14c8] sm:$0xff] }
 0x31e   :  { %v903_v58 = vld [vmem:[#allocation5 + $0x12a8] sm:$0xff]  ;;  %v10364_v62 = vcombine.low %v971_v46, %v975_v47 }
 0x31f   :  { %6590 = vmatpush2.bf16.msra.mxu0 %v10148_v51  ;;  %v10308_v51 = vcombine.low %v915_v20, %v919_v28  ;;  %v959_v17 = vld [vmem:[#allocation5 + $0x1468] sm:$0xff]  ;;  %v10292_v21 = vcombine.low %v899_v53, %v903_v58 }
 0x320   :  { %6615 = vmatpush1.bf16.msra.mxu1 %v10212_v60  ;;  %6641 = vmatprep.subr.bf16.mxu0 %v10397_v52  ;;  %v10365_v60 = vcombine.high %v971_v46, %v975_v47  ;;  %v10301_v52 = vcombine.high %v907_v48, %v911_v50  ;;  %v891_v43 = vld [vmem:[#allocation5 + $0x1248] sm:$0xff] }
 0x321   :  { %6616 = vmatprep.subr.bf16.mxu1 %v10333_v56  ;;  %v963_v56 = vld [vmem:[#allocation5 + $0x1488] sm:$0xff] }
 0x322   :  { %v6306_v6 = vpop.f32.mrf.mxu0  ;;  %6592 = vmatmul.mubr.bf16.vlgmr.msra.gmra.mxu0 %v11865_v40  ;;  %v10356_v11 = vcombine.low %v963_v56, %v967_v57  ;;  %v1067_v1 = vld [vmem:[#allocation5 + $0x17c8] sm:$0xff] }
 0x323   :  { %v6307_v9 = vadd.f32 %v6306_v6, %v11924_v14  ;;  %v6347_v12 = vpop.f32.mrf.mxu1  ;;  %6642 = vmatpush1.bf16.msra.mxu0 %v10396_v63  ;;  %6673 = vmatprep.mubr.bf16.mxu0 %v11871_v8  ;;  %v10300_v63 = vcombine.low %v907_v48, %v911_v50  ;;  %v895_v6 = vld [vmem:[#allocation5 + $0x1268] sm:$0xff] }
 0x324   :  { %6617 = vmatpush2.bf16.msra.mxu1 %v10332_v10  ;;  %v6308_v54 = vpop.f32.mrf.mxu0  ;;  %6643 = vmatprep.subr.bf16.mxu0 %v10389_v2  ;;  %v10357_v10 = vcombine.high %v963_v56, %v967_v57  ;;  %v10293_v2 = vcombine.high %v899_v53, %v903_v58  ;;  %v1127_v46 = vld [vmem:[#allocation5 + $0x19a8] sm:$0xff] }
 0x325   :  { %v11934_v19 = vadd.f32 %v6347_v12, %v6307_v9  ;;  %v6309_v22 = vadd.f32 %v6308_v54, %v11927_v18  ;;  %v6349_v23 = vpop.f32.mrf.mxu1  ;;  %6618 = vmatprep.subr.bf16.mxu1 %v10325_v0  ;;  %v10309_v18 = vcombine.high %v915_v20, %v919_v28  ;;  %v955_v0 = vld [vmem:[#allocation5 + $0x1448] sm:$0xff]  ;;  %v10285_v12 = vcombine.high %v891_v43, %v895_v6 }
 0x326   :  { %v6310_v14 = vpop.f32.mrf.mxu0  ;;  %v10349_v9 = vcombine.high %v955_v0, %v959_v17  ;;  %v951_v54 = vld [vmem:[#allocation5 + $0x1428] sm:$0xff] }
 0x327   :  { %v11937_v31 = vadd.f32 %v6349_v23, %v6309_v22  ;;  %v6351_v32 = vpop.f32.mrf.mxu1  ;;  %6644 = vmatpush1.bf16.msra.mxu0 %v10388_v26  ;;  %v947_v26 = vld [vmem:[#allocation5 + $0x1408] sm:$0xff]  ;;  %v10348_v22 = vcombine.low %v955_v0, %v959_v17  ;;  %v10284_v23 = vcombine.low %v891_v43, %v895_v6 }
 0x328   :  { %6619 = vmatpush2.bf16.msra.mxu1 %v10324_v16  ;;  %v6311_v36 = vpop.f32.mrf.mxu0  ;;  %6645 = vmatprep.subr.bf16.mxu0 %v10381_v13  ;;  %v883_v16 = vld [vmem:[#allocation5 + $0x1208] sm:$0xff]  ;;  %v10340_v32 = vcombine.low %v947_v26, %v951_v54 }
 0x329   :  { %v6352_v45 = vpop.f32.mrf.mxu1  ;;  %6620 = vmatprep.subr.bf16.mxu1 %v10317_v27  ;;  %v887_v13 = vld [vmem:[#allocation5 + $0x1228] sm:$0xff]  ;;  %v10341_v27 = vcombine.high %v947_v26, %v951_v54 }
 0x32a   :  { %v10277_v59 = vcombine.high %v883_v16, %v887_v13  ;;  %v1071_v14 = vld [vmem:[#allocation5 + $0x17e8] sm:$0xff] }
 0x32b   :  { %6646 = vmatpush1.bf16.msra.mxu0 %v10380_v34  ;;  %v1131_v20 = vld [vmem:[#allocation5 + $0x19c8] sm:$0xff]  ;;  %v10276_v34 = vcombine.low %v883_v16, %v887_v13  ;;  %v10461_v36 = vcombine.high %v1067_v1, %v1071_v14  ;;  %v10460_v47 = vcombine.low %v1067_v1, %v1071_v14 }
 0x32c   :  { %6621 = vmatpush2.bf16.msra.mxu1 %v10316_v37  ;;  %6647 = vmatprep.subr.bf16.mxu0 %v10373_v42  ;;  %v1135_v28 = vld [vmem:[#allocation5 + $0x19e8] sm:$0xff] }
 0x32d   :  { %6622 = vmatprep.subr.bf16.mxu1 %v10309_v18  ;;  %v10525_v37 = vcombine.high %v1131_v20, %v1135_v28  ;;  %v1059_v42 = vld [vmem:[#allocation5 + $0x1788] sm:$0xff]  ;;  %v10524_v48 = vcombine.low %v1131_v20, %v1135_v28 }
 0x32e   :  { %v1063_v45 = vld [vmem:[#allocation5 + $0x17a8] sm:$0xff] }
 0x32f   :  { %6648 = vmatpush1.bf16.msra.mxu0 %v10372_v35  ;;  %v1123_v18 = vld [vmem:[#allocation5 + $0x1988] sm:$0xff]  ;;  %v10453_v50 = vcombine.high %v1059_v42, %v1063_v45  ;;  %v10452_v53 = vcombine.low %v1059_v42, %v1063_v45 }
 0x330   :  { %6623 = vmatpush2.bf16.msra.mxu1 %v10308_v51  ;;  %6649 = vmatprep.subr.bf16.mxu0 %v10365_v60  ;;  %v10517_v35 = vcombine.high %v1123_v18, %v1127_v46  ;;  %v1051_v51 = vld [vmem:[#allocation5 + $0x1748] sm:$0xff]  ;;  %v10516_v58 = vcombine.low %v1123_v18, %v1127_v46 }
 0x331   :  { %6624 = vmatprep.subr.bf16.mxu1 %v10301_v52  ;;  %v1055_v60 = vld [vmem:[#allocation5 + $0x1768] sm:$0xff] }
 0x332   :  { %v1115_v52 = vld [vmem:[#allocation5 + $0x1948] sm:$0xff] }
 0x333   :  { %6650 = vmatpush1.bf16.msra.mxu0 %v10364_v62  ;;  %v1119_v56 = vld [vmem:[#allocation5 + $0x1968] sm:$0xff]  ;;  %v10445_v62 = vcombine.high %v1051_v51, %v1055_v60 }
 0x334   :  { %6625 = vmatpush2.bf16.msra.mxu1 %v10300_v63  ;;  %6651 = vmatprep.subr.bf16.mxu0 %v10357_v10  ;;  %v10509_v10 = vcombine.high %v1115_v52, %v1119_v56  ;;  %v1047_v0 = vld [vmem:[#allocation5 + $0x1728] sm:$0xff] }
 0x335   :  { %6626 = vmatprep.subr.bf16.mxu1 %v10293_v2  ;;  %v1043_v2 = vld [vmem:[#allocation5 + $0x1708] sm:$0xff] }
 0x336   :  { %v1107_v17 = vld [vmem:[#allocation5 + $0x1908] sm:$0xff] }
 0x337   :  { %6652 = vmatpush1.bf16.msra.mxu0 %v10356_v11  ;;  %v1111_v43 = vld [vmem:[#allocation5 + $0x1928] sm:$0xff]  ;;  %v10444_v11 = vcombine.low %v1051_v51, %v1055_v60 }
 0x338   :  { %6627 = vmatpush2.bf16.msra.mxu1 %v10292_v21  ;;  %6653 = vmatprep.subr.bf16.mxu0 %v10349_v9  ;;  %v10508_v21 = vcombine.low %v1115_v52, %v1119_v56  ;;  %v10437_v9 = vcombine.high %v1043_v2, %v1047_v0  ;;  %v10501_v26 = vcombine.high %v1107_v17, %v1111_v43  ;;  %v1035_v54 = vld [vmem:[#allocation5 + $0x16c8] sm:$0xff] }
 0x339   :  { %6628 = vmatprep.subr.bf16.mxu1 %v10285_v12  ;;  %v1039_v16 = vld [vmem:[#allocation5 + $0x16e8] sm:$0xff] }
 0x33a   :  { %v1099_v13 = vld [vmem:[#allocation5 + $0x18c8] sm:$0xff] }
 0x33b   :  { %6654 = vmatpush1.bf16.msra.mxu0 %v10348_v22  ;;  %v1103_v22 = vld [vmem:[#allocation5 + $0x18e8] sm:$0xff] }
 0x33c   :  { %6629 = vmatpush2.bf16.msra.mxu1 %v10284_v23  ;;  %6655 = vmatprep.subr.bf16.mxu0 %v10341_v27  ;;  %v10436_v23 = vcombine.low %v1043_v2, %v1047_v0  ;;  %v10500_v27 = vcombine.low %v1107_v17, %v1111_v43  ;;  %v10493_v1 = vcombine.high %v1099_v13, %v1103_v22  ;;  %v1027_v14 = vld [vmem:[#allocation5 + $0x1688] sm:$0xff] }
 0x33d   :  { %6630 = vmatprep.subr.bf16.mxu1 %v10277_v59  ;;  %v10429_v59 = vcombine.high %v1035_v54, %v1039_v16  ;;  %v1031_v20 = vld [vmem:[#allocation5 + $0x16a8] sm:$0xff] }
 0x33e   :  { %v1091_v28 = vld [vmem:[#allocation5 + $0x1888] sm:$0xff] }
 0x33f   :  { %6656 = vmatpush1.bf16.msra.mxu0 %v10340_v32  ;;  %v1095_v32 = vld [vmem:[#allocation5 + $0x18a8] sm:$0xff] }
 0x340   :  { %6631 = vmatpush2.bf16.msra.mxu1 %v10276_v34  ;;  %6657 = vmatprep.subr.bf16.mxu0 %v10461_v36  ;;  %v10428_v34 = vcombine.low %v1035_v54, %v1039_v16  ;;  %v10492_v36 = vcombine.low %v1099_v13, %v1103_v22  ;;  %v10485_v42 = vcombine.high %v1091_v28, %v1095_v32  ;;  %v1019_v45 = vld [vmem:[#allocation5 + $0x1648] sm:$0xff] }
 0x341   :  { %6682 = vmatprep.subr.bf16.mxu1 %v10525_v37  ;;  %v10421_v37 = vcombine.high %v1027_v14, %v1031_v20  ;;  %v1023_v18 = vld [vmem:[#allocation5 + $0x1668] sm:$0xff] }
 0x342   :  { %v1083_v46 = vld [vmem:[#allocation5 + $0x1848] sm:$0xff] }
 0x343   :  { %v11939_v57 = vpop.f32.mrf.mxu1  ;;  %6633 = vmatmul.mubr.bf16.vlgmr.msra.gmra.mxu1 %v11883_v24  ;;  %6658 = vmatpush2.bf16.msra.mxu0 %v10460_v47  ;;  %v1087_v47 = vld [vmem:[#allocation5 + $0x1868] sm:$0xff] }
 0x344   :  { %6683 = vmatpush1.bf16.msra.mxu1 %v10524_v48  ;;  %6714 = vmatprep.mubr.bf16.mxu1 %v11890_v55  ;;  %v10420_v48 = vcombine.low %v1027_v14, %v1031_v20  ;;  %v10477_v51 = vcombine.high %v1083_v46, %v1087_v47  ;;  %v1011_v60 = vld [vmem:[#allocation5 + $0x1608] sm:$0xff] }
 0x345   :  { %v11943_v63 = vpop.f32.mrf.mxu1  ;;  %6659 = vmatprep.subr.bf16.mxu0 %v10453_v50  ;;  %6684 = vmatprep.subr.bf16.mxu1 %v10517_v35  ;;  %v10484_v50 = vcombine.low %v1091_v28, %v1095_v32  ;;  %v10413_v35 = vcombine.high %v1019_v45, %v1023_v18  ;;  %v1015_v52 = vld [vmem:[#allocation5 + $0x1628] sm:$0xff] }
 0x346   :  { %v1075_v56 = vld [vmem:[#allocation5 + $0x1808] sm:$0xff] }
 0x347   :  { %v6433_v6 = vpop.f32.mrf.mxu1  ;;  %6660 = vmatpush2.bf16.msra.mxu0 %v10452_v53  ;;  %v1079_v53 = vld [vmem:[#allocation5 + $0x1828] sm:$0xff] }
 0x348   :  { %6685 = vmatpush1.bf16.msra.mxu1 %v10516_v58  ;;  %6661 = vmatprep.subr.bf16.mxu0 %v10445_v62  ;;  %v10412_v58 = vcombine.low %v1019_v45, %v1023_v18  ;;  %v10476_v62 = vcombine.low %v1083_v46, %v1087_v47  ;;  %v10469_v2 = vcombine.high %v1075_v56, %v1079_v53  ;;  %v1259_v0 = vld [vmem:[#allocation5 + $0x1dc8] sm:$0xff] }
 0x349   :  { %v6434_v12 = vpop.f32.mrf.mxu1  ;;  %6686 = vmatprep.subr.bf16.mxu1 %v10509_v10  ;;  %v10405_v10 = vcombine.high %v1011_v60, %v1015_v52  ;;  %v1263_v17 = vld [vmem:[#allocation5 + $0x1de8] sm:$0xff] }
 0x34a   :  { %v1195_v43 = vld [vmem:[#allocation5 + $0x1bc8] sm:$0xff]  ;;  %v10652_v22 = vcombine.low %v1259_v0, %v1263_v17 }
 0x34b   :  { %6662 = vmatpush2.bf16.msra.mxu0 %v10444_v11  ;;  %v1199_v6 = vld [vmem:[#allocation5 + $0x1be8] sm:$0xff]  ;;  %v10404_v11 = vcombine.low %v1011_v60, %v1015_v52 }
 0x34c   :  { %6687 = vmatpush1.bf16.msra.mxu1 %v10508_v21  ;;  %6663 = vmatprep.subr.bf16.mxu0 %v10437_v9  ;;  %v10468_v21 = vcombine.low %v1075_v56, %v1079_v53  ;;  %v10653_v9 = vcombine.high %v1259_v0, %v1263_v17  ;;  %v10589_v12 = vcombine.high %v1195_v43, %v1199_v6  ;;  %v1255_v54 = vld [vmem:[#allocation5 + $0x1da8] sm:$0xff] }
 0x34d   :  { %6688 = vmatprep.subr.bf16.mxu1 %v10501_v26  ;;  %v1251_v26 = vld [vmem:[#allocation5 + $0x1d88] sm:$0xff] }
 0x34e   :  { %v1187_v16 = vld [vmem:[#allocation5 + $0x1b88] sm:$0xff] }
 0x34f   :  { %6664 = vmatpush2.bf16.msra.mxu0 %v10436_v23  ;;  %v1191_v13 = vld [vmem:[#allocation5 + $0x1ba8] sm:$0xff]  ;;  %v10588_v23 = vcombine.low %v1195_v43, %v1199_v6 }
 0x350   :  { %6689 = vmatpush1.bf16.msra.mxu1 %v10500_v27  ;;  %6665 = vmatprep.subr.bf16.mxu0 %v10429_v59  ;;  %v10645_v27 = vcombine.high %v1251_v26, %v1255_v54  ;;  %v10581_v59 = vcombine.high %v1187_v16, %v1191_v13  ;;  %v1247_v14 = vld [vmem:[#allocation5 + $0x1d68] sm:$0xff] }
 0x351   :  { %6690 = vmatprep.subr.bf16.mxu1 %v10493_v1  ;;  %v1243_v1 = vld [vmem:[#allocation5 + $0x1d48] sm:$0xff] }
 0x352   :  { %v1179_v28 = vld [vmem:[#allocation5 + $0x1b48] sm:$0xff]  ;;  %v10637_v45 = vcombine.high %v1243_v1, %v1247_v14  ;;  %v10636_v52 = vcombine.low %v1243_v1, %v1247_v14 }
 0x353   :  { %6666 = vmatpush2.bf16.msra.mxu0 %v10428_v34  ;;  %v1183_v32 = vld [vmem:[#allocation5 + $0x1b68] sm:$0xff] }
 0x354   :  { %6691 = vmatpush1.bf16.msra.mxu1 %v10492_v36  ;;  %6667 = vmatprep.subr.bf16.mxu0 %v10421_v37  ;;  %v10644_v36 = vcombine.low %v1251_v26, %v1255_v54  ;;  %v10573_v47 = vcombine.high %v1179_v28, %v1183_v32  ;;  %v10572_v53 = vcombine.low %v1179_v28, %v1183_v32  ;;  %v1219_v6 = vld [vmem:[#allocation5 + $0x1c88] sm:$0xff] }
 0x355   :  { %6692 = vmatprep.subr.bf16.mxu1 %v10485_v42  ;;  %v10580_v42 = vcombine.low %v1187_v16, %v1191_v13  ;;  %v1211_v13 = vld [vmem:[#allocation5 + $0x1c48] sm:$0xff] }
 0x356   :  { %v1203_v28 = vld [vmem:[#allocation5 + $0x1c08] sm:$0xff] }
 0x357   :  { %6668 = vmatpush2.bf16.msra.mxu0 %v10420_v48  ;;  %v1235_v48 = vld [vmem:[#allocation5 + $0x1d08] sm:$0xff] }
 0x358   :  { %6693 = vmatpush1.bf16.msra.mxu1 %v10484_v50  ;;  %6669 = vmatprep.subr.bf16.mxu0 %v10413_v35  ;;  %v1239_v50 = vld [vmem:[#allocation5 + $0x1d28] sm:$0xff] }
 0x359   :  { %6694 = vmatprep.subr.bf16.mxu1 %v10477_v51  ;;  %v1175_v51 = vld [vmem:[#allocation5 + $0x1b28] sm:$0xff]  ;;  %v10628_v0 = vcombine.low %v1235_v48, %v1239_v50 }
 0x35a   :  { %v1207_v32 = vld [vmem:[#allocation5 + $0x1c28] sm:$0xff] }
 0x35b   :  { %6670 = vmatpush2.bf16.msra.mxu0 %v10412_v58 }
 0x35c   :  { %6695 = vmatpush1.bf16.msra.mxu1 %v10476_v62  ;;  %6671 = vmatprep.subr.bf16.mxu0 %v10405_v10  ;;  %v1231_v62 = vld [vmem:[#allocation5 + $0x1ce8] sm:$0xff] }
 0x35d   :  { %6696 = vmatprep.subr.bf16.mxu1 %v10469_v2  ;;  %v1163_v10 = vld [vmem:[#allocation5 + $0x1ac8] sm:$0xff] }
 0x35e   :  { %v1167_v2 = vld [vmem:[#allocation5 + $0x1ae8] sm:$0xff] }
 0x35f   :  { %6672 = vmatpush2.bf16.msra.mxu0 %v10404_v11  ;;  %v10557_v43 = vcombine.high %v1163_v10, %v1167_v2  ;;  %v1223_v11 = vld [vmem:[#allocation5 + $0x1ca8] sm:$0xff]  ;;  %v10556_v26 = vcombine.low %v1163_v10, %v1167_v2 }
 0x360   :  { %6697 = vmatpush1.bf16.msra.mxu1 %v10468_v21  ;;  %6723 = vmatprep.subr.bf16.mxu0 %v10653_v9  ;;  %v1155_v21 = vld [vmem:[#allocation5 + $0x1a88] sm:$0xff]  ;;  %v10613_v54 = vcombine.high %v1219_v6, %v1223_v11 }
 0x361   :  { %6698 = vmatprep.subr.bf16.mxu1 %v10589_v12  ;;  %v1159_v9 = vld [vmem:[#allocation5 + $0x1aa8] sm:$0xff] }
 0x362   :  { %v6388_v20 = vpop.f32.mrf.mxu0  ;;  %6674 = vmatmul.mubr.bf16.vlgmr.msra.gmra.mxu0 %v11887_v49  ;;  %v10549_v16 = vcombine.high %v1155_v21, %v1159_v9  ;;  %v10548_v1 = vcombine.low %v1155_v21, %v1159_v9 }
 0x363   :  { %v6389_v34 = vadd.f32 %v6388_v20, %v11934_v19  ;;  %6724 = vmatpush1.bf16.msra.mxu0 %v10652_v22  ;;  %6755 = vmatprep.mubr.bf16.mxu0 %v11622_v4  ;;  %v1171_v19 = vld [vmem:[#allocation5 + $0x1b08] sm:$0xff] }
 0x364   :  { %6699 = vmatpush2.bf16.msra.mxu1 %v10588_v23  ;;  %v6390_v37 = vpop.f32.mrf.mxu0  ;;  %6725 = vmatprep.subr.bf16.mxu0 %v10645_v27  ;;  %v10565_v58 = vcombine.high %v1171_v19, %v1175_v51  ;;  %v10564_v17 = vcombine.low %v1171_v19, %v1175_v51  ;;  %v1215_v22 = vld [vmem:[#allocation5 + $0x1c68] sm:$0xff]  ;;  %v10596_v19 = vcombine.low %v1203_v28, %v1207_v32 }
 0x365   :  { %v11949_v18 = vadd.f32 %v11939_v57, %v6389_v34  ;;  %v6391_v46 = vadd.f32 %v6390_v37, %v11937_v31  ;;  %6700 = vmatprep.subr.bf16.mxu1 %v10581_v59  ;;  %v10629_v57 = vcombine.high %v1235_v48, %v1239_v50  ;;  %v1227_v31 = vld [vmem:[#allocation5 + $0x1cc8] sm:$0xff]  ;;  %v10612_v59 = vcombine.low %v1219_v6, %v1223_v11  ;;  %v368_v48 = vld [vmem:[#allocation5 + $0x1f0] sm:$0xff] }
 0x366   :  { %v6392_v35 = vpop.f32.mrf.mxu0  ;;  %v10620_v12 = vcombine.low %v1227_v31, %v1231_v62  ;;  %v1147_v23 = vld [vmem:[#allocation5 + $0x1a48] sm:$0xff]  ;;  %v10605_v14 = vcombine.high %v1211_v13, %v1215_v22  ;;  %v10604_v37 = vcombine.low %v1211_v13, %v1215_v22  ;;  %v492_v50 = vld [vmem:[#allocation5 + $0x5d0] sm:$0xff] }
 0x367   :  { %v11953_v60 = vadd.f32 %v11943_v63, %v6391_v46  ;;  %6726 = vmatpush1.bf16.msra.mxu0 %v10644_v36  ;;  %v10621_v63 = vcombine.high %v1227_v31, %v1231_v62  ;;  %v1151_v27 = vld [vmem:[#allocation5 + $0x1a68] sm:$0xff]  ;;  %v496_v35 = vld [vmem:[#allocation5 + $0x5f0] sm:$0xff] }
 0x368   :  { %6701 = vmatpush2.bf16.msra.mxu1 %v10580_v42  ;;  %v6393_v56 = vpop.f32.mrf.mxu0  ;;  %6727 = vmatprep.subr.bf16.mxu0 %v10637_v45  ;;  %v10541_v20 = vcombine.high %v1147_v23, %v1151_v27  ;;  %v1139_v34 = vld [vmem:[#allocation5 + $0x1a08] sm:$0xff]  ;;  %v10540_v42 = vcombine.low %v1147_v23, %v1151_v27  ;;  %v10597_v45 = vcombine.high %v1203_v28, %v1207_v32  ;;  %v484_v31 = vld [vmem:[#allocation5 + $0x590] sm:$0xff] }
 0x369   :  { %6702 = vmatprep.subr.bf16.mxu1 %v10573_v47  ;;  %v1143_v36 = vld [vmem:[#allocation5 + $0x1a28] sm:$0xff]  ;;  %v364_v47 = vld [vmem:[#allocation5 + $0x1d0] sm:$0xff]  ;;  %v9887_v56 = vcombine.high %v492_v50, %v496_v35  ;;  %v9886_v10 = vcombine.low %v492_v50, %v496_v35 }
 0x36a   :  { %v10533_v46 = vcombine.high %v1139_v34, %v1143_v36  ;;  %v10532_v51 = vcombine.low %v1139_v34, %v1143_v36  ;;  %v488_v62 = vld [vmem:[#allocation5 + $0x5b0] sm:$0xff] }
 0x36b   :  { %6728 = vmatpush1.bf16.msra.mxu0 %v10636_v52  ;;  %v9759_v52 = vcombine.high %v364_v47, %v368_v48  ;;  %v480_v6 = vld [vmem:[#allocation5 + $0x570] sm:$0xff]  ;;  %v9878_v9 = vcombine.low %v484_v31, %v488_v62 }
 0x36c   :  { %6703 = vmatpush2.bf16.msra.mxu1 %v10572_v53  ;;  %6729 = vmatprep.subr.bf16.mxu0 %v10629_v57  ;;  %v356_v53 = vld [vmem:[#allocation5 + $0x190] sm:$0xff] }
 0x36d   :  { %6704 = vmatprep.subr.bf16.mxu1 %v10565_v58  ;;  %v360_v57 = vld [vmem:[#allocation5 + $0x1b0] sm:$0xff]  ;;  %v9758_v58 = vcombine.low %v364_v47, %v368_v48 }
 0x36e   :  { %v9751_v2 = vcombine.high %v356_v53, %v360_v57  ;;  %v9750_v21 = vcombine.low %v356_v53, %v360_v57  ;;  %v344_v13 = vld [vmem:[#allocation5 + $0x130] sm:$0xff] }
 0x36f   :  { %6730 = vmatpush1.bf16.msra.mxu0 %v10628_v0  ;;  %v348_v0 = vld [vmem:[#allocation5 + $0x150] sm:$0xff] }
 0x370   :  { %6705 = vmatpush2.bf16.msra.mxu1 %v10564_v17  ;;  %6731 = vmatprep.subr.bf16.mxu0 %v10621_v63  ;;  %v352_v17 = vld [vmem:[#allocation5 + $0x170] sm:$0xff]  ;;  %v9879_v63 = vcombine.high %v484_v31, %v488_v62 }
 0x371   :  { %6706 = vmatprep.subr.bf16.mxu1 %v10557_v43  ;;  %v476_v43 = vld [vmem:[#allocation5 + $0x550] sm:$0xff] }
 0x372   :  { %v468_v22 = vld [vmem:[#allocation5 + $0x510] sm:$0xff] }
 0x373   :  { %6732 = vmatpush1.bf16.msra.mxu0 %v10620_v12  ;;  %v9743_v12 = vcombine.high %v348_v0, %v352_v17  ;;  %v472_v23 = vld [vmem:[#allocation5 + $0x530] sm:$0xff] }
 0x374   :  { %6707 = vmatpush2.bf16.msra.mxu1 %v10556_v26  ;;  %6733 = vmatprep.subr.bf16.mxu0 %v10613_v54  ;;  %v9871_v54 = vcombine.high %v476_v43, %v480_v6  ;;  %v9863_v28 = vcombine.high %v468_v22, %v472_v23  ;;  %v332_v32 = vld [vmem:[#allocation5 + $0xd0] sm:$0xff] }
 0x375   :  { %6708 = vmatprep.subr.bf16.mxu1 %v10549_v16  ;;  %v340_v16 = vld [vmem:[#allocation5 + $0x110] sm:$0xff] }
 0x376   :  { %v336_v34 = vld [vmem:[#allocation5 + $0xf0] sm:$0xff] }
 0x377   :  { %6734 = vmatpush1.bf16.msra.mxu0 %v10612_v59  ;;  %v9742_v59 = vcombine.low %v348_v0, %v352_v17  ;;  %v460_v36 = vld [vmem:[#allocation5 + $0x4d0] sm:$0xff] }
 0x378   :  { %6709 = vmatpush2.bf16.msra.mxu1 %v10548_v1  ;;  %6735 = vmatprep.subr.bf16.mxu0 %v10605_v14  ;;  %v9870_v1 = vcombine.low %v476_v43, %v480_v6  ;;  %v9735_v14 = vcombine.high %v340_v16, %v344_v13  ;;  %v324_v48 = vld [vmem:[#allocation5 + $0x90] sm:$0xff] }
 0x379   :  { %6710 = vmatprep.subr.bf16.mxu1 %v10541_v20  ;;  %v328_v50 = vld [vmem:[#allocation5 + $0xb0] sm:$0xff] }
 0x37a   :  { %v452_v35 = vld [vmem:[#allocation5 + $0x490] sm:$0xff] }
 0x37b   :  { %6736 = vmatpush1.bf16.msra.mxu0 %v10604_v37  ;;  %v464_v37 = vld [vmem:[#allocation5 + $0x4f0] sm:$0xff] }
 0x37c   :  { %6711 = vmatpush2.bf16.msra.mxu1 %v10540_v42  ;;  %6737 = vmatprep.subr.bf16.mxu0 %v10597_v45  ;;  %v9734_v42 = vcombine.low %v340_v16, %v344_v13  ;;  %v9862_v45 = vcombine.low %v468_v22, %v472_v23  ;;  %v9855_v47 = vcombine.high %v460_v36, %v464_v37  ;;  %v316_v57 = vld [vmem:[#allocation5 + $0x50] sm:$0xff]  ;;  %v1278_v16 = vsub.s32 2, %v11901_v7 }
 0x37d   :  { %6712 = vmatprep.subr.bf16.mxu1 %v10533_v46  ;;  %v9727_v46 = vcombine.high %v332_v32, %v336_v34  ;;  %v444_v31 = vld [vmem:[#allocation5 + $0x450] sm:$0xff] }
 0x37e   :  { %v448_v62 = vld [vmem:[#allocation5 + $0x470] sm:$0xff] }
 0x37f   :  { %6738 = vmatpush1.bf16.msra.mxu0 %v10596_v19  ;;  %v456_v19 = vld [vmem:[#allocation5 + $0x4b0] sm:$0xff]  ;;  %v9839_v17 = vcombine.high %v444_v31, %v448_v62 }
 0x380   :  { %6713 = vmatpush2.bf16.msra.mxu1 %v10532_v51  ;;  %6764 = vmatprep.subr.bf16.mxu0 %v9759_v52  ;;  %v9726_v51 = vcombine.low %v332_v32, %v336_v34  ;;  %v9854_v52 = vcombine.low %v460_v36, %v464_v37  ;;  %v9847_v53 = vcombine.high %v452_v35, %v456_v19  ;;  %v312_v43 = vld [vmem:[#allocation5 + $0x30] sm:$0xff]  ;;  %v11436_v32 = vld [vmem:[#allocation7] sm:$0xff] }
 0x381   :  { %6805 = vmatprep.subr.bf16.mxu1 %v9887_v56  ;;  %v9719_v56 = vcombine.high %v324_v48, %v328_v50  ;;  %v436_v6 = vld [vmem:[#allocation5 + $0x410] sm:$0xff]  ;;  %v1279_v34 = vrot.slane %v11436_v32, %v1278_v16 }
 0x382   :  { %6756 = vmatmul.mubr.bf16.vlgmr.msra.gmra.mxu0 %v11897_v5  ;;  %v428_v22 = vld [vmem:[#allocation5 + $0x3d0] sm:$0xff] }
 0x383   :  { %v11956_v11 = vpop.f32.mrf.mxu1  ;;  %6715 = vmatmul.mubr.bf16.vlgmr.msra.gmra.mxu1 %v11909_v33  ;;  %6765 = vmatpush1.bf16.msra.mxu0 %v9758_v58  ;;  %v320_v58 = vld [vmem:[#allocation5 + $0x70] sm:$0xff] }
 0x384   :  { %6796 = vmatprep.mubr.bf16.mxu0 %v11829_v29  ;;  %6806 = vmatpush1.bf16.msra.mxu1 %v9886_v10  ;;  %v9718_v10 = vcombine.low %v324_v48, %v328_v50  ;;  %v9711_v0 = vcombine.high %v316_v57, %v320_v58  ;;  %v432_v23 = vld [vmem:[#allocation5 + $0x3f0] sm:$0xff] }
 0x385   :  { %6837 = vmatprep.mubr.bf16.mxu1 %v11831_v61  ;;  %v11961_v26 = vpop.f32.mrf.mxu1  ;;  %6766 = vmatprep.subr.bf16.mxu0 %v9751_v2  ;;  %v9846_v2 = vcombine.low %v452_v35, %v456_v19  ;;  %v420_v37 = vld [vmem:[#allocation5 + $0x390] sm:$0xff]  ;;  %v9822_v48 = vcombine.low %v428_v22, %v432_v23  ;;  %v6471_v19 = vadd.f32 %v11956_v11, %v1279_v34 }
 0x386   :  { %6807 = vmatprep.subr.bf16.mxu1 %v9879_v63  ;;  %v308_v63 = vld [vmem:[#allocation5 + $0x10] sm:$0xff] }
 0x387   :  { %v6474_v27 = vpop.f32.mrf.mxu1  ;;  %6767 = vmatpush1.bf16.msra.mxu0 %v9750_v21  ;;  %v440_v21 = vld [vmem:[#allocation5 + $0x430] sm:$0xff] }
 0x388   :  { %6808 = vmatpush1.bf16.msra.mxu1 %v9878_v9  ;;  %6768 = vmatprep.subr.bf16.mxu0 %v9743_v12  ;;  %v9710_v9 = vcombine.low %v316_v57, %v320_v58  ;;  %v9838_v12 = vcombine.low %v444_v31, %v448_v62  ;;  %v9831_v13 = vcombine.high %v436_v6, %v440_v21  ;;  %v556_v27 = vld [vmem:[#allocation5 + $0x7d0] sm:$0xff] }
 0x389   :  { %v6475_v20 = vpop.f32.mrf.mxu1  ;;  %6809 = vmatprep.subr.bf16.mxu1 %v9871_v54  ;;  %v9703_v54 = vcombine.high %v308_v63, %v312_v43  ;;  %v540_v57 = vld [vmem:[#allocation5 + $0x750] sm:$0xff] }
 0x38a   :  { %v9830_v20 = vcombine.low %v436_v6, %v440_v21  ;;  %v544_v58 = vld [vmem:[#allocation5 + $0x770] sm:$0xff] }
 0x38b   :  { %6769 = vmatpush1.bf16.msra.mxu0 %v9742_v59  ;;  %v560_v59 = vld [vmem:[#allocation5 + $0x7f0] sm:$0xff]  ;;  %v9935_v11 = vcombine.high %v540_v57, %v544_v58 }
 0x38c   :  { %6810 = vmatpush1.bf16.msra.mxu1 %v9870_v1  ;;  %6770 = vmatprep.subr.bf16.mxu0 %v9735_v14  ;;  %v1282_v1 = vsub.s32 3, %v11901_v7  ;;  %v9702_v14 = vcombine.low %v308_v63, %v312_v43  ;;  %v9951_v36 = vcombine.high %v556_v27, %v560_v59  ;;  %v9950_v50 = vcombine.low %v556_v27, %v560_v59  ;;  %v404_v43 = vld [vmem:[#allocation5 + $0x310] sm:$0xff] }
 0x38d   :  { %6811 = vmatprep.subr.bf16.mxu1 %v9863_v28  ;;  %v9823_v28 = vcombine.high %v428_v22, %v432_v23  ;;  %v408_v6 = vld [vmem:[#allocation5 + $0x330] sm:$0xff] }
 0x38e   :  { %v9799_v22 = vcombine.high %v404_v43, %v408_v6  ;;  %v396_v27 = vld [vmem:[#allocation5 + $0x2d0] sm:$0xff] }
 0x38f   :  { %6771 = vmatpush1.bf16.msra.mxu0 %v9734_v42  ;;  %v424_v42 = vld [vmem:[#allocation5 + $0x3b0] sm:$0xff] }
 0x390   :  { %6812 = vmatpush1.bf16.msra.mxu1 %v9862_v45  ;;  %6772 = vmatprep.subr.bf16.mxu0 %v9727_v46  ;;  %v548_v45 = vld [vmem:[#allocation5 + $0x790] sm:$0xff]  ;;  %v9815_v35 = vcombine.high %v420_v37, %v424_v42 }
 0x391   :  { %6813 = vmatprep.subr.bf16.mxu1 %v9855_v47  ;;  %v552_v46 = vld [vmem:[#allocation5 + $0x7b0] sm:$0xff]  ;;  %v1283_v47 = vrot.slane %v11436_v32, %v1282_v1 }
 0x392   :  { %v400_v59 = vld [vmem:[#allocation5 + $0x2f0] sm:$0xff] }
 0x393   :  { %6773 = vmatpush1.bf16.msra.mxu0 %v9726_v51  ;;  %v9943_v51 = vcombine.high %v548_v45, %v552_v46  ;;  %v6473_v31 = vadd.f32 %v11961_v26, %v1283_v47  ;;  %v9791_v34 = vcombine.high %v396_v27, %v400_v59  ;;  %v9790_v47 = vcombine.low %v396_v27, %v400_v59  ;;  %v612_v59 = vld [vmem:[#allocation5 + $0x990] sm:$0xff] }
 0x394   :  { %6814 = vmatpush1.bf16.msra.mxu1 %v9854_v52  ;;  %6774 = vmatprep.subr.bf16.mxu0 %v9719_v56  ;;  %v412_v52 = vld [vmem:[#allocation5 + $0x350] sm:$0xff] }
 0x395   :  { %6815 = vmatprep.subr.bf16.mxu1 %v9847_v53  ;;  %v416_v56 = vld [vmem:[#allocation5 + $0x370] sm:$0xff] }
 0x396   :  { %v9806_v26 = vcombine.low %v412_v52, %v416_v56 }
 0x397   :  { %6775 = vmatpush1.bf16.msra.mxu0 %v9718_v10  ;;  %v9814_v10 = vcombine.low %v420_v37, %v424_v42  ;;  %v388_v37 = vld [vmem:[#allocation5 + $0x290] sm:$0xff] }
 0x398   :  { %6816 = vmatpush1.bf16.msra.mxu1 %v9846_v2  ;;  %6776 = vmatprep.subr.bf16.mxu0 %v9711_v0  ;;  %v9942_v0 = vcombine.low %v548_v45, %v552_v46  ;;  %v392_v42 = vld [vmem:[#allocation5 + $0x2b0] sm:$0xff] }
 0x399   :  { %6817 = vmatprep.subr.bf16.mxu1 %v9839_v17  ;;  %v9807_v17 = vcombine.high %v412_v52, %v416_v56  ;;  %v516_v45 = vld [vmem:[#allocation5 + $0x690] sm:$0xff] }
 0x39a   :  { %v520_v46 = vld [vmem:[#allocation5 + $0x6b0] sm:$0xff] }
 0x39b   :  { %6777 = vmatpush1.bf16.msra.mxu0 %v9710_v9  ;;  %v532_v9 = vld [vmem:[#allocation5 + $0x710] sm:$0xff] }
 0x39c   :  { %6818 = vmatpush1.bf16.msra.mxu1 %v9838_v12  ;;  %6778 = vmatprep.subr.bf16.mxu0 %v9703_v54  ;;  %v536_v12 = vld [vmem:[#allocation5 + $0x730] sm:$0xff] }
 0x39d   :  { %6819 = vmatprep.subr.bf16.mxu1 %v9831_v13  ;;  %v9934_v13 = vcombine.low %v540_v57, %v544_v58  ;;  %v9927_v23 = vcombine.high %v532_v9, %v536_v12  ;;  %v9926_v32 = vcombine.low %v532_v9, %v536_v12  ;;  %v508_v52 = vld [vmem:[#allocation5 + $0x650] sm:$0xff]  ;;  %v9910_v57 = vcombine.low %v516_v45, %v520_v46 }
 0x39e   :  { %v512_v56 = vld [vmem:[#allocation5 + $0x670] sm:$0xff] }
 0x39f   :  { %6779 = vmatpush1.bf16.msra.mxu0 %v9702_v14  ;;  %v524_v14 = vld [vmem:[#allocation5 + $0x6d0] sm:$0xff] }
 0x3a0   :  { %6820 = vmatpush1.bf16.msra.mxu1 %v9830_v20  ;;  %6780 = vmatprep.subr.bf16.mxu0 %v9823_v28  ;;  %v528_v20 = vld [vmem:[#allocation5 + $0x6f0] sm:$0xff]  ;;  %v9798_v28 = vcombine.low %v404_v43, %v408_v6  ;;  %v9902_v43 = vcombine.low %v508_v52, %v512_v56 }
 0x3a1   :  { %6821 = vmatprep.subr.bf16.mxu1 %v9951_v36  ;;  %v9919_v36 = vcombine.high %v524_v14, %v528_v20  ;;  %v620_v9 = vld [vmem:[#allocation5 + $0x9d0] sm:$0xff] }
 0x3a2   :  { %v6511_v53 = vpop.f32.mrf.mxu0  ;;  %v624_v12 = vld [vmem:[#allocation5 + $0x9f0] sm:$0xff] }
 0x3a3   :  { %v11971_v62 = vadd.f32 %v6511_v53, %v6471_v19  ;;  %6781 = vmatpush2.bf16.msra.mxu0 %v9822_v48  ;;  %v9918_v48 = vcombine.low %v524_v14, %v528_v20  ;;  %v380_v19 = vld [vmem:[#allocation5 + $0x250] sm:$0xff]  ;;  %v9782_v53 = vcombine.low %v388_v37, %v392_v42  ;;  %v10014_v20 = vcombine.low %v620_v9, %v624_v12 }
 0x3a4   :  { %6822 = vmatpush2.bf16.msra.mxu1 %v9950_v50  ;;  %v6513_v2 = vpop.f32.mrf.mxu0  ;;  %6782 = vmatprep.subr.bf16.mxu0 %v9815_v35  ;;  %v9783_v50 = vcombine.high %v388_v37, %v392_v42  ;;  %v9911_v35 = vcombine.high %v516_v45, %v520_v46  ;;  %v616_v14 = vld [vmem:[#allocation5 + $0x9b0] sm:$0xff] }
 0x3a5   :  { %v11973_v63 = vadd.f32 %v6513_v2, %v6473_v31  ;;  %6823 = vmatprep.subr.bf16.mxu1 %v9943_v51  ;;  %v384_v51 = vld [vmem:[#allocation5 + $0x270] sm:$0xff]  ;;  %v9903_v31 = vcombine.high %v508_v52, %v512_v56 }
 0x3a6   :  { %v6515_v21 = vpop.f32.mrf.mxu0  ;;  %v9775_v58 = vcombine.high %v380_v19, %v384_v51  ;;  %v376_v2 = vld [vmem:[#allocation5 + $0x230] sm:$0xff] }
 0x3a7   :  { %6783 = vmatpush2.bf16.msra.mxu0 %v9814_v10  ;;  %v372_v10 = vld [vmem:[#allocation5 + $0x210] sm:$0xff] }
 0x3a8   :  { %6824 = vmatpush2.bf16.msra.mxu1 %v9942_v0  ;;  %v6516_v54 = vpop.f32.mrf.mxu0  ;;  %6784 = vmatprep.subr.bf16.mxu0 %v9807_v17  ;;  %v500_v0 = vld [vmem:[#allocation5 + $0x610] sm:$0xff]  ;;  %v9767_v6 = vcombine.high %v372_v10, %v376_v2 }
 0x3a9   :  { %6825 = vmatprep.subr.bf16.mxu1 %v9935_v11  ;;  %v504_v17 = vld [vmem:[#allocation5 + $0x630] sm:$0xff]  ;;  %v9774_v11 = vcombine.low %v380_v19, %v384_v51 }
 0x3aa   :  { %v9895_v21 = vcombine.high %v500_v0, %v504_v17  ;;  %v752_v54 = vld [vmem:[#allocation5 + $0xdf0] sm:$0xff] }
 0x3ab   :  { %6785 = vmatpush2.bf16.msra.mxu0 %v9806_v26  ;;  %v748_v26 = vld [vmem:[#allocation5 + $0xdd0] sm:$0xff] }
 0x3ac   :  { %6826 = vmatpush2.bf16.msra.mxu1 %v9934_v13  ;;  %6786 = vmatprep.subr.bf16.mxu0 %v9799_v22  ;;  %v9766_v13 = vcombine.low %v372_v10, %v376_v2  ;;  %v9894_v22 = vcombine.low %v500_v0, %v504_v17  ;;  %v10143_v27 = vcombine.high %v748_v26, %v752_v54  ;;  %v604_v37 = vld [vmem:[#allocation5 + $0x950] sm:$0xff] }
 0x3ad   :  { %6827 = vmatprep.subr.bf16.mxu1 %v9927_v23  ;;  %v10015_v23 = vcombine.high %v620_v9, %v624_v12  ;;  %v608_v42 = vld [vmem:[#allocation5 + $0x970] sm:$0xff] }
 0x3ae   :  { %v732_v46 = vld [vmem:[#allocation5 + $0xd50] sm:$0xff]  ;;  %v9999_v51 = vcombine.high %v604_v37, %v608_v42  ;;  %v9998_v2 = vcombine.low %v604_v37, %v608_v42 }
 0x3af   :  { %6787 = vmatpush2.bf16.msra.mxu0 %v9798_v28  ;;  %v740_v28 = vld [vmem:[#allocation5 + $0xd90] sm:$0xff] }
 0x3b0   :  { %6828 = vmatpush2.bf16.msra.mxu1 %v9926_v32  ;;  %6788 = vmatprep.subr.bf16.mxu0 %v9791_v34  ;;  %v744_v32 = vld [vmem:[#allocation5 + $0xdb0] sm:$0xff]  ;;  %v10142_v34 = vcombine.low %v748_v26, %v752_v54 }
 0x3b1   :  { %6829 = vmatprep.subr.bf16.mxu1 %v9919_v36  ;;  %v10007_v36 = vcombine.high %v612_v59, %v616_v14  ;;  %v10135_v45 = vcombine.high %v740_v28, %v744_v32  ;;  %v10134_v19 = vcombine.low %v740_v28, %v744_v32  ;;  %v728_v10 = vld [vmem:[#allocation5 + $0xd30] sm:$0xff] }
 0x3b2   :  { %v716_v9 = vld [vmem:[#allocation5 + $0xcd0] sm:$0xff] }
 0x3b3   :  { %6789 = vmatpush2.bf16.msra.mxu0 %v9790_v47  ;;  %v736_v47 = vld [vmem:[#allocation5 + $0xd70] sm:$0xff] }
 0x3b4   :  { %6830 = vmatpush2.bf16.msra.mxu1 %v9918_v48  ;;  %6790 = vmatprep.subr.bf16.mxu0 %v9783_v50  ;;  %v10006_v50 = vcombine.low %v612_v59, %v616_v14  ;;  %v10127_v56 = vcombine.high %v732_v46, %v736_v47  ;;  %v10126_v0 = vcombine.low %v732_v46, %v736_v47  ;;  %v720_v12 = vld [vmem:[#allocation5 + $0xcf0] sm:$0xff] }
 0x3b5   :  { %6831 = vmatprep.subr.bf16.mxu1 %v9911_v35  ;;  %v712_v59 = vld [vmem:[#allocation5 + $0xcb0] sm:$0xff] }
 0x3b6   :  { %v700_v37 = vld [vmem:[#allocation5 + $0xc50] sm:$0xff] }
 0x3b7   :  { %6791 = vmatpush2.bf16.msra.mxu0 %v9782_v53  ;;  %v596_v53 = vld [vmem:[#allocation5 + $0x910] sm:$0xff] }
 0x3b8   :  { %6832 = vmatpush2.bf16.msra.mxu1 %v9910_v57  ;;  %6792 = vmatprep.subr.bf16.mxu0 %v9775_v58  ;;  %v600_v57 = vld [vmem:[#allocation5 + $0x930] sm:$0xff] }
 0x3b9   :  { %6833 = vmatprep.subr.bf16.mxu1 %v9903_v31  ;;  %v724_v31 = vld [vmem:[#allocation5 + $0xd10] sm:$0xff]  ;;  %v9991_v17 = vcombine.high %v596_v53, %v600_v57 }
 0x3ba   :  { %v10118_v26 = vcombine.low %v724_v31, %v728_v10  ;;  %v704_v42 = vld [vmem:[#allocation5 + $0xc70] sm:$0xff] }
 0x3bb   :  { %6793 = vmatpush2.bf16.msra.mxu0 %v9774_v11 }
 0x3bc   :  { %6834 = vmatpush2.bf16.msra.mxu1 %v9902_v43  ;;  %6794 = vmatprep.subr.bf16.mxu0 %v9767_v6  ;;  %v10119_v43 = vcombine.high %v724_v31, %v728_v10  ;;  %v588_v6 = vld [vmem:[#allocation5 + $0x8d0] sm:$0xff] }
 0x3bd   :  { %6835 = vmatprep.subr.bf16.mxu1 %v9895_v21  ;;  %v592_v21 = vld [vmem:[#allocation5 + $0x8f0] sm:$0xff] }
 0x3be   :  { %v9983_v54 = vcombine.high %v588_v6, %v592_v21  ;;  %v9982_v14 = vcombine.low %v588_v6, %v592_v21  ;;  %v684_v10 = vld [vmem:[#allocation5 + $0xbd0] sm:$0xff] }
 0x3bf   :  { %6795 = vmatpush2.bf16.msra.mxu0 %v9766_v13  ;;  %v10111_v13 = vcombine.high %v716_v9, %v720_v12  ;;  %v676_v21 = vld [vmem:[#allocation5 + $0xb90] sm:$0xff] }
 0x3c0   :  { %6836 = vmatpush2.bf16.msra.mxu1 %v9894_v22  ;;  %6846 = vmatprep.subr.bf16.mxu0 %v10015_v23  ;;  %v580_v22 = vld [vmem:[#allocation5 + $0x890] sm:$0xff] }
 0x3c1   :  { %6887 = vmatprep.subr.bf16.mxu1 %v10143_v27  ;;  %v584_v23 = vld [vmem:[#allocation5 + $0x8b0] sm:$0xff] }
 0x3c2   :  { %6797 = vmatmul.mubr.bf16.vlgmr.msra.gmra.mxu0 %v11833_v30  ;;  %v708_v27 = vld [vmem:[#allocation5 + $0xc90] sm:$0xff]  ;;  %v9975_v28 = vcombine.high %v580_v22, %v584_v23 }
 0x3c3   :  { %v6552_v48 = vpop.f32.mrf.mxu1  ;;  %6838 = vmatmul.mubr.bf16.vlgmr.msra.gmra.mxu1 %v11835_v3  ;;  %6847 = vmatpush1.bf16.msra.mxu0 %v10014_v20  ;;  %v10110_v20 = vcombine.low %v716_v9, %v720_v12  ;;  %v10103_v32 = vcombine.high %v708_v27, %v712_v59  ;;  %v10102_v46 = vcombine.low %v708_v27, %v712_v59  ;;  %v680_v9 = vld [vmem:[#allocation5 + $0xbb0] sm:$0xff] }
 0x3c4   :  { %v11978_v35 = vadd.f32 %v6552_v48, %v11971_v62  ;;  %6878 = vmatprep.mubr.bf16.mxu0 %v11841_v38  ;;  %6888 = vmatpush1.bf16.msra.mxu1 %v10142_v34  ;;  %v572_v34 = vld [vmem:[#allocation5 + $0x850] sm:$0xff]  ;;  %v10095_v48 = vcombine.high %v700_v37, %v704_v42 }
 0x3c5   :  { %6919 = vmatprep.mubr.bf16.mxu1 %v11843_v41  ;;  %v6554_v52 = vpop.f32.mrf.mxu1  ;;  %6848 = vmatprep.subr.bf16.mxu0 %v10007_v36  ;;  %v576_v36 = vld [vmem:[#allocation5 + $0x870] sm:$0xff] }
 0x3c6   :  { %v11983_v58 = vadd.f32 %v6554_v52, %v11973_v63  ;;  %6889 = vmatprep.subr.bf16.mxu1 %v10135_v45  ;;  %v9990_v63 = vcombine.low %v596_v53, %v600_v57  ;;  %v9974_v45 = vcombine.low %v580_v22, %v584_v23  ;;  %v9967_v47 = vcombine.high %v572_v34, %v576_v36  ;;  %v696_v52 = vld [vmem:[#allocation5 + $0xc30] sm:$0xff] }
 0x3c7   :  { %v6556_v62 = vpop.f32.mrf.mxu1  ;;  %6849 = vmatpush1.bf16.msra.mxu0 %v10006_v50  ;;  %v564_v50 = vld [vmem:[#allocation5 + $0x810] sm:$0xff]  ;;  %v10094_v53 = vcombine.low %v700_v37, %v704_v42 }
 0x3c8   :  { %6890 = vmatpush1.bf16.msra.mxu1 %v10134_v19  ;;  %6850 = vmatprep.subr.bf16.mxu0 %v9999_v51  ;;  %v568_v19 = vld [vmem:[#allocation5 + $0x830] sm:$0xff] }
 0x3c9   :  { %v6557_v11 = vpop.f32.mrf.mxu1  ;;  %6891 = vmatprep.subr.bf16.mxu1 %v10127_v56  ;;  %v692_v51 = vld [vmem:[#allocation5 + $0xc10] sm:$0xff]  ;;  %v9966_v56 = vcombine.low %v572_v34, %v576_v36  ;;  %v9959_v57 = vcombine.high %v564_v50, %v568_v19 }
 0x3ca   :  { %v10087_v31 = vcombine.high %v692_v51, %v696_v52  ;;  %v688_v62 = vld [vmem:[#allocation5 + $0xbf0] sm:$0xff]  ;;  %v10086_v11 = vcombine.low %v692_v51, %v696_v52 }
 0x3cb   :  { %6851 = vmatpush1.bf16.msra.mxu0 %v9998_v2  ;;  %v812_v2 = vld [vmem:[#allocation5 + $0xfd0] sm:$0xff] }
 0x3cc   :  { %6892 = vmatpush1.bf16.msra.mxu1 %v10126_v0  ;;  %6852 = vmatprep.subr.bf16.mxu0 %v9991_v17  ;;  %v816_v0 = vld [vmem:[#allocation5 + $0xff0] sm:$0xff]  ;;  %v9958_v17 = vcombine.low %v564_v50, %v568_v19 }
 0x3cd   :  { %6893 = vmatprep.subr.bf16.mxu1 %v10119_v43  ;;  %v10079_v43 = vcombine.high %v684_v10, %v688_v62  ;;  %v10207_v6 = vcombine.high %v812_v2, %v816_v0  ;;  %v804_v12 = vld [vmem:[#allocation5 + $0xf90] sm:$0xff] }
 0x3ce   :  { %v668_v23 = vld [vmem:[#allocation5 + $0xb50] sm:$0xff] }
 0x3cf   :  { %6853 = vmatpush1.bf16.msra.mxu0 %v9990_v63  ;;  %v808_v63 = vld [vmem:[#allocation5 + $0xfb0] sm:$0xff] }
 0x3d0   :  { %6894 = vmatpush1.bf16.msra.mxu1 %v10118_v26  ;;  %6854 = vmatprep.subr.bf16.mxu0 %v9983_v54  ;;  %v10078_v26 = vcombine.low %v684_v10, %v688_v62  ;;  %v10206_v54 = vcombine.low %v812_v2, %v816_v0  ;;  %v10199_v22 = vcombine.high %v804_v12, %v808_v63  ;;  %v672_v27 = vld [vmem:[#allocation5 + $0xb70] sm:$0xff] }
 0x3d1   :  { %6895 = vmatprep.subr.bf16.mxu1 %v10111_v13  ;;  %v10071_v13 = vcombine.high %v676_v21, %v680_v9  ;;  %v10198_v36 = vcombine.low %v804_v12, %v808_v63  ;;  %v10063_v37 = vcombine.high %v668_v23, %v672_v27  ;;  %v788_v50 = vld [vmem:[#allocation5 + $0xf10] sm:$0xff] }
 0x3d2   :  { %v792_v19 = vld [vmem:[#allocation5 + $0xf30] sm:$0xff] }
 0x3d3   :  { %6855 = vmatpush1.bf16.msra.mxu0 %v9982_v14  ;;  %v796_v14 = vld [vmem:[#allocation5 + $0xf50] sm:$0xff]  ;;  %v10182_v2 = vcombine.low %v788_v50, %v792_v19 }
 0x3d4   :  { %6896 = vmatpush1.bf16.msra.mxu1 %v10110_v20  ;;  %6856 = vmatprep.subr.bf16.mxu0 %v9975_v28  ;;  %v800_v20 = vld [vmem:[#allocation5 + $0xf70] sm:$0xff] }
 0x3d5   :  { %6897 = vmatprep.subr.bf16.mxu1 %v10103_v32  ;;  %v10070_v32 = vcombine.low %v676_v21, %v680_v9  ;;  %v10190_v52 = vcombine.low %v796_v14, %v800_v20  ;;  %v784_v10 = vld [vmem:[#allocation5 + $0xef0] sm:$0xff] }
 0x3d6   :  { %v776_v21 = vld [vmem:[#allocation5 + $0xeb0] sm:$0xff] }
 0x3d7   :  { %6857 = vmatpush1.bf16.msra.mxu0 %v9974_v45  ;;  %v10191_v45 = vcombine.high %v796_v14, %v800_v20 }
 0x3d8   :  { %6898 = vmatpush1.bf16.msra.mxu1 %v10102_v46  ;;  %6858 = vmatprep.subr.bf16.mxu0 %v9967_v47  ;;  %v660_v46 = vld [vmem:[#allocation5 + $0xb10] sm:$0xff] }
 0x3d9   :  { %6899 = vmatprep.subr.bf16.mxu1 %v10095_v48  ;;  %v664_v47 = vld [vmem:[#allocation5 + $0xb30] sm:$0xff] }
 0x3da   :  { %v10054_v62 = vcombine.low %v660_v46, %v664_v47 }
 0x3db   :  { %6859 = vmatpush1.bf16.msra.mxu0 %v9966_v56  ;;  %v10055_v56 = vcombine.high %v660_v46, %v664_v47 }
 0x3dc   :  { %6900 = vmatpush1.bf16.msra.mxu1 %v10094_v53  ;;  %6860 = vmatprep.subr.bf16.mxu0 %v9959_v57  ;;  %v10183_v53 = vcombine.high %v788_v50, %v792_v19  ;;  %v652_v57 = vld [vmem:[#allocation5 + $0xad0] sm:$0xff] }
 0x3dd   :  { %6901 = vmatprep.subr.bf16.mxu1 %v10087_v31  ;;  %v656_v31 = vld [vmem:[#allocation5 + $0xaf0] sm:$0xff] }
 0x3de   :  { %v10047_v0 = vcombine.high %v652_v57, %v656_v31  ;;  %v10046_v9 = vcombine.low %v652_v57, %v656_v31  ;;  %v876_v50 = vld [vmem:[#allocation5 + $0x11d0] sm:$0xff] }
 0x3df   :  { %6861 = vmatpush1.bf16.msra.mxu0 %v9958_v17  ;;  %v880_v19 = vld [vmem:[#allocation5 + $0x11f0] sm:$0xff] }
 0x3e0   :  { %6902 = vmatpush1.bf16.msra.mxu1 %v10086_v11  ;;  %6862 = vmatprep.subr.bf16.mxu0 %v10079_v43  ;;  %v644_v11 = vld [vmem:[#allocation5 + $0xa90] sm:$0xff] }
 0x3e1   :  { %6903 = vmatprep.subr.bf16.mxu1 %v10207_v6  ;;  %v648_v43 = vld [vmem:[#allocation5 + $0xab0] sm:$0xff] }
 0x3e2   :  { %v6593_v59 = vpop.f32.mrf.mxu0  ;;  %v772_v6 = vld [vmem:[#allocation5 + $0xe90] sm:$0xff]  ;;  %v10039_v63 = vcombine.high %v644_v11, %v648_v43 }
 0x3e3   :  { %v11986_v28 = vadd.f32 %v6593_v59, %v11978_v35  ;;  %6863 = vmatpush2.bf16.msra.mxu0 %v10078_v26  ;;  %v10062_v35 = vcombine.low %v668_v23, %v672_v27  ;;  %v10167_v26 = vcombine.high %v772_v6, %v776_v21  ;;  %v768_v23 = vld [vmem:[#allocation5 + $0xe70] sm:$0xff]  ;;  %v10038_v27 = vcombine.low %v644_v11, %v648_v43 }
 0x3e4   :  { %6904 = vmatpush2.bf16.msra.mxu1 %v10206_v54  ;;  %v6595_v34 = vpop.f32.mrf.mxu0  ;;  %6864 = vmatprep.subr.bf16.mxu0 %v10071_v13  ;;  %v636_v54 = vld [vmem:[#allocation5 + $0xa50] sm:$0xff]  ;;  %v10166_v59 = vcombine.low %v772_v6, %v776_v21 }
 0x3e5   :  { %v11989_v42 = vadd.f32 %v6595_v34, %v11983_v58  ;;  %6905 = vmatprep.subr.bf16.mxu1 %v10199_v22  ;;  %v780_v58 = vld [vmem:[#allocation5 + $0xed0] sm:$0xff] }
 0x3e6   :  { %v6597_v48 = vpop.f32.mrf.mxu0  ;;  %v10175_v17 = vcombine.high %v780_v58, %v784_v10  ;;  %v10174_v12 = vcombine.low %v780_v58, %v784_v10  ;;  %v640_v13 = vld [vmem:[#allocation5 + $0xa70] sm:$0xff]  ;;  %v10270_v10 = vcombine.low %v876_v50, %v880_v19 }
 0x3e7   :  { %6865 = vmatpush2.bf16.msra.mxu0 %v10070_v32  ;;  %v764_v22 = vld [vmem:[#allocation5 + $0xe50] sm:$0xff]  ;;  %v10031_v14 = vcombine.high %v636_v54, %v640_v13 }
 0x3e8   :  { %6906 = vmatpush2.bf16.msra.mxu1 %v10198_v36  ;;  %v6598_v51 = vpop.f32.mrf.mxu0  ;;  %6866 = vmatprep.subr.bf16.mxu0 %v10063_v37  ;;  %v10159_v20 = vcombine.high %v764_v22, %v768_v23  ;;  %v628_v32 = vld [vmem:[#allocation5 + $0xa10] sm:$0xff]  ;;  %v10158_v46 = vcombine.low %v764_v22, %v768_v23 }
 0x3e9   :  { %6907 = vmatprep.subr.bf16.mxu1 %v10191_v45  ;;  %v632_v34 = vld [vmem:[#allocation5 + $0xa30] sm:$0xff]  ;;  %v10030_v45 = vcombine.low %v636_v54, %v640_v13 }
 0x3ea   :  { %v756_v36 = vld [vmem:[#allocation5 + $0xe10] sm:$0xff]  ;;  %v10023_v47 = vcombine.high %v628_v32, %v632_v34 }
 0x3eb   :  { %6867 = vmatpush2.bf16.msra.mxu0 %v10062_v35  ;;  %v760_v37 = vld [vmem:[#allocation5 + $0xe30] sm:$0xff] }
 0x3ec   :  { %6908 = vmatpush2.bf16.msra.mxu1 %v10190_v52  ;;  %6868 = vmatprep.subr.bf16.mxu0 %v10055_v56  ;;  %v10151_v48 = vcombine.high %v756_v36, %v760_v37  ;;  %v1004_v35 = vld [vmem:[#allocation5 + $0x15d0] sm:$0xff]  ;;  %v10022_v52 = vcombine.low %v628_v32, %v632_v34  ;;  %v10150_v56 = vcombine.low %v756_v36, %v760_v37 }
 0x3ed   :  { %6909 = vmatprep.subr.bf16.mxu1 %v10183_v53  ;;  %v1008_v51 = vld [vmem:[#allocation5 + $0x15f0] sm:$0xff]  ;;  %v10271_v53 = vcombine.high %v876_v50, %v880_v19 }
 0x3ee   :  { %v10399_v57 = vcombine.high %v1004_v35, %v1008_v51  ;;  %v868_v31 = vld [vmem:[#allocation5 + $0x1190] sm:$0xff] }
 0x3ef   :  { %6869 = vmatpush2.bf16.msra.mxu0 %v10054_v62  ;;  %v872_v58 = vld [vmem:[#allocation5 + $0x11b0] sm:$0xff] }
 0x3f0   :  { %6910 = vmatpush2.bf16.msra.mxu1 %v10182_v2  ;;  %6870 = vmatprep.subr.bf16.mxu0 %v10047_v0  ;;  %v996_v62 = vld [vmem:[#allocation5 + $0x1590] sm:$0xff]  ;;  %v10398_v0 = vcombine.low %v1004_v35, %v1008_v51 }
 0x3f1   :  { %6911 = vmatprep.subr.bf16.mxu1 %v10175_v17  ;;  %v1000_v2 = vld [vmem:[#allocation5 + $0x15b0] sm:$0xff]  ;;  %v10263_v17 = vcombine.high %v868_v31, %v872_v58 }
 0x3f2   :  { %v860_v11 = vld [vmem:[#allocation5 + $0x1150] sm:$0xff]  ;;  %v10391_v6 = vcombine.high %v996_v62, %v1000_v2  ;;  %v10390_v54 = vcombine.low %v996_v62, %v1000_v2 }
 0x3f3   :  { %6871 = vmatpush2.bf16.msra.mxu0 %v10046_v9  ;;  %v864_v43 = vld [vmem:[#allocation5 + $0x1170] sm:$0xff] }
 0x3f4   :  { %6912 = vmatpush2.bf16.msra.mxu1 %v10174_v12  ;;  %6872 = vmatprep.subr.bf16.mxu0 %v10039_v63  ;;  %v988_v21 = vld [vmem:[#allocation5 + $0x1550] sm:$0xff]  ;;  %v10262_v63 = vcombine.low %v868_v31, %v872_v58  ;;  %v10255_v13 = vcombine.high %v860_v11, %v864_v43  ;;  %v10254_v34 = vcombine.low %v860_v11, %v864_v43 }
 0x3f5   :  { %6913 = vmatprep.subr.bf16.mxu1 %v10167_v26  ;;  %v992_v9 = vld [vmem:[#allocation5 + $0x1570] sm:$0xff] }
 0x3f6   :  { %v10383_v23 = vcombine.high %v988_v21, %v992_v9  ;;  %v984_v32 = vld [vmem:[#allocation5 + $0x1530] sm:$0xff]  ;;  %v10382_v36 = vcombine.low %v988_v21, %v992_v9 }
 0x3f7   :  { %6873 = vmatpush2.bf16.msra.mxu0 %v10038_v27  ;;  %v852_v27 = vld [vmem:[#allocation5 + $0x1110] sm:$0xff] }
 0x3f8   :  { %6914 = vmatpush2.bf16.msra.mxu1 %v10166_v59  ;;  %6874 = vmatprep.subr.bf16.mxu0 %v10031_v14  ;;  %v856_v59 = vld [vmem:[#allocation5 + $0x1130] sm:$0xff] }
 0x3f9   :  { %6915 = vmatprep.subr.bf16.mxu1 %v10159_v20  ;;  %v980_v20 = vld [vmem:[#allocation5 + $0x1510] sm:$0xff]  ;;  %v10247_v37 = vcombine.high %v852_v27, %v856_v59 }
 0x3fa   :  { %v972_v50 = vld [vmem:[#allocation5 + $0x14d0] sm:$0xff]  ;;  %v10374_v35 = vcombine.low %v980_v20, %v984_v32 }
 0x3fb   :  { %6875 = vmatpush2.bf16.msra.mxu0 %v10030_v45  ;;  %v976_v19 = vld [vmem:[#allocation5 + $0x14f0] sm:$0xff] }
 0x3fc   :  { %6916 = vmatpush2.bf16.msra.mxu1 %v10158_v46  ;;  %6876 = vmatprep.subr.bf16.mxu0 %v10023_v47  ;;  %v10375_v46 = vcombine.high %v980_v20, %v984_v32  ;;  %v844_v47 = vld [vmem:[#allocation5 + $0x10d0] sm:$0xff] }
 0x3fd   :  { %6917 = vmatprep.subr.bf16.mxu1 %v10151_v48  ;;  %v848_v48 = vld [vmem:[#allocation5 + $0x10f0] sm:$0xff] }
 0x3fe   :  { %v10239_v51 = vcombine.high %v844_v47, %v848_v48  ;;  %v968_v31 = vld [vmem:[#allocation5 + $0x14b0] sm:$0xff]  ;;  %v10238_v58 = vcombine.low %v844_v47, %v848_v48 }
 0x3ff   :  { %6877 = vmatpush2.bf16.msra.mxu0 %v10022_v52  ;;  %v10367_v52 = vcombine.high %v972_v50, %v976_v19  ;;  %v956_v11 = vld [vmem:[#allocation5 + $0x1450] sm:$0xff] }
 0x400   :  { %6918 = vmatpush2.bf16.msra.mxu1 %v10150_v56  ;;  %6928 = vmatprep.subr.bf16.mxu0 %v10271_v53  ;;  %v836_v56 = vld [vmem:[#allocation5 + $0x1090] sm:$0xff] }
 0x401   :  { %6969 = vmatprep.subr.bf16.mxu1 %v10399_v57  ;;  %v840_v53 = vld [vmem:[#allocation5 + $0x10b0] sm:$0xff] }
 0x402   :  { %6879 = vmatmul.mubr.bf16.vlgmr.msra.gmra.mxu0 %v11861_v39  ;;  %v964_v57 = vld [vmem:[#allocation5 + $0x1490] sm:$0xff]  ;;  %v10231_v62 = vcombine.high %v836_v56, %v840_v53 }
 0x403   :  { %v6634_v12 = vpop.f32.mrf.mxu1  ;;  %6920 = vmatmul.mubr.bf16.vlgmr.msra.gmra.mxu1 %v11865_v40  ;;  %6929 = vmatpush1.bf16.msra.mxu0 %v10270_v10  ;;  %v10366_v10 = vcombine.low %v972_v50, %v976_v19  ;;  %v10359_v2 = vcombine.high %v964_v57, %v968_v31  ;;  %v960_v43 = vld [vmem:[#allocation5 + $0x1470] sm:$0xff]  ;;  %v10358_v21 = vcombine.low %v964_v57, %v968_v31 }
 0x404   :  { %v11994_v26 = vadd.f32 %v6634_v12, %v11986_v28  ;;  %6960 = vmatprep.mubr.bf16.mxu0 %v11867_v44  ;;  %6970 = vmatpush1.bf16.msra.mxu1 %v10398_v0  ;;  %v828_v0 = vld [vmem:[#allocation5 + $0x1050] sm:$0xff]  ;;  %v10351_v12 = vcombine.high %v956_v11, %v960_v43 }
 0x405   :  { %7001 = vmatprep.mubr.bf16.mxu1 %v11871_v8  ;;  %v6636_v22 = vpop.f32.mrf.mxu1  ;;  %6930 = vmatprep.subr.bf16.mxu0 %v10263_v17  ;;  %v832_v17 = vld [vmem:[#allocation5 + $0x1070] sm:$0xff] }
 0x406   :  { %v11999_v14 = vadd.f32 %v6636_v22, %v11989_v42  ;;  %6971 = vmatprep.subr.bf16.mxu1 %v10391_v6  ;;  %v10246_v42 = vcombine.low %v852_v27, %v856_v59  ;;  %v10230_v6 = vcombine.low %v836_v56, %v840_v53  ;;  %v10223_v9 = vcombine.high %v828_v0, %v832_v17  ;;  %v952_v22 = vld [vmem:[#allocation5 + $0x1430] sm:$0xff] }
 0x407   :  { %v6638_v28 = vpop.f32.mrf.mxu1  ;;  %6931 = vmatpush1.bf16.msra.mxu0 %v10262_v63  ;;  %v820_v63 = vld [vmem:[#allocation5 + $0x1010] sm:$0xff]  ;;  %v10350_v27 = vcombine.low %v956_v11, %v960_v43 }
 0x408   :  { %6972 = vmatpush1.bf16.msra.mxu1 %v10390_v54  ;;  %6932 = vmatprep.subr.bf16.mxu0 %v10255_v13  ;;  %v824_v54 = vld [vmem:[#allocation5 + $0x1030] sm:$0xff] }
 0x409   :  { %v6639_v45 = vpop.f32.mrf.mxu1  ;;  %6973 = vmatprep.subr.bf16.mxu1 %v10383_v23  ;;  %v948_v13 = vld [vmem:[#allocation5 + $0x1410] sm:$0xff]  ;;  %v10222_v23 = vcombine.low %v828_v0, %v832_v17  ;;  %v10215_v59 = vcombine.high %v820_v63, %v824_v54 }
 0x40a   :  { %v10343_v20 = vcombine.high %v948_v13, %v952_v22  ;;  %v940_v32 = vld [vmem:[#allocation5 + $0x13d0] sm:$0xff]  ;;  %v10342_v45 = vcombine.low %v948_v13, %v952_v22 }
 0x40b   :  { %6933 = vmatpush1.bf16.msra.mxu0 %v10254_v34  ;;  %v944_v28 = vld [vmem:[#allocation5 + $0x13f0] sm:$0xff] }
 0x40c   :  { %6974 = vmatpush1.bf16.msra.mxu1 %v10382_v36  ;;  %6934 = vmatprep.subr.bf16.mxu0 %v10247_v37  ;;  %v1068_v34 = vld [vmem:[#allocation5 + $0x17d0] sm:$0xff]  ;;  %v10214_v37 = vcombine.low %v820_v63, %v824_v54 }
 0x40d   :  { %6975 = vmatprep.subr.bf16.mxu1 %v10375_v46  ;;  %v1072_v36 = vld [vmem:[#allocation5 + $0x17f0] sm:$0xff]  ;;  %v10335_v46 = vcombine.high %v940_v32, %v944_v28 }
 0x40e   :  { %v10463_v47 = vcombine.high %v1068_v34, %v1072_v36  ;;  %v932_v48 = vld [vmem:[#allocation5 + $0x1390] sm:$0xff] }
 0x40f   :  { %6935 = vmatpush1.bf16.msra.mxu0 %v10246_v42  ;;  %v936_v50 = vld [vmem:[#allocation5 + $0x13b0] sm:$0xff] }
 0x410   :  { %6976 = vmatpush1.bf16.msra.mxu1 %v10374_v35  ;;  %6936 = vmatprep.subr.bf16.mxu0 %v10239_v51  ;;  %v1060_v19 = vld [vmem:[#allocation5 + $0x1790] sm:$0xff]  ;;  %v10334_v35 = vcombine.low %v940_v32, %v944_v28  ;;  %v10462_v51 = vcombine.low %v1068_v34, %v1072_v36 }
 0x411   :  { %6977 = vmatprep.subr.bf16.mxu1 %v10367_v52  ;;  %v1064_v42 = vld [vmem:[#allocation5 + $0x17b0] sm:$0xff]  ;;  %v10327_v52 = vcombine.high %v932_v48, %v936_v50 }
 0x412   :  { %v10455_v56 = vcombine.high %v1060_v19, %v1064_v42  ;;  %v924_v53 = vld [vmem:[#allocation5 + $0x1350] sm:$0xff]  ;;  %v10454_v17 = vcombine.low %v1060_v19, %v1064_v42 }
 0x413   :  { %6937 = vmatpush1.bf16.msra.mxu0 %v10238_v58  ;;  %v928_v57 = vld [vmem:[#allocation5 + $0x1370] sm:$0xff] }
 0x414   :  { %6978 = vmatpush1.bf16.msra.mxu1 %v10366_v10  ;;  %6938 = vmatprep.subr.bf16.mxu0 %v10231_v62  ;;  %v1052_v58 = vld [vmem:[#allocation5 + $0x1750] sm:$0xff]  ;;  %v10319_v11 = vcombine.high %v924_v53, %v928_v57 }
 0x415   :  { %6979 = vmatprep.subr.bf16.mxu1 %v10359_v2  ;;  %v1056_v10 = vld [vmem:[#allocation5 + $0x1770] sm:$0xff]  ;;  %v10326_v2 = vcombine.low %v932_v48, %v936_v50 }
 0x416   :  { %v1044_v63 = vld [vmem:[#allocation5 + $0x1710] sm:$0xff]  ;;  %v10446_v22 = vcombine.low %v1052_v58, %v1056_v10 }
 0x417   :  { %6939 = vmatpush1.bf16.msra.mxu0 %v10230_v6  ;;  %v10447_v6 = vcombine.high %v1052_v58, %v1056_v10  ;;  %v1048_v54 = vld [vmem:[#allocation5 + $0x1730] sm:$0xff] }
 0x418   :  { %6980 = vmatpush1.bf16.msra.mxu1 %v10358_v21  ;;  %6940 = vmatprep.subr.bf16.mxu0 %v10223_v9  ;;  %v916_v21 = vld [vmem:[#allocation5 + $0x1310] sm:$0xff]  ;;  %v10438_v34 = vcombine.low %v1044_v63, %v1048_v54 }
 0x419   :  { %6981 = vmatprep.subr.bf16.mxu1 %v10351_v12  ;;  %v920_v9 = vld [vmem:[#allocation5 + $0x1330] sm:$0xff] }
 0x41a   :  { %v1040_v32 = vld [vmem:[#allocation5 + $0x16f0] sm:$0xff]  ;;  %v10310_v28 = vcombine.low %v916_v21, %v920_v9 }
 0x41b   :  { %6941 = vmatpush1.bf16.msra.mxu0 %v10222_v23  ;;  %v10311_v23 = vcombine.high %v916_v21, %v920_v9  ;;  %v1032_v48 = vld [vmem:[#allocation5 + $0x16b0] sm:$0xff] }
 0x41c   :  { %6982 = vmatpush1.bf16.msra.mxu1 %v10350_v27  ;;  %6942 = vmatprep.subr.bf16.mxu0 %v10215_v59  ;;  %v10439_v27 = vcombine.high %v1044_v63, %v1048_v54  ;;  %v908_v59 = vld [vmem:[#allocation5 + $0x12d0] sm:$0xff] }
 0x41d   :  { %6983 = vmatprep.subr.bf16.mxu1 %v10343_v20  ;;  %v912_v20 = vld [vmem:[#allocation5 + $0x12f0] sm:$0xff] }
 0x41e   :  { %v10303_v36 = vcombine.high %v908_v59, %v912_v20  ;;  %v10302_v50 = vcombine.low %v908_v59, %v912_v20  ;;  %v1132_v63 = vld [vmem:[#allocation5 + $0x19d0] sm:$0xff] }
 0x41f   :  { %6943 = vmatpush1.bf16.msra.mxu0 %v10214_v37  ;;  %v1136_v54 = vld [vmem:[#allocation5 + $0x19f0] sm:$0xff] }
 0x420   :  { %6984 = vmatpush1.bf16.msra.mxu1 %v10342_v45  ;;  %6944 = vmatprep.subr.bf16.mxu0 %v10335_v46  ;;  %v900_v45 = vld [vmem:[#allocation5 + $0x1290] sm:$0xff] }
 0x421   :  { %6985 = vmatprep.subr.bf16.mxu1 %v10463_v47  ;;  %v904_v46 = vld [vmem:[#allocation5 + $0x12b0] sm:$0xff] }
 0x422   :  { %v6675_v31 = vpop.f32.mrf.mxu0  ;;  %v1028_v47 = vld [vmem:[#allocation5 + $0x1690] sm:$0xff]  ;;  %v10295_v42 = vcombine.high %v900_v45, %v904_v46 }
 0x423   :  { %v12002_v62 = vadd.f32 %v6675_v31, %v11994_v26  ;;  %6945 = vmatpush2.bf16.msra.mxu0 %v10334_v35  ;;  %v10318_v26 = vcombine.low %v924_v53, %v928_v57  ;;  %v10423_v35 = vcombine.high %v1028_v47, %v1032_v48  ;;  %v1024_v53 = vld [vmem:[#allocation5 + $0x1670] sm:$0xff]  ;;  %v10294_v57 = vcombine.low %v900_v45, %v904_v46 }
 0x424   :  { %6986 = vmatpush2.bf16.msra.mxu1 %v10462_v51  ;;  %v6677_v0 = vpop.f32.mrf.mxu0  ;;  %6946 = vmatprep.subr.bf16.mxu0 %v10327_v52  ;;  %v892_v51 = vld [vmem:[#allocation5 + $0x1250] sm:$0xff]  ;;  %v10422_v31 = vcombine.low %v1028_v47, %v1032_v48 }
 0x425   :  { %v12005_v43 = vadd.f32 %v6677_v0, %v11999_v14  ;;  %6987 = vmatprep.subr.bf16.mxu1 %v10455_v56  ;;  %v1036_v14 = vld [vmem:[#allocation5 + $0x16d0] sm:$0xff] }
 0x426   :  { %v6679_v12 = vpop.f32.mrf.mxu0  ;;  %v10431_v37 = vcombine.high %v1036_v14, %v1040_v32  ;;  %v10430_v19 = vcombine.low %v1036_v14, %v1040_v32  ;;  %v896_v52 = vld [vmem:[#allocation5 + $0x1270] sm:$0xff] }
 0x427   :  { %6947 = vmatpush2.bf16.msra.mxu0 %v10326_v2  ;;  %v1020_v56 = vld [vmem:[#allocation5 + $0x1650] sm:$0xff]  ;;  %v10287_v58 = vcombine.high %v892_v51, %v896_v52 }
 0x428   :  { %6988 = vmatpush2.bf16.msra.mxu1 %v10454_v17  ;;  %v6680_v13 = vpop.f32.mrf.mxu0  ;;  %6948 = vmatprep.subr.bf16.mxu0 %v10319_v11  ;;  %v10415_v10 = vcombine.high %v1020_v56, %v1024_v53  ;;  %v884_v2 = vld [vmem:[#allocation5 + $0x1210] sm:$0xff]  ;;  %v10414_v21 = vcombine.low %v1020_v56, %v1024_v53 }
 0x429   :  { %6989 = vmatprep.subr.bf16.mxu1 %v10447_v6  ;;  %v888_v0 = vld [vmem:[#allocation5 + $0x1230] sm:$0xff]  ;;  %v10286_v6 = vcombine.low %v892_v51, %v896_v52 }
 0x42a   :  { %v1012_v17 = vld [vmem:[#allocation5 + $0x1610] sm:$0xff]  ;;  %v10279_v9 = vcombine.high %v884_v2, %v888_v0 }
 0x42b   :  { %6949 = vmatpush2.bf16.msra.mxu0 %v10318_v26  ;;  %v1016_v11 = vld [vmem:[#allocation5 + $0x1630] sm:$0xff] }
 0x42c   :  { %6990 = vmatpush2.bf16.msra.mxu1 %v10446_v22  ;;  %6950 = vmatprep.subr.bf16.mxu0 %v10311_v23  ;;  %v10407_v12 = vcombine.high %v1012_v17, %v1016_v11  ;;  %v1260_v26 = vld [vmem:[#allocation5 + $0x1dd0] sm:$0xff]  ;;  %v10278_v22 = vcombine.low %v884_v2, %v888_v0  ;;  %v10406_v23 = vcombine.low %v1012_v17, %v1016_v11 }
 0x42d   :  { %6991 = vmatprep.subr.bf16.mxu1 %v10439_v27  ;;  %v1264_v13 = vld [vmem:[#allocation5 + $0x1df0] sm:$0xff]  ;;  %v10527_v27 = vcombine.high %v1132_v63, %v1136_v54 }
 0x42e   :  { %v10655_v59 = vcombine.high %v1260_v26, %v1264_v13  ;;  %v1124_v20 = vld [vmem:[#allocation5 + $0x1990] sm:$0xff] }
 0x42f   :  { %6951 = vmatpush2.bf16.msra.mxu0 %v10310_v28  ;;  %v1128_v14 = vld [vmem:[#allocation5 + $0x19b0] sm:$0xff] }
 0x430   :  { %6992 = vmatpush2.bf16.msra.mxu1 %v10438_v34  ;;  %6952 = vmatprep.subr.bf16.mxu0 %v10303_v36  ;;  %v1252_v32 = vld [vmem:[#allocation5 + $0x1d90] sm:$0xff]  ;;  %v10526_v34 = vcombine.low %v1132_v63, %v1136_v54  ;;  %v10654_v36 = vcombine.low %v1260_v26, %v1264_v13 }
 0x431   :  { %6993 = vmatprep.subr.bf16.mxu1 %v10431_v37  ;;  %v1256_v28 = vld [vmem:[#allocation5 + $0x1db0] sm:$0xff]  ;;  %v10519_v37 = vcombine.high %v1124_v20, %v1128_v14 }
 0x432   :  { %v10647_v45 = vcombine.high %v1252_v32, %v1256_v28  ;;  %v1116_v46 = vld [vmem:[#allocation5 + $0x1950] sm:$0xff]  ;;  %v10646_v56 = vcombine.low %v1252_v32, %v1256_v28 }
 0x433   :  { %6953 = vmatpush2.bf16.msra.mxu0 %v10302_v50  ;;  %v1120_v47 = vld [vmem:[#allocation5 + $0x1970] sm:$0xff] }
 0x434   :  { %6994 = vmatpush2.bf16.msra.mxu1 %v10430_v19  ;;  %6954 = vmatprep.subr.bf16.mxu0 %v10295_v42  ;;  %v1244_v50 = vld [vmem:[#allocation5 + $0x1d50] sm:$0xff]  ;;  %v10511_v53 = vcombine.high %v1116_v46, %v1120_v47 }
 0x435   :  { %6995 = vmatprep.subr.bf16.mxu1 %v10423_v35  ;;  %v1248_v19 = vld [vmem:[#allocation5 + $0x1d70] sm:$0xff]  ;;  %v10518_v35 = vcombine.low %v1124_v20, %v1128_v14 }
 0x436   :  { %v1236_v11 = vld [vmem:[#allocation5 + $0x1d10] sm:$0xff]  ;;  %v10638_v63 = vcombine.low %v1244_v50, %v1248_v19 }
 0x437   :  { %6955 = vmatpush2.bf16.msra.mxu0 %v10294_v57  ;;  %v1092_v28 = vld [vmem:[#allocation5 + $0x1890] sm:$0xff] }
 0x438   :  { %6996 = vmatpush2.bf16.msra.mxu1 %v10422_v31  ;;  %6956 = vmatprep.subr.bf16.mxu0 %v10287_v58  ;;  %v10639_v31 = vcombine.high %v1244_v50, %v1248_v19  ;;  %v1108_v58 = vld [vmem:[#allocation5 + $0x1910] sm:$0xff] }
 0x439   :  { %6997 = vmatprep.subr.bf16.mxu1 %v10415_v10  ;;  %v1112_v10 = vld [vmem:[#allocation5 + $0x1930] sm:$0xff] }
 0x43a   :  { %v10503_v54 = vcombine.high %v1108_v58, %v1112_v10  ;;  %v1084_v50 = vld [vmem:[#allocation5 + $0x1850] sm:$0xff] }
 0x43b   :  { %6957 = vmatpush2.bf16.msra.mxu0 %v10286_v6  ;;  %v1240_v6 = vld [vmem:[#allocation5 + $0x1d30] sm:$0xff] }
 0x43c   :  { %6998 = vmatpush2.bf16.msra.mxu1 %v10414_v21  ;;  %6958 = vmatprep.subr.bf16.mxu0 %v10279_v9  ;;  %v10510_v21 = vcombine.low %v1116_v46, %v1120_v47  ;;  %v10631_v13 = vcombine.high %v1236_v11, %v1240_v6  ;;  %v10630_v20 = vcombine.low %v1236_v11, %v1240_v6  ;;  %v1088_v19 = vld [vmem:[#allocation5 + $0x1870] sm:$0xff] }
 0x43d   :  { %6999 = vmatprep.subr.bf16.mxu1 %v10407_v12 }
 0x43f   :  { %6959 = vmatpush2.bf16.msra.mxu0 %v10278_v22  ;;  %v1100_v22 = vld [vmem:[#allocation5 + $0x18d0] sm:$0xff] }
 0x440   :  { %7000 = vmatpush2.bf16.msra.mxu1 %v10406_v23  ;;  %7010 = vmatprep.subr.bf16.mxu0 %v10527_v27  ;;  %v1228_v23 = vld [vmem:[#allocation5 + $0x1cd0] sm:$0xff] }
 0x441   :  { %7051 = vmatprep.subr.bf16.mxu1 %v10655_v59  ;;  %v1232_v27 = vld [vmem:[#allocation5 + $0x1cf0] sm:$0xff]  ;;  %v10502_v59 = vcombine.low %v1108_v58, %v1112_v10 }
 0x442   :  { %v6757_v48 = vpop.f32.mrf.mxu0  ;;  %6961 = vmatmul.mubr.bf16.vlgmr.msra.gmra.mxu0 %v11883_v24  ;;  %v10623_v32 = vcombine.high %v1228_v23, %v1232_v27  ;;  %v10622_v46 = vcombine.low %v1228_v23, %v1232_v27  ;;  %v1204_v58 = vld [vmem:[#allocation5 + $0x1c10] sm:$0xff]  ;;  %v357_v27 = vld [vmem:[#allocation5 + $0x198] sm:$0xff] }
 0x443   :  { %v6716_v42 = vpop.f32.mrf.mxu1  ;;  %7002 = vmatmul.mubr.bf16.vlgmr.msra.gmra.mxu1 %v11887_v49  ;;  %7011 = vmatpush1.bf16.msra.mxu0 %v10526_v34  ;;  %v1096_v34 = vld [vmem:[#allocation5 + $0x18b0] sm:$0xff] }
 0x444   :  { %v6717_v51 = vadd.f32 %v6716_v42, %v12002_v62  ;;  %7042 = vmatprep.mubr.bf16.mxu0 %v11890_v55  ;;  %7052 = vmatpush1.bf16.msra.mxu1 %v10654_v36  ;;  %v6759_v52 = vpop.f32.mrf.mxu0  ;;  %v1220_v36 = vld [vmem:[#allocation5 + $0x1c90] sm:$0xff]  ;;  %v10487_v47 = vcombine.high %v1092_v28, %v1096_v34 }
 0x445   :  { %v6718_v57 = vpop.f32.mrf.mxu1  ;;  %7012 = vmatprep.subr.bf16.mxu0 %v10519_v37  ;;  %7053 = vmatprep.subr.bf16.mxu1 %v10647_v45  ;;  %v1224_v37 = vld [vmem:[#allocation5 + $0x1cb0] sm:$0xff] }
 0x446   :  { %v12011_v2 = vadd.f32 %v6757_v48, %v6717_v51  ;;  %v6719_v0 = vadd.f32 %v6718_v57, %v12005_v43  ;;  %v6761_v17 = vpop.f32.mrf.mxu0  ;;  %7083 = vmatprep.mubr.bf16.mxu1 %v11622_v4  ;;  %v1104_v43 = vld [vmem:[#allocation5 + $0x18f0] sm:$0xff]  ;;  %v10615_v48 = vcombine.high %v1220_v36, %v1224_v37  ;;  %v10486_v51 = vcombine.low %v1092_v28, %v1096_v34 }
 0x447   :  { %v6720_v62 = vpop.f32.mrf.mxu1  ;;  %7013 = vmatpush1.bf16.msra.mxu0 %v10518_v35  ;;  %v10495_v14 = vcombine.high %v1100_v22, %v1104_v43  ;;  %v10494_v45 = vcombine.low %v1100_v22, %v1104_v43  ;;  %v1212_v42 = vld [vmem:[#allocation5 + $0x1c50] sm:$0xff] }
 0x448   :  { %v12015_v9 = vadd.f32 %v6759_v52, %v6719_v0  ;;  %7054 = vmatpush1.bf16.msra.mxu1 %v10646_v56  ;;  %v6762_v12 = vpop.f32.mrf.mxu0  ;;  %7014 = vmatprep.subr.bf16.mxu0 %v10511_v53  ;;  %v1216_v35 = vld [vmem:[#allocation5 + $0x1c70] sm:$0xff]  ;;  %v10614_v52 = vcombine.low %v1220_v36, %v1224_v37  ;;  %v10479_v56 = vcombine.high %v1084_v50, %v1088_v19  ;;  %v349_v37 = vld [vmem:[#allocation5 + $0x158] sm:$0xff] }
 0x449   :  { %v6721_v26 = vpop.f32.mrf.mxu1  ;;  %7055 = vmatprep.subr.bf16.mxu1 %v10639_v31  ;;  %v10607_v53 = vcombine.high %v1212_v42, %v1216_v35  ;;  %v1076_v57 = vld [vmem:[#allocation5 + $0x1810] sm:$0xff]  ;;  %v10478_v0 = vcombine.low %v1084_v50, %v1088_v19  ;;  %v10606_v17 = vcombine.low %v1212_v42, %v1216_v35  ;;  %v365_v12 = vld [vmem:[#allocation5 + $0x1d8] sm:$0xff] }
 0x44a   :  { %v1080_v31 = vld [vmem:[#allocation5 + $0x1830] sm:$0xff]  ;;  %v341_v35 = vld [vmem:[#allocation5 + $0x118] sm:$0xff] }
 0x44b   :  { %7015 = vmatpush1.bf16.msra.mxu0 %v10510_v21  ;;  %v1208_v10 = vld [vmem:[#allocation5 + $0x1c30] sm:$0xff]  ;;  %v10471_v11 = vcombine.high %v1076_v57, %v1080_v31 }
 0x44c   :  { %7056 = vmatpush1.bf16.msra.mxu1 %v10638_v63  ;;  %7016 = vmatprep.subr.bf16.mxu0 %v10503_v54  ;;  %v10599_v6 = vcombine.high %v1204_v58, %v1208_v10  ;;  %v1196_v62 = vld [vmem:[#allocation5 + $0x1bd0] sm:$0xff]  ;;  %v369_v63 = vld [vmem:[#allocation5 + $0x1f8] sm:$0xff]  ;;  %v10470_v54 = vcombine.low %v1076_v57, %v1080_v31  ;;  %v10598_v26 = vcombine.low %v1204_v58, %v1208_v10 }
 0x44d   :  { %7057 = vmatprep.subr.bf16.mxu1 %v10631_v13  ;;  %v1200_v21 = vld [vmem:[#allocation5 + $0x1bf0] sm:$0xff]  ;;  %v9761_v22 = vcombine.high %v365_v12, %v369_v63  ;;  %v337_v10 = vld [vmem:[#allocation5 + $0xf8] sm:$0xff] }
 0x44e   :  { %v10591_v13 = vcombine.high %v1196_v62, %v1200_v21  ;;  %v1188_v43 = vld [vmem:[#allocation5 + $0x1b90] sm:$0xff] }
 0x44f   :  { %7017 = vmatpush1.bf16.msra.mxu0 %v10502_v59  ;;  %v1192_v23 = vld [vmem:[#allocation5 + $0x1bb0] sm:$0xff]  ;;  %v361_v59 = vld [vmem:[#allocation5 + $0x1b8] sm:$0xff] }
 0x450   :  { %7058 = vmatpush1.bf16.msra.mxu1 %v10630_v20  ;;  %7018 = vmatprep.subr.bf16.mxu0 %v10495_v14  ;;  %v10590_v20 = vcombine.low %v1196_v62, %v1200_v21  ;;  %v9760_v14 = vcombine.low %v365_v12, %v369_v63  ;;  %v9753_v28 = vcombine.high %v357_v27, %v361_v59  ;;  %v1180_v34 = vld [vmem:[#allocation5 + $0x1b50] sm:$0xff]  ;;  %v325_v12 = vld [vmem:[#allocation5 + $0x98] sm:$0xff] }
 0x451   :  { %7059 = vmatprep.subr.bf16.mxu1 %v10623_v32  ;;  %v10583_v32 = vcombine.high %v1188_v43, %v1192_v23  ;;  %v1184_v36 = vld [vmem:[#allocation5 + $0x1b70] sm:$0xff]  ;;  %v329_v63 = vld [vmem:[#allocation5 + $0xb8] sm:$0xff] }
 0x452   :  { %v1172_v19 = vld [vmem:[#allocation5 + $0x1b10] sm:$0xff] }
 0x453   :  { %7019 = vmatpush1.bf16.msra.mxu0 %v10494_v45  ;;  %v353_v45 = vld [vmem:[#allocation5 + $0x178] sm:$0xff]  ;;  %v1176_v42 = vld [vmem:[#allocation5 + $0x1b30] sm:$0xff] }
 0x454   :  { %7060 = vmatpush1.bf16.msra.mxu1 %v10622_v46  ;;  %7020 = vmatprep.subr.bf16.mxu0 %v10487_v47  ;;  %v10582_v46 = vcombine.low %v1188_v43, %v1192_v23  ;;  %v9752_v47 = vcombine.low %v357_v27, %v361_v59  ;;  %v9745_v50 = vcombine.high %v349_v37, %v353_v45  ;;  %v1164_v31 = vld [vmem:[#allocation5 + $0x1ad0] sm:$0xff]  ;;  %v317_v27 = vld [vmem:[#allocation5 + $0x58] sm:$0xff] }
 0x455   :  { %7061 = vmatprep.subr.bf16.mxu1 %v10615_v48  ;;  %v10575_v48 = vcombine.high %v1180_v34, %v1184_v36  ;;  %v1168_v58 = vld [vmem:[#allocation5 + $0x1af0] sm:$0xff]  ;;  %v321_v59 = vld [vmem:[#allocation5 + $0x78] sm:$0xff] }
 0x456   :  { %v1156_v62 = vld [vmem:[#allocation5 + $0x1a90] sm:$0xff] }
 0x457   :  { %7021 = vmatpush1.bf16.msra.mxu0 %v10486_v51  ;;  %v345_v51 = vld [vmem:[#allocation5 + $0x138] sm:$0xff]  ;;  %v1160_v21 = vld [vmem:[#allocation5 + $0x1ab0] sm:$0xff] }
 0x458   :  { %7062 = vmatpush1.bf16.msra.mxu1 %v10614_v52  ;;  %7022 = vmatprep.subr.bf16.mxu0 %v10479_v56  ;;  %v10574_v52 = vcombine.low %v1180_v34, %v1184_v36  ;;  %v9744_v56 = vcombine.low %v349_v37, %v353_v45  ;;  %v9737_v57 = vcombine.high %v341_v35, %v345_v51  ;;  %v1148_v43 = vld [vmem:[#allocation5 + $0x1a50] sm:$0xff]  ;;  %v309_v37 = vld [vmem:[#allocation5 + $0x18] sm:$0xff] }
 0x459   :  { %7063 = vmatprep.subr.bf16.mxu1 %v10607_v53  ;;  %v10567_v53 = vcombine.high %v1172_v19, %v1176_v42  ;;  %v1152_v23 = vld [vmem:[#allocation5 + $0x1a70] sm:$0xff]  ;;  %v313_v45 = vld [vmem:[#allocation5 + $0x38] sm:$0xff] }
 0x45a   :  { %v1140_v34 = vld [vmem:[#allocation5 + $0x1a10] sm:$0xff] }
 0x45b   :  { %7023 = vmatpush1.bf16.msra.mxu0 %v10478_v0  ;;  %v10566_v0 = vcombine.low %v1172_v19, %v1176_v42  ;;  %v1144_v36 = vld [vmem:[#allocation5 + $0x1a30] sm:$0xff]  ;;  %v493_v19 = vld [vmem:[#allocation5 + $0x5d8] sm:$0xff] }
 0x45c   :  { %7064 = vmatpush1.bf16.msra.mxu1 %v10606_v17  ;;  %7024 = vmatprep.subr.bf16.mxu0 %v10471_v11  ;;  %v9736_v17 = vcombine.low %v341_v35, %v345_v51  ;;  %v10559_v11 = vcombine.high %v1164_v31, %v1168_v58  ;;  %v497_v42 = vld [vmem:[#allocation5 + $0x5f8] sm:$0xff] }
 0x45d   :  { %7065 = vmatprep.subr.bf16.mxu1 %v10599_v6  ;;  %v429_v35 = vld [vmem:[#allocation5 + $0x3d8] sm:$0xff] }
 0x45e   :  { %v433_v51 = vld [vmem:[#allocation5 + $0x3f8] sm:$0xff] }
 0x45f   :  { %7025 = vmatpush1.bf16.msra.mxu0 %v10470_v54  ;;  %v10558_v54 = vcombine.low %v1164_v31, %v1168_v58  ;;  %v9825_v31 = vcombine.high %v429_v35, %v433_v51  ;;  %v1290_v58 = vsub.s32 5, %v11901_v7 }
 0x460   :  { %7066 = vmatpush1.bf16.msra.mxu1 %v10598_v26  ;;  %7026 = vmatprep.subr.bf16.mxu0 %v10591_v13  ;;  %v10551_v13 = vcombine.high %v1156_v62, %v1160_v21 }
 0x461   :  { %7092 = vmatprep.subr.bf16.mxu1 %v9761_v22  ;;  %v9721_v22 = vcombine.high %v325_v12, %v329_v63 }
 0x463   :  { %7084 = vmatmul.mubr.bf16.vlgmr.msra.gmra.mxu1 %v11897_v5  ;;  %7027 = vmatpush2.bf16.msra.mxu0 %v10590_v20  ;;  %v10550_v20 = vcombine.low %v1156_v62, %v1160_v21  ;;  %v9888_v62 = vcombine.low %v493_v19, %v497_v42  ;;  %v9824_v21 = vcombine.low %v429_v35, %v433_v51 }
 0x464   :  { %7093 = vmatpush1.bf16.msra.mxu1 %v9760_v14  ;;  %7124 = vmatprep.mubr.bf16.mxu1 %v11829_v29  ;;  %v333_v29 = vld [vmem:[#allocation5 + $0xd8] sm:$0xff]  ;;  %v9720_v14 = vcombine.low %v325_v12, %v329_v63 }
 0x465   :  { %7028 = vmatprep.subr.bf16.mxu0 %v10583_v32  ;;  %7094 = vmatprep.subr.bf16.mxu1 %v9753_v28  ;;  %v9729_v6 = vcombine.high %v333_v29, %v337_v10  ;;  %v9728_v26 = vcombine.low %v333_v29, %v337_v10  ;;  %v10543_v32 = vcombine.high %v1148_v43, %v1152_v23  ;;  %v485_v29 = vld [vmem:[#allocation5 + $0x598] sm:$0xff] }
 0x466   :  { %v9713_v28 = vcombine.high %v317_v27, %v321_v59  ;;  %v489_v10 = vld [vmem:[#allocation5 + $0x5b8] sm:$0xff] }
 0x467   :  { %7029 = vmatpush2.bf16.msra.mxu0 %v10582_v46  ;;  %v10542_v46 = vcombine.low %v1148_v43, %v1152_v23  ;;  %v9881_v12 = vcombine.high %v485_v29, %v489_v10  ;;  %v413_v43 = vld [vmem:[#allocation5 + $0x358] sm:$0xff] }
 0x468   :  { %7095 = vmatpush1.bf16.msra.mxu1 %v9752_v47  ;;  %7030 = vmatprep.subr.bf16.mxu0 %v10575_v48  ;;  %v9712_v47 = vcombine.low %v317_v27, %v321_v59  ;;  %v10535_v48 = vcombine.high %v1140_v34, %v1144_v36  ;;  %v417_v23 = vld [vmem:[#allocation5 + $0x378] sm:$0xff] }
 0x469   :  { %7096 = vmatprep.subr.bf16.mxu1 %v9745_v50  ;;  %v9705_v50 = vcombine.high %v309_v37, %v313_v45 }
 0x46b   :  { %7031 = vmatpush2.bf16.msra.mxu0 %v10574_v52  ;;  %v10534_v52 = vcombine.low %v1140_v34, %v1144_v36 }
 0x46c   :  { %7097 = vmatpush1.bf16.msra.mxu1 %v9744_v56  ;;  %7032 = vmatprep.subr.bf16.mxu0 %v10567_v53  ;;  %v1286_v56 = vsub.s32 4, %v11901_v7  ;;  %v9704_v53 = vcombine.low %v309_v37, %v313_v45  ;;  %v9809_v45 = vcombine.high %v413_v43, %v417_v23 }
 0x46d   :  { %7098 = vmatprep.subr.bf16.mxu1 %v9737_v57  ;;  %v9889_v57 = vcombine.high %v493_v19, %v497_v42  ;;  %v409_v19 = vld [vmem:[#allocation5 + $0x338] sm:$0xff] }
 0x46f   :  { %7033 = vmatpush2.bf16.msra.mxu0 %v10566_v0  ;;  %v421_v0 = vld [vmem:[#allocation5 + $0x398] sm:$0xff] }
 0x470   :  { %7099 = vmatpush1.bf16.msra.mxu1 %v9736_v17  ;;  %7034 = vmatprep.subr.bf16.mxu0 %v10559_v11  ;;  %v425_v17 = vld [vmem:[#allocation5 + $0x3b8] sm:$0xff]  ;;  %v11437_v11 = vld [vmem:[#allocation7] sm:$0xff] }
 0x471   :  { %7100 = vmatprep.subr.bf16.mxu1 %v9729_v6  ;;  %v1287_v6 = vrot.slane %v11437_v11, %v1286_v56  ;;  %v1291_v63 = vrot.slane %v11437_v11, %v1290_v58  ;;  %v465_v58 = vld [vmem:[#allocation5 + $0x4f8] sm:$0xff] }
 0x473   :  { %7035 = vmatpush2.bf16.msra.mxu0 %v10558_v54  ;;  %v9817_v54 = vcombine.high %v421_v0, %v425_v17 }
 0x474   :  { %7101 = vmatpush1.bf16.msra.mxu1 %v9728_v26  ;;  %7036 = vmatprep.subr.bf16.mxu0 %v10551_v13  ;;  %v477_v26 = vld [vmem:[#allocation5 + $0x558] sm:$0xff] }
 0x475   :  { %7102 = vmatprep.subr.bf16.mxu1 %v9721_v22  ;;  %v481_v13 = vld [vmem:[#allocation5 + $0x578] sm:$0xff] }
 0x476   :  { %v9872_v35 = vcombine.low %v477_v26, %v481_v13 }
 0x477   :  { %7037 = vmatpush2.bf16.msra.mxu0 %v10550_v20  ;;  %v9880_v20 = vcombine.low %v485_v29, %v489_v10  ;;  %v397_v29 = vld [vmem:[#allocation5 + $0x2d8] sm:$0xff] }
 0x478   :  { %7103 = vmatpush1.bf16.msra.mxu1 %v9720_v14  ;;  %7038 = vmatprep.subr.bf16.mxu0 %v10543_v32  ;;  %v9816_v32 = vcombine.low %v421_v0, %v425_v17  ;;  %v401_v10 = vld [vmem:[#allocation5 + $0x2f8] sm:$0xff] }
 0x479   :  { %7104 = vmatprep.subr.bf16.mxu1 %v9713_v28  ;;  %v9873_v28 = vcombine.high %v477_v26, %v481_v13  ;;  %v9792_v26 = vcombine.low %v397_v29, %v401_v10 }
 0x47b   :  { %7039 = vmatpush2.bf16.msra.mxu0 %v10542_v46  ;;  %v469_v46 = vld [vmem:[#allocation5 + $0x518] sm:$0xff] }
 0x47c   :  { %7105 = vmatpush1.bf16.msra.mxu1 %v9712_v47  ;;  %7040 = vmatprep.subr.bf16.mxu0 %v10535_v48  ;;  %v473_v47 = vld [vmem:[#allocation5 + $0x538] sm:$0xff] }
 0x47d   :  { %7106 = vmatprep.subr.bf16.mxu1 %v9705_v50  ;;  %v405_v50 = vld [vmem:[#allocation5 + $0x318] sm:$0xff]  ;;  %v9865_v56 = vcombine.high %v469_v46, %v473_v47  ;;  %v9864_v0 = vcombine.low %v469_v46, %v473_v47 }
 0x47e   :  { %v9800_v17 = vcombine.low %v405_v50, %v409_v19  ;;  %v377_v46 = vld [vmem:[#allocation5 + $0x238] sm:$0xff] }
 0x47f   :  { %7041 = vmatpush2.bf16.msra.mxu0 %v10534_v52  ;;  %v9808_v52 = vcombine.low %v413_v43, %v417_v23  ;;  %v445_v43 = vld [vmem:[#allocation5 + $0x458] sm:$0xff] }
 0x480   :  { %7107 = vmatpush1.bf16.msra.mxu1 %v9704_v53  ;;  %7133 = vmatprep.subr.bf16.mxu0 %v9889_v57  ;;  %v9801_v57 = vcombine.high %v405_v50, %v409_v19  ;;  %v449_v23 = vld [vmem:[#allocation5 + $0x478] sm:$0xff] }
 0x481   :  { %7108 = vmatprep.subr.bf16.mxu1 %v9825_v31  ;;  %v461_v31 = vld [vmem:[#allocation5 + $0x4d8] sm:$0xff]  ;;  %v9840_v47 = vcombine.low %v445_v43, %v449_v23 }
 0x482   :  { %v6798_v22 = vpop.f32.mrf.mxu0  ;;  %7043 = vmatmul.mubr.bf16.vlgmr.msra.gmra.mxu0 %v11909_v33  ;;  %v9857_v11 = vcombine.high %v461_v31, %v465_v58 }
 0x483   :  { %v6799_v27 = vadd.f32 %v6798_v22, %v1287_v6  ;;  %v6839_v59 = vpop.f32.mrf.mxu1  ;;  %7134 = vmatpush1.bf16.msra.mxu0 %v9888_v62  ;;  %7165 = vmatprep.mubr.bf16.mxu0 %v11831_v61  ;;  %v9793_v6 = vcombine.high %v397_v29, %v401_v10  ;;  %v453_v62 = vld [vmem:[#allocation5 + $0x498] sm:$0xff] }
 0x484   :  { %7109 = vmatpush2.bf16.msra.mxu1 %v9824_v21  ;;  %v6800_v14 = vpop.f32.mrf.mxu0  ;;  %7135 = vmatprep.subr.bf16.mxu0 %v9881_v12  ;;  %v457_v21 = vld [vmem:[#allocation5 + $0x4b8] sm:$0xff] }
 0x485   :  { %v12023_v34 = vadd.f32 %v6839_v59, %v6799_v27  ;;  %v6801_v36 = vadd.f32 %v6800_v14, %v1291_v63  ;;  %v6841_v37 = vpop.f32.mrf.mxu1  ;;  %7110 = vmatprep.subr.bf16.mxu1 %v9817_v54  ;;  %v389_v12 = vld [vmem:[#allocation5 + $0x298] sm:$0xff]  ;;  %v9856_v54 = vcombine.low %v461_v31, %v465_v58  ;;  %v9849_v13 = vcombine.high %v453_v62, %v457_v21 }
 0x486   :  { %v6802_v48 = vpop.f32.mrf.mxu0  ;;  %v393_v63 = vld [vmem:[#allocation5 + $0x2b8] sm:$0xff] }
 0x487   :  { %v12025_v42 = vadd.f32 %v6841_v37, %v6801_v36  ;;  %v6843_v61 = vpop.f32.mrf.mxu1  ;;  %7136 = vmatpush1.bf16.msra.mxu0 %v9880_v20  ;;  %v9785_v22 = vcombine.high %v389_v12, %v393_v63  ;;  %v381_v27 = vld [vmem:[#allocation5 + $0x258] sm:$0xff]  ;;  %v9848_v20 = vcombine.low %v453_v62, %v457_v21  ;;  %v9784_v14 = vcombine.low %v389_v12, %v393_v63 }
 0x488   :  { %7111 = vmatpush2.bf16.msra.mxu1 %v9816_v32  ;;  %v6803_v51 = vpop.f32.mrf.mxu0  ;;  %7137 = vmatprep.subr.bf16.mxu0 %v9873_v28  ;;  %v385_v59 = vld [vmem:[#allocation5 + $0x278] sm:$0xff]  ;;  %v9841_v32 = vcombine.high %v445_v43, %v449_v23 }
 0x489   :  { %v6844_v53 = vpop.f32.mrf.mxu1  ;;  %7112 = vmatprep.subr.bf16.mxu1 %v9809_v45  ;;  %v9777_v28 = vcombine.high %v381_v27, %v385_v59  ;;  %v437_v36 = vld [vmem:[#allocation5 + $0x418] sm:$0xff]  ;;  %v9776_v48 = vcombine.low %v381_v27, %v385_v59 }
 0x48a   :  { %v441_v37 = vld [vmem:[#allocation5 + $0x438] sm:$0xff] }
 0x48b   :  { %7138 = vmatpush1.bf16.msra.mxu0 %v9872_v35  ;;  %v373_v45 = vld [vmem:[#allocation5 + $0x218] sm:$0xff]  ;;  %v9833_v50 = vcombine.high %v437_v36, %v441_v37 }
 0x48c   :  { %7113 = vmatpush2.bf16.msra.mxu1 %v9808_v52  ;;  %7139 = vmatprep.subr.bf16.mxu0 %v9865_v56  ;;  %v9769_v19 = vcombine.high %v373_v45, %v377_v46  ;;  %v557_v61 = vld [vmem:[#allocation5 + $0x7d8] sm:$0xff]  ;;  %v9832_v56 = vcombine.low %v437_v36, %v441_v37  ;;  %v9768_v53 = vcombine.low %v373_v45, %v377_v46 }
 0x48d   :  { %7114 = vmatprep.subr.bf16.mxu1 %v9801_v57  ;;  %v561_v35 = vld [vmem:[#allocation5 + $0x7f8] sm:$0xff] }
 0x48e   :  { %v621_v51 = vld [vmem:[#allocation5 + $0x9d8] sm:$0xff]  ;;  %v9953_v57 = vcombine.high %v557_v61, %v561_v35 }
 0x48f   :  { %7140 = vmatpush1.bf16.msra.mxu0 %v9864_v0  ;;  %v625_v52 = vld [vmem:[#allocation5 + $0x9f8] sm:$0xff] }
 0x490   :  { %7115 = vmatpush2.bf16.msra.mxu1 %v9800_v17  ;;  %7141 = vmatprep.subr.bf16.mxu0 %v9857_v11  ;;  %v10017_v31 = vcombine.high %v621_v51, %v625_v52  ;;  %v549_v58 = vld [vmem:[#allocation5 + $0x798] sm:$0xff]  ;;  %v9952_v17 = vcombine.low %v557_v61, %v561_v35  ;;  %v10016_v11 = vcombine.low %v621_v51, %v625_v52 }
 0x491   :  { %7116 = vmatprep.subr.bf16.mxu1 %v9793_v6  ;;  %v553_v29 = vld [vmem:[#allocation5 + $0x7b8] sm:$0xff] }
 0x492   :  { %v613_v10 = vld [vmem:[#allocation5 + $0x998] sm:$0xff]  ;;  %v9945_v6 = vcombine.high %v549_v58, %v553_v29 }
 0x493   :  { %7142 = vmatpush1.bf16.msra.mxu0 %v9856_v54  ;;  %v617_v0 = vld [vmem:[#allocation5 + $0x9b8] sm:$0xff] }
 0x494   :  { %7117 = vmatpush2.bf16.msra.mxu1 %v9792_v26  ;;  %7143 = vmatprep.subr.bf16.mxu0 %v9849_v13  ;;  %v10009_v62 = vcombine.high %v613_v10, %v617_v0  ;;  %v541_v21 = vld [vmem:[#allocation5 + $0x758] sm:$0xff]  ;;  %v9944_v26 = vcombine.low %v549_v58, %v553_v29  ;;  %v10008_v13 = vcombine.low %v613_v10, %v617_v0 }
 0x495   :  { %7118 = vmatprep.subr.bf16.mxu1 %v9785_v22  ;;  %v545_v12 = vld [vmem:[#allocation5 + $0x778] sm:$0xff] }
 0x496   :  { %v605_v63 = vld [vmem:[#allocation5 + $0x958] sm:$0xff]  ;;  %v9937_v22 = vcombine.high %v541_v21, %v545_v12 }
 0x497   :  { %7144 = vmatpush1.bf16.msra.mxu0 %v9848_v20  ;;  %v609_v54 = vld [vmem:[#allocation5 + $0x978] sm:$0xff] }
 0x498   :  { %7119 = vmatpush2.bf16.msra.mxu1 %v9784_v14  ;;  %7145 = vmatprep.subr.bf16.mxu0 %v9841_v32  ;;  %v10001_v43 = vcombine.high %v605_v63, %v609_v54  ;;  %v533_v23 = vld [vmem:[#allocation5 + $0x718] sm:$0xff]  ;;  %v9936_v14 = vcombine.low %v541_v21, %v545_v12  ;;  %v10000_v32 = vcombine.low %v605_v63, %v609_v54 }
 0x499   :  { %7120 = vmatprep.subr.bf16.mxu1 %v9777_v28  ;;  %v537_v27 = vld [vmem:[#allocation5 + $0x738] sm:$0xff] }
 0x49a   :  { %v597_v59 = vld [vmem:[#allocation5 + $0x918] sm:$0xff]  ;;  %v9928_v46 = vcombine.low %v533_v23, %v537_v27 }
 0x49b   :  { %7146 = vmatpush1.bf16.msra.mxu0 %v9840_v47  ;;  %v601_v20 = vld [vmem:[#allocation5 + $0x938] sm:$0xff] }
 0x49c   :  { %7121 = vmatpush2.bf16.msra.mxu1 %v9776_v48  ;;  %7147 = vmatprep.subr.bf16.mxu0 %v9833_v50  ;;  %v9993_v28 = vcombine.high %v597_v59, %v601_v20  ;;  %v525_v36 = vld [vmem:[#allocation5 + $0x6d8] sm:$0xff]  ;;  %v9992_v47 = vcombine.low %v597_v59, %v601_v20 }
 0x49d   :  { %7122 = vmatprep.subr.bf16.mxu1 %v9769_v19  ;;  %v529_v37 = vld [vmem:[#allocation5 + $0x6f8] sm:$0xff] }
 0x49e   :  { %v593_v45 = vld [vmem:[#allocation5 + $0x8f8] sm:$0xff]  ;;  %v9921_v48 = vcombine.high %v525_v36, %v529_v37  ;;  %v9920_v52 = vcombine.low %v525_v36, %v529_v37 }
 0x49f   :  { %7148 = vmatpush1.bf16.msra.mxu0 %v9832_v56  ;;  %v517_v19 = vld [vmem:[#allocation5 + $0x698] sm:$0xff] }
 0x4a0   :  { %7123 = vmatpush2.bf16.msra.mxu1 %v9768_v53  ;;  %7149 = vmatprep.subr.bf16.mxu0 %v9953_v57  ;;  %v521_v61 = vld [vmem:[#allocation5 + $0x6b8] sm:$0xff] }
 0x4a1   :  { %7174 = vmatprep.subr.bf16.mxu1 %v10017_v31  ;;  %v581_v35 = vld [vmem:[#allocation5 + $0x898] sm:$0xff]  ;;  %v9913_v53 = vcombine.high %v517_v19, %v521_v61  ;;  %v9912_v0 = vcombine.low %v517_v19, %v521_v61 }
 0x4a2   :  { %v585_v51 = vld [vmem:[#allocation5 + $0x8b8] sm:$0xff] }
 0x4a3   :  { %7125 = vmatmul.mubr.bf16.vlgmr.msra.gmra.mxu1 %v11833_v30  ;;  %7150 = vmatpush2.bf16.msra.mxu0 %v9952_v17  ;;  %v9929_v30 = vcombine.high %v533_v23, %v537_v27  ;;  %v9977_v57 = vcombine.high %v581_v35, %v585_v51  ;;  %v509_v31 = vld [vmem:[#allocation5 + $0x658] sm:$0xff]  ;;  %v9976_v17 = vcombine.low %v581_v35, %v585_v51 }
 0x4a4   :  { %7175 = vmatpush1.bf16.msra.mxu1 %v10016_v11  ;;  %7206 = vmatprep.mubr.bf16.mxu1 %v11841_v38  ;;  %v589_v38 = vld [vmem:[#allocation5 + $0x8d8] sm:$0xff] }
 0x4a5   :  { %7151 = vmatprep.subr.bf16.mxu0 %v9945_v6  ;;  %7176 = vmatprep.subr.bf16.mxu1 %v10009_v62  ;;  %v9985_v50 = vcombine.high %v589_v38, %v593_v45  ;;  %v9984_v56 = vcombine.low %v589_v38, %v593_v45  ;;  %v513_v58 = vld [vmem:[#allocation5 + $0x678] sm:$0xff] }
 0x4a6   :  { %v573_v29 = vld [vmem:[#allocation5 + $0x858] sm:$0xff]  ;;  %v9905_v11 = vcombine.high %v509_v31, %v513_v58  ;;  %v9904_v54 = vcombine.low %v509_v31, %v513_v58 }
 0x4a7   :  { %7152 = vmatpush2.bf16.msra.mxu0 %v9944_v26  ;;  %v577_v10 = vld [vmem:[#allocation5 + $0x878] sm:$0xff] }
 0x4a8   :  { %7177 = vmatpush1.bf16.msra.mxu1 %v10008_v13  ;;  %7153 = vmatprep.subr.bf16.mxu0 %v9937_v22  ;;  %v9969_v6 = vcombine.high %v573_v29, %v577_v10  ;;  %v501_v62 = vld [vmem:[#allocation5 + $0x618] sm:$0xff]  ;;  %v9968_v26 = vcombine.low %v573_v29, %v577_v10 }
 0x4a9   :  { %7178 = vmatprep.subr.bf16.mxu1 %v10001_v43  ;;  %v505_v21 = vld [vmem:[#allocation5 + $0x638] sm:$0xff] }
 0x4aa   :  { %v565_v12 = vld [vmem:[#allocation5 + $0x818] sm:$0xff]  ;;  %v9897_v13 = vcombine.high %v501_v62, %v505_v21  ;;  %v9896_v20 = vcombine.low %v501_v62, %v505_v21 }
 0x4ab   :  { %7154 = vmatpush2.bf16.msra.mxu0 %v9936_v14  ;;  %v569_v63 = vld [vmem:[#allocation5 + $0x838] sm:$0xff] }
 0x4ac   :  { %7179 = vmatpush1.bf16.msra.mxu1 %v10000_v32  ;;  %7155 = vmatprep.subr.bf16.mxu0 %v9929_v30  ;;  %v9961_v22 = vcombine.high %v565_v12, %v569_v63  ;;  %v749_v43 = vld [vmem:[#allocation5 + $0xdd8] sm:$0xff]  ;;  %v9960_v14 = vcombine.low %v565_v12, %v569_v63 }
 0x4ad   :  { %7180 = vmatprep.subr.bf16.mxu1 %v9993_v28  ;;  %v753_v23 = vld [vmem:[#allocation5 + $0xdf8] sm:$0xff] }
 0x4ae   :  { %v685_v27 = vld [vmem:[#allocation5 + $0xbd8] sm:$0xff]  ;;  %v10145_v32 = vcombine.high %v749_v43, %v753_v23  ;;  %v10144_v45 = vcombine.low %v749_v43, %v753_v23 }
 0x4af   :  { %7156 = vmatpush2.bf16.msra.mxu0 %v9928_v46  ;;  %v689_v59 = vld [vmem:[#allocation5 + $0xbf8] sm:$0xff] }
 0x4b0   :  { %7181 = vmatpush1.bf16.msra.mxu1 %v9992_v47  ;;  %7157 = vmatprep.subr.bf16.mxu0 %v9921_v48  ;;  %v10081_v30 = vcombine.high %v685_v27, %v689_v59  ;;  %v741_v28 = vld [vmem:[#allocation5 + $0xd98] sm:$0xff]  ;;  %v10080_v46 = vcombine.low %v685_v27, %v689_v59 }
 0x4b1   :  { %7182 = vmatprep.subr.bf16.mxu1 %v9985_v50  ;;  %v745_v36 = vld [vmem:[#allocation5 + $0xdb8] sm:$0xff] }
 0x4b2   :  { %v677_v37 = vld [vmem:[#allocation5 + $0xb98] sm:$0xff]  ;;  %v10137_v47 = vcombine.high %v741_v28, %v745_v36 }
 0x4b3   :  { %7158 = vmatpush2.bf16.msra.mxu0 %v9920_v52  ;;  %v681_v38 = vld [vmem:[#allocation5 + $0xbb8] sm:$0xff] }
 0x4b4   :  { %7183 = vmatpush1.bf16.msra.mxu1 %v9984_v56  ;;  %7159 = vmatprep.subr.bf16.mxu0 %v9913_v53  ;;  %v10073_v48 = vcombine.high %v677_v37, %v681_v38  ;;  %v733_v50 = vld [vmem:[#allocation5 + $0xd58] sm:$0xff]  ;;  %v10136_v53 = vcombine.low %v741_v28, %v745_v36  ;;  %v10072_v31 = vcombine.low %v677_v37, %v681_v38 }
 0x4b5   :  { %7184 = vmatprep.subr.bf16.mxu1 %v9977_v57  ;;  %v737_v19 = vld [vmem:[#allocation5 + $0xd78] sm:$0xff] }
 0x4b6   :  { %v669_v35 = vld [vmem:[#allocation5 + $0xb58] sm:$0xff]  ;;  %v10129_v58 = vcombine.high %v733_v50, %v737_v19  ;;  %v10128_v12 = vcombine.low %v733_v50, %v737_v19 }
 0x4b7   :  { %7160 = vmatpush2.bf16.msra.mxu0 %v9912_v0  ;;  %v673_v51 = vld [vmem:[#allocation5 + $0xb78] sm:$0xff] }
 0x4b8   :  { %7185 = vmatpush1.bf16.msra.mxu1 %v9976_v17  ;;  %7161 = vmatprep.subr.bf16.mxu0 %v9905_v11  ;;  %v725_v17 = vld [vmem:[#allocation5 + $0xd18] sm:$0xff] }
 0x4b9   :  { %7186 = vmatprep.subr.bf16.mxu1 %v9969_v6  ;;  %v729_v11 = vld [vmem:[#allocation5 + $0xd38] sm:$0xff] }
 0x4ba   :  { %v661_v6 = vld [vmem:[#allocation5 + $0xb18] sm:$0xff]  ;;  %v10120_v59 = vcombine.low %v725_v17, %v729_v11 }
 0x4bb   :  { %7162 = vmatpush2.bf16.msra.mxu0 %v9904_v54  ;;  %v665_v62 = vld [vmem:[#allocation5 + $0xb38] sm:$0xff]  ;;  %v10064_v54 = vcombine.low %v669_v35, %v673_v51 }
 0x4bc   :  { %7187 = vmatpush1.bf16.msra.mxu1 %v9968_v26  ;;  %7163 = vmatprep.subr.bf16.mxu0 %v9897_v13  ;;  %v10121_v26 = vcombine.high %v725_v17, %v729_v11  ;;  %v721_v43 = vld [vmem:[#allocation5 + $0xcf8] sm:$0xff] }
 0x4bd   :  { %7188 = vmatprep.subr.bf16.mxu1 %v9961_v22  ;;  %v717_v22 = vld [vmem:[#allocation5 + $0xcd8] sm:$0xff] }
 0x4be   :  { %v653_v23 = vld [vmem:[#allocation5 + $0xad8] sm:$0xff]  ;;  %v10112_v38 = vcombine.low %v717_v22, %v721_v43 }
 0x4bf   :  { %7164 = vmatpush2.bf16.msra.mxu0 %v9896_v20  ;;  %v657_v27 = vld [vmem:[#allocation5 + $0xaf8] sm:$0xff]  ;;  %v10056_v20 = vcombine.low %v661_v6, %v665_v62 }
 0x4c0   :  { %7189 = vmatpush1.bf16.msra.mxu1 %v9960_v14  ;;  %7215 = vmatprep.subr.bf16.mxu0 %v10145_v32  ;;  %v10113_v14 = vcombine.high %v717_v22, %v721_v43  ;;  %v10049_v32 = vcombine.high %v653_v23, %v657_v27  ;;  %v713_v28 = vld [vmem:[#allocation5 + $0xcb8] sm:$0xff] }
 0x4c1   :  { %7190 = vmatprep.subr.bf16.mxu1 %v10081_v30  ;;  %v709_v30 = vld [vmem:[#allocation5 + $0xc98] sm:$0xff] }
 0x4c2   :  { %v6880_v61 = vpop.f32.mrf.mxu0  ;;  %7166 = vmatmul.mubr.bf16.vlgmr.msra.gmra.mxu0 %v11835_v3  ;;  %v10065_v3 = vcombine.high %v669_v35, %v673_v51  ;;  %v645_v36 = vld [vmem:[#allocation5 + $0xa98] sm:$0xff]  ;;  %v10104_v35 = vcombine.low %v709_v30, %v713_v28 }
 0x4c3   :  { %v6881_v52 = vadd.f32 %v6880_v61, %v12023_v34  ;;  %v6921_v56 = vpop.f32.mrf.mxu1  ;;  %7216 = vmatpush1.bf16.msra.mxu0 %v10144_v45  ;;  %7247 = vmatprep.mubr.bf16.mxu0 %v11843_v41  ;;  %v649_v37 = vld [vmem:[#allocation5 + $0xab8] sm:$0xff]  ;;  %v10048_v45 = vcombine.low %v653_v23, %v657_v27 }
 0x4c4   :  { %7191 = vmatpush2.bf16.msra.mxu1 %v10080_v46  ;;  %v6882_v57 = vpop.f32.mrf.mxu0  ;;  %7217 = vmatprep.subr.bf16.mxu0 %v10137_v47  ;;  %v10105_v46 = vcombine.high %v709_v30, %v713_v28  ;;  %v10041_v47 = vcombine.high %v645_v36, %v649_v37  ;;  %v705_v50 = vld [vmem:[#allocation5 + $0xc78] sm:$0xff]  ;;  %v10040_v51 = vcombine.low %v645_v36, %v649_v37 }
 0x4c5   :  { %v12032_v29 = vadd.f32 %v6921_v56, %v6881_v52  ;;  %v6883_v10 = vadd.f32 %v6882_v57, %v12025_v42  ;;  %v6923_v0 = vpop.f32.mrf.mxu1  ;;  %7192 = vmatprep.subr.bf16.mxu1 %v10073_v48  ;;  %v10057_v42 = vcombine.high %v661_v6, %v665_v62  ;;  %v701_v48 = vld [vmem:[#allocation5 + $0xc58] sm:$0xff] }
 0x4c6   :  { %v6884_v34 = vpop.f32.mrf.mxu0  ;;  %v637_v19 = vld [vmem:[#allocation5 + $0xa58] sm:$0xff]  ;;  %v10097_v52 = vcombine.high %v701_v48, %v705_v50 }
 0x4c7   :  { %v12035_v21 = vadd.f32 %v6923_v0, %v6883_v10  ;;  %v6925_v41 = vpop.f32.mrf.mxu1  ;;  %7218 = vmatpush1.bf16.msra.mxu0 %v10136_v53  ;;  %v641_v61 = vld [vmem:[#allocation5 + $0xa78] sm:$0xff]  ;;  %v10096_v10 = vcombine.low %v701_v48, %v705_v50 }
 0x4c8   :  { %7193 = vmatpush2.bf16.msra.mxu1 %v10072_v31  ;;  %v6885_v63 = vpop.f32.mrf.mxu0  ;;  %7219 = vmatprep.subr.bf16.mxu0 %v10129_v58  ;;  %v10033_v56 = vcombine.high %v637_v19, %v641_v61  ;;  %v693_v53 = vld [vmem:[#allocation5 + $0xc18] sm:$0xff]  ;;  %v10032_v0 = vcombine.low %v637_v19, %v641_v61 }
 0x4c9   :  { %v6926_v13 = vpop.f32.mrf.mxu1  ;;  %7194 = vmatprep.subr.bf16.mxu1 %v10065_v3  ;;  %v697_v57 = vld [vmem:[#allocation5 + $0xc38] sm:$0xff] }
 0x4ca   :  { %v629_v31 = vld [vmem:[#allocation5 + $0xa18] sm:$0xff]  ;;  %v10089_v3 = vcombine.high %v693_v53, %v697_v57  ;;  %v10088_v41 = vcombine.low %v693_v53, %v697_v57 }
 0x4cb   :  { %7220 = vmatpush1.bf16.msra.mxu0 %v10128_v12  ;;  %v633_v58 = vld [vmem:[#allocation5 + $0xa38] sm:$0xff] }
 0x4cc   :  { %7195 = vmatpush2.bf16.msra.mxu1 %v10064_v54  ;;  %7221 = vmatprep.subr.bf16.mxu0 %v10121_v26  ;;  %v10025_v17 = vcombine.high %v629_v31, %v633_v58  ;;  %v813_v11 = vld [vmem:[#allocation5 + $0xfd8] sm:$0xff]  ;;  %v10024_v12 = vcombine.low %v629_v31, %v633_v58 }
 0x4cd   :  { %7196 = vmatprep.subr.bf16.mxu1 %v10057_v42  ;;  %v817_v34 = vld [vmem:[#allocation5 + $0xff8] sm:$0xff] }
 0x4ce   :  { %v877_v6 = vld [vmem:[#allocation5 + $0x11d8] sm:$0xff]  ;;  %v10209_v63 = vcombine.high %v813_v11, %v817_v34  ;;  %v10208_v43 = vcombine.low %v813_v11, %v817_v34 }
 0x4cf   :  { %7222 = vmatpush1.bf16.msra.mxu0 %v10120_v59  ;;  %v881_v62 = vld [vmem:[#allocation5 + $0x11f8] sm:$0xff] }
 0x4d0   :  { %7197 = vmatpush2.bf16.msra.mxu1 %v10056_v20  ;;  %7223 = vmatprep.subr.bf16.mxu0 %v10113_v14  ;;  %v10273_v54 = vcombine.high %v877_v6, %v881_v62  ;;  %v805_v26 = vld [vmem:[#allocation5 + $0xf98] sm:$0xff]  ;;  %v10272_v23 = vcombine.low %v877_v6, %v881_v62 }
 0x4d1   :  { %7198 = vmatprep.subr.bf16.mxu1 %v10049_v32  ;;  %v809_v13 = vld [vmem:[#allocation5 + $0xfb8] sm:$0xff] }
 0x4d2   :  { %v869_v42 = vld [vmem:[#allocation5 + $0x1198] sm:$0xff]  ;;  %v10201_v27 = vcombine.high %v805_v26, %v809_v13  ;;  %v10200_v28 = vcombine.low %v805_v26, %v809_v13 }
 0x4d3   :  { %7224 = vmatpush1.bf16.msra.mxu0 %v10112_v38  ;;  %v873_v22 = vld [vmem:[#allocation5 + $0x11b8] sm:$0xff] }
 0x4d4   :  { %7199 = vmatpush2.bf16.msra.mxu1 %v10048_v45  ;;  %7225 = vmatprep.subr.bf16.mxu0 %v10105_v46  ;;  %v10265_v59 = vcombine.high %v869_v42, %v873_v22  ;;  %v797_v20 = vld [vmem:[#allocation5 + $0xf58] sm:$0xff]  ;;  %v10264_v36 = vcombine.low %v869_v42, %v873_v22 }
 0x4d5   :  { %7200 = vmatprep.subr.bf16.mxu1 %v10041_v47  ;;  %v801_v14 = vld [vmem:[#allocation5 + $0xf78] sm:$0xff] }
 0x4d6   :  { %v861_v32 = vld [vmem:[#allocation5 + $0x1158] sm:$0xff]  ;;  %v10193_v37 = vcombine.high %v797_v20, %v801_v14  ;;  %v10192_v50 = vcombine.low %v797_v20, %v801_v14 }
 0x4d7   :  { %7226 = vmatpush1.bf16.msra.mxu0 %v10104_v35  ;;  %v865_v30 = vld [vmem:[#allocation5 + $0x1178] sm:$0xff] }
 0x4d8   :  { %7201 = vmatpush2.bf16.msra.mxu1 %v10040_v51  ;;  %7227 = vmatprep.subr.bf16.mxu0 %v10097_v52  ;;  %v10257_v38 = vcombine.high %v861_v32, %v865_v30  ;;  %v789_v45 = vld [vmem:[#allocation5 + $0xf18] sm:$0xff]  ;;  %v10256_v19 = vcombine.low %v861_v32, %v865_v30 }
 0x4d9   :  { %7202 = vmatprep.subr.bf16.mxu1 %v10033_v56  ;;  %v793_v46 = vld [vmem:[#allocation5 + $0xf38] sm:$0xff] }
 0x4da   :  { %v853_v47 = vld [vmem:[#allocation5 + $0x1118] sm:$0xff]  ;;  %v10184_v56 = vcombine.low %v789_v45, %v793_v46 }
 0x4db   :  { %7228 = vmatpush1.bf16.msra.mxu0 %v10096_v10  ;;  %v857_v48 = vld [vmem:[#allocation5 + $0x1138] sm:$0xff] }
 0x4dc   :  { %7203 = vmatpush2.bf16.msra.mxu1 %v10032_v0  ;;  %7229 = vmatprep.subr.bf16.mxu0 %v10089_v3  ;;  %v10249_v61 = vcombine.high %v853_v47, %v857_v48  ;;  %v781_v35 = vld [vmem:[#allocation5 + $0xed8] sm:$0xff]  ;;  %v10248_v53 = vcombine.low %v853_v47, %v857_v48 }
 0x4dd   :  { %7204 = vmatprep.subr.bf16.mxu1 %v10025_v17  ;;  %v785_v51 = vld [vmem:[#allocation5 + $0xef8] sm:$0xff] }
 0x4de   :  { %v849_v52 = vld [vmem:[#allocation5 + $0x10f8] sm:$0xff]  ;;  %v10177_v57 = vcombine.high %v781_v35, %v785_v51  ;;  %v10176_v17 = vcombine.low %v781_v35, %v785_v51 }
 0x4df   :  { %7230 = vmatpush1.bf16.msra.mxu0 %v10088_v41  ;;  %v773_v58 = vld [vmem:[#allocation5 + $0xe98] sm:$0xff] }
 0x4e0   :  { %7205 = vmatpush2.bf16.msra.mxu1 %v10024_v12  ;;  %7231 = vmatprep.subr.bf16.mxu0 %v10209_v63  ;;  %v777_v10 = vld [vmem:[#allocation5 + $0xeb8] sm:$0xff] }
 0x4e1   :  { %7256 = vmatprep.subr.bf16.mxu1 %v10273_v54  ;;  %v837_v0 = vld [vmem:[#allocation5 + $0x1098] sm:$0xff]  ;;  %v10169_v34 = vcombine.high %v773_v58, %v777_v10  ;;  %v10168_v54 = vcombine.low %v773_v58, %v777_v10 }
 0x4e2   :  { %v841_v3 = vld [vmem:[#allocation5 + $0x10b8] sm:$0xff] }
 0x4e3   :  { %7207 = vmatmul.mubr.bf16.vlgmr.msra.gmra.mxu1 %v11861_v39  ;;  %7232 = vmatpush2.bf16.msra.mxu0 %v10208_v43  ;;  %v10185_v39 = vcombine.high %v789_v45, %v793_v46  ;;  %v10233_v6 = vcombine.high %v837_v0, %v841_v3  ;;  %v765_v62 = vld [vmem:[#allocation5 + $0xe58] sm:$0xff]  ;;  %v10232_v26 = vcombine.low %v837_v0, %v841_v3 }
 0x4e4   :  { %7257 = vmatpush1.bf16.msra.mxu1 %v10272_v23  ;;  %7288 = vmatprep.mubr.bf16.mxu1 %v11867_v44  ;;  %v845_v44 = vld [vmem:[#allocation5 + $0x10d8] sm:$0xff] }
 0x4e5   :  { %7233 = vmatprep.subr.bf16.mxu0 %v10201_v27  ;;  %7258 = vmatprep.subr.bf16.mxu1 %v10265_v59  ;;  %v10241_v31 = vcombine.high %v845_v44, %v849_v52  ;;  %v10240_v11 = vcombine.low %v845_v44, %v849_v52  ;;  %v769_v41 = vld [vmem:[#allocation5 + $0xe78] sm:$0xff] }
 0x4e6   :  { %v829_v12 = vld [vmem:[#allocation5 + $0x1058] sm:$0xff]  ;;  %v10161_v13 = vcombine.high %v765_v62, %v769_v41  ;;  %v10160_v59 = vcombine.low %v765_v62, %v769_v41 }
 0x4e7   :  { %7234 = vmatpush2.bf16.msra.mxu0 %v10200_v28  ;;  %v833_v63 = vld [vmem:[#allocation5 + $0x1078] sm:$0xff] }
 0x4e8   :  { %7259 = vmatpush1.bf16.msra.mxu1 %v10264_v36  ;;  %7235 = vmatprep.subr.bf16.mxu0 %v10193_v37  ;;  %v10225_v42 = vcombine.high %v829_v12, %v833_v63  ;;  %v757_v22 = vld [vmem:[#allocation5 + $0xe18] sm:$0xff]  ;;  %v10224_v20 = vcombine.low %v829_v12, %v833_v63 }
 0x4e9   :  { %7260 = vmatprep.subr.bf16.mxu1 %v10257_v38  ;;  %v761_v43 = vld [vmem:[#allocation5 + $0xe38] sm:$0xff] }
 0x4ea   :  { %v821_v23 = vld [vmem:[#allocation5 + $0x1018] sm:$0xff]  ;;  %v10153_v14 = vcombine.high %v757_v22, %v761_v43  ;;  %v10152_v38 = vcombine.low %v757_v22, %v761_v43 }
 0x4eb   :  { %7236 = vmatpush2.bf16.msra.mxu0 %v10192_v50  ;;  %v825_v27 = vld [vmem:[#allocation5 + $0x1038] sm:$0xff] }
 0x4ec   :  { %7261 = vmatpush1.bf16.msra.mxu1 %v10256_v19  ;;  %7237 = vmatprep.subr.bf16.mxu0 %v10185_v39  ;;  %v10217_v32 = vcombine.high %v821_v23, %v825_v27  ;;  %v1005_v30 = vld [vmem:[#allocation5 + $0x15d8] sm:$0xff]  ;;  %v10216_v45 = vcombine.low %v821_v23, %v825_v27 }
 0x4ed   :  { %7262 = vmatprep.subr.bf16.mxu1 %v10249_v61  ;;  %v1009_v28 = vld [vmem:[#allocation5 + $0x15f8] sm:$0xff] }
 0x4ee   :  { %v941_v36 = vld [vmem:[#allocation5 + $0x13d8] sm:$0xff]  ;;  %v10401_v46 = vcombine.high %v1005_v30, %v1009_v28  ;;  %v10400_v61 = vcombine.low %v1005_v30, %v1009_v28 }
 0x4ef   :  { %7238 = vmatpush2.bf16.msra.mxu0 %v10184_v56  ;;  %v945_v37 = vld [vmem:[#allocation5 + $0x13f8] sm:$0xff] }
 0x4f0   :  { %7263 = vmatpush1.bf16.msra.mxu1 %v10248_v53  ;;  %7239 = vmatprep.subr.bf16.mxu0 %v10177_v57  ;;  %v10337_v47 = vcombine.high %v941_v36, %v945_v37  ;;  %v997_v48 = vld [vmem:[#allocation5 + $0x1598] sm:$0xff]  ;;  %v10336_v35 = vcombine.low %v941_v36, %v945_v37 }
 0x4f1   :  { %7264 = vmatprep.subr.bf16.mxu1 %v10241_v31  ;;  %v1001_v50 = vld [vmem:[#allocation5 + $0x15b8] sm:$0xff] }
 0x4f2   :  { %v933_v19 = vld [vmem:[#allocation5 + $0x1398] sm:$0xff]  ;;  %v10393_v51 = vcombine.high %v997_v48, %v1001_v50  ;;  %v10392_v0 = vcombine.low %v997_v48, %v1001_v50 }
 0x4f3   :  { %7240 = vmatpush2.bf16.msra.mxu0 %v10176_v17  ;;  %v937_v39 = vld [vmem:[#allocation5 + $0x13b8] sm:$0xff] }
 0x4f4   :  { %7265 = vmatpush1.bf16.msra.mxu1 %v10240_v11  ;;  %7241 = vmatprep.subr.bf16.mxu0 %v10169_v34  ;;  %v10329_v44 = vcombine.high %v933_v19, %v937_v39  ;;  %v989_v52 = vld [vmem:[#allocation5 + $0x1558] sm:$0xff]  ;;  %v10328_v17 = vcombine.low %v933_v19, %v937_v39 }
 0x4f5   :  { %7266 = vmatprep.subr.bf16.mxu1 %v10233_v6  ;;  %v993_v56 = vld [vmem:[#allocation5 + $0x1578] sm:$0xff] }
 0x4f6   :  { %v925_v57 = vld [vmem:[#allocation5 + $0x1358] sm:$0xff]  ;;  %v10385_v11 = vcombine.high %v989_v52, %v993_v56 }
 0x4f7   :  { %7242 = vmatpush2.bf16.msra.mxu0 %v10168_v54  ;;  %v929_v31 = vld [vmem:[#allocation5 + $0x1378] sm:$0xff] }
 0x4f8   :  { %7267 = vmatpush1.bf16.msra.mxu1 %v10232_v26  ;;  %7243 = vmatprep.subr.bf16.mxu0 %v10161_v13  ;;  %v981_v41 = vld [vmem:[#allocation5 + $0x1518] sm:$0xff]  ;;  %v10384_v13 = vcombine.low %v989_v52, %v993_v56  ;;  %v10320_v22 = vcombine.low %v925_v57, %v929_v31 }
 0x4f9   :  { %7268 = vmatprep.subr.bf16.mxu1 %v10225_v42  ;;  %v985_v12 = vld [vmem:[#allocation5 + $0x1538] sm:$0xff] }
 0x4fa   :  { %v917_v63 = vld [vmem:[#allocation5 + $0x1318] sm:$0xff]  ;;  %v10377_v43 = vcombine.high %v981_v41, %v985_v12 }
 0x4fb   :  { %7244 = vmatpush2.bf16.msra.mxu0 %v10160_v59  ;;  %v921_v54 = vld [vmem:[#allocation5 + $0x1338] sm:$0xff] }
 0x4fc   :  { %7269 = vmatpush1.bf16.msra.mxu1 %v10224_v20  ;;  %7245 = vmatprep.subr.bf16.mxu0 %v10153_v14  ;;  %v973_v27 = vld [vmem:[#allocation5 + $0x14d8] sm:$0xff]  ;;  %v10312_v30 = vcombine.low %v917_v63, %v921_v54 }
 0x4fd   :  { %7270 = vmatprep.subr.bf16.mxu1 %v10217_v32  ;;  %v977_v59 = vld [vmem:[#allocation5 + $0x14f8] sm:$0xff]  ;;  %v10376_v32 = vcombine.low %v981_v41, %v985_v12 }
 0x4fe   :  { %v909_v20 = vld [vmem:[#allocation5 + $0x12d8] sm:$0xff]  ;;  %v10369_v28 = vcombine.high %v973_v27, %v977_v59 }
 0x4ff   :  { %7246 = vmatpush2.bf16.msra.mxu0 %v10152_v38  ;;  %v913_v14 = vld [vmem:[#allocation5 + $0x12f8] sm:$0xff] }
 0x500   :  { %7271 = vmatpush1.bf16.msra.mxu1 %v10216_v45  ;;  %7297 = vmatprep.subr.bf16.mxu0 %v10401_v46  ;;  %v10305_v36 = vcombine.high %v909_v20, %v913_v14  ;;  %v965_v37 = vld [vmem:[#allocation5 + $0x1498] sm:$0xff]  ;;  %v10304_v48 = vcombine.low %v909_v20, %v913_v14 }
 0x501   :  { %7272 = vmatprep.subr.bf16.mxu1 %v10337_v47  ;;  %v969_v38 = vld [vmem:[#allocation5 + $0x14b8] sm:$0xff]  ;;  %v10368_v47 = vcombine.low %v973_v27, %v977_v59 }
 0x502   :  { %v6962_v53 = vpop.f32.mrf.mxu0  ;;  %7248 = vmatmul.mubr.bf16.vlgmr.msra.gmra.mxu0 %v11865_v40  ;;  %v10321_v40 = vcombine.high %v925_v57, %v929_v31  ;;  %v901_v45 = vld [vmem:[#allocation5 + $0x1298] sm:$0xff]  ;;  %v10361_v50 = vcombine.high %v965_v37, %v969_v38 }
 0x503   :  { %v6963_v58 = vadd.f32 %v6962_v53, %v12032_v29  ;;  %v7003_v10 = vpop.f32.mrf.mxu1  ;;  %7298 = vmatpush1.bf16.msra.mxu0 %v10400_v61  ;;  %7329 = vmatprep.mubr.bf16.mxu0 %v11871_v8  ;;  %v905_v46 = vld [vmem:[#allocation5 + $0x12b8] sm:$0xff] }
 0x504   :  { %7273 = vmatpush2.bf16.msra.mxu1 %v10336_v35  ;;  %v6964_v3 = vpop.f32.mrf.mxu0  ;;  %7299 = vmatprep.subr.bf16.mxu0 %v10393_v51  ;;  %v10297_v19 = vcombine.high %v901_v45, %v905_v46  ;;  %v957_v39 = vld [vmem:[#allocation5 + $0x1458] sm:$0xff]  ;;  %v10296_v52 = vcombine.low %v901_v45, %v905_v46 }
 0x505   :  { %v12042_v34 = vadd.f32 %v7003_v10, %v6963_v58  ;;  %v6965_v6 = vadd.f32 %v6964_v3, %v12035_v21  ;;  %v7005_v62 = vpop.f32.mrf.mxu1  ;;  %7274 = vmatprep.subr.bf16.mxu1 %v10329_v44  ;;  %v10313_v21 = vcombine.high %v917_v63, %v921_v54  ;;  %v961_v61 = vld [vmem:[#allocation5 + $0x1478] sm:$0xff]  ;;  %v10360_v44 = vcombine.low %v965_v37, %v969_v38 }
 0x506   :  { %v6966_v29 = vpop.f32.mrf.mxu0  ;;  %v893_v35 = vld [vmem:[#allocation5 + $0x1258] sm:$0xff]  ;;  %v10353_v56 = vcombine.high %v957_v39, %v961_v61 }
 0x507   :  { %v12045_v26 = vadd.f32 %v7005_v62, %v6965_v6  ;;  %v7007_v8 = vpop.f32.mrf.mxu1  ;;  %7300 = vmatpush1.bf16.msra.mxu0 %v10392_v0  ;;  %v897_v51 = vld [vmem:[#allocation5 + $0x1278] sm:$0xff]  ;;  %v10352_v0 = vcombine.low %v957_v39, %v961_v61 }
 0x508   :  { %7275 = vmatpush2.bf16.msra.mxu1 %v10328_v17  ;;  %v6967_v42 = vpop.f32.mrf.mxu0  ;;  %7301 = vmatprep.subr.bf16.mxu0 %v10385_v11  ;;  %v10289_v53 = vcombine.high %v893_v35, %v897_v51  ;;  %v949_v57 = vld [vmem:[#allocation5 + $0x1418] sm:$0xff]  ;;  %v10288_v3 = vcombine.low %v893_v35, %v897_v51 }
 0x509   :  { %v7008_v23 = vpop.f32.mrf.mxu1  ;;  %7276 = vmatprep.subr.bf16.mxu1 %v10321_v40  ;;  %v953_v31 = vld [vmem:[#allocation5 + $0x1438] sm:$0xff] }
 0x50a   :  { %v885_v58 = vld [vmem:[#allocation5 + $0x1218] sm:$0xff]  ;;  %v10345_v17 = vcombine.high %v949_v57, %v953_v31  ;;  %v10344_v12 = vcombine.low %v949_v57, %v953_v31 }
 0x50b   :  { %7302 = vmatpush1.bf16.msra.mxu0 %v10384_v13  ;;  %v889_v10 = vld [vmem:[#allocation5 + $0x1238] sm:$0xff] }
 0x50c   :  { %7277 = vmatpush2.bf16.msra.mxu1 %v10320_v22  ;;  %7303 = vmatprep.subr.bf16.mxu0 %v10377_v43  ;;  %v10281_v11 = vcombine.high %v885_v58, %v889_v10  ;;  %v1069_v6 = vld [vmem:[#allocation5 + $0x17d8] sm:$0xff]  ;;  %v10280_v29 = vcombine.low %v885_v58, %v889_v10 }
 0x50d   :  { %7278 = vmatprep.subr.bf16.mxu1 %v10313_v21  ;;  %v1073_v62 = vld [vmem:[#allocation5 + $0x17f8] sm:$0xff] }
 0x50e   :  { %v1133_v40 = vld [vmem:[#allocation5 + $0x19d8] sm:$0xff]  ;;  %v10465_v63 = vcombine.high %v1069_v6, %v1073_v62  ;;  %v10464_v43 = vcombine.low %v1069_v6, %v1073_v62 }
 0x50f   :  { %7304 = vmatpush1.bf16.msra.mxu0 %v10376_v32  ;;  %v1137_v41 = vld [vmem:[#allocation5 + $0x19f8] sm:$0xff] }
 0x510   :  { %7279 = vmatpush2.bf16.msra.mxu1 %v10312_v30  ;;  %7305 = vmatprep.subr.bf16.mxu0 %v10369_v28  ;;  %v10529_v54 = vcombine.high %v1133_v40, %v1137_v41  ;;  %v1061_v8 = vld [vmem:[#allocation5 + $0x1798] sm:$0xff]  ;;  %v10528_v23 = vcombine.low %v1133_v40, %v1137_v41 }
 0x511   :  { %7280 = vmatprep.subr.bf16.mxu1 %v10305_v36  ;;  %v1065_v13 = vld [vmem:[#allocation5 + $0x17b8] sm:$0xff] }
 0x512   :  { %v1125_v42 = vld [vmem:[#allocation5 + $0x1998] sm:$0xff]  ;;  %v10457_v21 = vcombine.high %v1061_v8, %v1065_v13  ;;  %v10456_v28 = vcombine.low %v1061_v8, %v1065_v13 }
 0x513   :  { %7306 = vmatpush1.bf16.msra.mxu0 %v10368_v47  ;;  %v1129_v22 = vld [vmem:[#allocation5 + $0x19b8] sm:$0xff] }
 0x514   :  { %7281 = vmatpush2.bf16.msra.mxu1 %v10304_v48  ;;  %7307 = vmatprep.subr.bf16.mxu0 %v10361_v50  ;;  %v10521_v27 = vcombine.high %v1125_v42, %v1129_v22  ;;  %v1053_v59 = vld [vmem:[#allocation5 + $0x1758] sm:$0xff]  ;;  %v10520_v36 = vcombine.low %v1125_v42, %v1129_v22 }
 0x515   :  { %7282 = vmatprep.subr.bf16.mxu1 %v10297_v19  ;;  %v1057_v20 = vld [vmem:[#allocation5 + $0x1778] sm:$0xff] }
 0x516   :  { %v1117_v14 = vld [vmem:[#allocation5 + $0x1958] sm:$0xff]  ;;  %v10449_v37 = vcombine.high %v1053_v59, %v1057_v20  ;;  %v10448_v39 = vcombine.low %v1053_v59, %v1057_v20 }
 0x517   :  { %7308 = vmatpush1.bf16.msra.mxu0 %v10360_v44  ;;  %v1121_v32 = vld [vmem:[#allocation5 + $0x1978] sm:$0xff] }
 0x518   :  { %7283 = vmatpush2.bf16.msra.mxu1 %v10296_v52  ;;  %7309 = vmatprep.subr.bf16.mxu0 %v10353_v56  ;;  %v10513_v45 = vcombine.high %v1117_v14, %v1121_v32  ;;  %v1045_v46 = vld [vmem:[#allocation5 + $0x1718] sm:$0xff] }
 0x519   :  { %7284 = vmatprep.subr.bf16.mxu1 %v10289_v53  ;;  %v1049_v47 = vld [vmem:[#allocation5 + $0x1738] sm:$0xff] }
 0x51a   :  { %v1109_v48 = vld [vmem:[#allocation5 + $0x1918] sm:$0xff]  ;;  %v10441_v61 = vcombine.high %v1045_v46, %v1049_v47  ;;  %v10440_v53 = vcombine.low %v1045_v46, %v1049_v47 }
 0x51b   :  { %7310 = vmatpush1.bf16.msra.mxu0 %v10352_v0  ;;  %v1113_v50 = vld [vmem:[#allocation5 + $0x1938] sm:$0xff] }
 0x51c   :  { %7285 = vmatpush2.bf16.msra.mxu1 %v10288_v3  ;;  %7311 = vmatprep.subr.bf16.mxu0 %v10345_v17  ;;  %v1037_v51 = vld [vmem:[#allocation5 + $0x16d8] sm:$0xff]  ;;  %v10504_v57 = vcombine.low %v1109_v48, %v1113_v50 }
 0x51d   :  { %7286 = vmatprep.subr.bf16.mxu1 %v10281_v11  ;;  %v1041_v44 = vld [vmem:[#allocation5 + $0x16f8] sm:$0xff] }
 0x51e   :  { %v1101_v52 = vld [vmem:[#allocation5 + $0x18d8] sm:$0xff]  ;;  %v10433_v31 = vcombine.high %v1037_v51, %v1041_v44  ;;  %v10432_v11 = vcombine.low %v1037_v51, %v1041_v44 }
 0x51f   :  { %7312 = vmatpush1.bf16.msra.mxu0 %v10344_v12  ;;  %v1105_v56 = vld [vmem:[#allocation5 + $0x18f8] sm:$0xff] }
 0x520   :  { %7287 = vmatpush2.bf16.msra.mxu1 %v10280_v29  ;;  %7313 = vmatprep.subr.bf16.mxu0 %v10465_v63  ;;  %v10497_v58 = vcombine.high %v1101_v52, %v1105_v56  ;;  %v1029_v10 = vld [vmem:[#allocation5 + $0x1698] sm:$0xff]  ;;  %v10496_v6 = vcombine.low %v1101_v52, %v1105_v56 }
 0x521   :  { %7338 = vmatprep.subr.bf16.mxu1 %v10529_v54  ;;  %v1033_v0 = vld [vmem:[#allocation5 + $0x16b8] sm:$0xff] }
 0x522   :  { %v1093_v3 = vld [vmem:[#allocation5 + $0x1898] sm:$0xff]  ;;  %v10425_v62 = vcombine.high %v1029_v10, %v1033_v0  ;;  %v10424_v54 = vcombine.low %v1029_v10, %v1033_v0 }
 0x523   :  { %v12047_v30 = vpop.f32.mrf.mxu1  ;;  %7289 = vmatmul.mubr.bf16.vlgmr.msra.gmra.mxu1 %v11883_v24  ;;  %7314 = vmatpush2.bf16.msra.mxu0 %v10464_v43  ;;  %v10512_v24 = vcombine.low %v1117_v14, %v1121_v32  ;;  %v1097_v17 = vld [vmem:[#allocation5 + $0x18b8] sm:$0xff] }
 0x524   :  { %7339 = vmatpush1.bf16.msra.mxu1 %v10528_v23  ;;  %7370 = vmatprep.mubr.bf16.mxu1 %v11890_v55  ;;  %v10505_v55 = vcombine.high %v1109_v48, %v1113_v50  ;;  %v10489_v40 = vcombine.high %v1093_v3, %v1097_v17  ;;  %v1021_v41 = vld [vmem:[#allocation5 + $0x1658] sm:$0xff]  ;;  %v10488_v8 = vcombine.low %v1093_v3, %v1097_v17 }
 0x525   :  { %v12051_v38 = vpop.f32.mrf.mxu1  ;;  %7315 = vmatprep.subr.bf16.mxu0 %v10457_v21  ;;  %7340 = vmatprep.subr.bf16.mxu1 %v10521_v27  ;;  %v1025_v12 = vld [vmem:[#allocation5 + $0x1678] sm:$0xff] }
 0x526   :  { %v1085_v29 = vld [vmem:[#allocation5 + $0x1858] sm:$0xff]  ;;  %v10417_v13 = vcombine.high %v1021_v41, %v1025_v12  ;;  %v10416_v27 = vcombine.low %v1021_v41, %v1025_v12 }
 0x527   :  { %v7089_v19 = vpop.f32.mrf.mxu1  ;;  %7316 = vmatpush2.bf16.msra.mxu0 %v10456_v28  ;;  %v1089_v63 = vld [vmem:[#allocation5 + $0x1878] sm:$0xff] }
 0x528   :  { %7341 = vmatpush1.bf16.msra.mxu1 %v10520_v36  ;;  %7317 = vmatprep.subr.bf16.mxu0 %v10449_v37  ;;  %v10481_v42 = vcombine.high %v1085_v29, %v1089_v63  ;;  %v1013_v22 = vld [vmem:[#allocation5 + $0x1618] sm:$0xff]  ;;  %v10480_v59 = vcombine.low %v1085_v29, %v1089_v63 }
 0x529   :  { %v7090_v35 = vpop.f32.mrf.mxu1  ;;  %7342 = vmatprep.subr.bf16.mxu1 %v10513_v45  ;;  %v1017_v43 = vld [vmem:[#allocation5 + $0x1638] sm:$0xff] }
 0x52a   :  { %v1077_v23 = vld [vmem:[#allocation5 + $0x1818] sm:$0xff]  ;;  %v10409_v20 = vcombine.high %v1013_v22, %v1017_v43  ;;  %v10408_v45 = vcombine.low %v1013_v22, %v1017_v43 }
 0x52b   :  { %7318 = vmatpush2.bf16.msra.mxu0 %v10448_v39  ;;  %v1081_v21 = vld [vmem:[#allocation5 + $0x1838] sm:$0xff] }
 0x52c   :  { %7343 = vmatpush1.bf16.msra.mxu1 %v10512_v24  ;;  %7319 = vmatprep.subr.bf16.mxu0 %v10441_v61  ;;  %v10473_v14 = vcombine.high %v1077_v23, %v1081_v21  ;;  %v1261_v32 = vld [vmem:[#allocation5 + $0x1dd8] sm:$0xff]  ;;  %v10472_v46 = vcombine.low %v1077_v23, %v1081_v21 }
 0x52d   :  { %7344 = vmatprep.subr.bf16.mxu1 %v10505_v55  ;;  %v1265_v28 = vld [vmem:[#allocation5 + $0x1df8] sm:$0xff] }
 0x52e   :  { %v1197_v36 = vld [vmem:[#allocation5 + $0x1bd8] sm:$0xff]  ;;  %v10657_v47 = vcombine.high %v1261_v32, %v1265_v28  ;;  %v10656_v61 = vcombine.low %v1261_v32, %v1265_v28 }
 0x52f   :  { %7320 = vmatpush2.bf16.msra.mxu0 %v10440_v53  ;;  %v1201_v37 = vld [vmem:[#allocation5 + $0x1bf8] sm:$0xff] }
 0x530   :  { %7345 = vmatpush1.bf16.msra.mxu1 %v10504_v57  ;;  %7321 = vmatprep.subr.bf16.mxu0 %v10433_v31  ;;  %v10593_v48 = vcombine.high %v1197_v36, %v1201_v37  ;;  %v1253_v50 = vld [vmem:[#allocation5 + $0x1d98] sm:$0xff]  ;;  %v10592_v35 = vcombine.low %v1197_v36, %v1201_v37 }
 0x531   :  { %7346 = vmatprep.subr.bf16.mxu1 %v10497_v58  ;;  %v1257_v19 = vld [vmem:[#allocation5 + $0x1db8] sm:$0xff] }
 0x532   :  { %v1189_v39 = vld [vmem:[#allocation5 + $0x1b98] sm:$0xff]  ;;  %v10649_v55 = vcombine.high %v1253_v50, %v1257_v19  ;;  %v10648_v58 = vcombine.low %v1253_v50, %v1257_v19 }
 0x533   :  { %7322 = vmatpush2.bf16.msra.mxu0 %v10432_v11  ;;  %v1193_v24 = vld [vmem:[#allocation5 + $0x1bb8] sm:$0xff] }
 0x534   :  { %7347 = vmatpush1.bf16.msra.mxu1 %v10496_v6  ;;  %7323 = vmatprep.subr.bf16.mxu0 %v10425_v62  ;;  %v10585_v51 = vcombine.high %v1189_v39, %v1193_v24  ;;  %v1245_v44 = vld [vmem:[#allocation5 + $0x1d58] sm:$0xff]  ;;  %v10584_v0 = vcombine.low %v1189_v39, %v1193_v24 }
 0x535   :  { %7348 = vmatprep.subr.bf16.mxu1 %v10489_v40  ;;  %v1249_v52 = vld [vmem:[#allocation5 + $0x1d78] sm:$0xff] }
 0x536   :  { %v1181_v53 = vld [vmem:[#allocation5 + $0x1b58] sm:$0xff]  ;;  %v10641_v3 = vcombine.high %v1245_v44, %v1249_v52 }
 0x537   :  { %7324 = vmatpush2.bf16.msra.mxu0 %v10424_v54  ;;  %v1185_v57 = vld [vmem:[#allocation5 + $0x1b78] sm:$0xff] }
 0x538   :  { %7349 = vmatpush1.bf16.msra.mxu1 %v10488_v8  ;;  %7325 = vmatprep.subr.bf16.mxu0 %v10417_v13  ;;  %v1237_v6 = vld [vmem:[#allocation5 + $0x1d18] sm:$0xff]  ;;  %v10576_v63 = vcombine.low %v1181_v53, %v1185_v57 }
 0x539   :  { %7350 = vmatprep.subr.bf16.mxu1 %v10481_v42  ;;  %v1241_v62 = vld [vmem:[#allocation5 + $0x1d38] sm:$0xff] }
 0x53a   :  { %v1177_v41 = vld [vmem:[#allocation5 + $0x1b38] sm:$0xff]  ;;  %v10632_v22 = vcombine.low %v1237_v6, %v1241_v62 }
 0x53b   :  { %7326 = vmatpush2.bf16.msra.mxu0 %v10416_v27  ;;  %v1233_v8 = vld [vmem:[#allocation5 + $0x1cf8] sm:$0xff] }
 0x53c   :  { %7351 = vmatpush1.bf16.msra.mxu1 %v10480_v59  ;;  %7327 = vmatprep.subr.bf16.mxu0 %v10409_v20  ;;  %v1165_v13 = vld [vmem:[#allocation5 + $0x1ad8] sm:$0xff] }
 0x53d   :  { %7352 = vmatprep.subr.bf16.mxu1 %v10473_v14  ;;  %v1169_v42 = vld [vmem:[#allocation5 + $0x1af8] sm:$0xff] }
 0x53e   :  { %v10561_v23 = vcombine.high %v1165_v13, %v1169_v42  ;;  %v1221_v21 = vld [vmem:[#allocation5 + $0x1c98] sm:$0xff]  ;;  %v10560_v32 = vcombine.low %v1165_v13, %v1169_v42 }
 0x53f   :  { %7328 = vmatpush2.bf16.msra.mxu0 %v10408_v45  ;;  %v1225_v27 = vld [vmem:[#allocation5 + $0x1cb8] sm:$0xff] }
 0x540   :  { %7353 = vmatpush1.bf16.msra.mxu1 %v10472_v46  ;;  %7379 = vmatprep.subr.bf16.mxu0 %v10657_v47  ;;  %v1157_v59 = vld [vmem:[#allocation5 + $0x1a98] sm:$0xff]  ;;  %v10617_v28 = vcombine.high %v1221_v21, %v1225_v27 }
 0x541   :  { %7354 = vmatprep.subr.bf16.mxu1 %v10593_v48  ;;  %v1161_v20 = vld [vmem:[#allocation5 + $0x1ab8] sm:$0xff]  ;;  %v10616_v48 = vcombine.low %v1221_v21, %v1225_v27 }
 0x542   :  { %v7044_v56 = vpop.f32.mrf.mxu0  ;;  %7330 = vmatmul.mubr.bf16.vlgmr.msra.gmra.mxu0 %v11887_v49  ;;  %v10577_v49 = vcombine.high %v1181_v53, %v1185_v57  ;;  %v10553_v36 = vcombine.high %v1157_v59, %v1161_v20  ;;  %v1213_v37 = vld [vmem:[#allocation5 + $0x1c58] sm:$0xff]  ;;  %v10552_v50 = vcombine.low %v1157_v59, %v1161_v20 }
 0x543   :  { %v7045_v31 = vadd.f32 %v7044_v56, %v12042_v34  ;;  %7380 = vmatpush1.bf16.msra.mxu0 %v10656_v61  ;;  %7411 = vmatprep.mubr.bf16.mxu0 %v11622_v4  ;;  %v1173_v34 = vld [vmem:[#allocation5 + $0x1b18] sm:$0xff]  ;;  %v10640_v4 = vcombine.low %v1245_v44, %v1249_v52 }
 0x544   :  { %7355 = vmatpush2.bf16.msra.mxu1 %v10592_v35  ;;  %v7046_v10 = vpop.f32.mrf.mxu0  ;;  %7381 = vmatprep.subr.bf16.mxu0 %v10649_v55  ;;  %v10569_v54 = vcombine.high %v1173_v34, %v1177_v41  ;;  %v10568_v43 = vcombine.low %v1173_v34, %v1177_v41  ;;  %v1217_v45 = vld [vmem:[#allocation5 + $0x1c78] sm:$0xff] }
 0x545   :  { %v12057_v17 = vadd.f32 %v12047_v30, %v7045_v31  ;;  %v7047_v11 = vadd.f32 %v7046_v10, %v12045_v26  ;;  %7356 = vmatprep.subr.bf16.mxu1 %v10585_v51  ;;  %v10633_v30 = vcombine.high %v1237_v6, %v1241_v62  ;;  %v1229_v26 = vld [vmem:[#allocation5 + $0x1cd8] sm:$0xff]  ;;  %v10609_v19 = vcombine.high %v1213_v37, %v1217_v45 }
 0x546   :  { %v7048_v40 = vpop.f32.mrf.mxu0  ;;  %v10624_v14 = vcombine.low %v1229_v26, %v1233_v8  ;;  %v1149_v46 = vld [vmem:[#allocation5 + $0x1a58] sm:$0xff]  ;;  %v10608_v51 = vcombine.low %v1213_v37, %v1217_v45  ;;  %v7421_v10 = vmax.f32 %v11953_v60, 0.0  ;;  %v1294_v37 = vsub.s32 6, %v11901_v7 }
 0x547   :  { %v12061_v12 = vadd.f32 %v12051_v38, %v7047_v11  ;;  %7382 = vmatpush1.bf16.msra.mxu0 %v10648_v58  ;;  %v10625_v38 = vcombine.high %v1229_v26, %v1233_v8  ;;  %v1153_v47 = vld [vmem:[#allocation5 + $0x1a78] sm:$0xff] }
 0x548   :  { %7357 = vmatpush2.bf16.msra.mxu1 %v10584_v0  ;;  %v7049_v29 = vpop.f32.mrf.mxu0  ;;  %7383 = vmatprep.subr.bf16.mxu0 %v10641_v3  ;;  %v10545_v39 = vcombine.high %v1149_v46, %v1153_v47  ;;  %v1205_v24 = vld [vmem:[#allocation5 + $0x1c18] sm:$0xff]  ;;  %v10544_v44 = vcombine.low %v1149_v46, %v1153_v47  ;;  %v7423_v0 = vmax.f32 %v12015_v9, 0.0  ;;  %v12065_v6 = vpack.c.bf16 %v7421_v10, %v7421_v10 }
 0x549   :  { %7358 = vmatprep.subr.bf16.mxu1 %v10577_v49  ;;  %v1209_v61 = vld [vmem:[#allocation5 + $0x1c38] sm:$0xff]  ;;  %v1298_v46 = vsub.s32 7, %v11901_v7 }
 0x54a   :  { %v1141_v35 = vld [vmem:[#allocation5 + $0x1a18] sm:$0xff]  ;;  %v10601_v52 = vcombine.high %v1205_v24, %v1209_v61  ;;  %v10600_v53 = vcombine.low %v1205_v24, %v1209_v61  ;;  %v12068_v40 = vpack.c.bf16 %v7423_v0, %v7423_v0 }
 0x54b   :  { %7384 = vmatpush1.bf16.msra.mxu0 %v10640_v4  ;;  %v1145_v55 = vld [vmem:[#allocation5 + $0x1a38] sm:$0xff] }
 0x54c   :  { %7359 = vmatpush2.bf16.msra.mxu1 %v10576_v63  ;;  %7385 = vmatprep.subr.bf16.mxu0 %v10633_v30  ;;  %v10537_v56 = vcombine.high %v1141_v35, %v1145_v55  ;;  %v10536_v57 = vcombine.low %v1141_v35, %v1145_v55  ;;  %v11016_v31 = vld [vmem:[#allocation8 + $0xe4] ss:$16 sps:$4 sm:$0xff]   ;;  %v11014_v3 = vld [vmem:[#allocation8 + $0xe0] ss:$16 sps:$4 sm:$0xff]  }
 0x54d   :  { %7360 = vmatprep.subr.bf16.mxu1 %v10569_v54  ;;  %v11019_v58 = vld [vmem:[#allocation8 + $0x2e4] ss:$16 sps:$4 sm:$0xff]   ;;  %v11017_v11 = vld [vmem:[#allocation8 + $0x2e0] ss:$16 sps:$4 sm:$0xff]  }
 0x54e   :  { %v11022_v49 = vld [vmem:[#allocation8 + $0xc4] ss:$16 sps:$4 sm:$0xff]   ;;  %v11020_v60 = vld [vmem:[#allocation8 + $0xc0] ss:$16 sps:$4 sm:$0xff]  }
 0x54f   :  { %7386 = vmatpush1.bf16.msra.mxu0 %v10632_v22  ;;  %v11025_v62 = vld [vmem:[#allocation8 + $0x2c4] ss:$16 sps:$4 sm:$0xff]   ;;  %v11023_v9 = vld [vmem:[#allocation8 + $0x2c0] ss:$16 sps:$4 sm:$0xff]  }
 0x550   :  { %7361 = vmatpush2.bf16.msra.mxu1 %v10568_v43  ;;  %7387 = vmatprep.subr.bf16.mxu0 %v10625_v38  ;;  %v11028_v41 = vld [vmem:[#allocation8 + $0xa4] ss:$16 sps:$4 sm:$0xff]   ;;  %v11026_v63 = vld [vmem:[#allocation8 + $0xa0] ss:$16 sps:$4 sm:$0xff]  }
 0x551   :  { %7362 = vmatprep.subr.bf16.mxu1 %v10561_v23  ;;  %v11034_v30 = vld [vmem:[#allocation8 + $0x84] ss:$16 sps:$4 sm:$0xff]   ;;  %v11032_v8 = vld [vmem:[#allocation8 + $0x80] ss:$16 sps:$4 sm:$0xff]  }
 0x552   :  { %v11037_v26 = vld [vmem:[#allocation8 + $0x284] ss:$16 sps:$4 sm:$0xff]   ;;  %v11035_v13 = vld [vmem:[#allocation8 + $0x280] ss:$16 sps:$4 sm:$0xff]  }
 0x553   :  { %7388 = vmatpush1.bf16.msra.mxu0 %v10624_v14  ;;  %v11040_v42 = vld [vmem:[#allocation8 + $0x64] ss:$16 sps:$4 sm:$0xff]   ;;  %v11038_v43 = vld [vmem:[#allocation8 + $0x60] ss:$16 sps:$4 sm:$0xff]  }
 0x554   :  { %7363 = vmatpush2.bf16.msra.mxu1 %v10560_v32  ;;  %7389 = vmatprep.subr.bf16.mxu0 %v10617_v28  ;;  %v11043_v22 = vld [vmem:[#allocation8 + $0x264] ss:$16 sps:$4 sm:$0xff]   ;;  %v11041_v38 = vld [vmem:[#allocation8 + $0x260] ss:$16 sps:$4 sm:$0xff]  }
 0x555   :  { %7364 = vmatprep.subr.bf16.mxu1 %v10553_v36  ;;  %v11046_v23 = vld [vmem:[#allocation8 + $0x44] ss:$16 sps:$4 sm:$0xff]   ;;  %v11044_v27 = vld [vmem:[#allocation8 + $0x40] ss:$16 sps:$4 sm:$0xff]  }
 0x556   :  { %v11049_v21 = vld [vmem:[#allocation8 + $0x244] ss:$16 sps:$4 sm:$0xff]   ;;  %v11047_v59 = vld [vmem:[#allocation8 + $0x240] ss:$16 sps:$4 sm:$0xff]  }
 0x557   :  { %7390 = vmatpush1.bf16.msra.mxu0 %v10616_v48  ;;  %v11052_v20 = vld [vmem:[#allocation8 + $0x24] ss:$16 sps:$4 sm:$0xff]   ;;  %v11050_v32 = vld [vmem:[#allocation8 + $0x20] ss:$16 sps:$4 sm:$0xff]  }
 0x558   :  { %7365 = vmatpush2.bf16.msra.mxu1 %v10552_v50  ;;  %7391 = vmatprep.subr.bf16.mxu0 %v10609_v19  ;;  %v11055_v14 = vld [vmem:[#allocation8 + $0x224] ss:$16 sps:$4 sm:$0xff]   ;;  %v11053_v28 = vld [vmem:[#allocation8 + $0x220] ss:$16 sps:$4 sm:$0xff]   ;;  %v11438_v19 = vld [vmem:[#allocation7] sm:$0xff] }
 0x559   :  { %7366 = vmatprep.subr.bf16.mxu1 %v10545_v39  ;;  %v11058_v36 = vld [vmem:[#allocation8 + $0x4] ss:$16 sps:$4 sm:$0xff]   ;;  %v11056_v47 = vld [vmem:[#allocation8] ss:$16 sps:$4 sm:$0xff]   ;;  %v1295_v39 = vrot.slane %v11438_v19, %v1294_v37  ;;  %v1299_v61 = vrot.slane %v11438_v19, %v1298_v46 }
 0x55a   :  { %v11061_v45 = vld [vmem:[#allocation8 + $0x204] ss:$16 sps:$4 sm:$0xff]   ;;  %v11059_v48 = vld [vmem:[#allocation8 + $0x200] ss:$16 sps:$4 sm:$0xff]  }
 0x55b   :  { %7392 = vmatpush1.bf16.msra.mxu0 %v10608_v51  ;;  %v11064_v50 = vld [vmem:[#allocation8 + $0x1e4] ss:$16 sps:$4 sm:$0xff]   ;;  %v11062_v35 = vld [vmem:[#allocation8 + $0x1e0] ss:$16 sps:$4 sm:$0xff]  }
 0x55c   :  { %7367 = vmatpush2.bf16.msra.mxu1 %v10544_v44  ;;  %7393 = vmatprep.subr.bf16.mxu0 %v10601_v52  ;;  %v11067_v24 = vld [vmem:[#allocation8 + $0x3e4] ss:$16 sps:$4 sm:$0xff]   ;;  %v11065_v55 = vld [vmem:[#allocation8 + $0x3e0] ss:$16 sps:$4 sm:$0xff]  }
 0x55d   :  { %7368 = vmatprep.subr.bf16.mxu1 %v10537_v56  ;;  %v11070_v51 = vld [vmem:[#allocation8 + $0x1c4] ss:$16 sps:$4 sm:$0xff]   ;;  %v11071_v10 = vld [vmem:[#allocation8 + $0x3c0] ss:$16 sps:$4 sm:$0xff]  }
 0x55e   :  { %v11073_v52 = vld [vmem:[#allocation8 + $0x3c4] ss:$16 sps:$4 sm:$0xff]   ;;  %v11110_v37 = vld [vmem:[#allocation8 + $0x4e0] ss:$16 sps:$4 sm:$0xff]  }
 0x55f   :  { %7394 = vmatpush1.bf16.msra.mxu0 %v10600_v53  ;;  %v11076_v0 = vld [vmem:[#allocation8 + $0x1a4] ss:$16 sps:$4 sm:$0xff]  }
 0x560   :  { %7369 = vmatpush2.bf16.msra.mxu1 %v10536_v57  ;;  %8994 = vmatprep.subr.bf16.mxu0 %v11016_v31  ;;  %v11068_v31 = vld [vmem:[#allocation8 + $0x1c0] ss:$16 sps:$4 sm:$0xff]   ;;  %v11115_v46 = vld [vmem:[#allocation8 + $0x4c4] ss:$16 sps:$4 sm:$0xff]  }
 0x561   :  { %9035 = vmatprep.subr.bf16.mxu1 %v11019_v58 }
 0x562   :  { %7412 = vmatmul.mubr.bf16.vlgmr.msra.gmra.mxu0 %v11897_v5  ;;  %v11031_v5 = vld [vmem:[#allocation8 + $0x2a4] ss:$16 sps:$4 sm:$0xff]  }
 0x563   :  { %v12070_v34 = vpop.f32.mrf.mxu1  ;;  %7371 = vmatmul.mubr.bf16.vlgmr.msra.gmra.mxu1 %v11909_v33  ;;  %8995 = vmatpush1.bf16.msra.mxu0 %v11014_v3  ;;  %v11029_v33 = vld [vmem:[#allocation8 + $0x2a0] ss:$16 sps:$4 sm:$0xff]  }
 0x564   :  { %9026 = vmatprep.mubr.bf16.mxu0 %v12065_v6  ;;  %9036 = vmatpush1.bf16.msra.mxu1 %v11017_v11  ;;  %v7127_v44 = vadd.f32 %v12070_v34, %v1295_v39  ;;  %v11079_v11 = vld [vmem:[#allocation8 + $0x3a4] ss:$16 sps:$4 sm:$0xff]  }
 0x565   :  { %9067 = vmatprep.mubr.bf16.mxu1 %v12068_v40  ;;  %v12075_v4 = vpop.f32.mrf.mxu1  ;;  %8996 = vmatprep.subr.bf16.mxu0 %v11022_v49  ;;  %v11118_v39 = vld [vmem:[#allocation8 + $0x4a4] ss:$16 sps:$4 sm:$0xff]  }
 0x566   :  { %9037 = vmatprep.subr.bf16.mxu1 %v11025_v62  ;;  %v7129_v53 = vadd.f32 %v12075_v4, %v1299_v61  ;;  %v11074_v62 = vld [vmem:[#allocation8 + $0x1a0] ss:$16 sps:$4 sm:$0xff]  }
 0x567   :  { %v7130_v29 = vpop.f32.mrf.mxu1  ;;  %8997 = vmatpush1.bf16.msra.mxu0 %v11020_v60  ;;  %v11077_v60 = vld [vmem:[#allocation8 + $0x3a0] ss:$16 sps:$4 sm:$0xff]  }
 0x568   :  { %9038 = vmatpush1.bf16.msra.mxu1 %v11023_v9  ;;  %8998 = vmatprep.subr.bf16.mxu0 %v11028_v41  ;;  %v11082_v9 = vld [vmem:[#allocation8 + $0x184] ss:$16 sps:$4 sm:$0xff]   ;;  %v11080_v4 = vld [vmem:[#allocation8 + $0x180] ss:$16 sps:$4 sm:$0xff]  }
 0x569   :  { %v7131_v54 = vpop.f32.mrf.mxu1  ;;  %9039 = vmatprep.subr.bf16.mxu1 %v11031_v5  ;;  %v11085_v41 = vld [vmem:[#allocation8 + $0x384] ss:$16 sps:$4 sm:$0xff]   ;;  %v11083_v5 = vld [vmem:[#allocation8 + $0x380] ss:$16 sps:$4 sm:$0xff]  }
 0x56a   :  { %v11088_v29 = vld [vmem:[#allocation8 + $0x164] ss:$16 sps:$4 sm:$0xff]   ;;  %v11173_v61 = vld [vmem:[#allocation8 + $0x6c0] ss:$16 sps:$4 sm:$0xff]  }
 0x56b   :  { %8999 = vmatpush1.bf16.msra.mxu0 %v11026_v63  ;;  %v11091_v63 = vld [vmem:[#allocation8 + $0x364] ss:$16 sps:$4 sm:$0xff]  }
 0x56c   :  { %9040 = vmatpush1.bf16.msra.mxu1 %v11029_v33  ;;  %9000 = vmatprep.subr.bf16.mxu0 %v11034_v30  ;;  %v11086_v33 = vld [vmem:[#allocation8 + $0x160] ss:$16 sps:$4 sm:$0xff]   ;;  %v11094_v54 = vld [vmem:[#allocation8 + $0x144] ss:$16 sps:$4 sm:$0xff]  }
 0x56d   :  { %9041 = vmatprep.subr.bf16.mxu1 %v11037_v26  ;;  %v11089_v30 = vld [vmem:[#allocation8 + $0x360] ss:$16 sps:$4 sm:$0xff]   ;;  %v11097_v26 = vld [vmem:[#allocation8 + $0x344] ss:$16 sps:$4 sm:$0xff]  }
 0x56f   :  { %9001 = vmatpush1.bf16.msra.mxu0 %v11032_v8  ;;  %v11092_v8 = vld [vmem:[#allocation8 + $0x140] ss:$16 sps:$4 sm:$0xff]  }
 0x570   :  { %9042 = vmatpush1.bf16.msra.mxu1 %v11035_v13  ;;  %9002 = vmatprep.subr.bf16.mxu0 %v11040_v42  ;;  %v11095_v13 = vld [vmem:[#allocation8 + $0x340] ss:$16 sps:$4 sm:$0xff]   ;;  %v11100_v42 = vld [vmem:[#allocation8 + $0x124] ss:$16 sps:$4 sm:$0xff]  }
 0x571   :  { %9043 = vmatprep.subr.bf16.mxu1 %v11043_v22  ;;  %v11103_v22 = vld [vmem:[#allocation8 + $0x324] ss:$16 sps:$4 sm:$0xff]  }
 0x573   :  { %9003 = vmatpush1.bf16.msra.mxu0 %v11038_v43  ;;  %v11098_v43 = vld [vmem:[#allocation8 + $0x120] ss:$16 sps:$4 sm:$0xff]  }
 0x574   :  { %9044 = vmatpush1.bf16.msra.mxu1 %v11041_v38  ;;  %9004 = vmatprep.subr.bf16.mxu0 %v11046_v23  ;;  %v11101_v38 = vld [vmem:[#allocation8 + $0x320] ss:$16 sps:$4 sm:$0xff]   ;;  %v11106_v23 = vld [vmem:[#allocation8 + $0x104] ss:$16 sps:$4 sm:$0xff]  }
 0x575   :  { %9045 = vmatprep.subr.bf16.mxu1 %v11049_v21  ;;  %v11109_v21 = vld [vmem:[#allocation8 + $0x304] ss:$16 sps:$4 sm:$0xff]  }
 0x577   :  { %9005 = vmatpush1.bf16.msra.mxu0 %v11044_v27  ;;  %v11104_v27 = vld [vmem:[#allocation8 + $0x100] ss:$16 sps:$4 sm:$0xff]  }
 0x578   :  { %9046 = vmatpush1.bf16.msra.mxu1 %v11047_v59  ;;  %9006 = vmatprep.subr.bf16.mxu0 %v11052_v20  ;;  %v7420_v59 = vmax.f32 %v11949_v18, 0.0  ;;  %v11107_v20 = vld [vmem:[#allocation8 + $0x300] ss:$16 sps:$4 sm:$0xff]  }
 0x579   :  { %9047 = vmatprep.subr.bf16.mxu1 %v11055_v14  ;;  %v11112_v14 = vld [vmem:[#allocation8 + $0x4e4] ss:$16 sps:$4 sm:$0xff]   ;;  %v11167_v18 = vld [vmem:[#allocation8 + $0x6e0] ss:$16 sps:$4 sm:$0xff]  }
 0x57b   :  { %9007 = vmatpush1.bf16.msra.mxu0 %v11050_v32  ;;  %v7422_v32 = vmax.f32 %v12011_v2, 0.0  ;;  %v11175_v2 = vld [vmem:[#allocation8 + $0x6c4] ss:$16 sps:$4 sm:$0xff]  }
 0x57c   :  { %9048 = vmatpush1.bf16.msra.mxu1 %v11053_v28  ;;  %9008 = vmatprep.subr.bf16.mxu0 %v11058_v36  ;;  %v11169_v28 = vld [vmem:[#allocation8 + $0x6e4] ss:$16 sps:$4 sm:$0xff]   ;;  %v7425_v36 = vmax.f32 %v12061_v12, 0.0  ;;  %v11113_v12 = vld [vmem:[#allocation8 + $0x4c0] ss:$16 sps:$4 sm:$0xff]  }
 0x57d   :  { %9049 = vmatprep.subr.bf16.mxu1 %v11061_v45  ;;  %v12088_v45 = vpack.c.bf16 %v7420_v59, %v7420_v59 }
 0x57f   :  { %9009 = vmatpush1.bf16.msra.mxu0 %v11056_v47  ;;  %v12090_v47 = vpack.c.bf16 %v7422_v32, %v7422_v32  ;;  %v11229_v32 = vld [vmem:[#allocation8 + $0x7a4] ss:$16 sps:$4 sm:$0xff]  }
 0x580   :  { %9050 = vmatpush1.bf16.msra.mxu1 %v11059_v48  ;;  %9010 = vmatprep.subr.bf16.mxu0 %v11064_v50  ;;  %v12092_v48 = vpack.c.bf16 %v7425_v36, %v7425_v36 }
 0x581   :  { %9051 = vmatprep.subr.bf16.mxu1 %v11067_v24 }
 0x582   :  { %v7167_v56 = vpop.f32.mrf.mxu0 }
 0x583   :  { %v12081_v57 = vadd.f32 %v7167_v56, %v7127_v44  ;;  %9011 = vmatpush2.bf16.msra.mxu0 %v11062_v35  ;;  %v11116_v44 = vld [vmem:[#allocation8 + $0x4a0] ss:$16 sps:$4 sm:$0xff]  }
 0x584   :  { %9052 = vmatpush2.bf16.msra.mxu1 %v11065_v55  ;;  %v7169_v58 = vpop.f32.mrf.mxu0  ;;  %9012 = vmatprep.subr.bf16.mxu0 %v11070_v51  ;;  %v11181_v55 = vld [vmem:[#allocation8 + $0x6a4] ss:$16 sps:$4 sm:$0xff]  }
 0x585   :  { %v12083_v3 = vadd.f32 %v7169_v58, %v7129_v53  ;;  %9053 = vmatprep.subr.bf16.mxu1 %v11073_v52  ;;  %v11121_v52 = vld [vmem:[#allocation8 + $0x484] ss:$16 sps:$4 sm:$0xff]   ;;  %v11179_v53 = vld [vmem:[#allocation8 + $0x6a0] ss:$16 sps:$4 sm:$0xff]  }
 0x586   :  { %v7171_v49 = vpop.f32.mrf.mxu0  ;;  %v11124_v58 = vld [vmem:[#allocation8 + $0x464] ss:$16 sps:$4 sm:$0xff]  }
 0x587   :  { %9013 = vmatpush2.bf16.msra.mxu0 %v11068_v31  ;;  %v11119_v31 = vld [vmem:[#allocation8 + $0x480] ss:$16 sps:$4 sm:$0xff]  }
 0x588   :  { %9054 = vmatpush2.bf16.msra.mxu1 %v11071_v10  ;;  %v7172_v34 = vpop.f32.mrf.mxu0  ;;  %9014 = vmatprep.subr.bf16.mxu0 %v11076_v0  ;;  %v11185_v10 = vld [vmem:[#allocation8 + $0x680] ss:$16 sps:$4 sm:$0xff]   ;;  %v11193_v0 = vld [vmem:[#allocation8 + $0x664] ss:$16 sps:$4 sm:$0xff]  }
 0x589   :  { %9055 = vmatprep.subr.bf16.mxu1 %v11079_v11  ;;  %v11127_v11 = vld [vmem:[#allocation8 + $0x444] ss:$16 sps:$4 sm:$0xff]   ;;  %v11191_v49 = vld [vmem:[#allocation8 + $0x660] ss:$16 sps:$4 sm:$0xff]  }
 0x58a   :  { %v11125_v34 = vld [vmem:[#allocation8 + $0x440] ss:$16 sps:$4 sm:$0xff]  }
 0x58b   :  { %9015 = vmatpush2.bf16.msra.mxu0 %v11074_v62  ;;  %v11199_v62 = vld [vmem:[#allocation8 + $0x644] ss:$16 sps:$4 sm:$0xff]  }
 0x58c   :  { %9056 = vmatpush2.bf16.msra.mxu1 %v11077_v60  ;;  %9016 = vmatprep.subr.bf16.mxu0 %v11082_v9  ;;  %v11130_v60 = vld [vmem:[#allocation8 + $0x424] ss:$16 sps:$4 sm:$0xff]   ;;  %v11197_v9 = vld [vmem:[#allocation8 + $0x640] ss:$16 sps:$4 sm:$0xff]  }
 0x58d   :  { %9057 = vmatprep.subr.bf16.mxu1 %v11085_v41  ;;  %v11205_v41 = vld [vmem:[#allocation8 + $0x624] ss:$16 sps:$4 sm:$0xff]  }
 0x58f   :  { %9017 = vmatpush2.bf16.msra.mxu0 %v11080_v4  ;;  %v11128_v4 = vld [vmem:[#allocation8 + $0x420] ss:$16 sps:$4 sm:$0xff]  }
 0x590   :  { %9058 = vmatpush2.bf16.msra.mxu1 %v11083_v5  ;;  %9018 = vmatprep.subr.bf16.mxu0 %v11088_v29  ;;  %v11133_v5 = vld [vmem:[#allocation8 + $0x404] ss:$16 sps:$4 sm:$0xff]   ;;  %v11203_v29 = vld [vmem:[#allocation8 + $0x620] ss:$16 sps:$4 sm:$0xff]  }
 0x591   :  { %9059 = vmatprep.subr.bf16.mxu1 %v11091_v63  ;;  %v11211_v63 = vld [vmem:[#allocation8 + $0x604] ss:$16 sps:$4 sm:$0xff]  }
 0x593   :  { %9019 = vmatpush2.bf16.msra.mxu0 %v11086_v33  ;;  %v11131_v33 = vld [vmem:[#allocation8 + $0x400] ss:$16 sps:$4 sm:$0xff]  }
 0x594   :  { %9060 = vmatpush2.bf16.msra.mxu1 %v11089_v30  ;;  %9020 = vmatprep.subr.bf16.mxu0 %v11094_v54  ;;  %v11136_v30 = vld [vmem:[#allocation8 + $0x5e4] ss:$16 sps:$4 sm:$0xff]   ;;  %v11209_v54 = vld [vmem:[#allocation8 + $0x600] ss:$16 sps:$4 sm:$0xff]  }
 0x595   :  { %9061 = vmatprep.subr.bf16.mxu1 %v11097_v26  ;;  %v11217_v26 = vld [vmem:[#allocation8 + $0x7e4] ss:$16 sps:$4 sm:$0xff]  }
 0x597   :  { %9021 = vmatpush2.bf16.msra.mxu0 %v11092_v8  ;;  %v11134_v8 = vld [vmem:[#allocation8 + $0x5e0] ss:$16 sps:$4 sm:$0xff]  }
 0x598   :  { %9062 = vmatpush2.bf16.msra.mxu1 %v11095_v13  ;;  %9022 = vmatprep.subr.bf16.mxu0 %v11100_v42  ;;  %v11139_v13 = vld [vmem:[#allocation8 + $0x5c4] ss:$16 sps:$4 sm:$0xff]   ;;  %v11215_v42 = vld [vmem:[#allocation8 + $0x7e0] ss:$16 sps:$4 sm:$0xff]  }
 0x599   :  { %9063 = vmatprep.subr.bf16.mxu1 %v11103_v22 }
 0x59b   :  { %9023 = vmatpush2.bf16.msra.mxu0 %v11098_v43  ;;  %v11223_v43 = vld [vmem:[#allocation8 + $0x7c4] ss:$16 sps:$4 sm:$0xff]  }
 0x59c   :  { %9064 = vmatpush2.bf16.msra.mxu1 %v11101_v38  ;;  %9024 = vmatprep.subr.bf16.mxu0 %v11106_v23  ;;  %v11137_v23 = vld [vmem:[#allocation8 + $0x5c0] ss:$16 sps:$4 sm:$0xff]  }
 0x59d   :  { %9065 = vmatprep.subr.bf16.mxu1 %v11109_v21 }
 0x59f   :  { %9025 = vmatpush2.bf16.msra.mxu0 %v11104_v27  ;;  %v11142_v27 = vld [vmem:[#allocation8 + $0x5a4] ss:$16 sps:$4 sm:$0xff]  }
 0x5a0   :  { %9066 = vmatpush2.bf16.msra.mxu1 %v11107_v20  ;;  %9076 = vmatprep.subr.bf16.mxu0 %v11112_v14  ;;  %v11221_v20 = vld [vmem:[#allocation8 + $0x7c0] ss:$16 sps:$4 sm:$0xff]  }
 0x5a1   :  { %9117 = vmatprep.subr.bf16.mxu1 %v11169_v28  ;;  %v11140_v28 = vld [vmem:[#allocation8 + $0x5a0] ss:$16 sps:$4 sm:$0xff]  }
 0x5a2   :  { %9027 = vmatmul.mubr.bf16.vlgmr.msra.gmra.mxu0 %v12088_v45 }
 0x5a3   :  { %v7208_v50 = vpop.f32.mrf.mxu1  ;;  %9068 = vmatmul.mubr.bf16.vlgmr.msra.gmra.mxu1 %v12090_v47  ;;  %9077 = vmatpush1.bf16.msra.mxu0 %v11110_v37  ;;  %v11145_v37 = vld [vmem:[#allocation8 + $0x584] ss:$16 sps:$4 sm:$0xff]  }
 0x5a4   :  { %v12097_v19 = vadd.f32 %v7208_v50, %v12081_v57  ;;  %9108 = vmatprep.mubr.bf16.mxu0 %v12092_v48  ;;  %9078 = vmatprep.subr.bf16.mxu0 %v11115_v46  ;;  %v11187_v57 = vld [vmem:[#allocation8 + $0x684] ss:$16 sps:$4 sm:$0xff]   ;;  %v11227_v46 = vld [vmem:[#allocation8 + $0x7a0] ss:$16 sps:$4 sm:$0xff]  }
 0x5a5   :  { %v7210_v24 = vpop.f32.mrf.mxu1  ;;  %9118 = vmatpush1.bf16.msra.mxu1 %v11167_v18  ;;  %v11235_v18 = vld [vmem:[#allocation8 + $0x784] ss:$16 sps:$4 sm:$0xff]  }
 0x5a6   :  { %v12101_v35 = vadd.f32 %v7210_v24, %v12083_v3  ;;  %9119 = vmatprep.subr.bf16.mxu1 %v11175_v2  ;;  %v11122_v3 = vld [vmem:[#allocation8 + $0x460] ss:$16 sps:$4 sm:$0xff]   ;;  %v11148_v50 = vld [vmem:[#allocation8 + $0x564] ss:$16 sps:$4 sm:$0xff]  }
 0x5a7   :  { %v7212_v51 = vpop.f32.mrf.mxu1  ;;  %9079 = vmatpush1.bf16.msra.mxu0 %v11113_v12  ;;  %v11143_v2 = vld [vmem:[#allocation8 + $0x580] ss:$16 sps:$4 sm:$0xff]   ;;  %v11151_v24 = vld [vmem:[#allocation8 + $0x544] ss:$16 sps:$4 sm:$0xff]  }
 0x5a8   :  { %9080 = vmatprep.subr.bf16.mxu0 %v11118_v39  ;;  %v11233_v12 = vld [vmem:[#allocation8 + $0x780] ss:$16 sps:$4 sm:$0xff]   ;;  %v11154_v51 = vld [vmem:[#allocation8 + $0x524] ss:$16 sps:$4 sm:$0xff]  }
 0x5a9   :  { %v7213_v56 = vpop.f32.mrf.mxu1  ;;  %9120 = vmatpush1.bf16.msra.mxu1 %v11173_v61  ;;  %v11146_v39 = vld [vmem:[#allocation8 + $0x560] ss:$16 sps:$4 sm:$0xff]  }
 0x5aa   :  { %9121 = vmatprep.subr.bf16.mxu1 %v11181_v55  ;;  %v11239_v61 = vld [vmem:[#allocation8 + $0x760] ss:$16 sps:$4 sm:$0xff]  }
 0x5ab   :  { %9081 = vmatpush1.bf16.msra.mxu0 %v11116_v44  ;;  %v11149_v55 = vld [vmem:[#allocation8 + $0x540] ss:$16 sps:$4 sm:$0xff]  }
 0x5ac   :  { %9082 = vmatprep.subr.bf16.mxu0 %v11121_v52  ;;  %v11245_v44 = vld [vmem:[#allocation8 + $0x740] ss:$16 sps:$4 sm:$0xff]   ;;  %v11253_v52 = vld [vmem:[#allocation8 + $0x724] ss:$16 sps:$4 sm:$0xff]  }
 0x5ad   :  { %9122 = vmatpush1.bf16.msra.mxu1 %v11179_v53  ;;  %v11152_v56 = vld [vmem:[#allocation8 + $0x520] ss:$16 sps:$4 sm:$0xff]   ;;  %v11157_v53 = vld [vmem:[#allocation8 + $0x504] ss:$16 sps:$4 sm:$0xff]  }
 0x5ae   :  { %9123 = vmatprep.subr.bf16.mxu1 %v11187_v57  ;;  %v11251_v57 = vld [vmem:[#allocation8 + $0x720] ss:$16 sps:$4 sm:$0xff]  }
 0x5af   :  { %9083 = vmatpush1.bf16.msra.mxu0 %v11119_v31  ;;  %v11259_v31 = vld [vmem:[#allocation8 + $0x704] ss:$16 sps:$4 sm:$0xff]  }
 0x5b0   :  { %9084 = vmatprep.subr.bf16.mxu0 %v11124_v58  ;;  %v11155_v58 = vld [vmem:[#allocation8 + $0x500] ss:$16 sps:$4 sm:$0xff]  }
 0x5b1   :  { %9124 = vmatpush1.bf16.msra.mxu1 %v11185_v10  ;;  %v7424_v10 = vmax.f32 %v12057_v17, 0.0  ;;  %v11161_v17 = vld [vmem:[#allocation8 + $0xc8] ss:$16 sps:$4 sm:$0xff]  }
 0x5b2   :  { %9125 = vmatprep.subr.bf16.mxu1 %v11193_v0  ;;  %v11160_v0 = vld [vmem:[#allocation8 + $0xec] ss:$16 sps:$4 sm:$0xff]  }
 0x5b3   :  { %9085 = vmatpush1.bf16.msra.mxu0 %v11122_v3  ;;  %v11257_v3 = vld [vmem:[#allocation8 + $0x700] ss:$16 sps:$4 sm:$0xff]  }
 0x5b4   :  { %9086 = vmatprep.subr.bf16.mxu0 %v11127_v11  ;;  %v11265_v11 = vld [vmem:[#allocation8 + $0x2ec] ss:$16 sps:$4 sm:$0xff]  }
 0x5b5   :  { %9126 = vmatpush1.bf16.msra.mxu1 %v11191_v49  ;;  %v11158_v49 = vld [vmem:[#allocation8 + $0xe8] ss:$16 sps:$4 sm:$0xff]  }
 0x5b6   :  { %9127 = vmatprep.subr.bf16.mxu1 %v11199_v62  ;;  %v12110_v62 = vpack.c.bf16 %v7424_v10, %v7424_v10 }
 0x5b7   :  { %9087 = vmatpush1.bf16.msra.mxu0 %v11125_v34  ;;  %v11163_v34 = vld [vmem:[#allocation8 + $0xcc] ss:$16 sps:$4 sm:$0xff]  }
 0x5b8   :  { %9088 = vmatprep.subr.bf16.mxu0 %v11130_v60 }
 0x5b9   :  { %9128 = vmatpush1.bf16.msra.mxu1 %v11197_v9  ;;  %v11166_v9 = vld [vmem:[#allocation8 + $0xac] ss:$16 sps:$4 sm:$0xff]  }
 0x5ba   :  { %9129 = vmatprep.subr.bf16.mxu1 %v11205_v41 }
 0x5bb   :  { %9089 = vmatpush1.bf16.msra.mxu0 %v11128_v4 }
 0x5bc   :  { %9090 = vmatprep.subr.bf16.mxu0 %v11133_v5  ;;  %v11164_v5 = vld [vmem:[#allocation8 + $0xa8] ss:$16 sps:$4 sm:$0xff]  }
 0x5bd   :  { %9130 = vmatpush1.bf16.msra.mxu1 %v11203_v29  ;;  %v11172_v29 = vld [vmem:[#allocation8 + $0x8c] ss:$16 sps:$4 sm:$0xff]  }
 0x5be   :  { %9131 = vmatprep.subr.bf16.mxu1 %v11211_v63 }
 0x5bf   :  { %9091 = vmatpush1.bf16.msra.mxu0 %v11131_v33  ;;  %v11170_v33 = vld [vmem:[#allocation8 + $0x88] ss:$16 sps:$4 sm:$0xff]  }
 0x5c0   :  { %9092 = vmatprep.subr.bf16.mxu0 %v11136_v30  ;;  %v11178_v30 = vld [vmem:[#allocation8 + $0x6c] ss:$16 sps:$4 sm:$0xff]  }
 0x5c1   :  { %9132 = vmatpush1.bf16.msra.mxu1 %v11209_v54  ;;  %v11176_v54 = vld [vmem:[#allocation8 + $0x68] ss:$16 sps:$4 sm:$0xff]  }
 0x5c2   :  { %v7249_v22 = vpop.f32.mrf.mxu0  ;;  %9133 = vmatprep.subr.bf16.mxu1 %v11217_v26  ;;  %v11184_v26 = vld [vmem:[#allocation8 + $0x4c] ss:$16 sps:$4 sm:$0xff]  }
 0x5c3   :  { %v12104_v38 = vadd.f32 %v7249_v22, %v12097_v19  ;;  %9093 = vmatpush2.bf16.msra.mxu0 %v11134_v8  ;;  %v11241_v19 = vld [vmem:[#allocation8 + $0x764] ss:$16 sps:$4 sm:$0xff]   ;;  %v11190_v8 = vld [vmem:[#allocation8 + $0x2c] ss:$16 sps:$4 sm:$0xff]   ;;  %v11194_v22 = vld [vmem:[#allocation8 + $0x8] ss:$16 sps:$4 sm:$0xff]  }
 0x5c4   :  { %v7251_v21 = vpop.f32.mrf.mxu0  ;;  %9094 = vmatprep.subr.bf16.mxu0 %v11139_v13  ;;  %v11188_v13 = vld [vmem:[#allocation8 + $0x28] ss:$16 sps:$4 sm:$0xff]  }
 0x5c5   :  { %v12107_v59 = vadd.f32 %v7251_v21, %v12101_v35  ;;  %9134 = vmatpush2.bf16.msra.mxu1 %v11215_v42  ;;  %v11247_v35 = vld [vmem:[#allocation8 + $0x744] ss:$16 sps:$4 sm:$0xff]   ;;  %v11196_v42 = vld [vmem:[#allocation8 + $0xc] ss:$16 sps:$4 sm:$0xff]  }
 0x5c6   :  { %v7253_v14 = vpop.f32.mrf.mxu0  ;;  %9135 = vmatprep.subr.bf16.mxu1 %v11223_v43  ;;  %v11202_v43 = vld [vmem:[#allocation8 + $0x1ec] ss:$16 sps:$4 sm:$0xff]  }
 0x5c7   :  { %9095 = vmatpush2.bf16.msra.mxu0 %v11137_v23  ;;  %v11200_v23 = vld [vmem:[#allocation8 + $0x1e8] ss:$16 sps:$4 sm:$0xff]   ;;  %v11208_v21 = vld [vmem:[#allocation8 + $0x1cc] ss:$16 sps:$4 sm:$0xff]  }
 0x5c8   :  { %v7254_v36 = vpop.f32.mrf.mxu0  ;;  %9096 = vmatprep.subr.bf16.mxu0 %v11142_v27 }
 0x5c9   :  { %9136 = vmatpush2.bf16.msra.mxu1 %v11221_v20  ;;  %v11206_v20 = vld [vmem:[#allocation8 + $0x1c8] ss:$16 sps:$4 sm:$0xff]  }
 0x5ca   :  { %9137 = vmatprep.subr.bf16.mxu1 %v11229_v32  ;;  %v11214_v32 = vld [vmem:[#allocation8 + $0x1ac] ss:$16 sps:$4 sm:$0xff]   ;;  %v11212_v36 = vld [vmem:[#allocation8 + $0x1a8] ss:$16 sps:$4 sm:$0xff]  }
 0x5cb   :  { %9097 = vmatpush2.bf16.msra.mxu0 %v11140_v28 }
 0x5cc   :  { %9098 = vmatprep.subr.bf16.mxu0 %v11145_v37 }
 0x5cd   :  { %9138 = vmatpush2.bf16.msra.mxu1 %v11227_v46  ;;  %v11220_v46 = vld [vmem:[#allocation8 + $0x18c] ss:$16 sps:$4 sm:$0xff]  }
 0x5ce   :  { %9139 = vmatprep.subr.bf16.mxu1 %v11235_v18  ;;  %v11218_v18 = vld [vmem:[#allocation8 + $0x188] ss:$16 sps:$4 sm:$0xff]  }
 0x5cf   :  { %9099 = vmatpush2.bf16.msra.mxu0 %v11143_v2  ;;  %v11226_v2 = vld [vmem:[#allocation8 + $0x16c] ss:$16 sps:$4 sm:$0xff]  }
 0x5d0   :  { %9100 = vmatprep.subr.bf16.mxu0 %v11148_v50  ;;  %v11224_v50 = vld [vmem:[#allocation8 + $0x168] ss:$16 sps:$4 sm:$0xff]  }
 0x5d1   :  { %9140 = vmatpush2.bf16.msra.mxu1 %v11233_v12  ;;  %v11232_v12 = vld [vmem:[#allocation8 + $0x14c] ss:$16 sps:$4 sm:$0xff]  }
 0x5d2   :  { %9141 = vmatprep.subr.bf16.mxu1 %v11241_v19  ;;  %v11230_v19 = vld [vmem:[#allocation8 + $0x148] ss:$16 sps:$4 sm:$0xff]  }
 0x5d3   :  { %9101 = vmatpush2.bf16.msra.mxu0 %v11146_v39  ;;  %v11238_v39 = vld [vmem:[#allocation8 + $0x12c] ss:$16 sps:$4 sm:$0xff]  }
 0x5d4   :  { %9102 = vmatprep.subr.bf16.mxu0 %v11151_v24  ;;  %v11236_v24 = vld [vmem:[#allocation8 + $0x128] ss:$16 sps:$4 sm:$0xff]  }
 0x5d5   :  { %9142 = vmatpush2.bf16.msra.mxu1 %v11239_v61  ;;  %v11244_v61 = vld [vmem:[#allocation8 + $0x10c] ss:$16 sps:$4 sm:$0xff]  }
 0x5d6   :  { %9143 = vmatprep.subr.bf16.mxu1 %v11247_v35  ;;  %v11242_v35 = vld [vmem:[#allocation8 + $0x108] ss:$16 sps:$4 sm:$0xff]  }
 0x5d7   :  { %9103 = vmatpush2.bf16.msra.mxu0 %v11149_v55  ;;  %v11250_v55 = vld [vmem:[#allocation8 + $0x4ec] ss:$16 sps:$4 sm:$0xff]  }
 0x5d8   :  { %9104 = vmatprep.subr.bf16.mxu0 %v11154_v51  ;;  %v11248_v51 = vld [vmem:[#allocation8 + $0x4e8] ss:$16 sps:$4 sm:$0xff]  }
 0x5d9   :  { %9144 = vmatpush2.bf16.msra.mxu1 %v11245_v44 }
 0x5da   :  { %9145 = vmatprep.subr.bf16.mxu1 %v11253_v52  ;;  %v11256_v52 = vld [vmem:[#allocation8 + $0x4cc] ss:$16 sps:$4 sm:$0xff]  }
 0x5db   :  { %9105 = vmatpush2.bf16.msra.mxu0 %v11152_v56 }
 0x5dc   :  { %9106 = vmatprep.subr.bf16.mxu0 %v11157_v53 }
 0x5dd   :  { %9146 = vmatpush2.bf16.msra.mxu1 %v11251_v57 }
 0x5de   :  { %9147 = vmatprep.subr.bf16.mxu1 %v11259_v31 }
 0x5df   :  { %9107 = vmatpush2.bf16.msra.mxu0 %v11155_v58  ;;  %v11254_v58 = vld [vmem:[#allocation8 + $0x4c8] ss:$16 sps:$4 sm:$0xff]  }
 0x5e0   :  { %9158 = vmatprep.subr.bf16.mxu0 %v11160_v0 }
 0x5e1   :  { %9148 = vmatpush2.bf16.msra.mxu1 %v11257_v3 }
 0x5e2   :  { %9109 = vmatmul.mubr.bf16.vlgmr.msra.gmra.mxu0 %v12110_v62  ;;  %9199 = vmatprep.subr.bf16.mxu1 %v11265_v11  ;;  %v11262_v11 = vld [vmem:[#allocation8 + $0x4ac] ss:$16 sps:$4 sm:$0xff]  }
 0x5e3   :  { %v12113_v60 = vpop.f32.mrf.mxu1  ;;  %9159 = vmatpush1.bf16.msra.mxu0 %v11158_v49  ;;  %9190 = vmatprep.mubr.bf16.mxu0 %v12065_v6  ;;  %v11182_v6 = vld [vmem:[#allocation8 + $0x48] ss:$16 sps:$4 sm:$0xff]  }
 0x5e4   :  { %9160 = vmatprep.subr.bf16.mxu0 %v11163_v34  ;;  %v7291_v44 = vadd.f32 %v12113_v60, %v12104_v38 }
 0x5e5   :  { %v12116_v41 = vpop.f32.mrf.mxu1 }
 0x5e6   :  { %v7293_v56 = vadd.f32 %v12116_v41, %v12107_v59  ;;  %v11260_v59 = vld [vmem:[#allocation8 + $0x4a8] ss:$16 sps:$4 sm:$0xff]  }
 0x5e7   :  { %v7294_v4 = vpop.f32.mrf.mxu1  ;;  %9161 = vmatpush1.bf16.msra.mxu0 %v11161_v17 }
 0x5e8   :  { %9162 = vmatprep.subr.bf16.mxu0 %v11166_v9 }
 0x5e9   :  { %v7295_v63 = vpop.f32.mrf.mxu1 }
 0x5eb   :  { %9163 = vmatpush1.bf16.msra.mxu0 %v11164_v5 }
 0x5ec   :  { %9164 = vmatprep.subr.bf16.mxu0 %v11172_v29  ;;  %v11266_v29 = vld [vmem:[#allocation8 + $0x488] ss:$16 sps:$4 sm:$0xff]  }
 0x5ef   :  { %9165 = vmatpush1.bf16.msra.mxu0 %v11170_v33  ;;  %v11263_v33 = vld [vmem:[#allocation8 + $0x2e8] ss:$16 sps:$4 sm:$0xff]  }
 0x5f0   :  { %9166 = vmatprep.subr.bf16.mxu0 %v11178_v30 }
 0x5f3   :  { %9167 = vmatpush1.bf16.msra.mxu0 %v11176_v54  ;;  %v11271_v54 = vld [vmem:[#allocation8 + $0x2cc] ss:$16 sps:$4 sm:$0xff]  }
 0x5f4   :  { %9168 = vmatprep.subr.bf16.mxu0 %v11184_v26  ;;  %v11274_v26 = vld [vmem:[#allocation8 + $0x46c] ss:$16 sps:$4 sm:$0xff]  }
 0x5f7   :  { %9169 = vmatpush1.bf16.msra.mxu0 %v11182_v6  ;;  %v11272_v6 = vld [vmem:[#allocation8 + $0x468] ss:$16 sps:$4 sm:$0xff]  }
 0x5f8   :  { %9170 = vmatprep.subr.bf16.mxu0 %v11190_v8  ;;  %v11269_v8 = vld [vmem:[#allocation8 + $0x2c8] ss:$16 sps:$4 sm:$0xff]  }
 0x5fb   :  { %9171 = vmatpush1.bf16.msra.mxu0 %v11188_v13  ;;  %v11280_v13 = vld [vmem:[#allocation8 + $0x44c] ss:$16 sps:$4 sm:$0xff]  }
 0x5fc   :  { %9172 = vmatprep.subr.bf16.mxu0 %v11196_v42  ;;  %v11277_v42 = vld [vmem:[#allocation8 + $0x2ac] ss:$16 sps:$4 sm:$0xff]  }
 0x5ff   :  { %9173 = vmatpush1.bf16.msra.mxu0 %v11194_v22  ;;  %v11278_v22 = vld [vmem:[#allocation8 + $0x448] ss:$16 sps:$4 sm:$0xff]  }
 0x600   :  { %9174 = vmatprep.subr.bf16.mxu0 %v11202_v43  ;;  %v11275_v43 = vld [vmem:[#allocation8 + $0x2a8] ss:$16 sps:$4 sm:$0xff]  }
 0x602   :  { %v7331_v27 = vpop.f32.mrf.mxu0 }
 0x603   :  { %9175 = vmatpush2.bf16.msra.mxu0 %v11200_v23  ;;  %v7332_v53 = vadd.f32 %v7331_v27, %v7291_v44  ;;  %v11286_v23 = vld [vmem:[#allocation8 + $0x42c] ss:$16 sps:$4 sm:$0xff]   ;;  %v11284_v27 = vld [vmem:[#allocation8 + $0x428] ss:$16 sps:$4 sm:$0xff]  }
 0x604   :  { %v7333_v14 = vpop.f32.mrf.mxu0  ;;  %9176 = vmatprep.subr.bf16.mxu0 %v11208_v21  ;;  %v11283_v21 = vld [vmem:[#allocation8 + $0x28c] ss:$16 sps:$4 sm:$0xff]   ;;  %v11314_v44 = vld [vmem:[#allocation8 + $0x588] ss:$16 sps:$4 sm:$0xff]  }
 0x605   :  { %v7334_v10 = vadd.f32 %v7333_v14, %v7293_v56  ;;  %v11292_v14 = vld [vmem:[#allocation8 + $0x40c] ss:$16 sps:$4 sm:$0xff]  }
 0x606   :  { %v7335_v28 = vpop.f32.mrf.mxu0  ;;  %v11322_v56 = vld [vmem:[#allocation8 + $0x56c] ss:$16 sps:$4 sm:$0xff]  }
 0x607   :  { %9177 = vmatpush2.bf16.msra.mxu0 %v11206_v20  ;;  %v11281_v20 = vld [vmem:[#allocation8 + $0x288] ss:$16 sps:$4 sm:$0xff]  }
 0x608   :  { %v7336_v37 = vpop.f32.mrf.mxu0  ;;  %9178 = vmatprep.subr.bf16.mxu0 %v11214_v32  ;;  %v11290_v32 = vld [vmem:[#allocation8 + $0x408] ss:$16 sps:$4 sm:$0xff]  }
 0x609   :  { %v11287_v28 = vld [vmem:[#allocation8 + $0x268] ss:$16 sps:$4 sm:$0xff]   ;;  %v11295_v37 = vld [vmem:[#allocation8 + $0x24c] ss:$16 sps:$4 sm:$0xff]  }
 0x60b   :  { %9179 = vmatpush2.bf16.msra.mxu0 %v11212_v36  ;;  %v11298_v36 = vld [vmem:[#allocation8 + $0x5ec] ss:$16 sps:$4 sm:$0xff]  }
 0x60c   :  { %9180 = vmatprep.subr.bf16.mxu0 %v11220_v46  ;;  %v11296_v46 = vld [vmem:[#allocation8 + $0x5e8] ss:$16 sps:$4 sm:$0xff]  }
 0x60f   :  { %9181 = vmatpush2.bf16.msra.mxu0 %v11218_v18  ;;  %v11293_v18 = vld [vmem:[#allocation8 + $0x248] ss:$16 sps:$4 sm:$0xff]  }
 0x610   :  { %9182 = vmatprep.subr.bf16.mxu0 %v11226_v2  ;;  %v11304_v2 = vld [vmem:[#allocation8 + $0x5cc] ss:$16 sps:$4 sm:$0xff]  }
 0x613   :  { %9183 = vmatpush2.bf16.msra.mxu0 %v11224_v50  ;;  %v11301_v50 = vld [vmem:[#allocation8 + $0x22c] ss:$16 sps:$4 sm:$0xff]  }
 0x614   :  { %9184 = vmatprep.subr.bf16.mxu0 %v11232_v12  ;;  %v11302_v12 = vld [vmem:[#allocation8 + $0x5c8] ss:$16 sps:$4 sm:$0xff]  }
 0x617   :  { %9185 = vmatpush2.bf16.msra.mxu0 %v11230_v19  ;;  %v11299_v19 = vld [vmem:[#allocation8 + $0x228] ss:$16 sps:$4 sm:$0xff]  }
 0x618   :  { %9186 = vmatprep.subr.bf16.mxu0 %v11238_v39  ;;  %v11310_v39 = vld [vmem:[#allocation8 + $0x5ac] ss:$16 sps:$4 sm:$0xff]  }
 0x61b   :  { %9187 = vmatpush2.bf16.msra.mxu0 %v11236_v24  ;;  %v11307_v24 = vld [vmem:[#allocation8 + $0x20c] ss:$16 sps:$4 sm:$0xff]  }
 0x61c   :  { %9188 = vmatprep.subr.bf16.mxu0 %v11244_v61  ;;  %v11308_v61 = vld [vmem:[#allocation8 + $0x5a8] ss:$16 sps:$4 sm:$0xff]  }
 0x61f   :  { %9189 = vmatpush2.bf16.msra.mxu0 %v11242_v35  ;;  %v11305_v35 = vld [vmem:[#allocation8 + $0x208] ss:$16 sps:$4 sm:$0xff]  }
 0x620   :  { %9240 = vmatprep.subr.bf16.mxu0 %v11250_v55  ;;  %v11316_v55 = vld [vmem:[#allocation8 + $0x58c] ss:$16 sps:$4 sm:$0xff]  }
 0x622   :  { %v7413_v57 = vpop.f32.mrf.mxu0  ;;  %9191 = vmatmul.mubr.bf16.vlgmr.msra.gmra.mxu0 %v12088_v45  ;;  %v11268_v45 = vld [vmem:[#allocation8 + $0x48c] ss:$16 sps:$4 sm:$0xff]  }
 0x623   :  { %v7372_v31 = vpop.f32.mrf.mxu1  ;;  %9241 = vmatpush1.bf16.msra.mxu0 %v11248_v51  ;;  %9272 = vmatprep.mubr.bf16.mxu0 %v12092_v48  ;;  %v11313_v51 = vld [vmem:[#allocation8 + $0x3ec] ss:$16 sps:$4 sm:$0xff]  }
 0x624   :  { %v7373_v0 = vadd.f32 %v7372_v31, %v7332_v53  ;;  %v7415_v3 = vpop.f32.mrf.mxu0  ;;  %9242 = vmatprep.subr.bf16.mxu0 %v11256_v52  ;;  %v11311_v52 = vld [vmem:[#allocation8 + $0x3e8] ss:$16 sps:$4 sm:$0xff]   ;;  %v11319_v53 = vld [vmem:[#allocation8 + $0x3cc] ss:$16 sps:$4 sm:$0xff]  }
 0x625   :  { %v7374_v38 = vpop.f32.mrf.mxu1  ;;  %v11317_v31 = vld [vmem:[#allocation8 + $0x3c8] ss:$16 sps:$4 sm:$0xff]  }
 0x626   :  { %v7414_v49 = vadd.f32 %v7413_v57, %v7373_v0  ;;  %v7375_v34 = vadd.f32 %v7374_v38, %v7334_v10  ;;  %v7417_v60 = vpop.f32.mrf.mxu0  ;;  %v11320_v57 = vld [vmem:[#allocation8 + $0x568] ss:$16 sps:$4 sm:$0xff]   ;;  %v11325_v10 = vld [vmem:[#allocation8 + $0x3ac] ss:$16 sps:$4 sm:$0xff]  }
 0x627   :  { %v7376_v17 = vpop.f32.mrf.mxu1  ;;  %9243 = vmatpush1.bf16.msra.mxu0 %v11254_v58  ;;  %v11328_v58 = vld [vmem:[#allocation8 + $0x54c] ss:$16 sps:$4 sm:$0xff]   ;;  %v11326_v0 = vld [vmem:[#allocation8 + $0x548] ss:$16 sps:$4 sm:$0xff]  }
 0x628   :  { %v7416_v9 = vadd.f32 %v7415_v3, %v7375_v34  ;;  %v7418_v41 = vpop.f32.mrf.mxu0  ;;  %9244 = vmatprep.subr.bf16.mxu0 %v11262_v11  ;;  %v7426_v4 = vmax.f32 %v7414_v49, 0.0  ;;  %v11323_v3 = vld [vmem:[#allocation8 + $0x3a8] ss:$16 sps:$4 sm:$0xff]   ;;  %v11334_v11 = vld [vmem:[#allocation8 + $0x52c] ss:$16 sps:$4 sm:$0xff]  }
 0x629   :  { %v7377_v5 = vpop.f32.mrf.mxu1  ;;  %v11331_v38 = vld [vmem:[#allocation8 + $0x38c] ss:$16 sps:$4 sm:$0xff]   ;;  %v11332_v49 = vld [vmem:[#allocation8 + $0x528] ss:$16 sps:$4 sm:$0xff]   ;;  %v12131_v41 = vld [vmem:[#allocation10] sm:$0xf] }
 0x62a   :  { %v7427_v48 = vmax.f32 %v7416_v9, 0.0  ;;  %v12126_v30 = vpack.c.bf16 %v7426_v4, %v7426_v4  ;;  %v11329_v34 = vld [vmem:[#allocation8 + $0x388] ss:$16 sps:$4 sm:$0xff]   ;;  %v11340_v60 = vld [vmem:[#allocation8 + $0x50c] ss:$16 sps:$4 sm:$0xff]   ;;  %v7697_v5 = vrot.slane %v12131_v41, %v1270_v15 }
 0x62b   :  { %9245 = vmatpush1.bf16.msra.mxu0 %v11260_v59  ;;  %v11337_v17 = vld [vmem:[#allocation8 + $0x36c] ss:$16 sps:$4 sm:$0xff]   ;;  %v11338_v59 = vld [vmem:[#allocation8 + $0x508] ss:$16 sps:$4 sm:$0xff]  }
 0x62c   :  { %v12124_v63 = vpack.c.bf16 %v7427_v48, %v7427_v48  ;;  %9246 = vmatprep.subr.bf16.mxu0 %v11268_v45  ;;  %v11335_v9 = vld [vmem:[#allocation8 + $0x368] ss:$16 sps:$4 sm:$0xff]   ;;  %v11398_v45 = vld [vmem:[#allocation11 + $0x78] sm:$0xff]  }
 0x62d   :  { %v11343_v4 = vld [vmem:[#allocation8 + $0x34c] ss:$16 sps:$4 sm:$0xff]  }
 0x62e   :  { %9149 = vmatprep.mubr.bf16.mxu1 %v12124_v63  ;;  %v11399_v48 = vld [vmem:[#allocation11 + $0x38] sm:$0xff]  }
 0x62f   :  { %9150 = vmatmul.mubr.bf16.vlgmr.msra.gmra.mxu1 %v12126_v30  ;;  %9247 = vmatpush1.bf16.msra.mxu0 %v11266_v29  ;;  %v11341_v29 = vld [vmem:[#allocation8 + $0x348] ss:$16 sps:$4 sm:$0xff]  }
 0x630   :  { %9200 = vmatpush1.bf16.msra.mxu1 %v11263_v33  ;;  %9231 = vmatprep.mubr.bf16.mxu1 %v12068_v40  ;;  %v11289_v40 = vld [vmem:[#allocation8 + $0x26c] ss:$16 sps:$4 sm:$0xff]   ;;  %v11400_v33 = vld [vmem:[#allocation11 + $0x70] sm:$0xff]  }
 0x631   :  { %9201 = vmatprep.subr.bf16.mxu1 %v11271_v54  ;;  %9248 = vmatprep.subr.bf16.mxu0 %v11274_v26  ;;  %v7701_v54 = vrot.slane %v12131_v41, %v1274_v25  ;;  %v11346_v26 = vld [vmem:[#allocation8 + $0x32c] ss:$16 sps:$4 sm:$0xff]  }
 0x633   :  { %9249 = vmatpush1.bf16.msra.mxu0 %v11272_v6 }
 0x634   :  { %9202 = vmatpush1.bf16.msra.mxu1 %v11269_v8  ;;  %9250 = vmatprep.subr.bf16.mxu0 %v11280_v13 }
 0x635   :  { %9203 = vmatprep.subr.bf16.mxu1 %v11277_v42  ;;  %v11401_v42 = vld [vmem:[#allocation11 + $0x30] sm:$0xff]  }
 0x637   :  { %9251 = vmatpush1.bf16.msra.mxu0 %v11278_v22  ;;  %v11344_v22 = vld [vmem:[#allocation8 + $0x328] ss:$16 sps:$4 sm:$0xff]  }
 0x638   :  { %9204 = vmatpush1.bf16.msra.mxu1 %v11275_v43  ;;  %9252 = vmatprep.subr.bf16.mxu0 %v11286_v23  ;;  %v11402_v43 = vld [vmem:[#allocation11 + $0x68] sm:$0xff]  }
 0x639   :  { %9205 = vmatprep.subr.bf16.mxu1 %v11283_v21 }
 0x63b   :  { %9253 = vmatpush1.bf16.msra.mxu0 %v11284_v27 }
 0x63c   :  { %9206 = vmatpush1.bf16.msra.mxu1 %v11281_v20  ;;  %9254 = vmatprep.subr.bf16.mxu0 %v11292_v14  ;;  %v11349_v20 = vld [vmem:[#allocation8 + $0x30c] ss:$16 sps:$4 sm:$0xff]  }
 0x63d   :  { %9207 = vmatprep.subr.bf16.mxu1 %v11289_v40 }
 0x63f   :  { %9255 = vmatpush1.bf16.msra.mxu0 %v11290_v32 }
 0x640   :  { %9208 = vmatpush1.bf16.msra.mxu1 %v11287_v28  ;;  %9256 = vmatprep.subr.bf16.mxu0 %v11298_v36  ;;  %v11347_v28 = vld [vmem:[#allocation8 + $0x308] ss:$16 sps:$4 sm:$0xff]  }
 0x641   :  { %9209 = vmatprep.subr.bf16.mxu1 %v11295_v37  ;;  %v11404_v36 = vld [vmem:[#allocation11 + $0x60] sm:$0xff]  }
 0x643   :  { %9257 = vmatpush2.bf16.msra.mxu0 %v11296_v46  ;;  %v11352_v46 = vld [vmem:[#allocation8 + $0x6ec] ss:$16 sps:$4 sm:$0xff]  }
 0x644   :  { %9210 = vmatpush1.bf16.msra.mxu1 %v11293_v18  ;;  %9258 = vmatprep.subr.bf16.mxu0 %v11304_v2  ;;  %v11405_v18 = vld [vmem:[#allocation11 + $0x20] sm:$0xff]  }
 0x645   :  { %9211 = vmatprep.subr.bf16.mxu1 %v11301_v50  ;;  %v11350_v2 = vld [vmem:[#allocation8 + $0x6e8] ss:$16 sps:$4 sm:$0xff]   ;;  %v11355_v50 = vld [vmem:[#allocation8 + $0x6cc] ss:$16 sps:$4 sm:$0xff]  }
 0x647   :  { %9259 = vmatpush2.bf16.msra.mxu0 %v11302_v12  ;;  %v11406_v12 = vld [vmem:[#allocation11 + $0x58] sm:$0xff]  }
 0x648   :  { %9212 = vmatpush1.bf16.msra.mxu1 %v11299_v19  ;;  %9260 = vmatprep.subr.bf16.mxu0 %v11310_v39  ;;  %v11407_v19 = vld [vmem:[#allocation11 + $0x18] sm:$0xff]   ;;  %v11353_v39 = vld [vmem:[#allocation8 + $0x6c8] ss:$16 sps:$4 sm:$0xff]  }
 0x649   :  { %9213 = vmatprep.subr.bf16.mxu1 %v11307_v24  ;;  %v11408_v24 = vld [vmem:[#allocation11 + $0x50] sm:$0xff]  }
 0x64b   :  { %9261 = vmatpush2.bf16.msra.mxu0 %v11308_v61  ;;  %v11358_v61 = vld [vmem:[#allocation8 + $0x6ac] ss:$16 sps:$4 sm:$0xff]  }
 0x64c   :  { %9214 = vmatpush1.bf16.msra.mxu1 %v11305_v35  ;;  %9262 = vmatprep.subr.bf16.mxu0 %v11316_v55  ;;  %v11409_v35 = vld [vmem:[#allocation11 + $0x10] sm:$0xff]  }
 0x64d   :  { %9215 = vmatprep.subr.bf16.mxu1 %v11313_v51  ;;  %v11356_v55 = vld [vmem:[#allocation8 + $0x6a8] ss:$16 sps:$4 sm:$0xff]   ;;  %v11410_v51 = vld [vmem:[#allocation11 + $0x48] sm:$0xff]  }
 0x64f   :  { %9263 = vmatpush2.bf16.msra.mxu0 %v11314_v44  ;;  %v11361_v44 = vld [vmem:[#allocation8 + $0x68c] ss:$16 sps:$4 sm:$0xff]  }
 0x650   :  { %9216 = vmatpush2.bf16.msra.mxu1 %v11311_v52  ;;  %9264 = vmatprep.subr.bf16.mxu0 %v11322_v56  ;;  %v11359_v52 = vld [vmem:[#allocation8 + $0x688] ss:$16 sps:$4 sm:$0xff]  }
 0x651   :  { %9217 = vmatprep.subr.bf16.mxu1 %v11319_v53  ;;  %v11412_v56 = vld [vmem:[#allocation11 + $0x40] sm:$0xff]  }
 0x652   :  { %v11413_v53 = vld [vmem:[#allocation11] sm:$0xff]  }
 0x653   :  { %9265 = vmatpush2.bf16.msra.mxu0 %v11320_v57  ;;  %v11362_v57 = vld [vmem:[#allocation8 + $0x668] ss:$16 sps:$4 sm:$0xff]  }
 0x654   :  { %9218 = vmatpush2.bf16.msra.mxu1 %v11317_v31  ;;  %9266 = vmatprep.subr.bf16.mxu0 %v11328_v58  ;;  %v11367_v31 = vld [vmem:[#allocation8 + $0x64c] ss:$16 sps:$4 sm:$0xff]   ;;  %v11365_v58 = vld [vmem:[#allocation8 + $0x648] ss:$16 sps:$4 sm:$0xff]  }
 0x655   :  { %9219 = vmatprep.subr.bf16.mxu1 %v11325_v10  ;;  %v11370_v10 = vld [vmem:[#allocation8 + $0x62c] ss:$16 sps:$4 sm:$0xff]  }
 0x657   :  { %9267 = vmatpush2.bf16.msra.mxu0 %v11326_v0  ;;  %v11368_v0 = vld [vmem:[#allocation8 + $0x628] ss:$16 sps:$4 sm:$0xff]  }
 0x658   :  { %9220 = vmatpush2.bf16.msra.mxu1 %v11323_v3  ;;  %9268 = vmatprep.subr.bf16.mxu0 %v11334_v11  ;;  %v11373_v3 = vld [vmem:[#allocation8 + $0x60c] ss:$16 sps:$4 sm:$0xff]   ;;  %v11371_v11 = vld [vmem:[#allocation8 + $0x608] ss:$16 sps:$4 sm:$0xff]  }
 0x659   :  { %9221 = vmatprep.subr.bf16.mxu1 %v11331_v38  ;;  %v11376_v38 = vld [vmem:[#allocation8 + $0x7ec] ss:$16 sps:$4 sm:$0xff]  }
 0x65b   :  { %9269 = vmatpush2.bf16.msra.mxu0 %v11332_v49  ;;  %v11374_v49 = vld [vmem:[#allocation8 + $0x7e8] ss:$16 sps:$4 sm:$0xff]  }
 0x65c   :  { %9222 = vmatpush2.bf16.msra.mxu1 %v11329_v34  ;;  %9270 = vmatprep.subr.bf16.mxu0 %v11340_v60  ;;  %v11379_v34 = vld [vmem:[#allocation8 + $0x7cc] ss:$16 sps:$4 sm:$0xff]   ;;  %v11377_v60 = vld [vmem:[#allocation8 + $0x7c8] ss:$16 sps:$4 sm:$0xff]  }
 0x65d   :  { %9223 = vmatprep.subr.bf16.mxu1 %v11337_v17  ;;  %v11382_v17 = vld [vmem:[#allocation8 + $0x7ac] ss:$16 sps:$4 sm:$0xff]  }
 0x65f   :  { %9271 = vmatpush2.bf16.msra.mxu0 %v11338_v59  ;;  %v11380_v59 = vld [vmem:[#allocation8 + $0x7a8] ss:$16 sps:$4 sm:$0xff]  }
 0x660   :  { %9224 = vmatpush2.bf16.msra.mxu1 %v11335_v9  ;;  %10948 = vmatprep.subr.bf16.mxu0 %v11398_v45  ;;  %v11385_v9 = vld [vmem:[#allocation8 + $0x78c] ss:$16 sps:$4 sm:$0xff]   ;;  %v11383_v45 = vld [vmem:[#allocation8 + $0x788] ss:$16 sps:$4 sm:$0xff]  }
 0x661   :  { %9225 = vmatprep.subr.bf16.mxu1 %v11343_v4  ;;  %v11388_v4 = vld [vmem:[#allocation8 + $0x76c] ss:$16 sps:$4 sm:$0xff]  }
 0x662   :  { %v9028_v6 = vpop.f32.mrf.mxu0  ;;  %9273 = vmatmul.mubr.bf16.vlgmr.msra.gmra.mxu0 %v12110_v62  ;;  %v11403_v62 = vld [vmem:[#allocation11 + $0x28] sm:$0xff]  }
 0x663   :  { %v9029_v8 = vadd.f32 %v9028_v6, %v7697_v5  ;;  %v9069_v13 = vpop.f32.mrf.mxu1  ;;  %10949 = vmatpush3.bf16.msra.mxu0 %v11399_v48  ;;  %v11386_v5 = vld [vmem:[#allocation8 + $0x768] ss:$16 sps:$4 sm:$0xff]   ;;  %v11391_v48 = vld [vmem:[#allocation8 + $0x74c] ss:$16 sps:$4 sm:$0xff]  }
 0x664   :  { %9226 = vmatpush2.bf16.msra.mxu1 %v11341_v29  ;;  %v9030_v15 = vpop.f32.mrf.mxu0  ;;  %10950 = vmatprep.subr.bf16.mxu0 %v11400_v33  ;;  %v11389_v29 = vld [vmem:[#allocation8 + $0x748] ss:$16 sps:$4 sm:$0xff]   ;;  %v11394_v33 = vld [vmem:[#allocation8 + $0x72c] ss:$16 sps:$4 sm:$0xff]  }
 0x665   :  { %v12140_v23 = vadd.f32 %v9069_v13, %v9029_v8  ;;  %v9031_v21 = vadd.f32 %v9030_v15, %v7701_v54  ;;  %v9071_v27 = vpop.f32.mrf.mxu1  ;;  %9227 = vmatprep.subr.bf16.mxu1 %v11346_v26  ;;  %v11392_v8 = vld [vmem:[#allocation8 + $0x728] ss:$16 sps:$4 sm:$0xff]  }
 0x666   :  { %v9032_v25 = vpop.f32.mrf.mxu0 }
 0x667   :  { %v12142_v14 = vadd.f32 %v9071_v27, %v9031_v21  ;;  %v9073_v40 = vpop.f32.mrf.mxu1  ;;  %10951 = vmatpush3.bf16.msra.mxu0 %v11401_v42  ;;  %v11397_v42 = vld [vmem:[#allocation8 + $0x70c] ss:$16 sps:$4 sm:$0xff]  }
 0x668   :  { %9228 = vmatpush2.bf16.msra.mxu1 %v11344_v22  ;;  %v9033_v32 = vpop.f32.mrf.mxu0  ;;  %10952 = vmatprep.subr.bf16.mxu0 %v11402_v43  ;;  %v11395_v43 = vld [vmem:[#allocation8 + $0x708] ss:$16 sps:$4 sm:$0xff]   ;;  %v11414_v21 = vld [vmem:[#allocation11 + $0xf8] sm:$0xff]   ;;  %v11418_v25 = vld [vmem:[#allocation11 + $0xe8] sm:$0xff]  }
 0x669   :  { %v9074_v37 = vpop.f32.mrf.mxu1  ;;  %9229 = vmatprep.subr.bf16.mxu1 %v11349_v20  ;;  %v11415_v27 = vld [vmem:[#allocation11 + $0xb8] sm:$0xff]   ;;  %v11416_v20 = vld [vmem:[#allocation11 + $0xf0] sm:$0xff]   ;;  %v11420_v40 = vld [vmem:[#allocation11 + $0xe0] sm:$0xff]  }
 0x66a   :  { %v11422_v32 = vld [vmem:[#allocation11 + $0xd8] sm:$0xff]  }
 0x66b   :  { %10953 = vmatpush3.bf16.msra.mxu0 %v11403_v62  ;;  %v11421_v62 = vld [vmem:[#allocation11 + $0xa0] sm:$0xff]  }
 0x66c   :  { %9230 = vmatpush2.bf16.msra.mxu1 %v11347_v28  ;;  %10954 = vmatprep.subr.bf16.mxu0 %v11404_v36  ;;  %v11423_v28 = vld [vmem:[#allocation11 + $0x98] sm:$0xff]   ;;  %v11425_v36 = vld [vmem:[#allocation11 + $0x90] sm:$0xff]  }
 0x66d   :  { %9281 = vmatprep.subr.bf16.mxu1 %v11352_v46 }
 0x66f   :  { %9232 = vmatmul.mubr.bf16.vlgmr.msra.gmra.mxu1 %v12090_v47  ;;  %10955 = vmatpush3.bf16.msra.mxu0 %v11405_v18  ;;  %v11411_v47 = vld [vmem:[#allocation11 + $0x8] sm:$0xff]  }
 0x670   :  { %9282 = vmatpush1.bf16.msra.mxu1 %v11350_v2  ;;  %9313 = vmatprep.mubr.bf16.mxu1 %v12124_v63  ;;  %v11364_v63 = vld [vmem:[#allocation8 + $0x66c] ss:$16 sps:$4 sm:$0xff]  }
 0x671   :  { %9283 = vmatprep.subr.bf16.mxu1 %v11355_v50  ;;  %10956 = vmatprep.subr.bf16.mxu0 %v11406_v12 }
 0x673   :  { %10957 = vmatpush3.bf16.msra.mxu0 %v11407_v19 }
 0x674   :  { %9284 = vmatpush1.bf16.msra.mxu1 %v11353_v39  ;;  %10958 = vmatprep.subr.bf16.mxu0 %v11408_v24  ;;  %v11426_v24 = vld [vmem:[#allocation11 + $0xc8] sm:$0xff]  }
 0x675   :  { %9285 = vmatprep.subr.bf16.mxu1 %v11358_v61 }
 0x677   :  { %10959 = vmatpush3.bf16.msra.mxu0 %v11409_v35 }
 0x678   :  { %9286 = vmatpush1.bf16.msra.mxu1 %v11356_v55  ;;  %10960 = vmatprep.subr.bf16.mxu0 %v11410_v51  ;;  %v11427_v55 = vld [vmem:[#allocation11 + $0x88] sm:$0xff]  }
 0x679   :  { %9287 = vmatprep.subr.bf16.mxu1 %v11361_v44 }
 0x67b   :  { %10961 = vmatpush3.bf16.msra.mxu0 %v11411_v47 }
 0x67c   :  { %9288 = vmatpush1.bf16.msra.mxu1 %v11359_v52  ;;  %10962 = vmatprep.subr.bf16.mxu0 %v11412_v56  ;;  %v11428_v52 = vld [vmem:[#allocation11 + $0xc0] sm:$0xff]  }
 0x67d   :  { %9289 = vmatprep.subr.bf16.mxu1 %v11364_v63  ;;  %v11429_v56 = vld [vmem:[#allocation11 + $0x80] sm:$0xff]  }
 0x67f   :  { %10963 = vmatpush3.bf16.msra.mxu0 %v11413_v53 }
 0x680   :  { %9290 = vmatpush1.bf16.msra.mxu1 %v11362_v57 }
 0x681   :  { %9291 = vmatprep.subr.bf16.mxu1 %v11367_v31 }
 0x684   :  { %9292 = vmatpush1.bf16.msra.mxu1 %v11365_v58 }
 0x685   :  { %9293 = vmatprep.subr.bf16.mxu1 %v11370_v10  ;;  %v7705_v10 = vrot.slane %v12131_v41, %v1278_v16 }
 0x688   :  { %9294 = vmatpush1.bf16.msra.mxu1 %v11368_v0  ;;  %v7709_v0 = vrot.slane %v12131_v41, %v1282_v1 }
 0x689   :  { %9295 = vmatprep.subr.bf16.mxu1 %v11373_v3 }
 0x68c   :  { %9296 = vmatpush1.bf16.msra.mxu1 %v11371_v11 }
 0x68d   :  { %9297 = vmatprep.subr.bf16.mxu1 %v11376_v38 }
 0x690   :  { %9298 = vmatpush2.bf16.msra.mxu1 %v11374_v49 }
 0x691   :  { %9299 = vmatprep.subr.bf16.mxu1 %v11379_v34 }
 0x694   :  { %9300 = vmatpush2.bf16.msra.mxu1 %v11377_v60 }
 0x695   :  { %9301 = vmatprep.subr.bf16.mxu1 %v11382_v17 }
 0x698   :  { %9302 = vmatpush2.bf16.msra.mxu1 %v11380_v59 }
 0x699   :  { %9303 = vmatprep.subr.bf16.mxu1 %v11385_v9 }
 0x69c   :  { %9304 = vmatpush2.bf16.msra.mxu1 %v11383_v45 }
 0x69d   :  { %9305 = vmatprep.subr.bf16.mxu1 %v11388_v4 }
 0x6a0   :  { %9306 = vmatpush2.bf16.msra.mxu1 %v11386_v5 }
 0x6a1   :  { %9307 = vmatprep.subr.bf16.mxu1 %v11391_v48 }
 0x6a2   :  { %v9110_v54 = vpop.f32.mrf.mxu0 }
 0x6a3   :  { %v9111_v26 = vadd.f32 %v9110_v54, %v12140_v23  ;;  %v11417_v23 = vld [vmem:[#allocation11 + $0xb0] sm:$0xff]  }
 0x6a4   :  { %9308 = vmatpush2.bf16.msra.mxu1 %v11389_v29  ;;  %v9112_v6 = vpop.f32.mrf.mxu0 }
 0x6a5   :  { %v9113_v13 = vadd.f32 %v9112_v6, %v12142_v14  ;;  %9309 = vmatprep.subr.bf16.mxu1 %v11394_v33  ;;  %v11419_v14 = vld [vmem:[#allocation11 + $0xa8] sm:$0xff]  }
 0x6a6   :  { %v9114_v15 = vpop.f32.mrf.mxu0 }
 0x6a7   :  { %v10914_v15 = vld [vmem:[#allocation13] ss:$0 sm:$0xff] }
 0x6a8   :  { %9310 = vmatpush2.bf16.msra.mxu1 %v11392_v8  ;;  %v9115_v22 = vpop.f32.mrf.mxu0 }
 0x6a9   :  { %9311 = vmatprep.subr.bf16.mxu1 %v11397_v42 }
 0x6ac   :  { %9312 = vmatpush2.bf16.msra.mxu1 %v11395_v43 }
 0x6ad   :  { %10970 = vmatprep.subr.bf16.mxu1 %v11414_v21 }
 0x6af   :  { %9314 = vmatmul.mubr.bf16.vlgmr.msra.gmra.mxu1 %v12126_v30  ;;  %v11424_v30 = vld [vmem:[#allocation11 + $0xd0] sm:$0xff]  }
 0x6b0   :  { %10971 = vmatpush3.bf16.msra.mxu1 %v11415_v27 }
 0x6b1   :  { %10972 = vmatprep.subr.bf16.mxu1 %v11416_v20 }
 0x6b4   :  { %10973 = vmatpush3.bf16.msra.mxu1 %v11417_v23 }
 0x6b5   :  { %10974 = vmatprep.subr.bf16.mxu1 %v11418_v25 }
 0x6b8   :  { %10975 = vmatpush3.bf16.msra.mxu1 %v11419_v14 }
 0x6b9   :  { %10976 = vmatprep.subr.bf16.mxu1 %v11420_v40 }
 0x6bc   :  { %10977 = vmatpush3.bf16.msra.mxu1 %v11421_v62 }
 0x6bd   :  { %10978 = vmatprep.subr.bf16.mxu1 %v11422_v32 }
 0x6c0   :  { %10979 = vmatpush3.bf16.msra.mxu1 %v11423_v28 }
 0x6c1   :  { %10980 = vmatprep.subr.bf16.mxu1 %v11424_v30 }
 0x6c4   :  { %10981 = vmatpush3.bf16.msra.mxu1 %v11425_v36 }
 0x6c5   :  { %10982 = vmatprep.subr.bf16.mxu1 %v11426_v24 }
 0x6c8   :  { %10983 = vmatpush3.bf16.msra.mxu1 %v11427_v55 }
 0x6c9   :  { %10984 = vmatprep.subr.bf16.mxu1 %v11428_v52 }
 0x6cc   :  { %10985 = vmatpush3.bf16.msra.mxu1 %v11429_v56 }
 0x6e2   :  { %v9192_v37 = vpop.f32.mrf.mxu0 }
 0x6e3   :  { %v9193_v3 = vadd.f32 %v9192_v37, %v7705_v10 }
 0x6e4   :  { %v9194_v46 = vpop.f32.mrf.mxu0 }
 0x6e5   :  { %v9195_v38 = vadd.f32 %v9194_v46, %v7709_v0 }
 0x6e6   :  { %v9196_v18 = vpop.f32.mrf.mxu0 }
 0x6e8   :  { %v9197_v2 = vpop.f32.mrf.mxu0 }
 0x6ef   :  { %v9151_v50 = vpop.f32.mrf.mxu1 }
 0x6f0   :  { %v9152_v12 = vadd.f32 %v9151_v50, %v9111_v26 }
 0x6f1   :  { %v9153_v19 = vpop.f32.mrf.mxu1 }
 0x6f2   :  { %v9154_v39 = vadd.f32 %v9153_v19, %v9113_v13  ;;  %v9322_v61 = vmax.f32 %v9152_v12, 0.0 }
 0x6f3   :  { %v9155_v35 = vpop.f32.mrf.mxu1 }
 0x6f4   :  { %v9323_v51 = vmax.f32 %v9154_v39, 0.0  ;;  %v9326_v63 = vpack.c.bf16 %v9322_v61, %v9322_v61 }
 0x6f5   :  { %v9156_v44 = vpop.f32.mrf.mxu1 }
 0x6f6   :  { %v9327_v47 = vpack.c.bf16 %v9323_v51, %v9323_v51 }
 0x6f8   :  { %9625 = vmatprep.mubr.bf16.mxu0 %v9327_v47 }
 0x6f9   :  { %9626 = vmatmul.mubr.bf16.vlgmr.msra.gmra.mxu0 %v9326_v63 }
 0x722   :  { %v9274_v53 = vpop.f32.mrf.mxu0 }
 0x724   :  { %v9276_v57 = vpop.f32.mrf.mxu0 }
 0x726   :  { %v9278_v31 = vpop.f32.mrf.mxu0 }
 0x728   :  { %v9279_v58 = vpop.f32.mrf.mxu0 }
 0x72f   :  { %v9233_v11 = vpop.f32.mrf.mxu1 }
 0x730   :  { %v9234_v49 = vadd.f32 %v9233_v11, %v9193_v3 }
 0x731   :  { %v9235_v34 = vpop.f32.mrf.mxu1 }
 0x732   :  { %v9236_v60 = vadd.f32 %v9235_v34, %v9195_v38  ;;  %v9275_v17 = vadd.f32 %v9274_v53, %v9234_v49 }
 0x733   :  { %v9237_v59 = vpop.f32.mrf.mxu1 }
 0x734   :  { %v9277_v9 = vadd.f32 %v9276_v57, %v9236_v60 }
 0x735   :  { %v9238_v45 = vpop.f32.mrf.mxu1 }
 0x76f   :  { %v9315_v4 = vpop.f32.mrf.mxu1 }
 0x770   :  { %v9316_v5 = vadd.f32 %v9315_v4, %v9275_v17 }
 0x771   :  { %v9317_v48 = vpop.f32.mrf.mxu1 }
 0x772   :  { %v9318_v29 = vadd.f32 %v9317_v48, %v9277_v9  ;;  %v9324_v33 = vmax.f32 %v9316_v5, 0.0 }
 0x773   :  { %v9319_v16 = vpop.f32.mrf.mxu1 }
 0x774   :  { %v9325_v54 = vmax.f32 %v9318_v29, 0.0  ;;  %v9328_v1 = vpack.c.bf16 %v9324_v33, %v9324_v33 }
 0x775   :  { %v9320_v7 = vpop.f32.mrf.mxu1 }
 0x776   :  { %v9329_v26 = vpack.c.bf16 %v9325_v54, %v9325_v54 }
 0x778   :  { %9665 = vmatprep.mubr.bf16.mxu1 %v9329_v26 }
 0x779   :  { %9666 = vmatmul.mubr.bf16.vlgmr.msra.gmra.mxu1 %v9328_v1 }
 0x7b9   :  { %v10964_v41 = vpop.f32.mrf.mxu0 }
 0x7bb   :  { %v10965_v6 = vpop.f32.mrf.mxu0 }
 0x7bc   :  { %v10966_v8 = vadd.f32 %v10965_v6, %v10964_v41 }
 0x7bd   :  { %v10967_v13 = vpop.f32.mrf.mxu0 }
 0x7be   :  { %v9628_v21 = vadd.f32 %v10966_v8, %v10914_v15 }
 0x7bf   :  { %v10968_v42 = vpop.f32.mrf.mxu0 }
 0x839   :  { %v10986_v22 = vpop.f32.mrf.mxu1 }
 0x83b   :  { %v10987_v43 = vpop.f32.mrf.mxu1 }
 0x83c   :  { %v10988_v27 = vadd.f32 %v10987_v43, %v10986_v22 }
 0x83d   :  { %v10989_v20 = vpop.f32.mrf.mxu1 }
 0x83e   :  { %v9668_v23 = vadd.f32 %v10988_v27, %v9628_v21 }
 0x83f   :  { %v10990_v25 = vpop.f32.mrf.mxu1 }
 0x840   :  { %v10947_v14 = vmul.f32 -1.442695, %v9668_v23 }
 0x842   :  { %11432 = vpow2.f32 %v10947_v14 }
 0x84f   :  { %v11433_v40 = vpop.eup %11432 }
 0x850   :  { %v9676_v62 = vadd.f32 1.0, %v11433_v40 }
 0x852   :  { %11434 = vrcp.f32 %v9676_v62 }
 0x85f   :  { %v11435_v32 = vpop.eup %11434 }
 0x860   :  { %9679 = vst [vmem:[#allocation14] sm:$0xf] %v11435_v32 }
 0x861   :  { %11590 = shalt.err (!%p11587_p11)
}
 0x862   :  { %9689 = dma.vmem_to_hbm [thread:$0]  %s9687_s6, 64, %s12165_s7, [#allocation4]  }
 0x863   :  { %11607 = dma.done.wait [#allocation4], 64  }
 0x864   :  { %11608 = vsyncadd [#allocation4], 4294967232 }
 0x865   :  { %9693 = vsyncpa [#allocation3], 1 }
 0x866   :  { %9694 = vsyncpa [#allocation6], 1 }
 0x867   :  { %9695 = vsyncpa [#allocation9], 1 }
 0x868   :  { %9696 = vsyncpa [#allocation12], 1 }
 0x869   :  { %9697 = vsyncpa [#allocation4], 1 }

</bundles_post_ra>
